<compile_context>
chip_gen: v7x
topology: tpu7x:2x2x1
jax: 0.10.0
libtpu: 0.0.40
codegen_flags: <defaults>
</compile_context>

<pallas_src>
import numpy as np
import jax
import jax.numpy as jnp
from jax.experimental import pallas as pl
from jax.experimental.pallas import tpu as pltpu


# ----------------------------------------------------------------------------
# Host-side constant spatial operators (flattened-spatial formulation)
# ----------------------------------------------------------------------------

_HAAR = 0.5 * np.array([[ 1.,  1.,  1.,  1.],
                        [-1., -1.,  1.,  1.],
                        [-1.,  1., -1.,  1.],
                        [ 1., -1., -1.,  1.]], dtype=np.float32)
_PHASES = ((0, 0), (1, 0), (0, 1), (1, 1))   # (row, col) offsets = a, b, c, d


def _pool_mats(h, w):
    """(4, h*w//4, h*w): Haar pooling matrices, one per subband LL/HL/LH/HH."""
    m, n = (h // 2) * (w // 2), h * w
    mats = np.zeros((4, m, n), np.float32)
    for i in range(h // 2):
        for j in range(w // 2):
            k = i * (w // 2) + j
            for p, (di, dj) in enumerate(_PHASES):
                mats[:, k, (2 * i + di) * w + (2 * j + dj)] = _HAAR[:, p]
    return mats


def _shift_mats(h, w):
    """(9, h*w, h*w): zero-padded 3x3 tap shift matrices over flattened spatial."""
    n = h * w
    mats = np.zeros((9, n, n), np.float32)
    for dy in range(3):
        for dx in range(3):
            t = dy * 3 + dx
            for i in range(h):
                for j in range(w):
                    ii, jj = i + dy - 1, j + dx - 1
                    if 0 <= ii < h and 0 <= jj < w:
                        mats[t, i * w + j, ii * w + jj] = 1.0
    return mats


def _pool_stacked(h, w, bt):
    """Batch-expanded pool operator, 4 subbands stacked along rows.

    Shape (4*bt*m, bt*n); row (s*bt + b)*m + k, col b*n + p  ->  P_s[k, p].
    One matmul pools a whole (bt*n, C) slab; subband s is row block s.
    """
    base = _pool_mats(h, w)
    m, n = base.shape[1], base.shape[2]
    out = np.zeros((4 * bt * m, bt * n), np.float32)
    for s in range(4):
        for b in range(bt):
            out[(s * bt + b) * m:(s * bt + b + 1) * m, b * n:(b + 1) * n] = base[s]
    return out


def _shift_wide(h, w, bt):
    """Batch-expanded 3x3 shift operator, 9 taps stacked along columns.

    Shape (bt*n, 9*bt*n); multiplying the row-stacked per-tap blocks of the
    fused weight-matmul output performs the whole 9-tap accumulation at once.
    """
    base = _shift_mats(h, w)
    n = base.shape[1]
    out = np.zeros((bt * n, 9 * bt * n), np.float32)
    for t in range(9):
        for b in range(bt):
            out[b * n:(b + 1) * n, (t * bt + b) * n:(t * bt + b + 1) * n] = base[t]
    return out


# ----------------------------------------------------------------------------
# Packed-operand layouts (shared by prepare_kernel_params and the kernel)
# ----------------------------------------------------------------------------

_DENSE_W = 192
_BIAS_W = 256
_BIAS_ROWS = {"b1": 0, "b2": 1, "b21": 2, "b3": 3, "b31": 4, "b4": 5, "b41": 6,
              "dab_b1": 7, "dab_b2": 8, "sa_b": 9, "ca_b1": 10, "ca_b2": 11,
              "c1x1_b": 12, "head_b": 13}
_NBIAS = 16


def _round8(v):
    return (v + 7) // 8 * 8


def _dense_layout(in_channel):
    """name -> (row_offset, rows, cols) inside the packed bf16 dense-weight slab."""
    entries = [("conv1", 36 * in_channel, 32),
               ("conv4_1", 1024, 64),
               ("dab_w1", 192, 192),
               ("dab_w2", 192, 192),
               ("ca_w1", 192, 6),
               ("ca_w2", 6, 192),
               ("sa_w", 2, 1),
               ("c1x1", 384, 192),
               ("head", 192, 1)]
    layout, off = {}, 0
    for name, k, n in entries:
        layout[name] = (off, k, n)
        off += _round8(k)
    return layout, _round8(off)


# ----------------------------------------------------------------------------
# Weight / constant preparation
# ----------------------------------------------------------------------------

def prepare_kernel_params(p, bt):
    """Pack weights + spatial constants for a batch tile of `bt` samples.

    The block-diagonal pool/shift constants scale as bt**2 (~0.9 MiB @ bt=2,
    ~3.4 MiB @ bt=4, ~13.5 MiB @ bt=8).  Keep bt <= 8; on v7x prefer bt <= B/2
    so the "parallel" batch grid still spans both TensorCores.
    """
    bf = jnp.bfloat16
    ic = p["conv1_w"].shape[2] // 4
    d = p["dab5"]

    def wall(w):   # (3,3,cin,cout) HWIO -> (cin, 9*cout), columns ordered (tap, cout)
        cin, cout = w.shape[2], w.shape[3]
        return jnp.asarray(jnp.transpose(w, (2, 0, 1, 3)).reshape(cin, 9 * cout), bf)

    layout, total_rows = _dense_layout(ic)
    dense_np = np.zeros((total_rows, _DENSE_W), np.float32)

    def put(name, arr):
        off, k, n = layout[name]
        dense_np[off:off + k, :n] = np.asarray(arr, np.float32).reshape(k, n)

    put("conv1", np.asarray(p["conv1_w"]).reshape(36 * ic, 32))
    put("conv4_1", np.asarray(p["conv4_1_w"])[1, 1])           # centre tap at 1x1
    put("dab_w1", np.asarray(d["body_w1"])[1, 1])
    put("dab_w2", np.asarray(d["body_w2"])[1, 1])
    put("ca_w1", np.asarray(d["ca_w1"]))
    put("ca_w2", np.asarray(d["ca_w2"]))
    put("sa_w", np.asarray(d["sa_w"])[2, 2])                   # 5x5 centre tap
    put("c1x1", np.asarray(d["c1x1_w"]))
    # fc1 -> fc2 has no nonlinearity in between: fold into one (192, 1) head.
    put("head", np.asarray(p["fc1_w"]) @ np.asarray(p["fc2_w"]))

    bias_np = np.zeros((_NBIAS, _BIAS_W), np.float32)

    def putb(name, vec):
        v = np.asarray(vec, np.float32).reshape(-1)
        bias_np[_BIAS_ROWS[name], :v.shape[0]] = v

    putb("b1", p["conv1_b"]); putb("b2", p["conv2_b"]); putb("b21", p["conv2_1_b"])
    putb("b3", p["conv3_b"]); putb("b31", p["conv3_1_b"]); putb("b4", p["conv4_b"])
    putb("b41", p["conv4_1_b"])
    putb("dab_b1", d["body_b1"]); putb("dab_b2", d["body_b2"])
    putb("sa_b", d["sa_b"]); putb("ca_b1", d["ca_b1"]); putb("ca_b2", d["ca_b2"])
    putb("c1x1_b", d["c1x1_b"])
    putb("head_b", np.asarray(p["fc1_b"]) @ np.asarray(p["fc2_w"]) + np.asarray(p["fc2_b"]))

    consts = tuple(jnp.asarray(m, bf) for m in (
        _pool_stacked(16, 16, bt), _pool_stacked(8, 8, bt),
        _pool_stacked(4, 4, bt), _pool_stacked(2, 2, bt),
        _shift_wide(8, 8, bt), _shift_wide(4, 4, bt), _shift_wide(2, 2, bt)))

    return (jnp.asarray(dense_np, bf), jnp.asarray(bias_np, jnp.float32),
            wall(p["conv2_w"]), wall(p["conv2_1_w"]), wall(p["conv3_w"]),
            wall(p["conv3_1_w"]), wall(p["conv4_w"])) + consts


# ----------------------------------------------------------------------------
# Fused Pallas kernel: one grid step == one batch tile, everything stays in VMEM
# ----------------------------------------------------------------------------

def _make_kernel(dlayout):
    f32, bf16 = jnp.float32, jnp.bfloat16

    def kernel(xcol_ref, ppx0_ref, dslab_ref, bias_ref,
               w2_ref, w21_ref, w3_ref, w31_ref, w4_ref,
               p16_ref, p8_ref, p4_ref, p2_ref,
               s8_ref, s4_ref, s2_ref, o_ref):

        def mm(a, b):
            return jnp.dot(a, b, preferred_element_type=f32)

        def wget(name):
            off, k, n = dlayout[name]
            return dslab_ref[off:off + k, :n]

        def bget(name, n):
            r = _BIAS_ROWS[name]
            return bias_ref[r:r + 1, :n]

        def sigmoid(y):                       # overflow-safe, divide on the EUP
            z = jnp.exp(-jnp.abs(y))
            r = pl.reciprocal(1.0 + z, approx=True)
            return jnp.where(y >= 0.0, r, z * r)

        def pool(x_bf, p_ref):
            # One matmul against the stacked batch-block-diag Haar operator, then
            # a free row split + lane concat -> channels ordered [LL,HL,LH,HH].
            allp = mm(p_ref[...], x_bf)                       # (4*mo, C) f32
            mo = p_ref.shape[0] // 4
            return jnp.concatenate(
                [allp[s * mo:(s + 1) * mo, :] for s in range(4)],
                axis=-1).astype(bf16)

        def conv_taps(y, s_ref, cout, bias_name):
            # y = x @ Wall: fused per-tap pre-activation with columns (tap, cout).
            # Row-stacking its 9 tap blocks + ONE matmul against the wide shift
            # operator performs the whole "same"-padded 3x3 conv accumulation.
            yv = jnp.concatenate(
                [y[:, t * cout:(t + 1) * cout] for t in range(9)],
                axis=0).astype(bf16)                          # (9*M, cout)
            acc = mm(s_ref[...], yv)                          # (M, cout) f32
            return jnp.maximum(acc + bget(bias_name, cout), 0.0).astype(bf16)

        # ---- conv1 (BasicConv) at 16x16 from host-side im2col -----------------
        a1 = jnp.maximum(mm(xcol_ref[...], wget("conv1")) + bget("b1", 32),
                         0.0).astype(bf16)                    # (bt*256, 32)

        # ---- main pyramid ------------------------------------------------------
        x1p = pool(a1, p16_ref)                               # (bt*64, 128)
        a2 = conv_taps(mm(x1p, w2_ref[...]), s8_ref, 16, "b2")          # (bt*64, 16)
        x2 = pool(a2, p8_ref)                                 # (bt*16, 64)

        c21 = conv_taps(mm(ppx0_ref[...], w21_ref[...]), s4_ref, 16, "b21")  # (bt*16, 16)

        # conv3 consumes cat([x2, c21], ch): split its weight along K instead.
        y3 = mm(x2, w3_ref[0:64, :]) + mm(c21, w3_ref[64:80, :])
        a3 = conv_taps(y3, s4_ref, 16, "b3")                  # (bt*16, 16)

        # conv3_1 branch: pool(pool(x1))
        pp1 = pool(pool(x1p, p8_ref), p4_ref)                 # (bt*4, 2048)
        c31 = conv_taps(mm(pp1, w31_ref[...]), s2_ref, 32, "b31")       # (bt*4, 32)

        x3p = pool(a3, p4_ref)                                # (bt*4, 64)
        y4 = mm(x3p, w4_ref[0:64, :]) + mm(c31, w4_ref[64:96, :])
        a4 = conv_taps(y4, s2_ref, 32, "b4")                  # (bt*4, 32)

        x4p = pool(a4, p2_ref)                                # (bt, 128)

        # conv4_1 branch: pool(pool(x2)); at 1x1 the 3x3 conv is its centre tap.
        pp2 = pool(pool(x2, p4_ref), p2_ref)                  # (bt, 1024)
        c41 = jnp.maximum(mm(pp2, wget("conv4_1")) + bget("b41", 64),
                          0.0).astype(bf16)                   # (bt, 64)

        x5 = jnp.concatenate([x4p, c41], axis=-1)             # (bt, 192) bf16
        x5f = x5.astype(f32)

        # ---- DAB at 1x1 spatial (3x3 / 5x5 convs collapse to centre taps) -----
        r = jnp.maximum(mm(x5, wget("dab_w1")) + bget("dab_b1", 192), 0.0)
        r = mm(r.astype(bf16), wget("dab_w2")) + bget("dab_b2", 192)    # (bt, 192)
        rb = r.astype(bf16)
        cmax = jnp.max(r, axis=-1, keepdims=True)
        cmean = jnp.mean(r, axis=-1, keepdims=True)
        sa_in = jnp.concatenate([cmax, cmean], axis=-1).astype(bf16)    # (bt, 2)
        sa = sigmoid(mm(sa_in, wget("sa_w")) + bget("sa_b", 1))         # (bt, 1)
        sa_branch = r * sa
        t = jnp.maximum(mm(rb, wget("ca_w1")) + bget("ca_b1", 6), 0.0)
        t = sigmoid(mm(t.astype(bf16), wget("ca_w2")) + bget("ca_b2", 192))
        ca_branch = r * t
        c1x1 = wget("c1x1")                                             # (384, 192)
        dab = (mm(sa_branch.astype(bf16), c1x1[0:192, :]) +
               mm(ca_branch.astype(bf16), c1x1[192:384, :]) +
               bget("c1x1_b", 192) + x5f)                               # (bt, 192)

        # AdaptiveAvgPool2d(1) over a 1x1 map is identity; fc1/fc2 folded host-side.
        logit = mm(dab.astype(bf16), wget("head")) + bget("head_b", 1)  # (bt, 1)
        o_ref[0] = logit

    return kernel


# ----------------------------------------------------------------------------
# Wrappers
# ----------------------------------------------------------------------------

def wavelet_res_logits(x, kparams):
    """Pre-sigmoid logits, shape (B, 1).  x: (B, 32, 32, Cin) NHWC float32."""
    B, H, W, Cin = x.shape
    assert H == 32 and W == 32, "fused kernel is specialized to 32x32 inputs"

    p16 = kparams[7]
    bt = p16.shape[1] // 256          # batch tile baked into the spatial constants

    # XLA glue: first Haar pool, conv1 im2col, and pool(pool(x0)) for conv2_1.
    x0 = _ref_pool(x)                                         # (B, 16, 16, 4*Cin)
    ppx0 = _ref_pool(_ref_pool(x0))                           # (B, 4, 4, 64*Cin)
    x0p = jnp.pad(x0, ((0, 0), (1, 1), (1, 1), (0, 0)))
    xcol = jnp.concatenate([x0p[:, dy:dy + 16, dx:dx + 16, :]
                            for dy in range(3) for dx in range(3)], axis=-1)

    Bp = -(-B // bt) * bt
    if Bp != B:
        padn = Bp - B
        xcol = jnp.pad(xcol, ((0, padn), (0, 0), (0, 0), (0, 0)))
        ppx0 = jnp.pad(ppx0, ((0, padn), (0, 0), (0, 0), (0, 0)))
    xcol = xcol.reshape(Bp * 256, 36 * Cin).astype(jnp.bfloat16)
    ppx0 = ppx0.reshape(Bp * 16, 64 * Cin).astype(jnp.bfloat16)

    dlayout, _ = _dense_layout(Cin)
    kernel = _make_kernel(dlayout)
    nsteps = Bp // bt

    in_specs = [pl.BlockSpec((bt * 256, 36 * Cin), lambda i: (i, 0)),
                pl.BlockSpec((bt * 16, 64 * Cin), lambda i: (i, 0))]
    in_specs += [pl.BlockSpec(a.shape, lambda i: (0, 0)) for a in kparams]

    out = pl.pallas_call(
        kernel,
        out_shape=jax.ShapeDtypeStruct((nsteps, bt, 1), jnp.float32),
        grid=(nsteps,),
        in_specs=in_specs,
        out_specs=pl.BlockSpec((1, bt, 1), lambda i: (i, 0, 0)),
        compiler_params=pltpu.CompilerParams(
            dimension_semantics=("parallel",),
            vmem_limit_bytes=48 * 1024 * 1024),
    )(xcol, ppx0, *kparams)
    return out.reshape(Bp, 1)[:B]


def wavelet_res_forward(x, kparams):
    """Module-equivalent forward: sigmoid probabilities, shape (B, 1)."""
    return jax.nn.sigmoid(wavelet_res_logits(x, kparams))


# ----------------------------------------------------------------------------
# Pure-JAX reference (f32, unfused) for a correctness self-check
# ----------------------------------------------------------------------------

def _ref_conv(x, w, b, relu=True):
    pad_h, pad_w = w.shape[0] // 2, w.shape[1] // 2
    y = jax.lax.conv_general_dilated(
        x, w, window_strides=(1, 1),
        padding=((pad_h, pad_h), (pad_w, pad_w)),
        dimension_numbers=("NHWC", "HWIO", "NHWC"))
    y = y + b
    return jnp.maximum(y, 0.0) if relu else y


def _ref_pool(x):
    a = x[:, 0::2, 0::2, :]
    b = x[:, 1::2, 0::2, :]
    c = x[:, 0::2, 1::2, :]
    d = x[:, 1::2, 1::2, :]
    return jnp.concatenate([0.5 * (a + b + c + d), 0.5 * (-a - b + c + d),
                            0.5 * (-a + b - c + d), 0.5 * (a - b - c + d)], axis=-1)


def _ref_dab(x, p):
    B, H, W, C = x.shape
    res = _ref_conv(x, p["body_w1"], p["body_b1"], relu=True)
    res = _ref_conv(res, p["body_w2"], p["body_b2"], relu=False)
    cmax = jnp.max(res, axis=-1, keepdims=True)
    cmean = jnp.mean(res, axis=-1, keepdims=True)
    sa = jax.nn.sigmoid(_ref_conv(jnp.concatenate([cmax, cmean], -1),
                                  p["sa_w"], p["sa_b"], relu=False))
    sa_branch = res * sa
    gap = jnp.mean(res, axis=(1, 2))
    t = jnp.maximum(gap @ p["ca_w1"] + p["ca_b1"], 0.0)
    t = jax.nn.sigmoid(t @ p["ca_w2"] + p["ca_b2"])
    ca_branch = res * t[:, None, None, :]
    cat = jnp.concatenate([sa_branch, ca_branch], axis=-1)
    out = cat.reshape(B * H * W, 2 * C) @ p["c1x1_w"] + p["c1x1_b"]
    return out.reshape(B, H, W, C) + x


def wavelet_res_reference(x, params):
    x0 = _ref_pool(x)
    x1 = _ref_pool(_ref_conv(x0, params["conv1_w"], params["conv1_b"]))
    x2 = _ref_pool(_ref_conv(x1, params["conv2_w"], params["conv2_b"]))
    x3 = jnp.concatenate(
        [x2, _ref_conv(_ref_pool(_ref_pool(x0)),
                       params["conv2_1_w"], params["conv2_1_b"])], -1)
    x3 = _ref_pool(_ref_conv(x3, params["conv3_w"], params["conv3_b"]))
    x4 = jnp.concatenate(
        [x3, _ref_conv(_ref_pool(_ref_pool(x1)),
                       params["conv3_1_w"], params["conv3_1_b"])], -1)
    x4 = _ref_pool(_ref_conv(x4, params["conv4_w"], params["conv4_b"]))
    x5 = jnp.concatenate(
        [x4, _ref_conv(_ref_pool(_ref_pool(x2)),
                       params["conv4_1_w"], params["conv4_1_b"])], -1)
    x5 = _ref_dab(x5, params["dab5"])
    out = jnp.mean(x5, axis=(1, 2))
    out = out @ params["fc1_w"] + params["fc1_b"]
    out = out @ params["fc2_w"] + params["fc2_b"]
    return jax.nn.sigmoid(out), out


# ----------------------------------------------------------------------------
# Deterministic parameter init (synthetic; no checkpoint loading)
# ----------------------------------------------------------------------------

def init_params(key, in_channel):
    keys = list(jax.random.split(key, 64))
    it = iter(keys)

    def conv_p(cin, cout, k=3):
        w = jax.random.normal(next(it), (k, k, cin, cout), jnp.float32)
        w = w * (2.0 / (k * k * cin)) ** 0.5
        b = jax.random.normal(next(it), (cout,), jnp.float32) * 0.01
        return w, b

    def lin_p(cin, cout):
        w = jax.random.normal(next(it), (cin, cout), jnp.float32)
        w = w * (1.0 / cin) ** 0.5
        b = jax.random.normal(next(it), (cout,), jnp.float32) * 0.01
        return w, b

    out1, out2, out2_1 = 32, 16, 16
    out3, out3_1 = 16, 32
    out4, out4_1 = 32, 64

    p = {}
    p["conv1_w"], p["conv1_b"] = conv_p(4 * in_channel, out1)
    p["conv2_w"], p["conv2_b"] = conv_p(4 * out1, out2)
    p["conv2_1_w"], p["conv2_1_b"] = conv_p(4 * 4 * 4 * in_channel, out2_1)
    p["conv3_w"], p["conv3_b"] = conv_p(4 * out2 + out2_1, out3)
    p["conv3_1_w"], p["conv3_1_b"] = conv_p(4 * 4 * 4 * out1, out3_1)
    p["conv4_w"], p["conv4_b"] = conv_p(4 * out3 + out3_1, out4)
    p["conv4_1_w"], p["conv4_1_b"] = conv_p(4 * 4 * 4 * out2, out4_1)

    nfeat = 4 * out4 + out4_1          # 192
    red = 32
    d = {}
    d["body_w1"], d["body_b1"] = conv_p(nfeat, nfeat)
    d["body_w2"], d["body_b2"] = conv_p(nfeat, nfeat)
    d["sa_w"], d["sa_b"] = conv_p(2, 1, k=5)
    d["ca_w1"], d["ca_b1"] = lin_p(nfeat, nfeat // red)
    d["ca_w2"], d["ca_b2"] = lin_p(nfeat // red, nfeat)
    d["c1x1_w"], d["c1x1_b"] = lin_p(2 * nfeat, nfeat)
    p["dab5"] = d
    # dab3 / dab4 are constructed in __init__ but never used in forward() -> omitted.

    p["fc1_w"], p["fc1_b"] = lin_p(nfeat, out2)
    p["fc2_w"], p["fc2_b"] = lin_p(out2, 1)
    return p


# ----------------------------------------------------------------------------

if __name__ == "__main__":
    in_channel = 4
    B, H, W = 2, 32, 32   # spatial must be 32 (five 2x halvings -> 1x1)

    key = jax.random.PRNGKey(0)
    kx, kp = jax.random.split(key)
    # NHWC input, equivalent to a PyTorch NCHW input of shape (2, 4, 32, 32)
    x = jax.random.normal(kx, (B, H, W, in_channel), jnp.float32)
    params = init_params(kp, in_channel)

    # Samples per grid step.  Larger bt fills the MXU better (v6e wants ~8);
    # on v7x keep bt <= B/2 so both TensorCores are used.
    bt = max(2, min(B, 8))
    kparams = prepare_kernel_params(params, bt)

    fwd = jax.jit(wavelet_res_forward)
    out = jax.block_until_ready(fwd(x, kparams))
    logits = jax.block_until_ready(jax.jit(wavelet_res_logits)(x, kparams))

    ref_prob, ref_logit = jax.jit(wavelet_res_reference)(x, params)
    ref_prob = jax.block_until_ready(ref_prob)

    err_p = float(jnp.max(jnp.abs(out - ref_prob)))
    err_l = float(jnp.max(jnp.abs(logits - ref_logit)))

    assert out.shape == (B, 1)
    assert bool(jnp.all(jnp.isfinite(out)))
    assert bool(jnp.all((out >= 0.0) & (out <= 1.0)))   # sigmoid output range
    assert err_p < 5e-2, f"probability mismatch vs pure-JAX reference: {err_p}"
    assert err_l < 5e-1, f"logit mismatch vs pure-JAX reference: {err_l}"
    print("KERNEL_OK")
</pallas_src>

<mosaic_0001>
module attributes {stable_mosaic.version = 11 : i64} {
  func.func @kernel(%arg0: i32, %arg1: memref<512x144xbf16, #tpu.memory_space<vmem>>, %arg2: memref<32x256xbf16, #tpu.memory_space<vmem>>, %arg3: memref<2336x192xbf16, #tpu.memory_space<vmem>>, %arg4: memref<16x256xf32, #tpu.memory_space<vmem>>, %arg5: memref<128x144xbf16, #tpu.memory_space<vmem>>, %arg6: memref<256x144xbf16, #tpu.memory_space<vmem>>, %arg7: memref<80x144xbf16, #tpu.memory_space<vmem>>, %arg8: memref<2048x288xbf16, #tpu.memory_space<vmem>>, %arg9: memref<96x288xbf16, #tpu.memory_space<vmem>>, %arg10: memref<512x512xbf16, #tpu.memory_space<vmem>>, %arg11: memref<128x128xbf16, #tpu.memory_space<vmem>>, %arg12: memref<32x32xbf16, #tpu.memory_space<vmem>>, %arg13: memref<8x8xbf16, #tpu.memory_space<vmem>>, %arg14: memref<128x1152xbf16, #tpu.memory_space<vmem>>, %arg15: memref<32x288xbf16, #tpu.memory_space<vmem>>, %arg16: memref<8x72xbf16, #tpu.memory_space<vmem>>, %arg17: memref<1x2x1xf32, #tpu.memory_space<vmem>>) attributes {dimension_semantics = [#tpu.dimension_semantics<parallel>], iteration_bounds = array<i64: 1>, scalar_prefetch = 0 : i64, scratch_operands = 0 : i64, tpu.core_type = #tpu.core_type<tc>, window_params = [{transform_indices = @transform_0, window_bounds = array<i64: 512, 144>}, {transform_indices = @transform_1, window_bounds = array<i64: 32, 256>}, {pipeline_mode = #tpu.pipeline_mode<synchronous>, transform_indices = @transform_2, window_bounds = array<i64: 2336, 192>}, {pipeline_mode = #tpu.pipeline_mode<synchronous>, transform_indices = @transform_3, window_bounds = array<i64: 16, 256>}, {pipeline_mode = #tpu.pipeline_mode<synchronous>, transform_indices = @transform_4, window_bounds = array<i64: 128, 144>}, {pipeline_mode = #tpu.pipeline_mode<synchronous>, transform_indices = @transform_5, window_bounds = array<i64: 256, 144>}, {pipeline_mode = #tpu.pipeline_mode<synchronous>, transform_indices = @transform_6, window_bounds = array<i64: 80, 144>}, {pipeline_mode = #tpu.pipeline_mode<synchronous>, transform_indices = @transform_7, window_bounds = array<i64: 2048, 288>}, {pipeline_mode = #tpu.pipeline_mode<synchronous>, transform_indices = @transform_8, window_bounds = array<i64: 96, 288>}, {pipeline_mode = #tpu.pipeline_mode<synchronous>, transform_indices = @transform_9, window_bounds = array<i64: 512, 512>}, {pipeline_mode = #tpu.pipeline_mode<synchronous>, transform_indices = @transform_10, window_bounds = array<i64: 128, 128>}, {pipeline_mode = #tpu.pipeline_mode<synchronous>, transform_indices = @transform_11, window_bounds = array<i64: 32, 32>}, {pipeline_mode = #tpu.pipeline_mode<synchronous>, transform_indices = @transform_12, window_bounds = array<i64: 8, 8>}, {pipeline_mode = #tpu.pipeline_mode<synchronous>, transform_indices = @transform_13, window_bounds = array<i64: 128, 1152>}, {pipeline_mode = #tpu.pipeline_mode<synchronous>, transform_indices = @transform_14, window_bounds = array<i64: 32, 288>}, {pipeline_mode = #tpu.pipeline_mode<synchronous>, transform_indices = @transform_15, window_bounds = array<i64: 8, 72>}, {transform_indices = @transform_16, window_bounds = array<i64: 1, 2, 1>}]} {
    %c0 = arith.constant 0 : index
    %c0_0 = arith.constant 0 : index
    %0 = vector.load %arg1[%c0, %c0_0] : memref<512x144xbf16, #tpu.memory_space<vmem>>, vector<512x144xbf16>
    %c0_1 = arith.constant 0 : index
    %c0_2 = arith.constant 0 : index
    %1 = vector.load %arg3[%c0_1, %c0_2] : memref<2336x192xbf16, #tpu.memory_space<vmem>>, vector<144x32xbf16>
    %cst = arith.constant dense<0.000000e+00> : vector<512x32xf32>
    %2 = tpu.matmul %0, %1, %cst {dimension_numbers = #tpu.dot_dimension_numbers<[1], [0], [0], [1], [0, 0, 1, 1], [], []>} : vector<512x144xbf16>, vector<144x32xbf16>, vector<512x32xf32> -> vector<512x32xf32>
    %c0_3 = arith.constant 0 : index
    %c0_4 = arith.constant 0 : index
    %3 = vector.load %arg4[%c0_3, %c0_4] : memref<16x256xf32, #tpu.memory_space<vmem>>, vector<1x32xf32>
    %4 = vector.broadcast %3 : vector<1x32xf32> to vector<512x32xf32>
    %5 = arith.addf %2, %4 : vector<512x32xf32>
    %cst_5 = arith.constant 0.000000e+00 : f32
    %6 = vector.broadcast %cst_5 : f32 to vector<512x32xf32>
    %7 = arith.maximumf %5, %6 : vector<512x32xf32>
    %8 = arith.truncf %7 : vector<512x32xf32> to vector<512x32xbf16>
    %c0_6 = arith.constant 0 : index
    %c0_7 = arith.constant 0 : index
    %9 = vector.load %arg10[%c0_6, %c0_7] : memref<512x512xbf16, #tpu.memory_space<vmem>>, vector<512x512xbf16>
    %cst_8 = arith.constant dense<0.000000e+00> : vector<512x32xf32>
    %10 = tpu.matmul %9, %8, %cst_8 {dimension_numbers = #tpu.dot_dimension_numbers<[1], [0], [0], [1], [0, 0, 1, 1], [], []>} : vector<512x512xbf16>, vector<512x32xbf16>, vector<512x32xf32> -> vector<512x32xf32>
    %11 = vector.extract_strided_slice %10 {offsets = [0, 0], sizes = [128, 32], strides = [1, 1]} : vector<512x32xf32> to vector<128x32xf32>
    %12 = vector.extract_strided_slice %10 {offsets = [128, 0], sizes = [128, 32], strides = [1, 1]} : vector<512x32xf32> to vector<128x32xf32>
    %13 = vector.extract_strided_slice %10 {offsets = [256, 0], sizes = [128, 32], strides = [1, 1]} : vector<512x32xf32> to vector<128x32xf32>
    %14 = vector.extract_strided_slice %10 {offsets = [384, 0], sizes = [128, 32], strides = [1, 1]} : vector<512x32xf32> to vector<128x32xf32>
    %15 = tpu.concatenate %11, %12, %13, %14 in 1 : vector<128x32xf32>, vector<128x32xf32>, vector<128x32xf32>, vector<128x32xf32> -> vector<128x128xf32>
    %16 = arith.truncf %15 : vector<128x128xf32> to vector<128x128xbf16>
    %c0_9 = arith.constant 0 : index
    %c0_10 = arith.constant 0 : index
    %17 = vector.load %arg5[%c0_9, %c0_10] : memref<128x144xbf16, #tpu.memory_space<vmem>>, vector<128x144xbf16>
    %cst_11 = arith.constant dense<0.000000e+00> : vector<128x144xf32>
    %18 = tpu.matmul %16, %17, %cst_11 {dimension_numbers = #tpu.dot_dimension_numbers<[1], [0], [0], [1], [0, 0, 1, 1], [], []>} : vector<128x128xbf16>, vector<128x144xbf16>, vector<128x144xf32> -> vector<128x144xf32>
    %19 = vector.extract_strided_slice %18 {offsets = [0, 0], sizes = [128, 16], strides = [1, 1]} : vector<128x144xf32> to vector<128x16xf32>
    %20 = vector.extract_strided_slice %18 {offsets = [0, 16], sizes = [128, 16], strides = [1, 1]} : vector<128x144xf32> to vector<128x16xf32>
    %21 = vector.extract_strided_slice %18 {offsets = [0, 32], sizes = [128, 16], strides = [1, 1]} : vector<128x144xf32> to vector<128x16xf32>
    %22 = vector.extract_strided_slice %18 {offsets = [0, 48], sizes = [128, 16], strides = [1, 1]} : vector<128x144xf32> to vector<128x16xf32>
    %23 = vector.extract_strided_slice %18 {offsets = [0, 64], sizes = [128, 16], strides = [1, 1]} : vector<128x144xf32> to vector<128x16xf32>
    %24 = vector.extract_strided_slice %18 {offsets = [0, 80], sizes = [128, 16], strides = [1, 1]} : vector<128x144xf32> to vector<128x16xf32>
    %25 = vector.extract_strided_slice %18 {offsets = [0, 96], sizes = [128, 16], strides = [1, 1]} : vector<128x144xf32> to vector<128x16xf32>
    %26 = vector.extract_strided_slice %18 {offsets = [0, 112], sizes = [128, 16], strides = [1, 1]} : vector<128x144xf32> to vector<128x16xf32>
    %27 = vector.extract_strided_slice %18 {offsets = [0, 128], sizes = [128, 16], strides = [1, 1]} : vector<128x144xf32> to vector<128x16xf32>
    %28 = tpu.concatenate %19, %20, %21, %22, %23, %24, %25, %26, %27 in 0 : vector<128x16xf32>, vector<128x16xf32>, vector<128x16xf32>, vector<128x16xf32>, vector<128x16xf32>, vector<128x16xf32>, vector<128x16xf32>, vector<128x16xf32>, vector<128x16xf32> -> vector<1152x16xf32>
    %29 = arith.truncf %28 : vector<1152x16xf32> to vector<1152x16xbf16>
    %c0_12 = arith.constant 0 : index
    %c0_13 = arith.constant 0 : index
    %30 = vector.load %arg14[%c0_12, %c0_13] : memref<128x1152xbf16, #tpu.memory_space<vmem>>, vector<128x1152xbf16>
    %cst_14 = arith.constant dense<0.000000e+00> : vector<128x16xf32>
    %31 = tpu.matmul %30, %29, %cst_14 {dimension_numbers = #tpu.dot_dimension_numbers<[1], [0], [0], [1], [0, 0, 1, 1], [], []>} : vector<128x1152xbf16>, vector<1152x16xbf16>, vector<128x16xf32> -> vector<128x16xf32>
    %c1 = arith.constant 1 : index
    %c0_15 = arith.constant 0 : index
    %32 = vector.load %arg4[%c1, %c0_15] : memref<16x256xf32, #tpu.memory_space<vmem>>, vector<1x16xf32>
    %33 = vector.broadcast %32 : vector<1x16xf32> to vector<128x16xf32>
    %34 = arith.addf %31, %33 : vector<128x16xf32>
    %cst_16 = arith.constant 0.000000e+00 : f32
    %35 = vector.broadcast %cst_16 : f32 to vector<128x16xf32>
    %36 = arith.maximumf %34, %35 : vector<128x16xf32>
    %37 = arith.truncf %36 : vector<128x16xf32> to vector<128x16xbf16>
    %c0_17 = arith.constant 0 : index
    %c0_18 = arith.constant 0 : index
    %38 = vector.load %arg11[%c0_17, %c0_18] : memref<128x128xbf16, #tpu.memory_space<vmem>>, vector<128x128xbf16>
    %cst_19 = arith.constant dense<0.000000e+00> : vector<128x16xf32>
    %39 = tpu.matmul %38, %37, %cst_19 {dimension_numbers = #tpu.dot_dimension_numbers<[1], [0], [0], [1], [0, 0, 1, 1], [], []>} : vector<128x128xbf16>, vector<128x16xbf16>, vector<128x16xf32> -> vector<128x16xf32>
    %40 = vector.extract_strided_slice %39 {offsets = [0, 0], sizes = [32, 16], strides = [1, 1]} : vector<128x16xf32> to vector<32x16xf32>
    %41 = vector.extract_strided_slice %39 {offsets = [32, 0], sizes = [32, 16], strides = [1, 1]} : vector<128x16xf32> to vector<32x16xf32>
    %42 = vector.extract_strided_slice %39 {offsets = [64, 0], sizes = [32, 16], strides = [1, 1]} : vector<128x16xf32> to vector<32x16xf32>
    %43 = vector.extract_strided_slice %39 {offsets = [96, 0], sizes = [32, 16], strides = [1, 1]} : vector<128x16xf32> to vector<32x16xf32>
    %44 = tpu.concatenate %40, %41, %42, %43 in 1 : vector<32x16xf32>, vector<32x16xf32>, vector<32x16xf32>, vector<32x16xf32> -> vector<32x64xf32>
    %45 = arith.truncf %44 : vector<32x64xf32> to vector<32x64xbf16>
    %c0_20 = arith.constant 0 : index
    %c0_21 = arith.constant 0 : index
    %46 = vector.load %arg2[%c0_20, %c0_21] : memref<32x256xbf16, #tpu.memory_space<vmem>>, vector<32x256xbf16>
    %c0_22 = arith.constant 0 : index
    %c0_23 = arith.constant 0 : index
    %47 = vector.load %arg6[%c0_22, %c0_23] : memref<256x144xbf16, #tpu.memory_space<vmem>>, vector<256x144xbf16>
    %cst_24 = arith.constant dense<0.000000e+00> : vector<32x144xf32>
    %48 = tpu.matmul %46, %47, %cst_24 {dimension_numbers = #tpu.dot_dimension_numbers<[1], [0], [0], [1], [0, 0, 1, 1], [], []>} : vector<32x256xbf16>, vector<256x144xbf16>, vector<32x144xf32> -> vector<32x144xf32>
    %49 = vector.extract_strided_slice %48 {offsets = [0, 0], sizes = [32, 16], strides = [1, 1]} : vector<32x144xf32> to vector<32x16xf32>
    %50 = vector.extract_strided_slice %48 {offsets = [0, 16], sizes = [32, 16], strides = [1, 1]} : vector<32x144xf32> to vector<32x16xf32>
    %51 = vector.extract_strided_slice %48 {offsets = [0, 32], sizes = [32, 16], strides = [1, 1]} : vector<32x144xf32> to vector<32x16xf32>
    %52 = vector.extract_strided_slice %48 {offsets = [0, 48], sizes = [32, 16], strides = [1, 1]} : vector<32x144xf32> to vector<32x16xf32>
    %53 = vector.extract_strided_slice %48 {offsets = [0, 64], sizes = [32, 16], strides = [1, 1]} : vector<32x144xf32> to vector<32x16xf32>
    %54 = vector.extract_strided_slice %48 {offsets = [0, 80], sizes = [32, 16], strides = [1, 1]} : vector<32x144xf32> to vector<32x16xf32>
    %55 = vector.extract_strided_slice %48 {offsets = [0, 96], sizes = [32, 16], strides = [1, 1]} : vector<32x144xf32> to vector<32x16xf32>
    %56 = vector.extract_strided_slice %48 {offsets = [0, 112], sizes = [32, 16], strides = [1, 1]} : vector<32x144xf32> to vector<32x16xf32>
    %57 = vector.extract_strided_slice %48 {offsets = [0, 128], sizes = [32, 16], strides = [1, 1]} : vector<32x144xf32> to vector<32x16xf32>
    %58 = tpu.concatenate %49, %50, %51, %52, %53, %54, %55, %56, %57 in 0 : vector<32x16xf32>, vector<32x16xf32>, vector<32x16xf32>, vector<32x16xf32>, vector<32x16xf32>, vector<32x16xf32>, vector<32x16xf32>, vector<32x16xf32>, vector<32x16xf32> -> vector<288x16xf32>
    %59 = arith.truncf %58 : vector<288x16xf32> to vector<288x16xbf16>
    %c0_25 = arith.constant 0 : index
    %c0_26 = arith.constant 0 : index
    %60 = vector.load %arg15[%c0_25, %c0_26] : memref<32x288xbf16, #tpu.memory_space<vmem>>, vector<32x288xbf16>
    %cst_27 = arith.constant dense<0.000000e+00> : vector<32x16xf32>
    %61 = tpu.matmul %60, %59, %cst_27 {dimension_numbers = #tpu.dot_dimension_numbers<[1], [0], [0], [1], [0, 0, 1, 1], [], []>} : vector<32x288xbf16>, vector<288x16xbf16>, vector<32x16xf32> -> vector<32x16xf32>
    %c2 = arith.constant 2 : index
    %c0_28 = arith.constant 0 : index
    %62 = vector.load %arg4[%c2, %c0_28] : memref<16x256xf32, #tpu.memory_space<vmem>>, vector<1x16xf32>
    %63 = vector.broadcast %62 : vector<1x16xf32> to vector<32x16xf32>
    %64 = arith.addf %61, %63 : vector<32x16xf32>
    %cst_29 = arith.constant 0.000000e+00 : f32
    %65 = vector.broadcast %cst_29 : f32 to vector<32x16xf32>
    %66 = arith.maximumf %64, %65 : vector<32x16xf32>
    %67 = arith.truncf %66 : vector<32x16xf32> to vector<32x16xbf16>
    %c0_30 = arith.constant 0 : index
    %c0_31 = arith.constant 0 : index
    %68 = vector.load %arg7[%c0_30, %c0_31] : memref<80x144xbf16, #tpu.memory_space<vmem>>, vector<64x144xbf16>
    %cst_32 = arith.constant dense<0.000000e+00> : vector<32x144xf32>
    %69 = tpu.matmul %45, %68, %cst_32 {dimension_numbers = #tpu.dot_dimension_numbers<[1], [0], [0], [1], [0, 0, 1, 1], [], []>} : vector<32x64xbf16>, vector<64x144xbf16>, vector<32x144xf32> -> vector<32x144xf32>
    %c64 = arith.constant 64 : index
    %c0_33 = arith.constant 0 : index
    %70 = vector.load %arg7[%c64, %c0_33] : memref<80x144xbf16, #tpu.memory_space<vmem>>, vector<16x144xbf16>
    %cst_34 = arith.constant dense<0.000000e+00> : vector<32x144xf32>
    %71 = tpu.matmul %67, %70, %cst_34 {dimension_numbers = #tpu.dot_dimension_numbers<[1], [0], [0], [1], [0, 0, 1, 1], [], []>} : vector<32x16xbf16>, vector<16x144xbf16>, vector<32x144xf32> -> vector<32x144xf32>
    %72 = arith.addf %69, %71 : vector<32x144xf32>
    %73 = vector.extract_strided_slice %72 {offsets = [0, 0], sizes = [32, 16], strides = [1, 1]} : vector<32x144xf32> to vector<32x16xf32>
    %74 = vector.extract_strided_slice %72 {offsets = [0, 16], sizes = [32, 16], strides = [1, 1]} : vector<32x144xf32> to vector<32x16xf32>
    %75 = vector.extract_strided_slice %72 {offsets = [0, 32], sizes = [32, 16], strides = [1, 1]} : vector<32x144xf32> to vector<32x16xf32>
    %76 = vector.extract_strided_slice %72 {offsets = [0, 48], sizes = [32, 16], strides = [1, 1]} : vector<32x144xf32> to vector<32x16xf32>
    %77 = vector.extract_strided_slice %72 {offsets = [0, 64], sizes = [32, 16], strides = [1, 1]} : vector<32x144xf32> to vector<32x16xf32>
    %78 = vector.extract_strided_slice %72 {offsets = [0, 80], sizes = [32, 16], strides = [1, 1]} : vector<32x144xf32> to vector<32x16xf32>
    %79 = vector.extract_strided_slice %72 {offsets = [0, 96], sizes = [32, 16], strides = [1, 1]} : vector<32x144xf32> to vector<32x16xf32>
    %80 = vector.extract_strided_slice %72 {offsets = [0, 112], sizes = [32, 16], strides = [1, 1]} : vector<32x144xf32> to vector<32x16xf32>
    %81 = vector.extract_strided_slice %72 {offsets = [0, 128], sizes = [32, 16], strides = [1, 1]} : vector<32x144xf32> to vector<32x16xf32>
    %82 = tpu.concatenate %73, %74, %75, %76, %77, %78, %79, %80, %81 in 0 : vector<32x16xf32>, vector<32x16xf32>, vector<32x16xf32>, vector<32x16xf32>, vector<32x16xf32>, vector<32x16xf32>, vector<32x16xf32>, vector<32x16xf32>, vector<32x16xf32> -> vector<288x16xf32>
    %83 = arith.truncf %82 : vector<288x16xf32> to vector<288x16xbf16>
    %c0_35 = arith.constant 0 : index
    %c0_36 = arith.constant 0 : index
    %84 = vector.load %arg15[%c0_35, %c0_36] : memref<32x288xbf16, #tpu.memory_space<vmem>>, vector<32x288xbf16>
    %cst_37 = arith.constant dense<0.000000e+00> : vector<32x16xf32>
    %85 = tpu.matmul %84, %83, %cst_37 {dimension_numbers = #tpu.dot_dimension_numbers<[1], [0], [0], [1], [0, 0, 1, 1], [], []>} : vector<32x288xbf16>, vector<288x16xbf16>, vector<32x16xf32> -> vector<32x16xf32>
    %c3 = arith.constant 3 : index
    %c0_38 = arith.constant 0 : index
    %86 = vector.load %arg4[%c3, %c0_38] : memref<16x256xf32, #tpu.memory_space<vmem>>, vector<1x16xf32>
    %87 = vector.broadcast %86 : vector<1x16xf32> to vector<32x16xf32>
    %88 = arith.addf %85, %87 : vector<32x16xf32>
    %cst_39 = arith.constant 0.000000e+00 : f32
    %89 = vector.broadcast %cst_39 : f32 to vector<32x16xf32>
    %90 = arith.maximumf %88, %89 : vector<32x16xf32>
    %91 = arith.truncf %90 : vector<32x16xf32> to vector<32x16xbf16>
    %c0_40 = arith.constant 0 : index
    %c0_41 = arith.constant 0 : index
    %92 = vector.load %arg11[%c0_40, %c0_41] : memref<128x128xbf16, #tpu.memory_space<vmem>>, vector<128x128xbf16>
    %cst_42 = arith.constant dense<0.000000e+00> : vector<128x128xf32>
    %93 = tpu.matmul %92, %16, %cst_42 {dimension_numbers = #tpu.dot_dimension_numbers<[1], [0], [0], [1], [0, 0, 1, 1], [], []>} : vector<128x128xbf16>, vector<128x128xbf16>, vector<128x128xf32> -> vector<128x128xf32>
    %94 = vector.extract_strided_slice %93 {offsets = [0, 0], sizes = [32, 128], strides = [1, 1]} : vector<128x128xf32> to vector<32x128xf32>
    %95 = vector.extract_strided_slice %93 {offsets = [32, 0], sizes = [32, 128], strides = [1, 1]} : vector<128x128xf32> to vector<32x128xf32>
    %96 = vector.extract_strided_slice %93 {offsets = [64, 0], sizes = [32, 128], strides = [1, 1]} : vector<128x128xf32> to vector<32x128xf32>
    %97 = vector.extract_strided_slice %93 {offsets = [96, 0], sizes = [32, 128], strides = [1, 1]} : vector<128x128xf32> to vector<32x128xf32>
    %98 = tpu.concatenate %94, %95, %96, %97 in 1 : vector<32x128xf32>, vector<32x128xf32>, vector<32x128xf32>, vector<32x128xf32> -> vector<32x512xf32>
    %99 = arith.truncf %98 : vector<32x512xf32> to vector<32x512xbf16>
    %c0_43 = arith.constant 0 : index
    %c0_44 = arith.constant 0 : index
    %100 = vector.load %arg12[%c0_43, %c0_44] : memref<32x32xbf16, #tpu.memory_space<vmem>>, vector<32x32xbf16>
    %cst_45 = arith.constant dense<0.000000e+00> : vector<32x512xf32>
    %101 = tpu.matmul %100, %99, %cst_45 {dimension_numbers = #tpu.dot_dimension_numbers<[1], [0], [0], [1], [0, 0, 1, 1], [], []>} : vector<32x32xbf16>, vector<32x512xbf16>, vector<32x512xf32> -> vector<32x512xf32>
    %102 = vector.extract_strided_slice %101 {offsets = [0, 0], sizes = [8, 512], strides = [1, 1]} : vector<32x512xf32> to vector<8x512xf32>
    %103 = vector.extract_strided_slice %101 {offsets = [8, 0], sizes = [8, 512], strides = [1, 1]} : vector<32x512xf32> to vector<8x512xf32>
    %104 = vector.extract_strided_slice %101 {offsets = [16, 0], sizes = [8, 512], strides = [1, 1]} : vector<32x512xf32> to vector<8x512xf32>
    %105 = vector.extract_strided_slice %101 {offsets = [24, 0], sizes = [8, 512], strides = [1, 1]} : vector<32x512xf32> to vector<8x512xf32>
    %106 = tpu.concatenate %102, %103, %104, %105 in 1 : vector<8x512xf32>, vector<8x512xf32>, vector<8x512xf32>, vector<8x512xf32> -> vector<8x2048xf32>
    %107 = arith.truncf %106 : vector<8x2048xf32> to vector<8x2048xbf16>
    %c0_46 = arith.constant 0 : index
    %c0_47 = arith.constant 0 : index
    %108 = vector.load %arg8[%c0_46, %c0_47] : memref<2048x288xbf16, #tpu.memory_space<vmem>>, vector<2048x288xbf16>
    %cst_48 = arith.constant dense<0.000000e+00> : vector<8x288xf32>
    %109 = tpu.matmul %107, %108, %cst_48 {dimension_numbers = #tpu.dot_dimension_numbers<[1], [0], [0], [1], [0, 0, 1, 1], [], []>} : vector<8x2048xbf16>, vector<2048x288xbf16>, vector<8x288xf32> -> vector<8x288xf32>
    %110 = vector.extract_strided_slice %109 {offsets = [0, 0], sizes = [8, 32], strides = [1, 1]} : vector<8x288xf32> to vector<8x32xf32>
    %111 = vector.extract_strided_slice %109 {offsets = [0, 32], sizes = [8, 32], strides = [1, 1]} : vector<8x288xf32> to vector<8x32xf32>
    %112 = vector.extract_strided_slice %109 {offsets = [0, 64], sizes = [8, 32], strides = [1, 1]} : vector<8x288xf32> to vector<8x32xf32>
    %113 = vector.extract_strided_slice %109 {offsets = [0, 96], sizes = [8, 32], strides = [1, 1]} : vector<8x288xf32> to vector<8x32xf32>
    %114 = vector.extract_strided_slice %109 {offsets = [0, 128], sizes = [8, 32], strides = [1, 1]} : vector<8x288xf32> to vector<8x32xf32>
    %115 = vector.extract_strided_slice %109 {offsets = [0, 160], sizes = [8, 32], strides = [1, 1]} : vector<8x288xf32> to vector<8x32xf32>
    %116 = vector.extract_strided_slice %109 {offsets = [0, 192], sizes = [8, 32], strides = [1, 1]} : vector<8x288xf32> to vector<8x32xf32>
    %117 = vector.extract_strided_slice %109 {offsets = [0, 224], sizes = [8, 32], strides = [1, 1]} : vector<8x288xf32> to vector<8x32xf32>
    %118 = vector.extract_strided_slice %109 {offsets = [0, 256], sizes = [8, 32], strides = [1, 1]} : vector<8x288xf32> to vector<8x32xf32>
    %119 = tpu.concatenate %110, %111, %112, %113, %114, %115, %116, %117, %118 in 0 : vector<8x32xf32>, vector<8x32xf32>, vector<8x32xf32>, vector<8x32xf32>, vector<8x32xf32>, vector<8x32xf32>, vector<8x32xf32>, vector<8x32xf32>, vector<8x32xf32> -> vector<72x32xf32>
    %120 = arith.truncf %119 : vector<72x32xf32> to vector<72x32xbf16>
    %c0_49 = arith.constant 0 : index
    %c0_50 = arith.constant 0 : index
    %121 = vector.load %arg16[%c0_49, %c0_50] : memref<8x72xbf16, #tpu.memory_space<vmem>>, vector<8x72xbf16>
    %cst_51 = arith.constant dense<0.000000e+00> : vector<8x32xf32>
    %122 = tpu.matmul %121, %120, %cst_51 {dimension_numbers = #tpu.dot_dimension_numbers<[1], [0], [0], [1], [0, 0, 1, 1], [], []>} : vector<8x72xbf16>, vector<72x32xbf16>, vector<8x32xf32> -> vector<8x32xf32>
    %c4 = arith.constant 4 : index
    %c0_52 = arith.constant 0 : index
    %123 = vector.load %arg4[%c4, %c0_52] : memref<16x256xf32, #tpu.memory_space<vmem>>, vector<1x32xf32>
    %124 = vector.broadcast %123 : vector<1x32xf32> to vector<8x32xf32>
    %125 = arith.addf %122, %124 : vector<8x32xf32>
    %cst_53 = arith.constant 0.000000e+00 : f32
    %126 = vector.broadcast %cst_53 : f32 to vector<8x32xf32>
    %127 = arith.maximumf %125, %126 : vector<8x32xf32>
    %128 = arith.truncf %127 : vector<8x32xf32> to vector<8x32xbf16>
    %c0_54 = arith.constant 0 : index
    %c0_55 = arith.constant 0 : index
    %129 = vector.load %arg12[%c0_54, %c0_55] : memref<32x32xbf16, #tpu.memory_space<vmem>>, vector<32x32xbf16>
    %cst_56 = arith.constant dense<0.000000e+00> : vector<32x16xf32>
    %130 = tpu.matmul %129, %91, %cst_56 {dimension_numbers = #tpu.dot_dimension_numbers<[1], [0], [0], [1], [0, 0, 1, 1], [], []>} : vector<32x32xbf16>, vector<32x16xbf16>, vector<32x16xf32> -> vector<32x16xf32>
    %131 = vector.extract_strided_slice %130 {offsets = [0, 0], sizes = [8, 16], strides = [1, 1]} : vector<32x16xf32> to vector<8x16xf32>
    %132 = vector.extract_strided_slice %130 {offsets = [8, 0], sizes = [8, 16], strides = [1, 1]} : vector<32x16xf32> to vector<8x16xf32>
    %133 = vector.extract_strided_slice %130 {offsets = [16, 0], sizes = [8, 16], strides = [1, 1]} : vector<32x16xf32> to vector<8x16xf32>
    %134 = vector.extract_strided_slice %130 {offsets = [24, 0], sizes = [8, 16], strides = [1, 1]} : vector<32x16xf32> to vector<8x16xf32>
    %135 = tpu.concatenate %131, %132, %133, %134 in 1 : vector<8x16xf32>, vector<8x16xf32>, vector<8x16xf32>, vector<8x16xf32> -> vector<8x64xf32>
    %136 = arith.truncf %135 : vector<8x64xf32> to vector<8x64xbf16>
    %c0_57 = arith.constant 0 : index
    %c0_58 = arith.constant 0 : index
    %137 = vector.load %arg9[%c0_57, %c0_58] : memref<96x288xbf16, #tpu.memory_space<vmem>>, vector<64x288xbf16>
    %cst_59 = arith.constant dense<0.000000e+00> : vector<8x288xf32>
    %138 = tpu.matmul %136, %137, %cst_59 {dimension_numbers = #tpu.dot_dimension_numbers<[1], [0], [0], [1], [0, 0, 1, 1], [], []>} : vector<8x64xbf16>, vector<64x288xbf16>, vector<8x288xf32> -> vector<8x288xf32>
    %c64_60 = arith.constant 64 : index
    %c0_61 = arith.constant 0 : index
    %139 = vector.load %arg9[%c64_60, %c0_61] : memref<96x288xbf16, #tpu.memory_space<vmem>>, vector<32x288xbf16>
    %cst_62 = arith.constant dense<0.000000e+00> : vector<8x288xf32>
    %140 = tpu.matmul %128, %139, %cst_62 {dimension_numbers = #tpu.dot_dimension_numbers<[1], [0], [0], [1], [0, 0, 1, 1], [], []>} : vector<8x32xbf16>, vector<32x288xbf16>, vector<8x288xf32> -> vector<8x288xf32>
    %141 = arith.addf %138, %140 : vector<8x288xf32>
    %142 = vector.extract_strided_slice %141 {offsets = [0, 0], sizes = [8, 32], strides = [1, 1]} : vector<8x288xf32> to vector<8x32xf32>
    %143 = vector.extract_strided_slice %141 {offsets = [0, 32], sizes = [8, 32], strides = [1, 1]} : vector<8x288xf32> to vector<8x32xf32>
    %144 = vector.extract_strided_slice %141 {offsets = [0, 64], sizes = [8, 32], strides = [1, 1]} : vector<8x288xf32> to vector<8x32xf32>
    %145 = vector.extract_strided_slice %141 {offsets = [0, 96], sizes = [8, 32], strides = [1, 1]} : vector<8x288xf32> to vector<8x32xf32>
    %146 = vector.extract_strided_slice %141 {offsets = [0, 128], sizes = [8, 32], strides = [1, 1]} : vector<8x288xf32> to vector<8x32xf32>
    %147 = vector.extract_strided_slice %141 {offsets = [0, 160], sizes = [8, 32], strides = [1, 1]} : vector<8x288xf32> to vector<8x32xf32>
    %148 = vector.extract_strided_slice %141 {offsets = [0, 192], sizes = [8, 32], strides = [1, 1]} : vector<8x288xf32> to vector<8x32xf32>
    %149 = vector.extract_strided_slice %141 {offsets = [0, 224], sizes = [8, 32], strides = [1, 1]} : vector<8x288xf32> to vector<8x32xf32>
    %150 = vector.extract_strided_slice %141 {offsets = [0, 256], sizes = [8, 32], strides = [1, 1]} : vector<8x288xf32> to vector<8x32xf32>
    %151 = tpu.concatenate %142, %143, %144, %145, %146, %147, %148, %149, %150 in 0 : vector<8x32xf32>, vector<8x32xf32>, vector<8x32xf32>, vector<8x32xf32>, vector<8x32xf32>, vector<8x32xf32>, vector<8x32xf32>, vector<8x32xf32>, vector<8x32xf32> -> vector<72x32xf32>
    %152 = arith.truncf %151 : vector<72x32xf32> to vector<72x32xbf16>
    %c0_63 = arith.constant 0 : index
    %c0_64 = arith.constant 0 : index
    %153 = vector.load %arg16[%c0_63, %c0_64] : memref<8x72xbf16, #tpu.memory_space<vmem>>, vector<8x72xbf16>
    %cst_65 = arith.constant dense<0.000000e+00> : vector<8x32xf32>
    %154 = tpu.matmul %153, %152, %cst_65 {dimension_numbers = #tpu.dot_dimension_numbers<[1], [0], [0], [1], [0, 0, 1, 1], [], []>} : vector<8x72xbf16>, vector<72x32xbf16>, vector<8x32xf32> -> vector<8x32xf32>
    %c5 = arith.constant 5 : index
    %c0_66 = arith.constant 0 : index
    %155 = vector.load %arg4[%c5, %c0_66] : memref<16x256xf32, #tpu.memory_space<vmem>>, vector<1x32xf32>
    %156 = vector.broadcast %155 : vector<1x32xf32> to vector<8x32xf32>
    %157 = arith.addf %154, %156 : vector<8x32xf32>
    %cst_67 = arith.constant 0.000000e+00 : f32
    %158 = vector.broadcast %cst_67 : f32 to vector<8x32xf32>
    %159 = arith.maximumf %157, %158 : vector<8x32xf32>
    %160 = arith.truncf %159 : vector<8x32xf32> to vector<8x32xbf16>
    %c0_68 = arith.constant 0 : index
    %c0_69 = arith.constant 0 : index
    %161 = vector.load %arg13[%c0_68, %c0_69] : memref<8x8xbf16, #tpu.memory_space<vmem>>, vector<8x8xbf16>
    %cst_70 = arith.constant dense<0.000000e+00> : vector<8x32xf32>
    %162 = tpu.matmul %161, %160, %cst_70 {dimension_numbers = #tpu.dot_dimension_numbers<[1], [0], [0], [1], [0, 0, 1, 1], [], []>} : vector<8x8xbf16>, vector<8x32xbf16>, vector<8x32xf32> -> vector<8x32xf32>
    %163 = vector.extract_strided_slice %162 {offsets = [0, 0], sizes = [2, 32], strides = [1, 1]} : vector<8x32xf32> to vector<2x32xf32>
    %164 = vector.extract_strided_slice %162 {offsets = [2, 0], sizes = [2, 32], strides = [1, 1]} : vector<8x32xf32> to vector<2x32xf32>
    %165 = vector.extract_strided_slice %162 {offsets = [4, 0], sizes = [2, 32], strides = [1, 1]} : vector<8x32xf32> to vector<2x32xf32>
    %166 = vector.extract_strided_slice %162 {offsets = [6, 0], sizes = [2, 32], strides = [1, 1]} : vector<8x32xf32> to vector<2x32xf32>
    %167 = tpu.concatenate %163, %164, %165, %166 in 1 : vector<2x32xf32>, vector<2x32xf32>, vector<2x32xf32>, vector<2x32xf32> -> vector<2x128xf32>
    %168 = arith.truncf %167 : vector<2x128xf32> to vector<2x128xbf16>
    %c0_71 = arith.constant 0 : index
    %c0_72 = arith.constant 0 : index
    %169 = vector.load %arg12[%c0_71, %c0_72] : memref<32x32xbf16, #tpu.memory_space<vmem>>, vector<32x32xbf16>
    %cst_73 = arith.constant dense<0.000000e+00> : vector<32x64xf32>
    %170 = tpu.matmul %169, %45, %cst_73 {dimension_numbers = #tpu.dot_dimension_numbers<[1], [0], [0], [1], [0, 0, 1, 1], [], []>} : vector<32x32xbf16>, vector<32x64xbf16>, vector<32x64xf32> -> vector<32x64xf32>
    %171 = vector.extract_strided_slice %170 {offsets = [0, 0], sizes = [8, 64], strides = [1, 1]} : vector<32x64xf32> to vector<8x64xf32>
    %172 = vector.extract_strided_slice %170 {offsets = [8, 0], sizes = [8, 64], strides = [1, 1]} : vector<32x64xf32> to vector<8x64xf32>
    %173 = vector.extract_strided_slice %170 {offsets = [16, 0], sizes = [8, 64], strides = [1, 1]} : vector<32x64xf32> to vector<8x64xf32>
    %174 = vector.extract_strided_slice %170 {offsets = [24, 0], sizes = [8, 64], strides = [1, 1]} : vector<32x64xf32> to vector<8x64xf32>
    %175 = tpu.concatenate %171, %172, %173, %174 in 1 : vector<8x64xf32>, vector<8x64xf32>, vector<8x64xf32>, vector<8x64xf32> -> vector<8x256xf32>
    %176 = arith.truncf %175 : vector<8x256xf32> to vector<8x256xbf16>
    %c0_74 = arith.constant 0 : index
    %c0_75 = arith.constant 0 : index
    %177 = vector.load %arg13[%c0_74, %c0_75] : memref<8x8xbf16, #tpu.memory_space<vmem>>, vector<8x8xbf16>
    %cst_76 = arith.constant dense<0.000000e+00> : vector<8x256xf32>
    %178 = tpu.matmul %177, %176, %cst_76 {dimension_numbers = #tpu.dot_dimension_numbers<[1], [0], [0], [1], [0, 0, 1, 1], [], []>} : vector<8x8xbf16>, vector<8x256xbf16>, vector<8x256xf32> -> vector<8x256xf32>
    %179 = vector.extract_strided_slice %178 {offsets = [0, 0], sizes = [2, 256], strides = [1, 1]} : vector<8x256xf32> to vector<2x256xf32>
    %180 = vector.extract_strided_slice %178 {offsets = [2, 0], sizes = [2, 256], strides = [1, 1]} : vector<8x256xf32> to vector<2x256xf32>
    %181 = vector.extract_strided_slice %178 {offsets = [4, 0], sizes = [2, 256], strides = [1, 1]} : vector<8x256xf32> to vector<2x256xf32>
    %182 = vector.extract_strided_slice %178 {offsets = [6, 0], sizes = [2, 256], strides = [1, 1]} : vector<8x256xf32> to vector<2x256xf32>
    %183 = tpu.concatenate %179, %180, %181, %182 in 1 : vector<2x256xf32>, vector<2x256xf32>, vector<2x256xf32>, vector<2x256xf32> -> vector<2x1024xf32>
    %184 = arith.truncf %183 : vector<2x1024xf32> to vector<2x1024xbf16>
    %c144 = arith.constant 144 : index
    %c0_77 = arith.constant 0 : index
    %185 = vector.load %arg3[%c144, %c0_77] : memref<2336x192xbf16, #tpu.memory_space<vmem>>, vector<1024x64xbf16>
    %cst_78 = arith.constant dense<0.000000e+00> : vector<2x64xf32>
    %186 = tpu.matmul %184, %185, %cst_78 {dimension_numbers = #tpu.dot_dimension_numbers<[1], [0], [0], [1], [0, 0, 1, 1], [], []>} : vector<2x1024xbf16>, vector<1024x64xbf16>, vector<2x64xf32> -> vector<2x64xf32>
    %c6 = arith.constant 6 : index
    %c0_79 = arith.constant 0 : index
    %187 = vector.load %arg4[%c6, %c0_79] : memref<16x256xf32, #tpu.memory_space<vmem>>, vector<1x64xf32>
    %188 = vector.broadcast %187 : vector<1x64xf32> to vector<2x64xf32>
    %189 = arith.addf %186, %188 : vector<2x64xf32>
    %cst_80 = arith.constant 0.000000e+00 : f32
    %190 = vector.broadcast %cst_80 : f32 to vector<2x64xf32>
    %191 = arith.maximumf %189, %190 : vector<2x64xf32>
    %192 = arith.truncf %191 : vector<2x64xf32> to vector<2x64xbf16>
    %193 = tpu.concatenate %168, %192 in 1 : vector<2x128xbf16>, vector<2x64xbf16> -> vector<2x192xbf16>
    %194 = arith.extf %193 : vector<2x192xbf16> to vector<2x192xf32>
    %c1168 = arith.constant 1168 : index
    %c0_81 = arith.constant 0 : index
    %195 = vector.load %arg3[%c1168, %c0_81] : memref<2336x192xbf16, #tpu.memory_space<vmem>>, vector<192x192xbf16>
    %cst_82 = arith.constant dense<0.000000e+00> : vector<2x192xf32>
    %196 = tpu.matmul %193, %195, %cst_82 {dimension_numbers = #tpu.dot_dimension_numbers<[1], [0], [0], [1], [0, 0, 1, 1], [], []>} : vector<2x192xbf16>, vector<192x192xbf16>, vector<2x192xf32> -> vector<2x192xf32>
    %c7 = arith.constant 7 : index
    %c0_83 = arith.constant 0 : index
    %197 = vector.load %arg4[%c7, %c0_83] : memref<16x256xf32, #tpu.memory_space<vmem>>, vector<1x192xf32>
    %198 = vector.broadcast %197 : vector<1x192xf32> to vector<2x192xf32>
    %199 = arith.addf %196, %198 : vector<2x192xf32>
    %cst_84 = arith.constant 0.000000e+00 : f32
    %200 = vector.broadcast %cst_84 : f32 to vector<2x192xf32>
    %201 = arith.maximumf %199, %200 : vector<2x192xf32>
    %202 = arith.truncf %201 : vector<2x192xf32> to vector<2x192xbf16>
    %c1360 = arith.constant 1360 : index
    %c0_85 = arith.constant 0 : index
    %203 = vector.load %arg3[%c1360, %c0_85] : memref<2336x192xbf16, #tpu.memory_space<vmem>>, vector<192x192xbf16>
    %cst_86 = arith.constant dense<0.000000e+00> : vector<2x192xf32>
    %204 = tpu.matmul %202, %203, %cst_86 {dimension_numbers = #tpu.dot_dimension_numbers<[1], [0], [0], [1], [0, 0, 1, 1], [], []>} : vector<2x192xbf16>, vector<192x192xbf16>, vector<2x192xf32> -> vector<2x192xf32>
    %c8 = arith.constant 8 : index
    %c0_87 = arith.constant 0 : index
    %205 = vector.load %arg4[%c8, %c0_87] : memref<16x256xf32, #tpu.memory_space<vmem>>, vector<1x192xf32>
    %206 = vector.broadcast %205 : vector<1x192xf32> to vector<2x192xf32>
    %207 = arith.addf %204, %206 : vector<2x192xf32>
    %208 = arith.truncf %207 : vector<2x192xf32> to vector<2x192xbf16>
    %cst_88 = arith.constant dense<0xFF800000> : vector<2xf32>
    %209 = vector.multi_reduction <maximumf>, %207, %cst_88 [1] : vector<2x192xf32> to vector<2xf32>
    %210 = vector.shape_cast %209 : vector<2xf32> to vector<2x1xf32>
    %cst_89 = arith.constant dense<0.000000e+00> : vector<2xf32>
    %211 = vector.multi_reduction <add>, %207, %cst_89 [1] : vector<2x192xf32> to vector<2xf32>
    %212 = vector.shape_cast %211 : vector<2xf32> to vector<2x1xf32>
    %cst_90 = arith.constant 1.920000e+02 : f32
    %213 = vector.broadcast %cst_90 : f32 to vector<2x1xf32>
    %214 = arith.divf %212, %213 : vector<2x1xf32>
    %215 = tpu.concatenate %210, %214 in 1 : vector<2x1xf32>, vector<2x1xf32> -> vector<2x2xf32>
    %216 = arith.truncf %215 : vector<2x2xf32> to vector<2x2xbf16>
    %c1752 = arith.constant 1752 : index
    %c0_91 = arith.constant 0 : index
    %217 = vector.load %arg3[%c1752, %c0_91] : memref<2336x192xbf16, #tpu.memory_space<vmem>>, vector<2x1xbf16>
    %cst_92 = arith.constant dense<0.000000e+00> : vector<2x1xf32>
    %218 = tpu.matmul %216, %217, %cst_92 {dimension_numbers = #tpu.dot_dimension_numbers<[1], [0], [0], [1], [0, 0, 1, 1], [], []>} : vector<2x2xbf16>, vector<2x1xbf16>, vector<2x1xf32> -> vector<2x1xf32>
    %c9 = arith.constant 9 : index
    %c0_93 = arith.constant 0 : index
    %219 = vector.load %arg4[%c9, %c0_93] : memref<16x256xf32, #tpu.memory_space<vmem>>, vector<1x1xf32>
    %220 = vector.broadcast %219 : vector<1x1xf32> to vector<2x1xf32>
    %221 = arith.addf %218, %220 : vector<2x1xf32>
    %222 = math.absf %221 : vector<2x1xf32>
    %cst_94 = arith.constant 0.000000e+00 : f32
    %223 = vector.broadcast %cst_94 : f32 to vector<2x1xf32>
    %224 = arith.subf %223, %222 : vector<2x1xf32>
    %225 = math.exp %224 : vector<2x1xf32>
    %cst_95 = arith.constant 1.000000e+00 : f32
    %226 = vector.broadcast %cst_95 : f32 to vector<2x1xf32>
    %227 = arith.addf %226, %225 : vector<2x1xf32>
    %228 = tpu.reciprocal %227 {approx = true} : vector<2x1xf32> -> vector<2x1xf32>
    %cst_96 = arith.constant 0.000000e+00 : f32
    %229 = vector.broadcast %cst_96 : f32 to vector<2x1xf32>
    %230 = arith.cmpf oge, %221, %229 : vector<2x1xf32>
    %231 = arith.mulf %225, %228 : vector<2x1xf32>
    %232 = arith.select %230, %228, %231 : vector<2x1xi1>, vector<2x1xf32>
    %233 = vector.broadcast %232 : vector<2x1xf32> to vector<2x192xf32>
    %234 = arith.mulf %207, %233 : vector<2x192xf32>
    %c1552 = arith.constant 1552 : index
    %c0_97 = arith.constant 0 : index
    %235 = vector.load %arg3[%c1552, %c0_97] : memref<2336x192xbf16, #tpu.memory_space<vmem>>, vector<192x6xbf16>
    %cst_98 = arith.constant dense<0.000000e+00> : vector<2x6xf32>
    %236 = tpu.matmul %208, %235, %cst_98 {dimension_numbers = #tpu.dot_dimension_numbers<[1], [0], [0], [1], [0, 0, 1, 1], [], []>} : vector<2x192xbf16>, vector<192x6xbf16>, vector<2x6xf32> -> vector<2x6xf32>
    %c10 = arith.constant 10 : index
    %c0_99 = arith.constant 0 : index
    %237 = vector.load %arg4[%c10, %c0_99] : memref<16x256xf32, #tpu.memory_space<vmem>>, vector<1x6xf32>
    %238 = vector.broadcast %237 : vector<1x6xf32> to vector<2x6xf32>
    %239 = arith.addf %236, %238 : vector<2x6xf32>
    %cst_100 = arith.constant 0.000000e+00 : f32
    %240 = vector.broadcast %cst_100 : f32 to vector<2x6xf32>
    %241 = arith.maximumf %239, %240 : vector<2x6xf32>
    %242 = arith.truncf %241 : vector<2x6xf32> to vector<2x6xbf16>
    %c1744 = arith.constant 1744 : index
    %c0_101 = arith.constant 0 : index
    %243 = vector.load %arg3[%c1744, %c0_101] : memref<2336x192xbf16, #tpu.memory_space<vmem>>, vector<6x192xbf16>
    %cst_102 = arith.constant dense<0.000000e+00> : vector<2x192xf32>
    %244 = tpu.matmul %242, %243, %cst_102 {dimension_numbers = #tpu.dot_dimension_numbers<[1], [0], [0], [1], [0, 0, 1, 1], [], []>} : vector<2x6xbf16>, vector<6x192xbf16>, vector<2x192xf32> -> vector<2x192xf32>
    %c11 = arith.constant 11 : index
    %c0_103 = arith.constant 0 : index
    %245 = vector.load %arg4[%c11, %c0_103] : memref<16x256xf32, #tpu.memory_space<vmem>>, vector<1x192xf32>
    %246 = vector.broadcast %245 : vector<1x192xf32> to vector<2x192xf32>
    %247 = arith.addf %244, %246 : vector<2x192xf32>
    %248 = math.absf %247 : vector<2x192xf32>
    %cst_104 = arith.constant 0.000000e+00 : f32
    %249 = vector.broadcast %cst_104 : f32 to vector<2x192xf32>
    %250 = arith.subf %249, %248 : vector<2x192xf32>
    %251 = math.exp %250 : vector<2x192xf32>
    %cst_105 = arith.constant 1.000000e+00 : f32
    %252 = vector.broadcast %cst_105 : f32 to vector<2x192xf32>
    %253 = arith.addf %252, %251 : vector<2x192xf32>
    %254 = tpu.reciprocal %253 {approx = true} : vector<2x192xf32> -> vector<2x192xf32>
    %cst_106 = arith.constant 0.000000e+00 : f32
    %255 = vector.broadcast %cst_106 : f32 to vector<2x192xf32>
    %256 = arith.cmpf oge, %247, %255 : vector<2x192xf32>
    %257 = arith.mulf %251, %254 : vector<2x192xf32>
    %258 = arith.select %256, %254, %257 : vector<2x192xi1>, vector<2x192xf32>
    %259 = arith.mulf %207, %258 : vector<2x192xf32>
    %c1760 = arith.constant 1760 : index
    %c0_107 = arith.constant 0 : index
    %260 = vector.load %arg3[%c1760, %c0_107] : memref<2336x192xbf16, #tpu.memory_space<vmem>>, vector<384x192xbf16>
    %261 = arith.truncf %234 : vector<2x192xf32> to vector<2x192xbf16>
    %262 = vector.extract_strided_slice %260 {offsets = [0, 0], sizes = [192, 192], strides = [1, 1]} : vector<384x192xbf16> to vector<192x192xbf16>
    %cst_108 = arith.constant dense<0.000000e+00> : vector<2x192xf32>
    %263 = tpu.matmul %261, %262, %cst_108 {dimension_numbers = #tpu.dot_dimension_numbers<[1], [0], [0], [1], [0, 0, 1, 1], [], []>} : vector<2x192xbf16>, vector<192x192xbf16>, vector<2x192xf32> -> vector<2x192xf32>
    %264 = arith.truncf %259 : vector<2x192xf32> to vector<2x192xbf16>
    %265 = vector.extract_strided_slice %260 {offsets = [192, 0], sizes = [192, 192], strides = [1, 1]} : vector<384x192xbf16> to vector<192x192xbf16>
    %cst_109 = arith.constant dense<0.000000e+00> : vector<2x192xf32>
    %266 = tpu.matmul %264, %265, %cst_109 {dimension_numbers = #tpu.dot_dimension_numbers<[1], [0], [0], [1], [0, 0, 1, 1], [], []>} : vector<2x192xbf16>, vector<192x192xbf16>, vector<2x192xf32> -> vector<2x192xf32>
    %267 = arith.addf %263, %266 : vector<2x192xf32>
    %c12 = arith.constant 12 : index
    %c0_110 = arith.constant 0 : index
    %268 = vector.load %arg4[%c12, %c0_110] : memref<16x256xf32, #tpu.memory_space<vmem>>, vector<1x192xf32>
    %269 = vector.broadcast %268 : vector<1x192xf32> to vector<2x192xf32>
    %270 = arith.addf %267, %269 : vector<2x192xf32>
    %271 = arith.addf %270, %194 : vector<2x192xf32>
    %272 = arith.truncf %271 : vector<2x192xf32> to vector<2x192xbf16>
    %c2144 = arith.constant 2144 : index
    %c0_111 = arith.constant 0 : index
    %273 = vector.load %arg3[%c2144, %c0_111] : memref<2336x192xbf16, #tpu.memory_space<vmem>>, vector<192x1xbf16>
    %cst_112 = arith.constant dense<0.000000e+00> : vector<2x1xf32>
    %274 = tpu.matmul %272, %273, %cst_112 {dimension_numbers = #tpu.dot_dimension_numbers<[1], [0], [0], [1], [0, 0, 1, 1], [], []>} : vector<2x192xbf16>, vector<192x1xbf16>, vector<2x1xf32> -> vector<2x1xf32>
    %c13 = arith.constant 13 : index
    %c0_113 = arith.constant 0 : index
    %275 = vector.load %arg4[%c13, %c0_113] : memref<16x256xf32, #tpu.memory_space<vmem>>, vector<1x1xf32>
    %276 = vector.broadcast %275 : vector<1x1xf32> to vector<2x1xf32>
    %277 = arith.addf %274, %276 : vector<2x1xf32>
    %c0_114 = arith.constant 0 : index
    %c0_115 = arith.constant 0 : index
    %c0_116 = arith.constant 0 : index
    %278 = vector.load %arg17[%c0_114, %c0_115, %c0_116] : memref<1x2x1xf32, #tpu.memory_space<vmem>>, vector<1x2x1xf32>
    %279 = vector.shape_cast %278 : vector<1x2x1xf32> to vector<2x1xf32>
    %280 = vector.shape_cast %277 : vector<2x1xf32> to vector<1x2x1xf32>
    tpu.vector_store %arg17[%c0_114, %c0_115, %c0_116], %280 {strides = array<i32>} : memref<1x2x1xf32, #tpu.memory_space<vmem>>, vector<1x2x1xf32>,
    return
  }
  func.func @transform_0(%arg0: i32) -> (i32, i32) {
    %c0_i32 = arith.constant 0 : i32
    %c0_i32_0 = arith.constant 0 : i32
    return %arg0, %c0_i32 : i32, i32
  }
  func.func @transform_1(%arg0: i32) -> (i32, i32) {
    %c0_i32 = arith.constant 0 : i32
    %c0_i32_0 = arith.constant 0 : i32
    return %arg0, %c0_i32 : i32, i32
  }
  func.func @transform_2(%arg0: i32) -> (i32, i32) {
    %c0_i32 = arith.constant 0 : i32
    %c0_i32_0 = arith.constant 0 : i32
    %c0_i32_1 = arith.constant 0 : i32
    return %c0_i32, %c0_i32_0 : i32, i32
  }
  func.func @transform_3(%arg0: i32) -> (i32, i32) {
    %c0_i32 = arith.constant 0 : i32
    %c0_i32_0 = arith.constant 0 : i32
    %c0_i32_1 = arith.constant 0 : i32
    return %c0_i32, %c0_i32_0 : i32, i32
  }
  func.func @transform_4(%arg0: i32) -> (i32, i32) {
    %c0_i32 = arith.constant 0 : i32
    %c0_i32_0 = arith.constant 0 : i32
    %c0_i32_1 = arith.constant 0 : i32
    return %c0_i32, %c0_i32_0 : i32, i32
  }
  func.func @transform_5(%arg0: i32) -> (i32, i32) {
    %c0_i32 = arith.constant 0 : i32
    %c0_i32_0 = arith.constant 0 : i32
    %c0_i32_1 = arith.constant 0 : i32
    return %c0_i32, %c0_i32_0 : i32, i32
  }
  func.func @transform_6(%arg0: i32) -> (i32, i32) {
    %c0_i32 = arith.constant 0 : i32
    %c0_i32_0 = arith.constant 0 : i32
    %c0_i32_1 = arith.constant 0 : i32
    return %c0_i32, %c0_i32_0 : i32, i32
  }
  func.func @transform_7(%arg0: i32) -> (i32, i32) {
    %c0_i32 = arith.constant 0 : i32
    %c0_i32_0 = arith.constant 0 : i32
    %c0_i32_1 = arith.constant 0 : i32
    return %c0_i32, %c0_i32_0 : i32, i32
  }
  func.func @transform_8(%arg0: i32) -> (i32, i32) {
    %c0_i32 = arith.constant 0 : i32
    %c0_i32_0 = arith.constant 0 : i32
    %c0_i32_1 = arith.constant 0 : i32
    return %c0_i32, %c0_i32_0 : i32, i32
  }
  func.func @transform_9(%arg0: i32) -> (i32, i32) {
    %c0_i32 = arith.constant 0 : i32
    %c0_i32_0 = arith.constant 0 : i32
    %c0_i32_1 = arith.constant 0 : i32
    return %c0_i32, %c0_i32_0 : i32, i32
  }
  func.func @transform_10(%arg0: i32) -> (i32, i32) {
    %c0_i32 = arith.constant 0 : i32
    %c0_i32_0 = arith.constant 0 : i32
    %c0_i32_1 = arith.constant 0 : i32
    return %c0_i32, %c0_i32_0 : i32, i32
  }
  func.func @transform_11(%arg0: i32) -> (i32, i32) {
    %c0_i32 = arith.constant 0 : i32
    %c0_i32_0 = arith.constant 0 : i32
    %c0_i32_1 = arith.constant 0 : i32
    return %c0_i32, %c0_i32_0 : i32, i32
  }
  func.func @transform_12(%arg0: i32) -> (i32, i32) {
    %c0_i32 = arith.constant 0 : i32
    %c0_i32_0 = arith.constant 0 : i32
    %c0_i32_1 = arith.constant 0 : i32
    return %c0_i32, %c0_i32_0 : i32, i32
  }
  func.func @transform_13(%arg0: i32) -> (i32, i32) {
    %c0_i32 = arith.constant 0 : i32
    %c0_i32_0 = arith.constant 0 : i32
    %c0_i32_1 = arith.constant 0 : i32
    return %c0_i32, %c0_i32_0 : i32, i32
  }
  func.func @transform_14(%arg0: i32) -> (i32, i32) {
    %c0_i32 = arith.constant 0 : i32
    %c0_i32_0 = arith.constant 0 : i32
    %c0_i32_1 = arith.constant 0 : i32
    return %c0_i32, %c0_i32_0 : i32, i32
  }
  func.func @transform_15(%arg0: i32) -> (i32, i32) {
    %c0_i32 = arith.constant 0 : i32
    %c0_i32_0 = arith.constant 0 : i32
    %c0_i32_1 = arith.constant 0 : i32
    return %c0_i32, %c0_i32_0 : i32, i32
  }
  func.func @transform_16(%arg0: i32) -> (i32, i32, i32) {
    %c0_i32 = arith.constant 0 : i32
    %c0_i32_0 = arith.constant 0 : i32
    %c0_i32_1 = arith.constant 0 : i32
    return %arg0, %c0_i32, %c0_i32_0 : i32, i32, i32
  }
}

</mosaic_0001>

<bundles_post_ra>
// kernel: wavelet_res_forward.1
= control target key start
LH: loop header
LB: loop body
LE: loop exit
PB: predicated region body
PF: predicated region fallthrough
CT: control target
= control target key end

     0   :  { %v15300_v0 = vmov 0   ;;  %vm479_vm0 = vcmask 130048   ;;  %s15301_s21 = smov 32   ;;  %s15302_s27 = smov 64   ;;  %vm2499_vm1 = vcmask 261120   ;;  %vm2516_vm2 = vcmask 523264   ;;  %s19515_s2 = inlined_call_operand.vmem [shape: bf16[2336,192], index: 2, kind: input, shape index: {}]   ;;  %s19516_s0 = inlined_call_operand.vmem [shape: bf16[512,144], index: 0, kind: input, shape index: {}]   ;;  %s19517_s3 = inlined_call_operand.vmem [shape: f32[16,256], index: 3, kind: input, shape index: {}]   ;;  %s19518_s9 = inlined_call_operand.vmem [shape: bf16[512,512], index: 9, kind: input, shape index: {}]   ;;  %s19519_s4 = inlined_call_operand.vmem [shape: bf16[128,144], index: 4, kind: input, shape index: {}]   ;;  %s19520_s13 = inlined_call_operand.vmem [shape: bf16[128,1152], index: 13, kind: input, shape index: {}]   ;;  %s19521_s5 = inlined_call_operand.vmem [shape: bf16[256,144], index: 5, kind: input, shape index: {}]   ;;  %s19522_s1 = inlined_call_operand.vmem [shape: bf16[32,256], index: 1, kind: input, shape index: {}]   ;;  %s19523_s10 = inlined_call_operand.vmem [shape: bf16[128,128], index: 10, kind: input, shape index: {}]   ;;  %s19524_s14 = inlined_call_operand.vmem [shape: bf16[32,288], index: 14, kind: input, shape index: {}]   ;;  %s19525_s6 = inlined_call_operand.vmem [shape: bf16[80,144], index: 6, kind: input, shape index: {}]   ;;  %s19526_s11 = inlined_call_operand.vmem [shape: bf16[32,32], index: 11, kind: input, shape index: {}]   ;;  %s19527_s7 = inlined_call_operand.vmem [shape: bf16[2048,288], index: 7, kind: input, shape index: {}]   ;;  %s19528_s8 = inlined_call_operand.vmem [shape: bf16[96,288], index: 8, kind: input, shape index: {}]   ;;  %s19529_s15 = inlined_call_operand.vmem [shape: bf16[8,72], index: 15, kind: input, shape index: {}]   ;;  %s19530_s12 = inlined_call_operand.vmem [shape: bf16[8,8], index: 12, kind: input, shape index: {}]   ;;  %s19531_s16 = inlined_call_operand.vmem [shape: f32[1,2,1], index: 16, kind: output, shape index: {}]  }
   0x1   :  { %19533 = sst [smem:[#allocation2_spill]] %s19515_s2  ;;  %576 = vmatprep.subr.bf16.mxu0 %v15300_v0  ;;  %1729 = vmatprep.subr.bf16.mxu1 %v15300_v0  ;;  %v14013_v5 = vld [vmem:[%s19516_s0 + $0x4] ss:$8 sps:$4 sm:$0xff]   ;;  %v14011_v11 = vld [vmem:[%s19516_s0] ss:$8 sps:$4 sm:$0xff]   ;;  %vm2533_vm3 = vcmask 785408  }
   0x2   :  { %s19534_s23 = sld [smem:[#allocation2_spill]]  ;;  %14001 = vset.pattern.permute.xlu0 %v15300_v0  ;;  %11456 = vmatprep.mubr.msk.bf16.mxu0 %vm479_vm0, %v14013_v5  ;;  %v14014_v12 = vld [vmem:[%s19516_s0 + $0x14] ss:$8 sps:$4 sm:$0xff]   ;;  %v14016_v13 = vld [vmem:[%s19516_s0 + $0x10] ss:$8 sps:$4 sm:$0xff]   ;;  %s15304_s19 = smov 112  }
   0x3   :  { %v14017_v14 = vld [vmem:[%s19516_s0 + $0x24] ss:$8 sps:$4 sm:$0xff]   ;;  %v14019_v15 = vld [vmem:[%s19516_s0 + $0x20] ss:$8 sps:$4 sm:$0xff]   ;;  %v14020_v16 = vld [vmem:[%s19516_s0 + $0x34] ss:$8 sps:$4 sm:$0xff]  }
   0x4   :  { %v14022_v17 = vld [vmem:[%s19516_s0 + $0x30] ss:$8 sps:$4 sm:$0xff]   ;;  %v14023_v18 = vld [vmem:[%s19516_s0 + $0x44] ss:$8 sps:$4 sm:$0xff]   ;;  %v14025_v19 = vld [vmem:[%s19516_s0 + $0x40] ss:$8 sps:$4 sm:$0xff]  }
   0x5   :  { %v14026_v20 = vld [vmem:[%s19516_s0 + $0x54] ss:$8 sps:$4 sm:$0xff]   ;;  %v14028_v21 = vld [vmem:[%s19516_s0 + $0x50] ss:$8 sps:$4 sm:$0xff]   ;;  %v14029_v22 = vld [vmem:[%s19516_s0 + $0x64] ss:$8 sps:$4 sm:$0xff]  }
   0x6   :  { %v14031_v23 = vld [vmem:[%s19516_s0 + $0x60] ss:$8 sps:$4 sm:$0xff]   ;;  %v14032_v24 = vld [vmem:[%s19516_s0 + $0x74] ss:$8 sps:$4 sm:$0xff]   ;;  %v14034_v25 = vld [vmem:[%s19516_s0 + $0x70] ss:$8 sps:$4 sm:$0xff]  }
   0x7   :  { %v14035_v26 = vld [vmem:[%s19516_s0 + $0x84] ss:$8 sps:$4 sm:$0xff]   ;;  %v14037_v27 = vld [vmem:[%s19516_s0 + $0x80] ss:$8 sps:$4 sm:$0xff]   ;;  %v14038_v28 = vld [vmem:[%s19516_s0 + $0x94] ss:$8 sps:$4 sm:$0xff]  }
   0x8   :  { %v14002_v1 = vld [vmem:[%s19534_s23] ss:$8 sps:$4 sm:$0xff]   ;;  %v14003_v2 = vld [vmem:[%s19534_s23 + $0x10] ss:$8 sps:$4 sm:$0xff]   ;;  %v14041_v30 = vld [vmem:[%s19516_s0 + $0xa4] ss:$8 sps:$4 sm:$0xff]  }
   0x9   :  { %577 = vmatpush1.bf16.msra.mxu0 %v14002_v1  ;;  %v14004_v3 = vld [vmem:[%s19534_s23 + $0x20] ss:$8 sps:$4 sm:$0xff]   ;;  %v14005_v4 = vld [vmem:[%s19534_s23 + $0x30] ss:$8 sps:$4 sm:$0xff]   ;;  %v14044_v32 = vld [vmem:[%s19516_s0 + $0xb4] ss:$8 sps:$4 sm:$0xff]  }
   0xa   :  { %578 = vmatprep.subr.bf16.mxu0 %v15300_v0  ;;  %v14006_v6 = vld [vmem:[%s19534_s23 + $0x40] ss:$8 sps:$4 sm:$0xff]   ;;  %v14007_v7 = vld [vmem:[%s19534_s23 + $0x50] ss:$8 sps:$4 sm:$0xff]   ;;  %v14047_v34 = vld [vmem:[%s19516_s0 + $0xc4] ss:$8 sps:$4 sm:$0xff]  }
   0xb   :  { %v14008_v8 = vld [vmem:[%s19534_s23 + $0x60] ss:$8 sps:$4 sm:$0xff]   ;;  %v14009_v9 = vld [vmem:[%s19534_s23 + $0x70] ss:$8 sps:$4 sm:$0xff]   ;;  %v14050_v36 = vld [vmem:[%s19516_s0 + $0xd4] ss:$8 sps:$4 sm:$0xff]  }
   0xc   :  { %v14010_v10 = vld [vmem:[%s19534_s23 + $0x80] ss:$8 sps:$4 sm:$0xff]   ;;  %v14040_v29 = vld [vmem:[%s19516_s0 + $0x90] ss:$8 sps:$4 sm:$0xff]   ;;  %v14053_v38 = vld [vmem:[%s19516_s0 + $0xe4] ss:$8 sps:$4 sm:$0xff]  }
   0xd   :  { %579 = vmatpush1.bf16.msra.mxu0 %v14003_v2  ;;  %v14043_v31 = vld [vmem:[%s19516_s0 + $0xa0] ss:$8 sps:$4 sm:$0xff]   ;;  %v14046_v33 = vld [vmem:[%s19516_s0 + $0xb0] ss:$8 sps:$4 sm:$0xff]   ;;  %v14056_v40 = vld [vmem:[%s19516_s0 + $0xf4] ss:$8 sps:$4 sm:$0xff]  }
   0xe   :  { %580 = vmatprep.subr.bf16.mxu0 %v15300_v0  ;;  %v14049_v35 = vld [vmem:[%s19516_s0 + $0xc0] ss:$8 sps:$4 sm:$0xff]   ;;  %v14052_v37 = vld [vmem:[%s19516_s0 + $0xd0] ss:$8 sps:$4 sm:$0xff]   ;;  %v14059_v42 = vld [vmem:[%s19516_s0 + $0x104] ss:$8 sps:$4 sm:$0xff]  }
   0xf   :  { %v14055_v39 = vld [vmem:[%s19516_s0 + $0xe0] ss:$8 sps:$4 sm:$0xff]   ;;  %v14058_v41 = vld [vmem:[%s19516_s0 + $0xf0] ss:$8 sps:$4 sm:$0xff]   ;;  %v14062_v44 = vld [vmem:[%s19516_s0 + $0x114] ss:$8 sps:$4 sm:$0xff]  }
  0x10   :  { %v14061_v43 = vld [vmem:[%s19516_s0 + $0x100] ss:$8 sps:$4 sm:$0xff]   ;;  %v14064_v45 = vld [vmem:[%s19516_s0 + $0x110] ss:$8 sps:$4 sm:$0xff]   ;;  %v14065_v46 = vld [vmem:[%s19516_s0 + $0x124] ss:$8 sps:$4 sm:$0xff]  }
  0x11   :  { %581 = vmatpush1.bf16.msra.mxu0 %v14004_v3  ;;  %v14067_v47 = vld [vmem:[%s19516_s0 + $0x120] ss:$8 sps:$4 sm:$0xff]   ;;  %v14068_v48 = vld [vmem:[%s19516_s0 + $0x134] ss:$8 sps:$4 sm:$0xff]   ;;  %v14070_v49 = vld [vmem:[%s19516_s0 + $0x130] ss:$8 sps:$4 sm:$0xff]  }
  0x12   :  { %582 = vmatprep.subr.bf16.mxu0 %v15300_v0  ;;  %v14071_v50 = vld [vmem:[%s19516_s0 + $0x144] ss:$8 sps:$4 sm:$0xff]   ;;  %v14073_v51 = vld [vmem:[%s19516_s0 + $0x140] ss:$8 sps:$4 sm:$0xff]   ;;  %v14074_v52 = vld [vmem:[%s19516_s0 + $0x154] ss:$8 sps:$4 sm:$0xff]  }
  0x13   :  { %v14076_v53 = vld [vmem:[%s19516_s0 + $0x150] ss:$8 sps:$4 sm:$0xff]   ;;  %v14077_v54 = vld [vmem:[%s19516_s0 + $0x164] ss:$8 sps:$4 sm:$0xff]   ;;  %v14079_v55 = vld [vmem:[%s19516_s0 + $0x160] ss:$8 sps:$4 sm:$0xff]  }
  0x14   :  { %v14080_v56 = vld [vmem:[%s19516_s0 + $0x174] ss:$8 sps:$4 sm:$0xff]   ;;  %v14082_v57 = vld [vmem:[%s19516_s0 + $0x170] ss:$8 sps:$4 sm:$0xff]   ;;  %v14083_v58 = vld [vmem:[%s19516_s0 + $0x184] ss:$8 sps:$4 sm:$0xff]  }
  0x15   :  { %583 = vmatpush1.bf16.msra.mxu0 %v14005_v4  ;;  %v14085_v59 = vld [vmem:[%s19516_s0 + $0x180] ss:$8 sps:$4 sm:$0xff]   ;;  %v14086_v60 = vld [vmem:[%s19516_s0 + $0x194] ss:$8 sps:$4 sm:$0xff]   ;;  %v14088_v61 = vld [vmem:[%s19516_s0 + $0x190] ss:$8 sps:$4 sm:$0xff]  }
  0x16   :  { %584 = vmatprep.subr.bf16.mxu0 %v15300_v0  ;;  %v14089_v62 = vld [vmem:[%s19516_s0 + $0x1a4] ss:$8 sps:$4 sm:$0xff]   ;;  %v14091_v63 = vld [vmem:[%s19516_s0 + $0x1a0] ss:$8 sps:$4 sm:$0xff]   ;;  %v14092_v1 = vld [vmem:[%s19516_s0 + $0x1b4] ss:$8 sps:$4 sm:$0xff]  }
  0x17   :  { %v15628_v2 = vld [vmem:[%s19517_s3] ss:$0 sm:$0xff]  ;;  %v14094_v4 = vld [vmem:[%s19516_s0 + $0x1b0] ss:$8 sps:$4 sm:$0xff]   ;;  %s15305_s24 = smov 80   ;;  %s15306_s25 = smov 48  }
  0x18   :  { %s15307_s26 = smov 16   ;;  %vm4366_vm4 = vcmask 392192   ;;  %vm15309_vm5 = vmmov 0   ;;  %vm8772_vm6 = vcmask 1043456   ;;  %vm8768_vm7 = vcmask 588800  }
  0x19   :  { %585 = vmatpush1.bf16.msra.mxu0 %v14006_v6  ;;  %vm9243_vm8 = vcmask 64512   ;;  %vm10522_vm9 = vcmask 1041408   ;;  %vm10524_vm10 = vcmask 517120   ;;  %vm10545_vm11 = vcmask 1040384  }
  0x1a   :  { %586 = vmatprep.subr.bf16.mxu0 %v15300_v0  ;;  %vm10770_vm12 = vcmask 1042432   ;;  %vm10536_vm13 = vcmask 7168   ;;  %vm10541_vm14 = vcmask 15360   ;;  %vm10766_vm15 = vcmask 48128  }
  0x1d   :  { %587 = vmatpush1.bf16.msra.mxu0 %v14007_v7  ;;  %v14103_v7 = vld [vmem:[%s19518_s9 + $0x4] ss:$16 sps:$4 sm:$0xff]  }
  0x1e   :  { %588 = vmatprep.subr.bf16.mxu0 %v15300_v0  ;;  %1761 = vmatprep.mubr.bf16.mxu1 %v14103_v7 }
  0x21   :  { %589 = vmatpush1.bf16.msra.mxu0 %v14008_v8 }
  0x22   :  { %590 = vmatprep.subr.bf16.mxu0 %v15300_v0 }
  0x25   :  { %591 = vmatpush1.bf16.msra.mxu0 %v14009_v9  ;;  %v14095_v9 = vld [vmem:[%s19516_s0 + $0x1c4] ss:$8 sps:$4 sm:$0xff]  }
  0x26   :  { %592 = vmatprep.subr.bf16.mxu0 %v15300_v0 }
  0x29   :  { %593 = vmatpush1.bf16.msra.mxu0 %v14010_v10 }
  0x2c   :  { %609 = vmatmul.mubr.bf16.vlgmr.msra.gmra.mrb[0].mxu0 %v14011_v11 }
  0x2d   :  { %11457 = vmatprep.mubr.msk.bf16.mxu0 %vm479_vm0, %v14014_v12 }
  0x34   :  { %617 = vmatmul.mubr.bf16.gmra.mrb[4].mxu0 %v14016_v13 }
  0x35   :  { %11458 = vmatprep.mubr.msk.bf16.mxu0 %vm479_vm0, %v14017_v14 }
  0x3c   :  { %625 = vmatmul.mubr.bf16.gmra.mrb[8].mxu0 %v14019_v15  ;;  %v14097_v15 = vld [vmem:[%s19516_s0 + $0x1c0] ss:$8 sps:$4 sm:$0xff]  }
  0x3d   :  { %11459 = vmatprep.mubr.msk.bf16.mxu0 %vm479_vm0, %v14020_v16 }
  0x44   :  { %633 = vmatmul.mubr.bf16.gmra.mrb[12].mxu0 %v14022_v17 }
  0x45   :  { %11460 = vmatprep.mubr.msk.bf16.mxu0 %vm479_vm0, %v14023_v18 }
  0x4c   :  { %641 = vmatmul.mubr.bf16.gmra.mrb[16].mxu0 %v14025_v19  ;;  %v14098_v19 = vld [vmem:[%s19516_s0 + $0x1d4] ss:$8 sps:$4 sm:$0xff]  }
  0x4d   :  { %11461 = vmatprep.mubr.msk.bf16.mxu0 %vm479_vm0, %v14026_v20 }
  0x54   :  { %649 = vmatmul.mubr.bf16.gmra.mrb[20].mxu0 %v14028_v21 }
  0x55   :  { %11462 = vmatprep.mubr.msk.bf16.mxu0 %vm479_vm0, %v14029_v22 }
  0x5c   :  { %657 = vmatmul.mubr.bf16.gmra.mrb[24].mxu0 %v14031_v23 }
  0x5d   :  { %11463 = vmatprep.mubr.msk.bf16.mxu0 %vm479_vm0, %v14032_v24 }
  0x64   :  { %665 = vmatmul.mubr.bf16.gmra.mrb[28].mxu0 %v14034_v25 }
  0x65   :  { %11464 = vmatprep.mubr.msk.bf16.mxu0 %vm479_vm0, %v14035_v26  ;;  %v14100_v26 = vld [vmem:[%s19516_s0 + $0x1d0] ss:$8 sps:$4 sm:$0xff]  }
  0x6c   :  { %673 = vmatmul.mubr.bf16.gmra.mrb[32].mxu0 %v14037_v27 }
  0x6d   :  { %11465 = vmatprep.mubr.msk.bf16.mxu0 %vm479_vm0, %v14038_v28  ;;  %v14107_v28 = vld [vmem:[%s19516_s0 + $0x1e4] ss:$8 sps:$4 sm:$0xff]  }
  0x74   :  { %681 = vmatmul.mubr.bf16.gmra.mrb[36].mxu0 %v14040_v29 }
  0x75   :  { %11466 = vmatprep.mubr.msk.bf16.mxu0 %vm479_vm0, %v14041_v30 }
  0x7c   :  { %689 = vmatmul.mubr.bf16.gmra.mrb[40].mxu0 %v14043_v31 }
  0x7d   :  { %11467 = vmatprep.mubr.msk.bf16.mxu0 %vm479_vm0, %v14044_v32 }
  0x84   :  { %697 = vmatmul.mubr.bf16.gmra.mrb[44].mxu0 %v14046_v33 }
  0x85   :  { %11468 = vmatprep.mubr.msk.bf16.mxu0 %vm479_vm0, %v14047_v34 }
  0x8c   :  { %705 = vmatmul.mubr.bf16.gmra.mrb[48].mxu0 %v14049_v35 }
  0x8d   :  { %11469 = vmatprep.mubr.msk.bf16.mxu0 %vm479_vm0, %v14050_v36 }
  0x94   :  { %713 = vmatmul.mubr.bf16.gmra.mrb[52].mxu0 %v14052_v37  ;;  %v14109_v37 = vld [vmem:[%s19516_s0 + $0x1e0] ss:$8 sps:$4 sm:$0xff]  }
  0x95   :  { %11470 = vmatprep.mubr.msk.bf16.mxu0 %vm479_vm0, %v14053_v38 }
  0x9c   :  { %721 = vmatmul.mubr.bf16.gmra.mrb[56].mxu0 %v14055_v39 }
  0x9d   :  { %11471 = vmatprep.mubr.msk.bf16.mxu0 %vm479_vm0, %v14056_v40 }
  0xa4   :  { %729 = vmatmul.mubr.bf16.gmra.mrb[60].mxu0 %v14058_v41 }
  0xa5   :  { %11472 = vmatprep.mubr.msk.bf16.mxu0 %vm479_vm0, %v14059_v42 }
  0xac   :  { %737 = vmatmul.mubr.bf16.gmra.mrb[64].mxu0 %v14061_v43 }
  0xad   :  { %11473 = vmatprep.mubr.msk.bf16.mxu0 %vm479_vm0, %v14062_v44  ;;  %v14116_v44 = vld [vmem:[%s19516_s0 + $0x1f4] ss:$8 sps:$4 sm:$0xff]  }
  0xb4   :  { %745 = vmatmul.mubr.bf16.gmra.mrb[68].mxu0 %v14064_v45 }
  0xb5   :  { %11474 = vmatprep.mubr.msk.bf16.mxu0 %vm479_vm0, %v14065_v46 }
  0xbc   :  { %753 = vmatmul.mubr.bf16.gmra.mrb[72].mxu0 %v14067_v47 }
  0xbd   :  { %11475 = vmatprep.mubr.msk.bf16.mxu0 %vm479_vm0, %v14068_v48  ;;  %v14118_v48 = vld [vmem:[%s19516_s0 + $0x1f0] ss:$8 sps:$4 sm:$0xff]  }
  0xc4   :  { %761 = vmatmul.mubr.bf16.gmra.mrb[76].mxu0 %v14070_v49 }
  0xc5   :  { %11476 = vmatprep.mubr.msk.bf16.mxu0 %vm479_vm0, %v14071_v50 }
  0xcc   :  { %769 = vmatmul.mubr.bf16.gmra.mrb[80].mxu0 %v14073_v51 }
  0xcd   :  { %11477 = vmatprep.mubr.msk.bf16.mxu0 %vm479_vm0, %v14074_v52 }
  0xd4   :  { %777 = vmatmul.mubr.bf16.gmra.mrb[84].mxu0 %v14076_v53 }
  0xd5   :  { %11478 = vmatprep.mubr.msk.bf16.mxu0 %vm479_vm0, %v14077_v54 }
  0xdc   :  { %785 = vmatmul.mubr.bf16.gmra.mrb[88].mxu0 %v14079_v55 }
  0xdd   :  { %11479 = vmatprep.mubr.msk.bf16.mxu0 %vm479_vm0, %v14080_v56 }
  0xe4   :  { %793 = vmatmul.mubr.bf16.gmra.mrb[92].mxu0 %v14082_v57 }
  0xe5   :  { %11480 = vmatprep.mubr.msk.bf16.mxu0 %vm479_vm0, %v14083_v58 }
  0xec   :  { %801 = vmatmul.mubr.bf16.gmra.mrb[96].mxu0 %v14085_v59 }
  0xed   :  { %11481 = vmatprep.mubr.msk.bf16.mxu0 %vm479_vm0, %v14086_v60 }
  0xf4   :  { %809 = vmatmul.mubr.bf16.gmra.mrb[100].mxu0 %v14088_v61 }
  0xf5   :  { %11482 = vmatprep.mubr.msk.bf16.mxu0 %vm479_vm0, %v14089_v62 }
  0xfc   :  { %817 = vmatmul.mubr.bf16.gmra.mrb[104].mxu0 %v14091_v63 }
  0xfd   :  { %11483 = vmatprep.mubr.msk.bf16.mxu0 %vm479_vm0, %v14092_v1 }
  0xff   :  { %v610_v3 = vpop.f32.mrb[0].mxu0 }
 0x100   :  { %v611_v5 = vadd.f32 %v610_v3, %v15628_v2  ;;  %v612_v6 = vpop.f32.mrb[1].mxu0 }
 0x101   :  { %v613_v8 = vpop.f32.mrb[2].mxu0 }
 0x102   :  { %v614_v10 = vadd.f32 %v613_v8, %v15628_v2  ;;  %v615_v11 = vpop.f32.mrb[3].mxu0  ;;  %v865_v12 = vmax.f32 %v611_v5, 0.0 }
 0x104   :  { %v866_v13 = vmax.f32 %v614_v10, 0.0  ;;  %825 = vmatmul.mubr.bf16.gmra.mrb[108].mxu0 %v14094_v4 }
 0x105   :  { %11484 = vmatprep.mubr.msk.bf16.mxu0 %vm479_vm0, %v14095_v9 }
 0x106   :  { %v929_v14 = vpack.c.bf16 %v866_v13, %v865_v12 }
 0x107   :  { %v618_v16 = vpop.f32.mrb[4].mxu0 }
 0x108   :  { %v619_v17 = vadd.f32 %v618_v16, %v15628_v2  ;;  %v620_v18 = vpop.f32.mrb[5].mxu0  ;;  %1730 = vmatpush1.bf16.msra.mxu1 %v929_v14 }
 0x109   :  { %v621_v20 = vpop.f32.mrb[6].mxu0  ;;  %1731 = vmatprep.subr.bf16.mxu1 %v15300_v0 }
 0x10a   :  { %v622_v21 = vadd.f32 %v621_v20, %v15628_v2  ;;  %v623_v22 = vpop.f32.mrb[7].mxu0  ;;  %v867_v23 = vmax.f32 %v619_v17, 0.0 }
 0x10c   :  { %v868_v24 = vmax.f32 %v622_v21, 0.0  ;;  %833 = vmatmul.mubr.bf16.gmra.mrb[112].mxu0 %v14097_v15 }
 0x10d   :  { %11485 = vmatprep.mubr.msk.bf16.mxu0 %vm479_vm0, %v14098_v19 }
 0x10e   :  { %v930_v25 = vpack.c.bf16 %v868_v24, %v867_v23 }
 0x10f   :  { %v626_v27 = vpop.f32.mrb[8].mxu0 }
 0x110   :  { %v627_v29 = vadd.f32 %v626_v27, %v15628_v2  ;;  %v628_v30 = vpop.f32.mrb[9].mxu0  ;;  %1732 = vmatpush1.bf16.msra.mxu1 %v930_v25 }
 0x111   :  { %v629_v31 = vpop.f32.mrb[10].mxu0  ;;  %1733 = vmatprep.subr.bf16.mxu1 %v15300_v0 }
 0x112   :  { %v630_v32 = vadd.f32 %v629_v31, %v15628_v2  ;;  %v631_v33 = vpop.f32.mrb[11].mxu0  ;;  %v869_v34 = vmax.f32 %v627_v29, 0.0 }
 0x114   :  { %v870_v35 = vmax.f32 %v630_v32, 0.0  ;;  %841 = vmatmul.mubr.bf16.gmra.mrb[116].mxu0 %v14100_v26 }
 0x115   :  { %11486 = vmatprep.mubr.msk.bf16.mxu0 %vm479_vm0, %v14107_v28 }
 0x116   :  { %v931_v36 = vpack.c.bf16 %v870_v35, %v869_v34 }
 0x117   :  { %v634_v38 = vpop.f32.mrb[12].mxu0 }
 0x118   :  { %v635_v39 = vadd.f32 %v634_v38, %v15628_v2  ;;  %v636_v40 = vpop.f32.mrb[13].mxu0  ;;  %1734 = vmatpush1.bf16.msra.mxu1 %v931_v36 }
 0x119   :  { %v637_v41 = vpop.f32.mrb[14].mxu0  ;;  %1735 = vmatprep.subr.bf16.mxu1 %v15300_v0 }
 0x11a   :  { %v638_v42 = vadd.f32 %v637_v41, %v15628_v2  ;;  %v639_v43 = vpop.f32.mrb[15].mxu0  ;;  %v871_v45 = vmax.f32 %v635_v39, 0.0 }
 0x11c   :  { %v872_v46 = vmax.f32 %v638_v42, 0.0  ;;  %849 = vmatmul.mubr.bf16.gmra.mrb[120].mxu0 %v14109_v37 }
 0x11d   :  { %11487 = vmatprep.mubr.msk.bf16.mxu0 %vm479_vm0, %v14116_v44 }
 0x11e   :  { %v932_v47 = vpack.c.bf16 %v872_v46, %v871_v45 }
 0x11f   :  { %v642_v49 = vpop.f32.mrb[16].mxu0 }
 0x120   :  { %v643_v50 = vadd.f32 %v642_v49, %v15628_v2  ;;  %v644_v51 = vpop.f32.mrb[17].mxu0  ;;  %1736 = vmatpush1.bf16.msra.mxu1 %v932_v47 }
 0x121   :  { %v645_v52 = vpop.f32.mrb[18].mxu0  ;;  %1737 = vmatprep.subr.bf16.mxu1 %v15300_v0 }
 0x122   :  { %v646_v53 = vadd.f32 %v645_v52, %v15628_v2  ;;  %v647_v54 = vpop.f32.mrb[19].mxu0  ;;  %v873_v55 = vmax.f32 %v643_v50, 0.0 }
 0x124   :  { %v874_v56 = vmax.f32 %v646_v53, 0.0  ;;  %857 = vmatmul.mubr.bf16.gmra.mrb[124].mxu0 %v14118_v48 }
 0x125   :  { %2686 = vmatprep.mubr.bf16.mxu0 %v15300_v0 }
 0x126   :  { %v933_v57 = vpack.c.bf16 %v874_v56, %v873_v55 }
 0x127   :  { %v650_v58 = vpop.f32.mrb[20].mxu0 }
 0x128   :  { %v651_v59 = vadd.f32 %v650_v58, %v15628_v2  ;;  %v652_v60 = vpop.f32.mrb[21].mxu0  ;;  %1738 = vmatpush1.bf16.msra.mxu1 %v933_v57 }
 0x129   :  { %v653_v61 = vpop.f32.mrb[22].mxu0  ;;  %1739 = vmatprep.subr.bf16.mxu1 %v15300_v0 }
 0x12a   :  { %v654_v62 = vadd.f32 %v653_v61, %v15628_v2  ;;  %v655_v63 = vpop.f32.mrb[23].mxu0  ;;  %v875_v1 = vmax.f32 %v651_v59, 0.0 }
 0x12c   :  { %v876_v3 = vmax.f32 %v654_v62, 0.0 }
 0x12e   :  { %v934_v4 = vpack.c.bf16 %v876_v3, %v875_v1 }
 0x12f   :  { %v658_v5 = vpop.f32.mrb[24].mxu0 }
 0x130   :  { %v659_v6 = vadd.f32 %v658_v5, %v15628_v2  ;;  %v660_v7 = vpop.f32.mrb[25].mxu0  ;;  %1740 = vmatpush1.bf16.msra.mxu1 %v934_v4 }
 0x131   :  { %v661_v8 = vpop.f32.mrb[26].mxu0  ;;  %1741 = vmatprep.subr.bf16.mxu1 %v15300_v0 }
 0x132   :  { %v662_v9 = vadd.f32 %v661_v8, %v15628_v2  ;;  %v663_v10 = vpop.f32.mrb[27].mxu0  ;;  %v877_v11 = vmax.f32 %v659_v6, 0.0 }
 0x134   :  { %v878_v12 = vmax.f32 %v662_v9, 0.0 }
 0x136   :  { %v935_v13 = vpack.c.bf16 %v878_v12, %v877_v11 }
 0x137   :  { %v666_v14 = vpop.f32.mrb[28].mxu0 }
 0x138   :  { %v667_v15 = vadd.f32 %v666_v14, %v15628_v2  ;;  %v668_v16 = vpop.f32.mrb[29].mxu0  ;;  %1742 = vmatpush1.bf16.msra.mxu1 %v935_v13 }
 0x139   :  { %v669_v17 = vpop.f32.mrb[30].mxu0  ;;  %1743 = vmatprep.subr.bf16.mxu1 %v15300_v0 }
 0x13a   :  { %v670_v18 = vadd.f32 %v669_v17, %v15628_v2  ;;  %v671_v19 = vpop.f32.mrb[31].mxu0  ;;  %v879_v20 = vmax.f32 %v667_v15, 0.0 }
 0x13c   :  { %v880_v21 = vmax.f32 %v670_v18, 0.0 }
 0x13e   :  { %v936_v22 = vpack.c.bf16 %v880_v21, %v879_v20 }
 0x13f   :  { %v674_v23 = vpop.f32.mrb[32].mxu0 }
 0x140   :  { %v675_v24 = vadd.f32 %v674_v23, %v15628_v2  ;;  %v676_v25 = vpop.f32.mrb[33].mxu0  ;;  %1744 = vmatpush1.bf16.msra.mxu1 %v936_v22 }
 0x141   :  { %v677_v26 = vpop.f32.mrb[34].mxu0  ;;  %1745 = vmatprep.subr.bf16.mxu1 %v15300_v0 }
 0x142   :  { %v678_v27 = vadd.f32 %v677_v26, %v15628_v2  ;;  %v679_v28 = vpop.f32.mrb[35].mxu0  ;;  %v881_v29 = vmax.f32 %v675_v24, 0.0 }
 0x144   :  { %v882_v30 = vmax.f32 %v678_v27, 0.0 }
 0x146   :  { %v937_v31 = vpack.c.bf16 %v882_v30, %v881_v29 }
 0x147   :  { %v682_v32 = vpop.f32.mrb[36].mxu0 }
 0x148   :  { %v683_v33 = vadd.f32 %v682_v32, %v15628_v2  ;;  %v684_v34 = vpop.f32.mrb[37].mxu0  ;;  %1746 = vmatpush1.bf16.msra.mxu1 %v937_v31 }
 0x149   :  { %v685_v35 = vpop.f32.mrb[38].mxu0  ;;  %1747 = vmatprep.subr.bf16.mxu1 %v15300_v0  ;;  %v14101_v34 = vld [vmem:[%s19518_s9] ss:$16 sps:$4 sm:$0xff]  }
 0x14a   :  { %v686_v36 = vadd.f32 %v685_v35, %v15628_v2  ;;  %v687_v37 = vpop.f32.mrb[39].mxu0  ;;  %v883_v38 = vmax.f32 %v683_v33, 0.0 }
 0x14b   :  { %v14104_v37 = vld [vmem:[%s19518_s9 + $0x24] ss:$16 sps:$4 sm:$0xff]  }
 0x14c   :  { %v884_v39 = vmax.f32 %v686_v36, 0.0 }
 0x14e   :  { %v938_v40 = vpack.c.bf16 %v884_v39, %v883_v38 }
 0x14f   :  { %v690_v41 = vpop.f32.mrb[40].mxu0 }
 0x150   :  { %v691_v42 = vadd.f32 %v690_v41, %v15628_v2  ;;  %v692_v43 = vpop.f32.mrb[41].mxu0  ;;  %1748 = vmatpush1.bf16.msra.mxu1 %v938_v40 }
 0x151   :  { %v693_v44 = vpop.f32.mrb[42].mxu0  ;;  %1749 = vmatprep.subr.bf16.mxu1 %v15300_v0 }
 0x152   :  { %v694_v45 = vadd.f32 %v693_v44, %v15628_v2  ;;  %v695_v46 = vpop.f32.mrb[43].mxu0  ;;  %v885_v47 = vmax.f32 %v691_v42, 0.0  ;;  %v14106_v44 = vld [vmem:[%s19518_s9 + $0x20] ss:$16 sps:$4 sm:$0xff]  }
 0x154   :  { %v886_v48 = vmax.f32 %v694_v45, 0.0 }
 0x156   :  { %v939_v49 = vpack.c.bf16 %v886_v48, %v885_v47  ;;  %v14110_v48 = vld [vmem:[%s19518_s9 + $0x44] ss:$16 sps:$4 sm:$0xff]  }
 0x157   :  { %v698_v50 = vpop.f32.mrb[44].mxu0 }
 0x158   :  { %v699_v51 = vadd.f32 %v698_v50, %v15628_v2  ;;  %v700_v52 = vpop.f32.mrb[45].mxu0  ;;  %1750 = vmatpush1.bf16.msra.mxu1 %v939_v49 }
 0x159   :  { %v701_v53 = vpop.f32.mrb[46].mxu0  ;;  %1751 = vmatprep.subr.bf16.mxu1 %v15300_v0 }
 0x15a   :  { %v702_v54 = vadd.f32 %v701_v53, %v15628_v2  ;;  %v703_v55 = vpop.f32.mrb[47].mxu0  ;;  %v887_v56 = vmax.f32 %v699_v51, 0.0 }
 0x15b   :  { %v14112_v55 = vld [vmem:[%s19518_s9 + $0x40] ss:$16 sps:$4 sm:$0xff]  }
 0x15c   :  { %v888_v57 = vmax.f32 %v702_v54, 0.0 }
 0x15e   :  { %v940_v58 = vpack.c.bf16 %v888_v57, %v887_v56  ;;  %v14113_v57 = vld [vmem:[%s19518_s9 + $0x64] ss:$16 sps:$4 sm:$0xff]  }
 0x15f   :  { %v706_v59 = vpop.f32.mrb[48].mxu0 }
 0x160   :  { %v707_v60 = vadd.f32 %v706_v59, %v15628_v2  ;;  %v708_v61 = vpop.f32.mrb[49].mxu0  ;;  %1752 = vmatpush1.bf16.msra.mxu1 %v940_v58 }
 0x161   :  { %v709_v62 = vpop.f32.mrb[50].mxu0  ;;  %1753 = vmatprep.subr.bf16.mxu1 %v15300_v0 }
 0x162   :  { %v710_v63 = vadd.f32 %v709_v62, %v15628_v2  ;;  %v711_v1 = vpop.f32.mrb[51].mxu0  ;;  %v889_v3 = vmax.f32 %v707_v60, 0.0 }
 0x164   :  { %v890_v4 = vmax.f32 %v710_v63, 0.0 }
 0x166   :  { %v941_v5 = vpack.c.bf16 %v890_v4, %v889_v3  ;;  %v14115_v4 = vld [vmem:[%s19518_s9 + $0x60] ss:$16 sps:$4 sm:$0xff]  }
 0x167   :  { %v714_v6 = vpop.f32.mrb[52].mxu0 }
 0x168   :  { %v715_v7 = vadd.f32 %v714_v6, %v15628_v2  ;;  %v716_v8 = vpop.f32.mrb[53].mxu0  ;;  %1754 = vmatpush1.bf16.msra.mxu1 %v941_v5  ;;  %v14119_v6 = vld [vmem:[%s19518_s9 + $0x84] ss:$16 sps:$4 sm:$0xff]  }
 0x169   :  { %v717_v9 = vpop.f32.mrb[54].mxu0  ;;  %1755 = vmatprep.subr.bf16.mxu1 %v15300_v0 }
 0x16a   :  { %v718_v10 = vadd.f32 %v717_v9, %v15628_v2  ;;  %v719_v11 = vpop.f32.mrb[55].mxu0  ;;  %v891_v12 = vmax.f32 %v715_v7, 0.0 }
 0x16c   :  { %v892_v13 = vmax.f32 %v718_v10, 0.0 }
 0x16e   :  { %v942_v14 = vpack.c.bf16 %v892_v13, %v891_v12 }
 0x16f   :  { %v722_v15 = vpop.f32.mrb[56].mxu0 }
 0x170   :  { %v723_v16 = vadd.f32 %v722_v15, %v15628_v2  ;;  %v724_v17 = vpop.f32.mrb[57].mxu0  ;;  %1756 = vmatpush1.bf16.msra.mxu1 %v942_v14  ;;  %v14121_v15 = vld [vmem:[%s19518_s9 + $0x80] ss:$16 sps:$4 sm:$0xff]  }
 0x171   :  { %v725_v18 = vpop.f32.mrb[58].mxu0  ;;  %1757 = vmatprep.subr.bf16.mxu1 %v15300_v0  ;;  %v14122_v17 = vld [vmem:[%s19518_s9 + $0xa4] ss:$16 sps:$4 sm:$0xff]  }
 0x172   :  { %v726_v19 = vadd.f32 %v725_v18, %v15628_v2  ;;  %v727_v20 = vpop.f32.mrb[59].mxu0  ;;  %v893_v21 = vmax.f32 %v723_v16, 0.0 }
 0x174   :  { %v894_v22 = vmax.f32 %v726_v19, 0.0 }
 0x176   :  { %v943_v23 = vpack.c.bf16 %v894_v22, %v893_v21 }
 0x177   :  { %v730_v24 = vpop.f32.mrb[60].mxu0 }
 0x178   :  { %v731_v25 = vadd.f32 %v730_v24, %v15628_v2  ;;  %v732_v26 = vpop.f32.mrb[61].mxu0  ;;  %1758 = vmatpush1.bf16.msra.mxu1 %v943_v23 }
 0x179   :  { %v733_v27 = vpop.f32.mrb[62].mxu0  ;;  %1759 = vmatprep.subr.bf16.mxu1 %v15300_v0  ;;  %v14124_v26 = vld [vmem:[%s19518_s9 + $0xa0] ss:$16 sps:$4 sm:$0xff]  }
 0x17a   :  { %v734_v28 = vadd.f32 %v733_v27, %v15628_v2  ;;  %v735_v29 = vpop.f32.mrb[63].mxu0  ;;  %v895_v30 = vmax.f32 %v731_v25, 0.0 }
 0x17c   :  { %v896_v31 = vmax.f32 %v734_v28, 0.0  ;;  %v14125_v28 = vld [vmem:[%s19518_s9 + $0xc4] ss:$16 sps:$4 sm:$0xff]  }
 0x17e   :  { %v944_v32 = vpack.c.bf16 %v896_v31, %v895_v30 }
 0x17f   :  { %v738_v33 = vpop.f32.mrb[64].mxu0 }
 0x180   :  { %v739_v35 = vadd.f32 %v738_v33, %v15628_v2  ;;  %1760 = vmatpush1.bf16.msra.mxu1 %v944_v32  ;;  %v740_v36 = vpop.f32.mrb[65].mxu0 }
 0x181   :  { %v741_v38 = vpop.f32.mrb[66].mxu0  ;;  %2018 = vmatprep.subr.bf16.mxu1 %v15300_v0 }
 0x182   :  { %v897_v39 = vmax.f32 %v739_v35, 0.0  ;;  %v742_v40 = vadd.f32 %v741_v38, %v15628_v2  ;;  %v743_v41 = vpop.f32.mrb[67].mxu0 }
 0x183   :  { %1762 = vmatmul.mubr.bf16.vlgmr.msra.gmra.mrb[0].mxu1 %v14101_v34 }
 0x184   :  { %v898_v42 = vmax.f32 %v742_v40, 0.0  ;;  %1769 = vmatprep.mubr.bf16.mxu1 %v14104_v37  ;;  %v14127_v37 = vld [vmem:[%s19518_s9 + $0xc0] ss:$16 sps:$4 sm:$0xff]  }
 0x186   :  { %v945_v43 = vpack.c.bf16 %v898_v42, %v897_v39  ;;  %v14128_v39 = vld [vmem:[%s19518_s9 + $0xe4] ss:$16 sps:$4 sm:$0xff]  }
 0x187   :  { %v746_v45 = vpop.f32.mrb[68].mxu0 }
 0x188   :  { %2019 = vmatpush1.bf16.msra.mxu1 %v945_v43  ;;  %v747_v46 = vadd.f32 %v746_v45, %v15628_v2  ;;  %v748_v47 = vpop.f32.mrb[69].mxu0 }
 0x189   :  { %v749_v49 = vpop.f32.mrb[70].mxu0  ;;  %2020 = vmatprep.subr.bf16.mxu1 %v15300_v0 }
 0x18a   :  { %v899_v50 = vmax.f32 %v747_v46, 0.0  ;;  %v750_v51 = vadd.f32 %v749_v49, %v15628_v2  ;;  %v751_v52 = vpop.f32.mrb[71].mxu0 }
 0x18b   :  { %1770 = vmatmul.mubr.bf16.gmra.mrb[4].mxu1 %v14106_v44 }
 0x18c   :  { %v900_v53 = vmax.f32 %v750_v51, 0.0  ;;  %1777 = vmatprep.mubr.bf16.mxu1 %v14110_v48  ;;  %v14130_v48 = vld [vmem:[%s19518_s9 + $0xe0] ss:$16 sps:$4 sm:$0xff]  }
 0x18e   :  { %v946_v54 = vpack.c.bf16 %v900_v53, %v899_v50  ;;  %v14131_v50 = vld [vmem:[%s19518_s9 + $0x104] ss:$16 sps:$4 sm:$0xff]  }
 0x18f   :  { %v754_v56 = vpop.f32.mrb[72].mxu0 }
 0x190   :  { %2021 = vmatpush1.bf16.msra.mxu1 %v946_v54  ;;  %v756_v58 = vpop.f32.mrb[73].mxu0  ;;  %v755_v59 = vadd.f32 %v754_v56, %v15628_v2 }
 0x191   :  { %v757_v60 = vpop.f32.mrb[74].mxu0  ;;  %2022 = vmatprep.subr.bf16.mxu1 %v15300_v0 }
 0x192   :  { %v759_v61 = vpop.f32.mrb[75].mxu0  ;;  %v758_v62 = vadd.f32 %v757_v60, %v15628_v2  ;;  %v901_v63 = vmax.f32 %v755_v59, 0.0  ;;  %v14133_v59 = vld [vmem:[%s19518_s9 + $0x100] ss:$16 sps:$4 sm:$0xff]  }
 0x193   :  { %1778 = vmatmul.mubr.bf16.gmra.mrb[8].mxu1 %v14112_v55  ;;  %v14134_v61 = vld [vmem:[%s19518_s9 + $0x124] ss:$16 sps:$4 sm:$0xff]  }
 0x194   :  { %1785 = vmatprep.mubr.bf16.mxu1 %v14113_v57  ;;  %v902_v1 = vmax.f32 %v758_v62, 0.0 }
 0x196   :  { %v947_v3 = vpack.c.bf16 %v902_v1, %v901_v63 }
 0x197   :  { %v762_v5 = vpop.f32.mrb[76].mxu0 }
 0x198   :  { %2023 = vmatpush1.bf16.msra.mxu1 %v947_v3  ;;  %v763_v7 = vadd.f32 %v762_v5, %v15628_v2  ;;  %v764_v8 = vpop.f32.mrb[77].mxu0 }
 0x199   :  { %v765_v9 = vpop.f32.mrb[78].mxu0  ;;  %2024 = vmatprep.subr.bf16.mxu1 %v15300_v0  ;;  %v14136_v8 = vld [vmem:[%s19518_s9 + $0x120] ss:$16 sps:$4 sm:$0xff]  }
 0x19a   :  { %v903_v10 = vmax.f32 %v763_v7, 0.0  ;;  %v766_v11 = vadd.f32 %v765_v9, %v15628_v2  ;;  %v767_v12 = vpop.f32.mrb[79].mxu0 }
 0x19b   :  { %1786 = vmatmul.mubr.bf16.gmra.mrb[12].mxu1 %v14115_v4 }
 0x19c   :  { %1793 = vmatprep.mubr.bf16.mxu1 %v14119_v6  ;;  %v904_v13 = vmax.f32 %v766_v11, 0.0 }
 0x19e   :  { %v948_v14 = vpack.c.bf16 %v904_v13, %v903_v10  ;;  %v14137_v10 = vld [vmem:[%s19518_s9 + $0x144] ss:$16 sps:$4 sm:$0xff]  }
 0x19f   :  { %v770_v16 = vpop.f32.mrb[80].mxu0 }
 0x1a0   :  { %2025 = vmatpush1.bf16.msra.mxu1 %v948_v14  ;;  %v771_v18 = vadd.f32 %v770_v16, %v15628_v2  ;;  %v772_v19 = vpop.f32.mrb[81].mxu0 }
 0x1a1   :  { %v773_v20 = vpop.f32.mrb[82].mxu0  ;;  %2026 = vmatprep.subr.bf16.mxu1 %v15300_v0  ;;  %v14139_v19 = vld [vmem:[%s19518_s9 + $0x140] ss:$16 sps:$4 sm:$0xff]  }
 0x1a2   :  { %v905_v21 = vmax.f32 %v771_v18, 0.0  ;;  %v774_v22 = vadd.f32 %v773_v20, %v15628_v2  ;;  %v775_v23 = vpop.f32.mrb[83].mxu0 }
 0x1a3   :  { %1794 = vmatmul.mubr.bf16.gmra.mrb[16].mxu1 %v14121_v15 }
 0x1a4   :  { %1801 = vmatprep.mubr.bf16.mxu1 %v14122_v17  ;;  %v906_v24 = vmax.f32 %v774_v22, 0.0 }
 0x1a6   :  { %v949_v25 = vpack.c.bf16 %v906_v24, %v905_v21  ;;  %v14140_v21 = vld [vmem:[%s19518_s9 + $0x164] ss:$16 sps:$4 sm:$0xff]  }
 0x1a7   :  { %v778_v27 = vpop.f32.mrb[84].mxu0 }
 0x1a8   :  { %2027 = vmatpush1.bf16.msra.mxu1 %v949_v25  ;;  %v779_v29 = vadd.f32 %v778_v27, %v15628_v2  ;;  %v780_v30 = vpop.f32.mrb[85].mxu0 }
 0x1a9   :  { %v781_v31 = vpop.f32.mrb[86].mxu0  ;;  %2028 = vmatprep.subr.bf16.mxu1 %v15300_v0  ;;  %v14142_v30 = vld [vmem:[%s19518_s9 + $0x160] ss:$16 sps:$4 sm:$0xff]  }
 0x1aa   :  { %v907_v32 = vmax.f32 %v779_v29, 0.0  ;;  %v782_v33 = vadd.f32 %v781_v31, %v15628_v2  ;;  %v783_v34 = vpop.f32.mrb[87].mxu0 }
 0x1ab   :  { %1802 = vmatmul.mubr.bf16.gmra.mrb[20].mxu1 %v14124_v26 }
 0x1ac   :  { %1809 = vmatprep.mubr.bf16.mxu1 %v14125_v28  ;;  %v908_v35 = vmax.f32 %v782_v33, 0.0 }
 0x1ae   :  { %v950_v36 = vpack.c.bf16 %v908_v35, %v907_v32  ;;  %v14143_v32 = vld [vmem:[%s19518_s9 + $0x184] ss:$16 sps:$4 sm:$0xff]  }
 0x1af   :  { %v786_v38 = vpop.f32.mrb[88].mxu0 }
 0x1b0   :  { %2029 = vmatpush1.bf16.msra.mxu1 %v950_v36  ;;  %v787_v40 = vadd.f32 %v786_v38, %v15628_v2  ;;  %v788_v41 = vpop.f32.mrb[89].mxu0 }
 0x1b1   :  { %v789_v42 = vpop.f32.mrb[90].mxu0  ;;  %2030 = vmatprep.subr.bf16.mxu1 %v15300_v0  ;;  %v14145_v41 = vld [vmem:[%s19518_s9 + $0x180] ss:$16 sps:$4 sm:$0xff]  }
 0x1b2   :  { %v909_v43 = vmax.f32 %v787_v40, 0.0  ;;  %v790_v44 = vadd.f32 %v789_v42, %v15628_v2  ;;  %v791_v45 = vpop.f32.mrb[91].mxu0 }
 0x1b3   :  { %1810 = vmatmul.mubr.bf16.gmra.mrb[24].mxu1 %v14127_v37 }
 0x1b4   :  { %1817 = vmatprep.mubr.bf16.mxu1 %v14128_v39  ;;  %v910_v46 = vmax.f32 %v790_v44, 0.0 }
 0x1b6   :  { %v951_v47 = vpack.c.bf16 %v910_v46, %v909_v43  ;;  %v14146_v43 = vld [vmem:[%s19518_s9 + $0x1a4] ss:$16 sps:$4 sm:$0xff]  }
 0x1b7   :  { %v794_v49 = vpop.f32.mrb[92].mxu0 }
 0x1b8   :  { %2031 = vmatpush1.bf16.msra.mxu1 %v951_v47  ;;  %v795_v51 = vadd.f32 %v794_v49, %v15628_v2  ;;  %v796_v52 = vpop.f32.mrb[93].mxu0 }
 0x1b9   :  { %v797_v53 = vpop.f32.mrb[94].mxu0  ;;  %2032 = vmatprep.subr.bf16.mxu1 %v15300_v0 }
 0x1ba   :  { %v911_v54 = vmax.f32 %v795_v51, 0.0  ;;  %v798_v55 = vadd.f32 %v797_v53, %v15628_v2  ;;  %v799_v56 = vpop.f32.mrb[95].mxu0  ;;  %v14148_v53 = vld [vmem:[%s19518_s9 + $0x1a0] ss:$16 sps:$4 sm:$0xff]  }
 0x1bb   :  { %1818 = vmatmul.mubr.bf16.gmra.mrb[28].mxu1 %v14130_v48  ;;  %v15296_v48 = vld [vmem:[%s19517_s3] ss:$0 sm:$0xff] }
 0x1bc   :  { %1825 = vmatprep.mubr.bf16.mxu1 %v14131_v50  ;;  %v912_v57 = vmax.f32 %v798_v55, 0.0 }
 0x1be   :  { %v952_v58 = vpack.c.bf16 %v912_v57, %v911_v54  ;;  %v14149_v54 = vld [vmem:[%s19518_s9 + $0x1c4] ss:$16 sps:$4 sm:$0xff]  }
 0x1bf   :  { %v802_v60 = vpop.f32.mrb[96].mxu0 }
 0x1c0   :  { %2033 = vmatpush1.bf16.msra.mxu1 %v952_v58  ;;  %v803_v62 = vadd.f32 %v802_v60, %v15628_v2  ;;  %v804_v63 = vpop.f32.mrb[97].mxu0 }
 0x1c1   :  { %v805_v1 = vpop.f32.mrb[98].mxu0  ;;  %2034 = vmatprep.subr.bf16.mxu1 %v15300_v0  ;;  %v14151_v63 = vld [vmem:[%s19518_s9 + $0x1c0] ss:$16 sps:$4 sm:$0xff]  }
 0x1c2   :  { %v913_v3 = vmax.f32 %v803_v62, 0.0  ;;  %v806_v4 = vadd.f32 %v805_v1, %v15628_v2  ;;  %v807_v5 = vpop.f32.mrb[99].mxu0 }
 0x1c3   :  { %1826 = vmatmul.mubr.bf16.gmra.mrb[32].mxu1 %v14133_v59 }
 0x1c4   :  { %1833 = vmatprep.mubr.bf16.mxu1 %v14134_v61  ;;  %v914_v6 = vmax.f32 %v806_v4, 0.0 }
 0x1c6   :  { %v953_v7 = vpack.c.bf16 %v914_v6, %v913_v3  ;;  %v14152_v3 = vld [vmem:[%s19518_s9 + $0x1e4] ss:$16 sps:$4 sm:$0xff]  }
 0x1c7   :  { %v810_v9 = vpop.f32.mrb[100].mxu0 }
 0x1c8   :  { %2035 = vmatpush1.bf16.msra.mxu1 %v953_v7  ;;  %v811_v11 = vadd.f32 %v810_v9, %v15628_v2  ;;  %v812_v12 = vpop.f32.mrb[101].mxu0 }
 0x1c9   :  { %v813_v13 = vpop.f32.mrb[102].mxu0  ;;  %2036 = vmatprep.subr.bf16.mxu1 %v15300_v0  ;;  %v14154_v12 = vld [vmem:[%s19518_s9 + $0x1e0] ss:$16 sps:$4 sm:$0xff]  }
 0x1ca   :  { %v915_v14 = vmax.f32 %v811_v11, 0.0  ;;  %v814_v15 = vadd.f32 %v813_v13, %v15628_v2  ;;  %v815_v16 = vpop.f32.mrb[103].mxu0 }
 0x1cb   :  { %1834 = vmatmul.mubr.bf16.gmra.mrb[36].mxu1 %v14136_v8 }
 0x1cc   :  { %1841 = vmatprep.mubr.bf16.mxu1 %v14137_v10  ;;  %v916_v17 = vmax.f32 %v814_v15, 0.0 }
 0x1ce   :  { %v954_v18 = vpack.c.bf16 %v916_v17, %v915_v14  ;;  %v14155_v14 = vld [vmem:[%s19518_s9 + $0x204] ss:$16 sps:$4 sm:$0xff]  }
 0x1cf   :  { %v818_v20 = vpop.f32.mrb[104].mxu0 }
 0x1d0   :  { %2037 = vmatpush1.bf16.msra.mxu1 %v954_v18  ;;  %v819_v22 = vadd.f32 %v818_v20, %v15628_v2  ;;  %v820_v23 = vpop.f32.mrb[105].mxu0 }
 0x1d1   :  { %v821_v24 = vpop.f32.mrb[106].mxu0  ;;  %2038 = vmatprep.subr.bf16.mxu1 %v15300_v0  ;;  %v14157_v23 = vld [vmem:[%s19518_s9 + $0x200] ss:$16 sps:$4 sm:$0xff]  }
 0x1d2   :  { %v917_v25 = vmax.f32 %v819_v22, 0.0  ;;  %v822_v26 = vadd.f32 %v821_v24, %v15628_v2  ;;  %v823_v27 = vpop.f32.mrb[107].mxu0  ;;  %v14158_v24 = vld [vmem:[%s19518_s9 + $0x224] ss:$16 sps:$4 sm:$0xff]  }
 0x1d3   :  { %1842 = vmatmul.mubr.bf16.gmra.mrb[40].mxu1 %v14139_v19  ;;  %v14163_v27 = vld [vmem:[%s19518_s9 + $0x240] ss:$16 sps:$4 sm:$0xff]  }
 0x1d4   :  { %1849 = vmatprep.mubr.bf16.mxu1 %v14140_v21  ;;  %v918_v28 = vmax.f32 %v822_v26, 0.0  ;;  %v14161_v26 = vld [vmem:[%s19518_s9 + $0x244] ss:$16 sps:$4 sm:$0xff]  }
 0x1d6   :  { %v955_v29 = vpack.c.bf16 %v918_v28, %v917_v25  ;;  %v14160_v25 = vld [vmem:[%s19518_s9 + $0x220] ss:$16 sps:$4 sm:$0xff]   ;;  %v14164_v28 = vld [vmem:[%s19518_s9 + $0x264] ss:$16 sps:$4 sm:$0xff]  }
 0x1d7   :  { %v826_v31 = vpop.f32.mrb[108].mxu0 }
 0x1d8   :  { %2039 = vmatpush1.bf16.msra.mxu1 %v955_v29  ;;  %v827_v33 = vadd.f32 %v826_v31, %v15628_v2  ;;  %v828_v34 = vpop.f32.mrb[109].mxu0  ;;  %v14166_v29 = vld [vmem:[%s19518_s9 + $0x260] ss:$16 sps:$4 sm:$0xff]  }
 0x1d9   :  { %v829_v35 = vpop.f32.mrb[110].mxu0  ;;  %2040 = vmatprep.subr.bf16.mxu1 %v15300_v0  ;;  %v14169_v31 = vld [vmem:[%s19518_s9 + $0x280] ss:$16 sps:$4 sm:$0xff]   ;;  %v14173_v34 = vld [vmem:[%s19518_s9 + $0x2c4] ss:$16 sps:$4 sm:$0xff]  }
 0x1da   :  { %v919_v36 = vmax.f32 %v827_v33, 0.0  ;;  %v830_v37 = vadd.f32 %v829_v35, %v15628_v2  ;;  %v831_v38 = vpop.f32.mrb[111].mxu0  ;;  %v14172_v33 = vld [vmem:[%s19518_s9 + $0x2a0] ss:$16 sps:$4 sm:$0xff]  }
 0x1db   :  { %1850 = vmatmul.mubr.bf16.gmra.mrb[44].mxu1 %v14142_v30  ;;  %v14167_v30 = vld [vmem:[%s19518_s9 + $0x284] ss:$16 sps:$4 sm:$0xff]   ;;  %v14175_v35 = vld [vmem:[%s19518_s9 + $0x2c0] ss:$16 sps:$4 sm:$0xff]  }
 0x1dc   :  { %1857 = vmatprep.mubr.bf16.mxu1 %v14143_v32  ;;  %v920_v39 = vmax.f32 %v830_v37, 0.0  ;;  %v14170_v32 = vld [vmem:[%s19518_s9 + $0x2a4] ss:$16 sps:$4 sm:$0xff]   ;;  %v14178_v37 = vld [vmem:[%s19518_s9 + $0x2e0] ss:$16 sps:$4 sm:$0xff]  }
 0x1dd   :  { %v14179_v38 = vld [vmem:[%s19518_s9 + $0x304] ss:$16 sps:$4 sm:$0xff]  }
 0x1de   :  { %v956_v40 = vpack.c.bf16 %v920_v39, %v919_v36  ;;  %v14176_v36 = vld [vmem:[%s19518_s9 + $0x2e4] ss:$16 sps:$4 sm:$0xff]   ;;  %v14181_v39 = vld [vmem:[%s19518_s9 + $0x300] ss:$16 sps:$4 sm:$0xff]  }
 0x1df   :  { %v834_v42 = vpop.f32.mrb[112].mxu0 }
 0x1e0   :  { %2041 = vmatpush1.bf16.msra.mxu1 %v956_v40  ;;  %v835_v44 = vadd.f32 %v834_v42, %v15628_v2  ;;  %v836_v45 = vpop.f32.mrb[113].mxu0  ;;  %v14182_v40 = vld [vmem:[%s19518_s9 + $0x324] ss:$16 sps:$4 sm:$0xff]  }
 0x1e1   :  { %v837_v46 = vpop.f32.mrb[114].mxu0  ;;  %2042 = vmatprep.subr.bf16.mxu1 %v15300_v0  ;;  %v14185_v42 = vld [vmem:[%s19518_s9 + $0x344] ss:$16 sps:$4 sm:$0xff]   ;;  %v14190_v45 = vld [vmem:[%s19518_s9 + $0x360] ss:$16 sps:$4 sm:$0xff]  }
 0x1e2   :  { %v921_v47 = vmax.f32 %v835_v44, 0.0  ;;  %v838_v49 = vadd.f32 %v15296_v48, %v837_v46  ;;  %v839_v50 = vpop.f32.mrb[115].mxu0  ;;  %v14188_v44 = vld [vmem:[%s19518_s9 + $0x364] ss:$16 sps:$4 sm:$0xff]  }
 0x1e3   :  { %1858 = vmatmul.mubr.bf16.gmra.mrb[48].mxu1 %v14145_v41  ;;  %v14184_v41 = vld [vmem:[%s19518_s9 + $0x320] ss:$16 sps:$4 sm:$0xff]   ;;  %v14191_v46 = vld [vmem:[%s19518_s9 + $0x384] ss:$16 sps:$4 sm:$0xff]  }
 0x1e4   :  { %1865 = vmatprep.mubr.bf16.mxu1 %v14146_v43  ;;  %v922_v51 = vmax.f32 %v838_v49, 0.0  ;;  %v14187_v43 = vld [vmem:[%s19518_s9 + $0x340] ss:$16 sps:$4 sm:$0xff]   ;;  %v14197_v50 = vld [vmem:[%s19518_s9 + $0x3c4] ss:$16 sps:$4 sm:$0xff]  }
 0x1e5   :  { %v14196_v49 = vld [vmem:[%s19518_s9 + $0x3a0] ss:$16 sps:$4 sm:$0xff]  }
 0x1e6   :  { %v957_v52 = vpack.c.bf16 %v922_v51, %v921_v47  ;;  %v14193_v47 = vld [vmem:[%s19518_s9 + $0x380] ss:$16 sps:$4 sm:$0xff]  }
 0x1e7   :  { %v842_v2 = vpop.f32.mrb[116].mxu0  ;;  %v14199_v51 = vld [vmem:[%s19518_s9 + $0x3c0] ss:$16 sps:$4 sm:$0xff]  }
 0x1e8   :  { %2043 = vmatpush1.bf16.msra.mxu1 %v957_v52  ;;  %v843_v55 = vadd.f32 %v15296_v48, %v842_v2  ;;  %v844_v56 = vpop.f32.mrb[117].mxu0  ;;  %v14200_v52 = vld [vmem:[%s19518_s9 + $0x3e4] ss:$16 sps:$4 sm:$0xff]   ;;  %v14205_v2 = vld [vmem:[%s19518_s9 + $0xc] ss:$16 sps:$4 sm:$0xff]  }
 0x1e9   :  { %v845_v57 = vpop.f32.mrb[118].mxu0  ;;  %2044 = vmatprep.subr.bf16.mxu1 %v15300_v0  ;;  %v14208_v56 = vld [vmem:[%s19518_s9 + $0x28] ss:$16 sps:$4 sm:$0xff]  }
 0x1ea   :  { %v923_v58 = vmax.f32 %v843_v55, 0.0  ;;  %v846_v59 = vadd.f32 %v15296_v48, %v845_v57  ;;  %v847_v60 = vpop.f32.mrb[119].mxu0  ;;  %v14206_v55 = vld [vmem:[%s19518_s9 + $0x2c] ss:$16 sps:$4 sm:$0xff]  }
 0x1eb   :  { %1866 = vmatmul.mubr.bf16.gmra.mrb[52].mxu1 %v14148_v53  ;;  %v14202_v53 = vld [vmem:[%s19518_s9 + $0x3e0] ss:$16 sps:$4 sm:$0xff]   ;;  %v14209_v57 = vld [vmem:[%s19518_s9 + $0x4c] ss:$16 sps:$4 sm:$0xff]   ;;  %v14214_v60 = vld [vmem:[%s19518_s9 + $0x68] ss:$16 sps:$4 sm:$0xff]  }
 0x1ec   :  { %1873 = vmatprep.mubr.bf16.mxu1 %v14149_v54  ;;  %v924_v61 = vmax.f32 %v846_v59, 0.0  ;;  %v14203_v54 = vld [vmem:[%s19518_s9 + $0x8] ss:$16 sps:$4 sm:$0xff]   ;;  %v14212_v59 = vld [vmem:[%s19518_s9 + $0x6c] ss:$16 sps:$4 sm:$0xff]  }
 0x1ee   :  { %v958_v62 = vpack.c.bf16 %v924_v61, %v923_v58  ;;  %v14211_v58 = vld [vmem:[%s19518_s9 + $0x48] ss:$16 sps:$4 sm:$0xff]   ;;  %v14215_v61 = vld [vmem:[%s19518_s9 + $0x8c] ss:$16 sps:$4 sm:$0xff]  }
 0x1ef   :  { %v850_v1 = vpop.f32.mrb[120].mxu0 }
 0x1f0   :  { %2045 = vmatpush1.bf16.msra.mxu1 %v958_v62  ;;  %v851_v4 = vadd.f32 %v15296_v48, %v850_v1  ;;  %v852_v5 = vpop.f32.mrb[121].mxu0  ;;  %v14217_v62 = vld [vmem:[%s19518_s9 + $0x88] ss:$16 sps:$4 sm:$0xff]  }
 0x1f1   :  { %v853_v6 = vpop.f32.mrb[122].mxu0  ;;  %2046 = vmatprep.subr.bf16.mxu1 %v15300_v0  ;;  %v14220_v1 = vld [vmem:[%s19518_s9 + $0xa8] ss:$16 sps:$4 sm:$0xff]   ;;  %v14224_v5 = vld [vmem:[%s19518_s9 + $0xec] ss:$16 sps:$4 sm:$0xff]  }
 0x1f2   :  { %v925_v7 = vmax.f32 %v851_v4, 0.0  ;;  %v854_v8 = vadd.f32 %v15296_v48, %v853_v6  ;;  %v855_v9 = vpop.f32.mrb[123].mxu0  ;;  %v14223_v4 = vld [vmem:[%s19518_s9 + $0xc8] ss:$16 sps:$4 sm:$0xff]  }
 0x1f3   :  { %1874 = vmatmul.mubr.bf16.gmra.mrb[56].mxu1 %v14151_v63  ;;  %v14218_v63 = vld [vmem:[%s19518_s9 + $0xac] ss:$16 sps:$4 sm:$0xff]   ;;  %v14226_v6 = vld [vmem:[%s19518_s9 + $0xe8] ss:$16 sps:$4 sm:$0xff]  }
 0x1f4   :  { %1881 = vmatprep.mubr.bf16.mxu1 %v14152_v3  ;;  %v926_v10 = vmax.f32 %v854_v8, 0.0  ;;  %v14221_v3 = vld [vmem:[%s19518_s9 + $0xcc] ss:$16 sps:$4 sm:$0xff]   ;;  %v14229_v8 = vld [vmem:[%s19518_s9 + $0x108] ss:$16 sps:$4 sm:$0xff]  }
 0x1f5   :  { %v14230_v9 = vld [vmem:[%s19518_s9 + $0x12c] ss:$16 sps:$4 sm:$0xff]  }
 0x1f6   :  { %v959_v11 = vpack.c.bf16 %v926_v10, %v925_v7  ;;  %v14227_v7 = vld [vmem:[%s19518_s9 + $0x10c] ss:$16 sps:$4 sm:$0xff]   ;;  %v14232_v10 = vld [vmem:[%s19518_s9 + $0x128] ss:$16 sps:$4 sm:$0xff]  }
 0x1f7   :  { %v858_v13 = vpop.f32.mrb[124].mxu0 }
 0x1f8   :  { %2047 = vmatpush1.bf16.msra.mxu1 %v959_v11  ;;  %v859_v15 = vadd.f32 %v15296_v48, %v858_v13  ;;  %v860_v16 = vpop.f32.mrb[125].mxu0  ;;  %v14233_v11 = vld [vmem:[%s19518_s9 + $0x14c] ss:$16 sps:$4 sm:$0xff]  }
 0x1f9   :  { %v861_v17 = vpop.f32.mrb[126].mxu0  ;;  %2048 = vmatprep.subr.bf16.mxu1 %v15300_v0  ;;  %v14236_v13 = vld [vmem:[%s19518_s9 + $0x16c] ss:$16 sps:$4 sm:$0xff]   ;;  %v14241_v16 = vld [vmem:[%s19518_s9 + $0x188] ss:$16 sps:$4 sm:$0xff]  }
 0x1fa   :  { %v927_v18 = vmax.f32 %v859_v15, 0.0  ;;  %v862_v19 = vadd.f32 %v15296_v48, %v861_v17  ;;  %v863_v20 = vpop.f32.mrb[127].mxu0  ;;  %v14194_v48 = vld [vmem:[%s19518_s9 + $0x3a4] ss:$16 sps:$4 sm:$0xff]   ;;  %v14239_v15 = vld [vmem:[%s19518_s9 + $0x18c] ss:$16 sps:$4 sm:$0xff]  }
 0x1fb   :  { %1882 = vmatmul.mubr.bf16.gmra.mrb[60].mxu1 %v14154_v12  ;;  %v14235_v12 = vld [vmem:[%s19518_s9 + $0x148] ss:$16 sps:$4 sm:$0xff]   ;;  %v14242_v17 = vld [vmem:[%s19518_s9 + $0x1ac] ss:$16 sps:$4 sm:$0xff]  }
 0x1fc   :  { %1889 = vmatprep.mubr.bf16.mxu1 %v14155_v14  ;;  %v928_v21 = vmax.f32 %v862_v19, 0.0  ;;  %v14238_v14 = vld [vmem:[%s19518_s9 + $0x168] ss:$16 sps:$4 sm:$0xff]   ;;  %v14245_v19 = vld [vmem:[%s19518_s9 + $0x1cc] ss:$16 sps:$4 sm:$0xff]  }
 0x1fd   :  { %v14247_v20 = vld [vmem:[%s19518_s9 + $0x1c8] ss:$16 sps:$4 sm:$0xff]  }
 0x1fe   :  { %v960_v22 = vpack.c.bf16 %v928_v21, %v927_v18  ;;  %v14244_v18 = vld [vmem:[%s19518_s9 + $0x1a8] ss:$16 sps:$4 sm:$0xff]   ;;  %v14248_v21 = vld [vmem:[%s19518_s9 + $0x1ec] ss:$16 sps:$4 sm:$0xff]  }
 0x200   :  { %2049 = vmatpush1.bf16.msra.mxu1 %v960_v22  ;;  %v14250_v22 = vld [vmem:[%s19518_s9 + $0x1e8] ss:$16 sps:$4 sm:$0xff]  }
 0x203   :  { %1890 = vmatmul.mubr.bf16.gmra.mrb[64].mxu1 %v14157_v23  ;;  %v14251_v23 = vld [vmem:[%s19518_s9 + $0x20c] ss:$16 sps:$4 sm:$0xff]  }
 0x204   :  { %1897 = vmatprep.mubr.bf16.mxu1 %v14158_v24  ;;  %v14253_v24 = vld [vmem:[%s19518_s9 + $0x208] ss:$16 sps:$4 sm:$0xff]  }
 0x20b   :  { %1898 = vmatmul.mubr.bf16.gmra.mrb[68].mxu1 %v14160_v25  ;;  %v14254_v25 = vld [vmem:[%s19518_s9 + $0x22c] ss:$16 sps:$4 sm:$0xff]  }
 0x20c   :  { %1905 = vmatprep.mubr.bf16.mxu1 %v14161_v26  ;;  %v14256_v26 = vld [vmem:[%s19518_s9 + $0x228] ss:$16 sps:$4 sm:$0xff]  }
 0x213   :  { %1906 = vmatmul.mubr.bf16.gmra.mrb[72].mxu1 %v14163_v27  ;;  %v14257_v27 = vld [vmem:[%s19518_s9 + $0x24c] ss:$16 sps:$4 sm:$0xff]  }
 0x214   :  { %1913 = vmatprep.mubr.bf16.mxu1 %v14164_v28  ;;  %v14259_v28 = vld [vmem:[%s19518_s9 + $0x248] ss:$16 sps:$4 sm:$0xff]  }
 0x21b   :  { %1914 = vmatmul.mubr.bf16.gmra.mrb[76].mxu1 %v14166_v29  ;;  %v14260_v29 = vld [vmem:[%s19518_s9 + $0x26c] ss:$16 sps:$4 sm:$0xff]  }
 0x21c   :  { %1921 = vmatprep.mubr.bf16.mxu1 %v14167_v30  ;;  %v14262_v30 = vld [vmem:[%s19518_s9 + $0x268] ss:$16 sps:$4 sm:$0xff]  }
 0x223   :  { %1922 = vmatmul.mubr.bf16.gmra.mrb[80].mxu1 %v14169_v31  ;;  %v14263_v31 = vld [vmem:[%s19518_s9 + $0x28c] ss:$16 sps:$4 sm:$0xff]  }
 0x224   :  { %1929 = vmatprep.mubr.bf16.mxu1 %v14170_v32  ;;  %v14299_v32 = vld [vmem:[%s19519_s4] ss:$8 sps:$4 sm:$0xff]  }
 0x22b   :  { %1930 = vmatmul.mubr.bf16.gmra.mrb[84].mxu1 %v14172_v33  ;;  %v14301_v33 = vld [vmem:[%s19519_s4 + $0x4] ss:$8 sps:$4 sm:$0xff]  }
 0x22c   :  { %1937 = vmatprep.mubr.bf16.mxu1 %v14173_v34  ;;  %v14265_v34 = vld [vmem:[%s19518_s9 + $0x288] ss:$16 sps:$4 sm:$0xff]   ;;  %2654 = vmatprep.subr.bf16.mxu0 %v14301_v33 }
 0x22d   :  { %2655 = vmatpush1.bf16.msra.mxu0 %v14299_v32 }
 0x233   :  { %1938 = vmatmul.mubr.bf16.gmra.mrb[88].mxu1 %v14175_v35  ;;  %v14266_v35 = vld [vmem:[%s19518_s9 + $0x2ac] ss:$16 sps:$4 sm:$0xff]  }
 0x234   :  { %1945 = vmatprep.mubr.bf16.mxu1 %v14176_v36  ;;  %v14268_v36 = vld [vmem:[%s19518_s9 + $0x2a8] ss:$16 sps:$4 sm:$0xff]  }
 0x23b   :  { %1946 = vmatmul.mubr.bf16.gmra.mrb[92].mxu1 %v14178_v37  ;;  %v14269_v37 = vld [vmem:[%s19518_s9 + $0x2cc] ss:$16 sps:$4 sm:$0xff]  }
 0x23c   :  { %1953 = vmatprep.mubr.bf16.mxu1 %v14179_v38  ;;  %v14271_v38 = vld [vmem:[%s19518_s9 + $0x2c8] ss:$16 sps:$4 sm:$0xff]  }
 0x243   :  { %1954 = vmatmul.mubr.bf16.gmra.mrb[96].mxu1 %v14181_v39  ;;  %v14272_v39 = vld [vmem:[%s19518_s9 + $0x2ec] ss:$16 sps:$4 sm:$0xff]  }
 0x244   :  { %1961 = vmatprep.mubr.bf16.mxu1 %v14182_v40  ;;  %v14274_v40 = vld [vmem:[%s19518_s9 + $0x2e8] ss:$16 sps:$4 sm:$0xff]  }
 0x24b   :  { %1962 = vmatmul.mubr.bf16.gmra.mrb[100].mxu1 %v14184_v41  ;;  %v14275_v41 = vld [vmem:[%s19518_s9 + $0x30c] ss:$16 sps:$4 sm:$0xff]  }
 0x24c   :  { %1969 = vmatprep.mubr.bf16.mxu1 %v14185_v42  ;;  %v14302_v42 = vld [vmem:[%s19519_s4 + $0x10] ss:$8 sps:$4 sm:$0xff]  }
 0x253   :  { %1970 = vmatmul.mubr.bf16.gmra.mrb[104].mxu1 %v14187_v43  ;;  %v14304_v43 = vld [vmem:[%s19519_s4 + $0x14] ss:$8 sps:$4 sm:$0xff]  }
 0x254   :  { %1977 = vmatprep.mubr.bf16.mxu1 %v14188_v44  ;;  %2656 = vmatprep.subr.bf16.mxu0 %v14304_v43  ;;  %v14277_v44 = vld [vmem:[%s19518_s9 + $0x308] ss:$16 sps:$4 sm:$0xff]  }
 0x255   :  { %2657 = vmatpush1.bf16.msra.mxu0 %v14302_v42 }
 0x25b   :  { %1978 = vmatmul.mubr.bf16.gmra.mrb[108].mxu1 %v14190_v45  ;;  %v14278_v45 = vld [vmem:[%s19518_s9 + $0x32c] ss:$16 sps:$4 sm:$0xff]  }
 0x25c   :  { %1985 = vmatprep.mubr.bf16.mxu1 %v14191_v46  ;;  %v14280_v46 = vld [vmem:[%s19518_s9 + $0x328] ss:$16 sps:$4 sm:$0xff]  }
 0x263   :  { %1986 = vmatmul.mubr.bf16.gmra.mrb[112].mxu1 %v14193_v47  ;;  %v14281_v47 = vld [vmem:[%s19518_s9 + $0x34c] ss:$16 sps:$4 sm:$0xff]  }
 0x264   :  { %1993 = vmatprep.mubr.bf16.mxu1 %v14194_v48  ;;  %v14283_v48 = vld [vmem:[%s19518_s9 + $0x348] ss:$16 sps:$4 sm:$0xff]  }
 0x26b   :  { %1994 = vmatmul.mubr.bf16.gmra.mrb[116].mxu1 %v14196_v49  ;;  %v14284_v49 = vld [vmem:[%s19518_s9 + $0x36c] ss:$16 sps:$4 sm:$0xff]  }
 0x26c   :  { %2001 = vmatprep.mubr.bf16.mxu1 %v14197_v50 }
 0x273   :  { %2002 = vmatmul.mubr.bf16.gmra.mrb[120].mxu1 %v14199_v51 }
 0x274   :  { %2009 = vmatprep.mubr.bf16.mxu1 %v14200_v52  ;;  %v14286_v52 = vld [vmem:[%s19518_s9 + $0x368] ss:$16 sps:$4 sm:$0xff]  }
 0x27b   :  { %2010 = vmatmul.mubr.bf16.gmra.mrb[124].mxu1 %v14202_v53 }
 0x27c   :  { %2050 = vmatprep.mubr.bf16.mxu1 %v14205_v2  ;;  %v14287_v2 = vld [vmem:[%s19518_s9 + $0x38c] ss:$16 sps:$4 sm:$0xff]  }
 0x283   :  { %2051 = vmatmul.mubr.bf16.vlgmr.msra.gmra.mrb[0].mxu1 %v14203_v54 }
 0x284   :  { %2058 = vmatprep.mubr.bf16.mxu1 %v14206_v55  ;;  %v14305_v55 = vld [vmem:[%s19519_s4 + $0x20] ss:$8 sps:$4 sm:$0xff]  }
 0x28b   :  { %2059 = vmatmul.mubr.bf16.gmra.mrb[4].mxu1 %v14208_v56  ;;  %v14307_v56 = vld [vmem:[%s19519_s4 + $0x24] ss:$8 sps:$4 sm:$0xff]  }
 0x28c   :  { %2066 = vmatprep.mubr.bf16.mxu1 %v14209_v57  ;;  %2658 = vmatprep.subr.bf16.mxu0 %v14307_v56 }
 0x28d   :  { %2659 = vmatpush1.bf16.msra.mxu0 %v14305_v55 }
 0x293   :  { %2067 = vmatmul.mubr.bf16.gmra.mrb[8].mxu1 %v14211_v58 }
 0x294   :  { %2074 = vmatprep.mubr.bf16.mxu1 %v14212_v59  ;;  %v14289_v59 = vld [vmem:[%s19518_s9 + $0x388] ss:$16 sps:$4 sm:$0xff]  }
 0x29b   :  { %2075 = vmatmul.mubr.bf16.gmra.mrb[12].mxu1 %v14214_v60 }
 0x29c   :  { %2082 = vmatprep.mubr.bf16.mxu1 %v14215_v61  ;;  %v14290_v61 = vld [vmem:[%s19518_s9 + $0x3ac] ss:$16 sps:$4 sm:$0xff]  }
 0x2a3   :  { %2083 = vmatmul.mubr.bf16.gmra.mrb[16].mxu1 %v14217_v62 }
 0x2a4   :  { %2090 = vmatprep.mubr.bf16.mxu1 %v14218_v63 }
 0x2ab   :  { %2091 = vmatmul.mubr.bf16.gmra.mrb[20].mxu1 %v14220_v1 }
 0x2ac   :  { %2098 = vmatprep.mubr.bf16.mxu1 %v14221_v3  ;;  %v14292_v3 = vld [vmem:[%s19518_s9 + $0x3a8] ss:$16 sps:$4 sm:$0xff]  }
 0x2b3   :  { %2099 = vmatmul.mubr.bf16.gmra.mrb[24].mxu1 %v14223_v4 }
 0x2b4   :  { %2106 = vmatprep.mubr.bf16.mxu1 %v14224_v5  ;;  %v14293_v5 = vld [vmem:[%s19518_s9 + $0x3cc] ss:$16 sps:$4 sm:$0xff]  }
 0x2bb   :  { %2107 = vmatmul.mubr.bf16.gmra.mrb[28].mxu1 %v14226_v6 }
 0x2bc   :  { %2114 = vmatprep.mubr.bf16.mxu1 %v14227_v7 }
 0x2c3   :  { %2115 = vmatmul.mubr.bf16.gmra.mrb[32].mxu1 %v14229_v8 }
 0x2c4   :  { %2122 = vmatprep.mubr.bf16.mxu1 %v14230_v9  ;;  %v14295_v9 = vld [vmem:[%s19518_s9 + $0x3c8] ss:$16 sps:$4 sm:$0xff]  }
 0x2cb   :  { %2123 = vmatmul.mubr.bf16.gmra.mrb[36].mxu1 %v14232_v10 }
 0x2cc   :  { %2130 = vmatprep.mubr.bf16.mxu1 %v14233_v11  ;;  %v14296_v11 = vld [vmem:[%s19518_s9 + $0x3ec] ss:$16 sps:$4 sm:$0xff]  }
 0x2d3   :  { %2131 = vmatmul.mubr.bf16.gmra.mrb[40].mxu1 %v14235_v12 }
 0x2d4   :  { %2138 = vmatprep.mubr.bf16.mxu1 %v14236_v13 }
 0x2db   :  { %2139 = vmatmul.mubr.bf16.gmra.mrb[44].mxu1 %v14238_v14 }
 0x2dc   :  { %2146 = vmatprep.mubr.bf16.mxu1 %v14239_v15  ;;  %v14298_v15 = vld [vmem:[%s19518_s9 + $0x3e8] ss:$16 sps:$4 sm:$0xff]  }
 0x2e3   :  { %2147 = vmatmul.mubr.bf16.gmra.mrb[48].mxu1 %v14241_v16 }
 0x2e4   :  { %2154 = vmatprep.mubr.bf16.mxu1 %v14242_v17 }
 0x2eb   :  { %2155 = vmatmul.mubr.bf16.gmra.mrb[52].mxu1 %v14244_v18  ;;  %v14308_v18 = vld [vmem:[%s19519_s4 + $0x30] ss:$8 sps:$4 sm:$0xff]  }
 0x2ec   :  { %2162 = vmatprep.mubr.bf16.mxu1 %v14245_v19  ;;  %v14310_v19 = vld [vmem:[%s19519_s4 + $0x34] ss:$8 sps:$4 sm:$0xff]  }
 0x2ed   :  { %2660 = vmatprep.subr.bf16.mxu0 %v14310_v19 }
 0x2ee   :  { %2661 = vmatpush1.bf16.msra.mxu0 %v14308_v18 }
 0x2f3   :  { %2163 = vmatmul.mubr.bf16.gmra.mrb[56].mxu1 %v14247_v20 }
 0x2f4   :  { %2170 = vmatprep.mubr.bf16.mxu1 %v14248_v21 }
 0x2fb   :  { %2171 = vmatmul.mubr.bf16.gmra.mrb[60].mxu1 %v14250_v22 }
 0x2fc   :  { %2178 = vmatprep.mubr.bf16.mxu1 %v14251_v23 }
 0x303   :  { %2179 = vmatmul.mubr.bf16.gmra.mrb[64].mxu1 %v14253_v24 }
 0x304   :  { %2186 = vmatprep.mubr.bf16.mxu1 %v14254_v25 }
 0x30b   :  { %2187 = vmatmul.mubr.bf16.gmra.mrb[68].mxu1 %v14256_v26 }
 0x30c   :  { %2194 = vmatprep.mubr.bf16.mxu1 %v14257_v27 }
 0x313   :  { %2195 = vmatmul.mubr.bf16.gmra.mrb[72].mxu1 %v14259_v28 }
 0x314   :  { %2202 = vmatprep.mubr.bf16.mxu1 %v14260_v29 }
 0x31b   :  { %2203 = vmatmul.mubr.bf16.gmra.mrb[76].mxu1 %v14262_v30 }
 0x31c   :  { %2210 = vmatprep.mubr.bf16.mxu1 %v14263_v31 }
 0x323   :  { %2211 = vmatmul.mubr.bf16.gmra.mrb[80].mxu1 %v14265_v34 }
 0x324   :  { %2218 = vmatprep.mubr.bf16.mxu1 %v14266_v35 }
 0x32b   :  { %2219 = vmatmul.mubr.bf16.gmra.mrb[84].mxu1 %v14268_v36 }
 0x32c   :  { %2226 = vmatprep.mubr.bf16.mxu1 %v14269_v37  ;;  %v14311_v37 = vld [vmem:[%s19519_s4 + $0x40] ss:$8 sps:$4 sm:$0xff]  }
 0x333   :  { %2227 = vmatmul.mubr.bf16.gmra.mrb[88].mxu1 %v14271_v38  ;;  %v14313_v38 = vld [vmem:[%s19519_s4 + $0x44] ss:$8 sps:$4 sm:$0xff]  }
 0x334   :  { %2234 = vmatprep.mubr.bf16.mxu1 %v14272_v39  ;;  %2662 = vmatprep.subr.bf16.mxu0 %v14313_v38 }
 0x335   :  { %2663 = vmatpush1.bf16.msra.mxu0 %v14311_v37 }
 0x33b   :  { %2235 = vmatmul.mubr.bf16.gmra.mrb[92].mxu1 %v14274_v40 }
 0x33c   :  { %2242 = vmatprep.mubr.bf16.mxu1 %v14275_v41 }
 0x343   :  { %2243 = vmatmul.mubr.bf16.gmra.mrb[96].mxu1 %v14277_v44 }
 0x344   :  { %2250 = vmatprep.mubr.bf16.mxu1 %v14278_v45 }
 0x34b   :  { %2251 = vmatmul.mubr.bf16.gmra.mrb[100].mxu1 %v14280_v46 }
 0x34c   :  { %2258 = vmatprep.mubr.bf16.mxu1 %v14281_v47 }
 0x353   :  { %2259 = vmatmul.mubr.bf16.gmra.mrb[104].mxu1 %v14283_v48 }
 0x354   :  { %2266 = vmatprep.mubr.bf16.mxu1 %v14284_v49 }
 0x356   :  { %v16123_v50 = vpop.f32.mrb[0].mxu1 }
 0x357   :  { %v2054_v51 = vpop.f32.mrb[1].mxu1 }
 0x358   :  { %v16128_v53 = vpop.f32.mrb[2].mxu1 }
 0x359   :  { %v2057_v54 = vpop.f32.mrb[3].mxu1 }
 0x35b   :  { %2267 = vmatmul.mubr.bf16.gmra.mrb[108].mxu1 %v14286_v52 }
 0x35c   :  { %2274 = vmatprep.mubr.bf16.mxu1 %v14287_v2 }
 0x35e   :  { %v16139_v57 = vpop.f32.mrb[4].mxu1 }
 0x35f   :  { %v2062_v58 = vpop.f32.mrb[5].mxu1 }
 0x360   :  { %v16144_v60 = vpop.f32.mrb[6].mxu1 }
 0x361   :  { %v2065_v62 = vpop.f32.mrb[7].mxu1 }
 0x362   :  { %v14314_v62 = vld [vmem:[%s19519_s4 + $0x50] ss:$8 sps:$4 sm:$0xff]  }
 0x363   :  { %2275 = vmatmul.mubr.bf16.gmra.mrb[112].mxu1 %v14289_v59 }
 0x364   :  { %2282 = vmatprep.mubr.bf16.mxu1 %v14290_v61 }
 0x366   :  { %v16149_v63 = vpop.f32.mrb[8].mxu1 }
 0x367   :  { %v2070_v1 = vpop.f32.mrb[9].mxu1 }
 0x368   :  { %v16154_v4 = vpop.f32.mrb[10].mxu1  ;;  %v14316_v1 = vld [vmem:[%s19519_s4 + $0x54] ss:$8 sps:$4 sm:$0xff]  }
 0x369   :  { %v2073_v6 = vpop.f32.mrb[11].mxu1  ;;  %2664 = vmatprep.subr.bf16.mxu0 %v14316_v1 }
 0x36a   :  { %2665 = vmatpush1.bf16.msra.mxu0 %v14314_v62 }
 0x36b   :  { %2283 = vmatmul.mubr.bf16.gmra.mrb[116].mxu1 %v14292_v3 }
 0x36c   :  { %2290 = vmatprep.mubr.bf16.mxu1 %v14293_v5 }
 0x36e   :  { %v16159_v7 = vpop.f32.mrb[12].mxu1 }
 0x36f   :  { %v2078_v8 = vpop.f32.mrb[13].mxu1 }
 0x370   :  { %v16164_v10 = vpop.f32.mrb[14].mxu1 }
 0x371   :  { %v2081_v12 = vpop.f32.mrb[15].mxu1 }
 0x373   :  { %2291 = vmatmul.mubr.bf16.gmra.mrb[120].mxu1 %v14295_v9 }
 0x374   :  { %2298 = vmatprep.mubr.bf16.mxu1 %v14296_v11 }
 0x376   :  { %v16169_v13 = vpop.f32.mrb[16].mxu1 }
 0x377   :  { %v2086_v14 = vpop.f32.mrb[17].mxu1 }
 0x378   :  { %v16174_v16 = vpop.f32.mrb[18].mxu1 }
 0x379   :  { %v2089_v17 = vpop.f32.mrb[19].mxu1 }
 0x37b   :  { %2299 = vmatmul.mubr.bf16.gmra.mrb[124].mxu1 %v14298_v15 }
 0x37e   :  { %v16182_v20 = vpop.f32.mrb[20].mxu1 }
 0x37f   :  { %v2094_v21 = vpop.f32.mrb[21].mxu1 }
 0x380   :  { %v16184_v22 = vpop.f32.mrb[22].mxu1 }
 0x381   :  { %v2097_v23 = vpop.f32.mrb[23].mxu1 }
 0x386   :  { %v16186_v24 = vpop.f32.mrb[24].mxu1 }
 0x387   :  { %v2102_v25 = vpop.f32.mrb[25].mxu1 }
 0x388   :  { %v16188_v26 = vpop.f32.mrb[26].mxu1 }
 0x389   :  { %v2105_v27 = vpop.f32.mrb[27].mxu1 }
 0x38e   :  { %v16190_v28 = vpop.f32.mrb[28].mxu1 }
 0x38f   :  { %v2110_v29 = vpop.f32.mrb[29].mxu1 }
 0x390   :  { %v16192_v30 = vpop.f32.mrb[30].mxu1 }
 0x391   :  { %v2113_v31 = vpop.f32.mrb[31].mxu1 }
 0x396   :  { %v2116_v32 = vpop.f32.mrb[32].mxu1 }
 0x397   :  { %v2118_v33 = vpop.f32.mrb[33].mxu1 }
 0x398   :  { %v2119_v34 = vpop.f32.mrb[34].mxu1 }
 0x399   :  { %v13426_v35 = vpack.i.bf16 %v2119_v34, %v2116_v32  ;;  %v2121_v36 = vpop.f32.mrb[35].mxu1  ;;  %v14317_v34 = vld [vmem:[%s19519_s4 + $0x60] ss:$8 sps:$4 sm:$0xff]  }
 0x39a   :  { %v14322_v36 = vld [vmem:[%s19519_s4 + $0x74] ss:$8 sps:$4 sm:$0xff]  }
 0x39b   :  { %13427 = vrot.lane.b32.xlu0 %v13426_v35, %s15301_s21  ;;  %v14319_v35 = vld [vmem:[%s19519_s4 + $0x64] ss:$8 sps:$4 sm:$0xff]  }
 0x39c   :  { %2666 = vmatprep.subr.bf16.mxu0 %v14319_v35 }
 0x39d   :  { %2667 = vmatpush1.bf16.msra.mxu0 %v14317_v34 }
 0x39e   :  { %v16201_v39 = vpop.f32.mrb[36].mxu1  ;;  %2668 = vmatprep.subr.bf16.mxu0 %v14322_v36 }
 0x39f   :  { %v2126_v40 = vpop.f32.mrb[37].mxu1 }
 0x3a0   :  { %v16203_v41 = vpop.f32.mrb[38].mxu1  ;;  %v14320_v40 = vld [vmem:[%s19519_s4 + $0x70] ss:$8 sps:$4 sm:$0xff]   ;;  %s15303_s4 = smov 96  }
 0x3a1   :  { %v13441_v42 = vpack.i.bf16 %v16203_v41, %v16201_v39  ;;  %v2129_v43 = vpop.f32.mrb[39].mxu1  ;;  %2669 = vmatpush1.bf16.msra.mxu0 %v14320_v40 }
 0x3a6   :  { %v2132_v44 = vpop.f32.mrb[40].mxu1 }
 0x3a7   :  { %v2134_v45 = vpop.f32.mrb[41].mxu1 }
 0x3a8   :  { %v2135_v46 = vpop.f32.mrb[42].mxu1 }
 0x3a9   :  { %v13456_v47 = vpack.i.bf16 %v2135_v46, %v2132_v44  ;;  %v2137_v48 = vpop.f32.mrb[43].mxu1 }
 0x3ae   :  { %v16207_v49 = vpop.f32.mrb[44].mxu1 }
 0x3af   :  { %v2142_v51 = vpop.f32.mrb[45].mxu1 }
 0x3b0   :  { %v16209_v52 = vpop.f32.mrb[46].mxu1 }
 0x3b1   :  { %v13471_v2 = vpack.i.bf16 %v16209_v52, %v16207_v49  ;;  %v2145_v54 = vpop.f32.mrb[47].mxu1 }
 0x3b6   :  { %v16213_v55 = vpop.f32.mrb[48].mxu1 }
 0x3b7   :  { %v2150_v56 = vpop.f32.mrb[49].mxu1 }
 0x3b8   :  { %v16215_v58 = vpop.f32.mrb[50].mxu1 }
 0x3b9   :  { %v13486_v59 = vpack.i.bf16 %v16215_v58, %v16213_v55  ;;  %v2153_v61 = vpop.f32.mrb[51].mxu1 }
 0x3be   :  { %v16225_v3 = vpop.f32.mrb[52].mxu1 }
 0x3bf   :  { %v2158_v5 = vpop.f32.mrb[53].mxu1 }
 0x3c0   :  { %v16227_v6 = vpop.f32.mrb[54].mxu1 }
 0x3c1   :  { %v13501_v8 = vpack.i.bf16 %v16227_v6, %v16225_v3  ;;  %v2161_v9 = vpop.f32.mrb[55].mxu1 }
 0x3c6   :  { %v16231_v11 = vpop.f32.mrb[56].mxu1 }
 0x3c7   :  { %v2166_v12 = vpop.f32.mrb[57].mxu1 }
 0x3c8   :  { %v16233_v14 = vpop.f32.mrb[58].mxu1 }
 0x3c9   :  { %v13516_v15 = vpack.i.bf16 %v16233_v14, %v16231_v11  ;;  %v2169_v17 = vpop.f32.mrb[59].mxu1 }
 0x3ce   :  { %v16237_v18 = vpop.f32.mrb[60].mxu1 }
 0x3cf   :  { %v2174_v19 = vpop.f32.mrb[61].mxu1 }
 0x3d0   :  { %v16239_v21 = vpop.f32.mrb[62].mxu1 }
 0x3d1   :  { %v13531_v23 = vpack.i.bf16 %v16239_v21, %v16237_v18  ;;  %v2177_v25 = vpop.f32.mrb[63].mxu1 }
 0x3d6   :  { %v2180_v27 = vpop.f32.mrb[64].mxu1 }
 0x3d7   :  { %v2182_v29 = vpop.f32.mrb[65].mxu1 }
 0x3d8   :  { %v2183_v31 = vpop.f32.mrb[66].mxu1 }
 0x3d9   :  { %v13431_v32 = vpack.i.bf16 %v2183_v31, %v2180_v27  ;;  %v2185_v33 = vpop.f32.mrb[67].mxu1 }
 0x3db   :  { %13432 = vrot.lane.b32.xlu0 %v13431_v32, %s15302_s27 }
 0x3de   :  { %v2188_v37 = vpop.f32.mrb[68].mxu1 }
 0x3df   :  { %v2190_v38 = vpop.f32.mrb[69].mxu1 }
 0x3e0   :  { %v2191_v43 = vpop.f32.mrb[70].mxu1 }
 0x3e1   :  { %v13446_v44 = vpack.i.bf16 %v2191_v43, %v2188_v37  ;;  %v2193_v45 = vpop.f32.mrb[71].mxu1 }
 0x3e3   :  { %13447 = vrot.lane.b32.xlu0 %v13446_v44, %s15302_s27 }
 0x3e6   :  { %v2196_v46 = vpop.f32.mrb[72].mxu1 }
 0x3e7   :  { %13457 = vrot.lane.b32.xlu0 %v13456_v47, %s15301_s21  ;;  %v2198_v48 = vpop.f32.mrb[73].mxu1 }
 0x3e8   :  { %v2199_v51 = vpop.f32.mrb[74].mxu1 }
 0x3e9   :  { %v13461_v54 = vpack.i.bf16 %v2199_v51, %v2196_v46  ;;  %v2201_v56 = vpop.f32.mrb[75].mxu1 }
 0x3ee   :  { %v2204_v61 = vpop.f32.mrb[76].mxu1 }
 0x3ef   :  { %v2206_v62 = vpop.f32.mrb[77].mxu1 }
 0x3f0   :  { %v2207_v1 = vpop.f32.mrb[78].mxu1 }
 0x3f1   :  { %v13476_v5 = vpack.i.bf16 %v2207_v1, %v2204_v61  ;;  %v2209_v9 = vpop.f32.mrb[79].mxu1 }
 0x3f6   :  { %v2212_v12 = vpop.f32.mrb[80].mxu1 }
 0x3f7   :  { %v2214_v17 = vpop.f32.mrb[81].mxu1 }
 0x3f8   :  { %v2215_v19 = vpop.f32.mrb[82].mxu1 }
 0x3f9   :  { %v13491_v25 = vpack.i.bf16 %v2215_v19, %v2212_v12  ;;  %v2217_v27 = vpop.f32.mrb[83].mxu1 }
 0x3fe   :  { %v2220_v29 = vpop.f32.mrb[84].mxu1 }
 0x3ff   :  { %v2222_v31 = vpop.f32.mrb[85].mxu1 }
 0x400   :  { %v2223_v32 = vpop.f32.mrb[86].mxu1 }
 0x401   :  { %v13506_v33 = vpack.i.bf16 %v2223_v32, %v2220_v29  ;;  %v2225_v34 = vpop.f32.mrb[87].mxu1 }
 0x406   :  { %v2228_v47 = vpop.f32.mrb[88].mxu1 }
 0x407   :  { %v2230_v35 = vpop.f32.mrb[89].mxu1 }
 0x408   :  { %v2231_v36 = vpop.f32.mrb[90].mxu1 }
 0x409   :  { %v13521_v37 = vpack.i.bf16 %v2231_v36, %v2228_v47  ;;  %v2233_v38 = vpop.f32.mrb[91].mxu1 }
 0x40e   :  { %v2236_v40 = vpop.f32.mrb[92].mxu1 }
 0x40f   :  { %v2238_v43 = vpop.f32.mrb[93].mxu1 }
 0x410   :  { %v2239_v44 = vpop.f32.mrb[94].mxu1 }
 0x411   :  { %v13536_v45 = vpack.i.bf16 %v2239_v44, %v2236_v40  ;;  %v2241_v46 = vpop.f32.mrb[95].mxu1 }
 0x416   :  { %v2244_v48 = vpop.f32.mrb[96].mxu1 }
 0x417   :  { %v2246_v51 = vpop.f32.mrb[97].mxu1 }
 0x418   :  { %v2247_v56 = vpop.f32.mrb[98].mxu1 }
 0x419   :  { %v13436_v61 = vpack.i.bf16 %v2247_v56, %v2244_v48  ;;  %v2249_v62 = vpop.f32.mrb[99].mxu1 }
 0x41b   :  { %13437 = vrot.lane.b32.xlu1 %v13436_v61, %s15303_s4 }
 0x41e   :  { %v2252_v1 = vpop.f32.mrb[100].mxu1 }
 0x41f   :  { %13442 = vrot.lane.b32.xlu1 %v13441_v42, %s15301_s21  ;;  %v2254_v9 = vpop.f32.mrb[101].mxu1 }
 0x420   :  { %v2255_v12 = vpop.f32.mrb[102].mxu1 }
 0x421   :  { %v13451_v17 = vpack.i.bf16 %v2255_v12, %v2252_v1  ;;  %v2257_v19 = vpop.f32.mrb[103].mxu1 }
 0x423   :  { %13452 = vrot.lane.b32.xlu1 %v13451_v17, %s15303_s4 }
 0x426   :  { %v2260_v27 = vpop.f32.mrb[104].mxu1 }
 0x427   :  { %13462 = vrot.lane.b32.xlu1 %v13461_v54, %s15302_s27  ;;  %v2262_v29 = vpop.f32.mrb[105].mxu1 }
 0x428   :  { %v2263_v31 = vpop.f32.mrb[106].mxu1 }
 0x429   :  { %v13466_v32 = vpack.i.bf16 %v2263_v31, %v2260_v27  ;;  %v2265_v34 = vpop.f32.mrb[107].mxu1 }
 0x42b   :  { %13472 = vrot.lane.b32.xlu1 %v13471_v2, %s15301_s21  ;;  %13467 = vrot.lane.b32.xlu0 %v13466_v32, %s15303_s4 }
 0x42e   :  { %v2268_v39 = vpop.f32.mrb[108].mxu1 }
 0x42f   :  { %13477 = vrot.lane.b32.xlu0 %v13476_v5, %s15302_s27  ;;  %v2270_v41 = vpop.f32.mrb[109].mxu1 }
 0x430   :  { %v2271_v42 = vpop.f32.mrb[110].mxu1 }
 0x431   :  { %v13481_v47 = vpack.i.bf16 %v2271_v42, %v2268_v39  ;;  %v2273_v35 = vpop.f32.mrb[111].mxu1 }
 0x433   :  { %13487 = vrot.lane.b32.xlu0 %v13486_v59, %s15301_s21  ;;  %13482 = vrot.lane.b32.xlu1 %v13481_v47, %s15303_s4 }
 0x436   :  { %v2276_v54 = vpop.f32.mrb[112].mxu1 }
 0x437   :  { %13492 = vrot.lane.b32.xlu1 %v13491_v25, %s15302_s27  ;;  %v2278_v49 = vpop.f32.mrb[113].mxu1 }
 0x438   :  { %v2279_v52 = vpop.f32.mrb[114].mxu1 }
 0x439   :  { %v13496_v2 = vpack.i.bf16 %v2279_v52, %v2276_v54  ;;  %v2281_v36 = vpop.f32.mrb[115].mxu1 }
 0x43b   :  { %13502 = vrot.lane.b32.xlu1 %v13501_v8, %s15301_s21  ;;  %13497 = vrot.lane.b32.xlu0 %v13496_v2, %s15303_s4 }
 0x43e   :  { %v2284_v5 = vpop.f32.mrb[116].mxu1 }
 0x43f   :  { %13507 = vrot.lane.b32.xlu0 %v13506_v33, %s15302_s27  ;;  %v2286_v55 = vpop.f32.mrb[117].mxu1 }
 0x440   :  { %v2287_v58 = vpop.f32.mrb[118].mxu1 }
 0x441   :  { %v13511_v59 = vpack.i.bf16 %v2287_v58, %v2284_v5  ;;  %v2289_v38 = vpop.f32.mrb[119].mxu1 }
 0x443   :  { %13517 = vrot.lane.b32.xlu0 %v13516_v15, %s15301_s21  ;;  %13512 = vrot.lane.b32.xlu1 %v13511_v59, %s15303_s4 }
 0x446   :  { %v2292_v25 = vpop.f32.mrb[120].mxu1 }
 0x447   :  { %13522 = vrot.lane.b32.xlu1 %v13521_v37, %s15302_s27  ;;  %v2294_v3 = vpop.f32.mrb[121].mxu1  ;;  %v13428_v37 = vpop.permute.xlu0 %13427 }
 0x448   :  { %v2295_v6 = vpop.f32.mrb[122].mxu1  ;;  %v13430_v46 = vunpack.i.h.bf16 %v13428_v37  ;;  %v13429_v48 = vunpack.i.l.bf16 %v13428_v37 }
 0x449   :  { %v13526_v8 = vpack.i.bf16 %v2295_v6, %v2292_v25  ;;  %v2297_v40 = vpop.f32.mrb[123].mxu1 }
 0x44a   :  { %v2501_v21 = vsel %vm2499_vm1, %v16128_v53, %v13430_v46 }
 0x44b   :  { %13532 = vrot.lane.b32.xlu1 %v13531_v23, %s15301_s21  ;;  %13527 = vrot.lane.b32.xlu0 %v13526_v8, %s15303_s4  ;;  %v2500_v23 = vsel %vm2499_vm1, %v16123_v50, %v13429_v48 }
 0x44d   :  { %v13433_v44 = vpop.permute.xlu0 %13432 }
 0x44e   :  { %v2300_v33 = vpop.f32.mrb[124].mxu1  ;;  %v13435_v51 = vunpack.i.h.bf16 %v13433_v44  ;;  %v13434_v56 = vunpack.i.l.bf16 %v13433_v44 }
 0x44f   :  { %13537 = vrot.lane.b32.xlu0 %v13536_v45, %s15302_s27  ;;  %v2302_v11 = vpop.f32.mrb[125].mxu1 }
 0x450   :  { %v2303_v14 = vpop.f32.mrb[126].mxu1  ;;  %v2518_v62 = vsel %vm2516_vm2, %v2501_v21, %v13435_v51  ;;  %v2517_v1 = vsel %vm2516_vm2, %v2500_v23, %v13434_v56 }
 0x451   :  { %v13541_v15 = vpack.i.bf16 %v2303_v14, %v2300_v33  ;;  %v2305_v43 = vpop.f32.mrb[127].mxu1 }
 0x453   :  { %13542 = vrot.lane.b32.xlu1 %v13541_v15, %s15303_s4 }
 0x455   :  { %v13448_v17 = vpop.permute.xlu0 %13447 }
 0x456   :  { %v13450_v32 = vunpack.i.h.bf16 %v13448_v17  ;;  %v13449_v34 = vunpack.i.l.bf16 %v13448_v17 }
 0x459   :  { %v13458_v47 = vpop.permute.xlu0 %13457 }
 0x45a   :  { %v13459_v36 = vunpack.i.l.bf16 %v13458_v47 }
 0x45c   :  { %v2504_v38 = vsel %vm2499_vm1, %v16149_v63, %v13459_v36 }
 0x48d   :  { %v13438_v18 = vpop.permute.xlu1 %13437 }
 0x48e   :  { %v13440_v45 = vunpack.i.h.bf16 %v13438_v18  ;;  %v13439_v61 = vunpack.i.l.bf16 %v13438_v18 }
 0x490   :  { %v2535_v9 = vsel %vm2533_vm3, %v2518_v62, %v13440_v45  ;;  %v2534_v12 = vsel %vm2533_vm3, %v2517_v1, %v13439_v61 }
 0x491   :  { %v16304_v19 = vpack.c.bf16 %v2535_v9, %v2534_v12  ;;  %v13443_v27 = vpop.permute.xlu1 %13442 }
 0x492   :  { %v13445_v29 = vunpack.i.h.bf16 %v13443_v27  ;;  %v13444_v31 = vunpack.i.l.bf16 %v13443_v27 }
 0x493   :  { %2687 = vmatmul.mubr.bf16.vlgmr.msra.gmra.mrb[128].mxu0 %v16304_v19 }
 0x494   :  { %v2503_v50 = vsel %vm2499_vm1, %v16144_v60, %v13445_v29  ;;  %v2502_v53 = vsel %vm2499_vm1, %v16139_v57, %v13444_v31  ;;  %2696 = vmatprep.mubr.bf16.mxu0 %v15300_v0  ;;  %v13460_v57 = vunpack.i.h.bf16 %v13458_v47 }
 0x495   :  { %v13453_v39 = vpop.permute.xlu1 %13452  ;;  %v2519_v35 = vsel %vm2516_vm2, %v2502_v53, %v13449_v34  ;;  %v2520_v54 = vsel %vm2516_vm2, %v2503_v50, %v13450_v32 }
 0x496   :  { %v13455_v41 = vunpack.i.h.bf16 %v13453_v39  ;;  %v13454_v42 = vunpack.i.l.bf16 %v13453_v39  ;;  %v2505_v59 = vsel %vm2499_vm1, %v16154_v4, %v13460_v57 }
 0x498   :  { %v2536_v49 = vsel %vm2533_vm3, %v2519_v35, %v13454_v42  ;;  %v2537_v52 = vsel %vm2533_vm3, %v2520_v54, %v13455_v41 }
 0x499   :  { %v13463_v60 = vpop.permute.xlu1 %13462  ;;  %v16316_v2 = vpack.c.bf16 %v2537_v52, %v2536_v49 }
 0x49a   :  { %v13465_v5 = vunpack.i.h.bf16 %v13463_v60  ;;  %v13464_v55 = vunpack.i.l.bf16 %v13463_v60 }
 0x49b   :  { %2697 = vmatmul.mubr.bf16.gmra.mrb[132].mxu0 %v16316_v2 }
 0x49c   :  { %2706 = vmatprep.mubr.bf16.mxu0 %v15300_v0  ;;  %v2521_v8 = vsel %vm2516_vm2, %v2504_v38, %v13464_v55  ;;  %v2522_v40 = vsel %vm2516_vm2, %v2505_v59, %v13465_v5 }
 0x49d   :  { %v13468_v58 = vpop.permute.xlu0 %13467  ;;  %v13473_v6 = vpop.permute.xlu1 %13472 }
 0x49e   :  { %v13470_v25 = vunpack.i.h.bf16 %v13468_v58  ;;  %v13469_v3 = vunpack.i.l.bf16 %v13468_v58  ;;  %v13475_v43 = vunpack.i.h.bf16 %v13473_v6  ;;  %v13474_v37 = vunpack.i.l.bf16 %v13473_v6 }
 0x4a0   :  { %v2538_v33 = vsel %vm2533_vm3, %v2521_v8, %v13469_v3  ;;  %v2539_v11 = vsel %vm2533_vm3, %v2522_v40, %v13470_v25  ;;  %v2507_v46 = vsel %vm2499_vm1, %v16164_v10, %v13475_v43  ;;  %v2506_v48 = vsel %vm2499_vm1, %v16159_v7, %v13474_v37 }
 0x4a1   :  { %v13478_v14 = vpop.permute.xlu0 %13477  ;;  %v16328_v15 = vpack.c.bf16 %v2539_v11, %v2538_v33 }
 0x4a2   :  { %v13480_v4 = vunpack.i.h.bf16 %v13478_v14  ;;  %v13479_v44 = vunpack.i.l.bf16 %v13478_v14 }
 0x4a3   :  { %2707 = vmatmul.mubr.bf16.gmra.mrb[136].mxu0 %v16328_v15 }
 0x4a4   :  { %2716 = vmatprep.mubr.bf16.mxu0 %v15300_v0  ;;  %v2523_v21 = vsel %vm2516_vm2, %v2506_v48, %v13479_v44  ;;  %v2524_v23 = vsel %vm2516_vm2, %v2507_v46, %v13480_v4 }
 0x4a5   :  { %v13483_v63 = vpop.permute.xlu1 %13482  ;;  %v13488_v18 = vpop.permute.xlu0 %13487 }
 0x4a6   :  { %v13485_v51 = vunpack.i.h.bf16 %v13483_v63  ;;  %v13484_v56 = vunpack.i.l.bf16 %v13483_v63  ;;  %v13490_v9 = vunpack.i.h.bf16 %v13488_v18  ;;  %v13489_v12 = vunpack.i.l.bf16 %v13488_v18 }
 0x4a8   :  { %v2540_v45 = vsel %vm2533_vm3, %v2523_v21, %v13484_v56  ;;  %v2541_v61 = vsel %vm2533_vm3, %v2524_v23, %v13485_v51  ;;  %v2509_v27 = vsel %vm2499_vm1, %v16174_v16, %v13490_v9  ;;  %v2508_v29 = vsel %vm2499_vm1, %v16169_v13, %v13489_v12 }
 0x4a9   :  { %v13493_v62 = vpop.permute.xlu1 %13492  ;;  %v16340_v1 = vpack.c.bf16 %v2541_v61, %v2540_v45 }
 0x4aa   :  { %v13495_v10 = vunpack.i.h.bf16 %v13493_v62  ;;  %v13494_v17 = vunpack.i.l.bf16 %v13493_v62 }
 0x4ab   :  { %2717 = vmatmul.mubr.bf16.gmra.mrb[140].mxu0 %v16340_v1 }
 0x4ac   :  { %2726 = vmatprep.mubr.bf16.mxu0 %v15300_v0  ;;  %v2525_v32 = vsel %vm2516_vm2, %v2508_v29, %v13494_v17  ;;  %v2526_v34 = vsel %vm2516_vm2, %v2509_v27, %v13495_v10 }
 0x4ad   :  { %v13498_v7 = vpop.permute.xlu0 %13497  ;;  %v13503_v53 = vpop.permute.xlu1 %13502 }
 0x4ae   :  { %v13500_v31 = vunpack.i.h.bf16 %v13498_v7  ;;  %v13499_v50 = vunpack.i.l.bf16 %v13498_v7  ;;  %v13505_v35 = vunpack.i.h.bf16 %v13503_v53  ;;  %v13504_v54 = vunpack.i.l.bf16 %v13503_v53 }
 0x4b0   :  { %v2542_v39 = vsel %vm2533_vm3, %v2525_v32, %v13499_v50  ;;  %v2543_v41 = vsel %vm2533_vm3, %v2526_v34, %v13500_v31  ;;  %v2511_v52 = vsel %vm2499_vm1, %v16184_v22, %v13505_v35  ;;  %v2510_v60 = vsel %vm2499_vm1, %v16182_v20, %v13504_v54 }
 0x4b1   :  { %v13508_v42 = vpop.permute.xlu0 %13507  ;;  %v16352_v47 = vpack.c.bf16 %v2543_v41, %v2542_v39 }
 0x4b2   :  { %v13510_v16 = vunpack.i.h.bf16 %v13508_v42  ;;  %v13509_v49 = vunpack.i.l.bf16 %v13508_v42 }
 0x4b3   :  { %2727 = vmatmul.mubr.bf16.gmra.mrb[144].mxu0 %v16352_v47 }
 0x4b4   :  { %2736 = vmatprep.mubr.bf16.mxu0 %v15300_v0  ;;  %v2527_v55 = vsel %vm2516_vm2, %v2510_v60, %v13509_v49  ;;  %v2528_v58 = vsel %vm2516_vm2, %v2511_v52, %v13510_v16 }
 0x4b5   :  { %v13513_v13 = vpop.permute.xlu1 %13512  ;;  %v13518_v5 = vpop.permute.xlu0 %13517 }
 0x4b6   :  { %v13515_v57 = vunpack.i.h.bf16 %v13513_v13  ;;  %v13514_v36 = vunpack.i.l.bf16 %v13513_v13  ;;  %v13520_v6 = vunpack.i.h.bf16 %v13518_v5  ;;  %v13519_v8 = vunpack.i.l.bf16 %v13518_v5 }
 0x4b8   :  { %v2544_v59 = vsel %vm2533_vm3, %v2527_v55, %v13514_v36  ;;  %v2545_v38 = vsel %vm2533_vm3, %v2528_v58, %v13515_v57  ;;  %v2513_v33 = vsel %vm2499_vm1, %v16188_v26, %v13520_v6  ;;  %v2512_v11 = vsel %vm2499_vm1, %v16186_v24, %v13519_v8 }
 0x4b9   :  { %v13523_v25 = vpop.permute.xlu1 %13522  ;;  %v16364_v3 = vpack.c.bf16 %v2545_v38, %v2544_v59 }
 0x4ba   :  { %v13525_v22 = vunpack.i.h.bf16 %v13523_v25  ;;  %v13524_v40 = vunpack.i.l.bf16 %v13523_v25 }
 0x4bb   :  { %2737 = vmatmul.mubr.bf16.gmra.mrb[148].mxu0 %v16364_v3 }
 0x4bc   :  { %2746 = vmatprep.mubr.bf16.mxu0 %v15300_v0  ;;  %v2529_v4 = vsel %vm2516_vm2, %v2512_v11, %v13524_v40  ;;  %v2530_v44 = vsel %vm2516_vm2, %v2513_v33, %v13525_v22 }
 0x4bd   :  { %v13528_v20 = vpop.permute.xlu0 %13527  ;;  %v13533_v37 = vpop.permute.xlu1 %13532 }
 0x4be   :  { %v13530_v14 = vunpack.i.h.bf16 %v13528_v20  ;;  %v13529_v43 = vunpack.i.l.bf16 %v13528_v20  ;;  %v13535_v56 = vunpack.i.h.bf16 %v13533_v37  ;;  %v13534_v18 = vunpack.i.l.bf16 %v13533_v37 }
 0x4c0   :  { %v2546_v63 = vsel %vm2533_vm3, %v2529_v4, %v13529_v43  ;;  %v2547_v46 = vsel %vm2533_vm3, %v2530_v44, %v13530_v14  ;;  %v2515_v23 = vsel %vm2499_vm1, %v16192_v30, %v13535_v56  ;;  %v2514_v45 = vsel %vm2499_vm1, %v16190_v28, %v13534_v18 }
 0x4c1   :  { %v13538_v48 = vpop.permute.xlu0 %13537  ;;  %v16376_v51 = vpack.c.bf16 %v2547_v46, %v2546_v63 }
 0x4c2   :  { %v13540_v26 = vunpack.i.h.bf16 %v13538_v48  ;;  %v13539_v21 = vunpack.i.l.bf16 %v13538_v48 }
 0x4c3   :  { %2747 = vmatmul.mubr.bf16.gmra.mrb[152].mxu0 %v16376_v51 }
 0x4c4   :  { %2756 = vmatprep.mubr.bf16.mxu0 %v15300_v0  ;;  %v2531_v9 = vsel %vm2516_vm2, %v2514_v45, %v13539_v21  ;;  %v2532_v12 = vsel %vm2516_vm2, %v2515_v23, %v13540_v26 }
 0x4c5   :  { %v13543_v24 = vpop.permute.xlu1 %13542 }
 0x4c6   :  { %v13545_v61 = vunpack.i.h.bf16 %v13543_v24  ;;  %v13544_v62 = vunpack.i.l.bf16 %v13543_v24 }
 0x4c8   :  { %v2548_v10 = vsel %vm2533_vm3, %v2531_v9, %v13544_v62  ;;  %v2549_v17 = vsel %vm2533_vm3, %v2532_v12, %v13545_v61  ;;  %v14325_v61 = vld [vmem:[%s19520_s13 + $0x4] ss:$36 sps:$4 sm:$0xff]  }
 0x4c9   :  { %v16388_v7 = vpack.c.bf16 %v2549_v17, %v2548_v10 }
 0x4cb   :  { %2757 = vmatmul.mubr.bf16.gmra.mrb[156].mxu0 %v16388_v7 }
 0x4cc   :  { %3672 = vmatprep.mubr.bf16.mxu0 %v14325_v61 }
 0x566   :  { %v16391_v27 = vpop.f32.mrb[128].mxu0 }
 0x567   :  { %v2690_v30 = vpop.f32.mrb[129].mxu0 }
 0x568   :  { %v16393_v29 = vpop.f32.mrb[130].mxu0 }
 0x569   :  { %v2694_v28 = vpop.f32.mrb[131].mxu0  ;;  %v16397_v31 = vpack.i.bf16 %v16393_v29, %v16391_v27  ;;  %v3119_v53 = vpack.c.bf16 %v16393_v29, %v16391_v27 }
 0x56a   :  { %v3183_v50 = vpack.c.bf16 %v2694_v28, %v2690_v30 }
 0x56b   :  { %13547 = vrot.lane.b32.xlu0 %v16397_v31, %s15304_s19 }
 0x56c   :  { %13056 = vmatprep.subr.bf16.mxu1 %v3183_v50 }
 0x56d   :  { %13057 = vmatpush3.bf16.msra.mxu1 %v3183_v50 }
 0x56e   :  { %v16403_v32 = vpop.f32.mrb[132].mxu0 }
 0x56f   :  { %v2700_v34 = vpop.f32.mrb[133].mxu0 }
 0x570   :  { %v16405_v39 = vpop.f32.mrb[134].mxu0 }
 0x571   :  { %v2704_v41 = vpop.f32.mrb[135].mxu0  ;;  %v16409_v42 = vpack.i.bf16 %v16405_v39, %v16403_v32  ;;  %v3120_v54 = vpack.c.bf16 %v16405_v39, %v16403_v32 }
 0x572   :  { %v3184_v35 = vpack.c.bf16 %v2704_v41, %v2700_v34 }
 0x573   :  { %13552 = vrot.lane.b32.xlu1 %v16409_v42, %s15304_s19 }
 0x574   :  { %13058 = vmatprep.subr.bf16.mxu1 %v3184_v35 }
 0x575   :  { %13059 = vmatpush3.bf16.msra.mxu1 %v3184_v35 }
 0x576   :  { %v16415_v16 = vpop.f32.mrb[136].mxu0 }
 0x577   :  { %v2710_v49 = vpop.f32.mrb[137].mxu0 }
 0x578   :  { %v16417_v13 = vpop.f32.mrb[138].mxu0 }
 0x579   :  { %v2714_v52 = vpop.f32.mrb[139].mxu0  ;;  %v16421_v60 = vpack.i.bf16 %v16417_v13, %v16415_v16  ;;  %v3121_v36 = vpack.c.bf16 %v16417_v13, %v16415_v16 }
 0x57a   :  { %v3185_v57 = vpack.c.bf16 %v2714_v52, %v2710_v49 }
 0x57b   :  { %13557 = vrot.lane.b32.xlu0 %v16421_v60, %s15304_s19 }
 0x57c   :  { %13060 = vmatprep.subr.bf16.mxu1 %v3185_v57 }
 0x57d   :  { %13061 = vmatpush3.bf16.msra.mxu1 %v3185_v57 }
 0x57e   :  { %v16427_v5 = vpop.f32.mrb[140].mxu0 }
 0x57f   :  { %v2720_v55 = vpop.f32.mrb[141].mxu0 }
 0x580   :  { %v16429_v58 = vpop.f32.mrb[142].mxu0 }
 0x581   :  { %v2724_v59 = vpop.f32.mrb[143].mxu0  ;;  %v16433_v38 = vpack.i.bf16 %v16429_v58, %v16427_v5  ;;  %v3122_v6 = vpack.c.bf16 %v16429_v58, %v16427_v5 }
 0x582   :  { %v3186_v25 = vpack.c.bf16 %v2724_v59, %v2720_v55 }
 0x583   :  { %13562 = vrot.lane.b32.xlu1 %v16433_v38, %s15304_s19 }
 0x584   :  { %13062 = vmatprep.subr.bf16.mxu1 %v3186_v25 }
 0x585   :  { %13063 = vmatpush3.bf16.msra.mxu1 %v3186_v25 }
 0x586   :  { %v16439_v8 = vpop.f32.mrb[144].mxu0 }
 0x587   :  { %v2730_v22 = vpop.f32.mrb[145].mxu0 }
 0x588   :  { %v16441_v40 = vpop.f32.mrb[146].mxu0 }
 0x589   :  { %v2734_v20 = vpop.f32.mrb[147].mxu0  ;;  %v16445_v33 = vpack.i.bf16 %v16441_v40, %v16439_v8  ;;  %v3123_v14 = vpack.c.bf16 %v16441_v40, %v16439_v8 }
 0x58a   :  { %v3187_v11 = vpack.c.bf16 %v2734_v20, %v2730_v22 }
 0x58b   :  { %13567 = vrot.lane.b32.xlu0 %v16445_v33, %s15304_s19 }
 0x58c   :  { %13064 = vmatprep.subr.bf16.mxu1 %v3187_v11 }
 0x58d   :  { %13065 = vmatpush3.bf16.msra.mxu1 %v3187_v11 }
 0x58e   :  { %v16451_v43 = vpop.f32.mrb[148].mxu0 }
 0x58f   :  { %v2740_v37 = vpop.f32.mrb[149].mxu0 }
 0x590   :  { %v16453_v4 = vpop.f32.mrb[150].mxu0 }
 0x591   :  { %v2744_v44 = vpop.f32.mrb[151].mxu0  ;;  %v16457_v63 = vpack.i.bf16 %v16453_v4, %v16451_v43  ;;  %v3124_v48 = vpack.c.bf16 %v16453_v4, %v16451_v43 }
 0x592   :  { %v3188_v46 = vpack.c.bf16 %v2744_v44, %v2740_v37 }
 0x593   :  { %13572 = vrot.lane.b32.xlu1 %v16457_v63, %s15304_s19 }
 0x594   :  { %13066 = vmatprep.subr.bf16.mxu1 %v3188_v46 }
 0x595   :  { %13067 = vmatpush3.bf16.msra.mxu1 %v3188_v46 }
 0x596   :  { %v16463_v56 = vpop.f32.mrb[152].mxu0 }
 0x597   :  { %v2750_v18 = vpop.f32.mrb[153].mxu0 }
 0x598   :  { %v16465_v26 = vpop.f32.mrb[154].mxu0 }
 0x599   :  { %v2754_v21 = vpop.f32.mrb[155].mxu0  ;;  %v16469_v24 = vpack.i.bf16 %v16465_v26, %v16463_v56  ;;  %v3125_v45 = vpack.c.bf16 %v16465_v26, %v16463_v56  ;;  %v14323_v56 = vld [vmem:[%s19520_s13] ss:$36 sps:$4 sm:$0xff]   ;;  %v14326_v26 = vld [vmem:[%s19520_s13 + $0x4c] ss:$36 sps:$4 sm:$0xff]  }
 0x59a   :  { %v3189_v23 = vpack.c.bf16 %v2754_v21, %v2750_v18 }
 0x59b   :  { %13577 = vrot.lane.b32.xlu0 %v16469_v24, %s15304_s19 }
 0x59c   :  { %13068 = vmatprep.subr.bf16.mxu1 %v3189_v23 }
 0x59d   :  { %13069 = vmatpush3.bf16.msra.mxu1 %v3189_v23 }
 0x59e   :  { %v16478_v62 = vpop.f32.mrb[156].mxu0 }
 0x59f   :  { %13587 = vrot.lane.b32.xlu0 %v16397_v31, %s15305_s24  ;;  %v2760_v9 = vpop.f32.mrb[157].mxu0 }
 0x5a0   :  { %v16482_v12 = vpop.f32.mrb[158].mxu0 }
 0x5a1   :  { %v2764_v10 = vpop.f32.mrb[159].mxu0  ;;  %v16486_v17 = vpack.i.bf16 %v16482_v12, %v16478_v62  ;;  %v3126_v28 = vpack.c.bf16 %v16482_v12, %v16478_v62 }
 0x5a2   :  { %v3190_v30 = vpack.c.bf16 %v2764_v10, %v2760_v9 }
 0x5a3   :  { %13597 = vrot.lane.b32.xlu0 %v16409_v42, %s15305_s24  ;;  %13582 = vrot.lane.b32.xlu1 %v16486_v17, %s15304_s19 }
 0x5a4   :  { %13070 = vmatprep.subr.bf16.mxu1 %v3190_v30 }
 0x5a5   :  { %13071 = vmatpush3.bf16.msra.mxu1 %v3190_v30 }
 0x5a7   :  { %13607 = vrot.lane.b32.xlu0 %v16421_v60, %s15305_s24  ;;  %13592 = vrot.lane.b32.xlu1 %v16397_v31, %s15303_s4 }
 0x5ab   :  { %13617 = vrot.lane.b32.xlu0 %v16433_v38, %s15305_s24  ;;  %13602 = vrot.lane.b32.xlu1 %v16409_v42, %s15303_s4 }
 0x5af   :  { %13627 = vrot.lane.b32.xlu0 %v16445_v33, %s15305_s24  ;;  %13612 = vrot.lane.b32.xlu1 %v16421_v60, %s15303_s4 }
 0x5b3   :  { %13637 = vrot.lane.b32.xlu0 %v16457_v63, %s15305_s24  ;;  %13622 = vrot.lane.b32.xlu1 %v16433_v38, %s15303_s4 }
 0x5b7   :  { %13647 = vrot.lane.b32.xlu0 %v16469_v24, %s15305_s24  ;;  %13632 = vrot.lane.b32.xlu1 %v16445_v33, %s15303_s4 }
 0x5bb   :  { %13657 = vrot.lane.b32.xlu0 %v16486_v17, %s15305_s24  ;;  %13642 = vrot.lane.b32.xlu1 %v16457_v63, %s15303_s4 }
 0x5bf   :  { %13667 = vrot.lane.b32.xlu0 %v16397_v31, %s15306_s25  ;;  %13652 = vrot.lane.b32.xlu1 %v16469_v24, %s15303_s4 }
 0x5c3   :  { %13677 = vrot.lane.b32.xlu0 %v16409_v42, %s15306_s25  ;;  %13662 = vrot.lane.b32.xlu1 %v16486_v17, %s15303_s4 }
 0x5c7   :  { %13687 = vrot.lane.b32.xlu0 %v16421_v60, %s15306_s25  ;;  %13672 = vrot.lane.b32.xlu1 %v16397_v31, %s15302_s27 }
 0x5cb   :  { %13697 = vrot.lane.b32.xlu0 %v16433_v38, %s15306_s25  ;;  %13682 = vrot.lane.b32.xlu1 %v16409_v42, %s15302_s27 }
 0x5cf   :  { %13707 = vrot.lane.b32.xlu0 %v16445_v33, %s15306_s25  ;;  %13692 = vrot.lane.b32.xlu1 %v16421_v60, %s15302_s27 }
 0x5d3   :  { %13717 = vrot.lane.b32.xlu0 %v16457_v63, %s15306_s25  ;;  %13702 = vrot.lane.b32.xlu1 %v16433_v38, %s15302_s27 }
 0x5d7   :  { %13727 = vrot.lane.b32.xlu0 %v16469_v24, %s15306_s25  ;;  %13712 = vrot.lane.b32.xlu1 %v16445_v33, %s15302_s27 }
 0x5db   :  { %13737 = vrot.lane.b32.xlu0 %v16486_v17, %s15306_s25  ;;  %13722 = vrot.lane.b32.xlu1 %v16457_v63, %s15302_s27 }
 0x5dd   :  { %v13548_v50 = vpop.permute.xlu0 %13547 }
 0x5de   :  { %v13550_v34 = vunpack.i.h.bf16 %v13548_v50  ;;  %v13549_v41 = vunpack.i.l.bf16 %v13548_v50 }
 0x5df   :  { %13747 = vrot.lane.b32.xlu0 %v16397_v31, %s15307_s26  ;;  %13732 = vrot.lane.b32.xlu1 %v16469_v24, %s15302_s27 }
 0x5e0   :  { %v3127_v35 = vpack.c.bf16 %v13550_v34, %v13549_v41 }
 0x5e2   :  { %12392 = vmatprep.subr.bf16.mxu0 %v3127_v35 }
 0x5e3   :  { %12393 = vmatpush3.bf16.msra.mxu0 %v3119_v53  ;;  %13757 = vrot.lane.b32.xlu0 %v16409_v42, %s15307_s26 }
 0x5e4   :  { %13742 = vrot.lane.b32.xlu1 %v16486_v17, %s15302_s27 }
 0x5e5   :  { %v13553_v49 = vpop.permute.xlu1 %13552 }
 0x5e6   :  { %v13555_v52 = vunpack.i.h.bf16 %v13553_v49  ;;  %v13554_v57 = vunpack.i.l.bf16 %v13553_v49 }
 0x5e7   :  { %13767 = vrot.lane.b32.xlu0 %v16421_v60, %s15307_s26 }
 0x5e8   :  { %13752 = vrot.lane.b32.xlu1 %v16397_v31, %s15301_s21  ;;  %v3128_v55 = vpack.c.bf16 %v13555_v52, %v13554_v57  ;;  %v14328_v57 = vld [vmem:[%s19520_s13 + $0x48] ss:$36 sps:$4 sm:$0xff]  }
 0x5ea   :  { %12394 = vmatprep.subr.bf16.mxu0 %v3128_v55  ;;  %v14329_v55 = vld [vmem:[%s19520_s13 + $0x94] ss:$36 sps:$4 sm:$0xff]  }
 0x5eb   :  { %12395 = vmatpush3.bf16.msra.mxu0 %v3120_v54  ;;  %13777 = vrot.lane.b32.xlu0 %v16433_v38, %s15307_s26 }
 0x5ec   :  { %13762 = vrot.lane.b32.xlu1 %v16409_v42, %s15301_s21 }
 0x5ed   :  { %v13558_v27 = vpop.permute.xlu0 %13557 }
 0x5ee   :  { %v13560_v29 = vunpack.i.h.bf16 %v13558_v27  ;;  %v13559_v53 = vunpack.i.l.bf16 %v13558_v27 }
 0x5ef   :  { %13787 = vrot.lane.b32.xlu0 %v16445_v33, %s15307_s26 }
 0x5f0   :  { %13772 = vrot.lane.b32.xlu1 %v16421_v60, %s15301_s21  ;;  %v3129_v31 = vpack.c.bf16 %v13560_v29, %v13559_v53 }
 0x5f2   :  { %12396 = vmatprep.subr.bf16.mxu0 %v3129_v31 }
 0x5f3   :  { %12397 = vmatpush3.bf16.msra.mxu0 %v3121_v36  ;;  %13797 = vrot.lane.b32.xlu0 %v16457_v63, %s15307_s26 }
 0x5f4   :  { %13782 = vrot.lane.b32.xlu1 %v16433_v38, %s15301_s21 }
 0x5f5   :  { %v13563_v32 = vpop.permute.xlu1 %13562 }
 0x5f6   :  { %v13565_v39 = vunpack.i.h.bf16 %v13563_v32  ;;  %v13564_v42 = vunpack.i.l.bf16 %v13563_v32 }
 0x5f7   :  { %13807 = vrot.lane.b32.xlu0 %v16469_v24, %s15307_s26 }
 0x5f8   :  { %13792 = vrot.lane.b32.xlu1 %v16445_v33, %s15301_s21  ;;  %v3130_v54 = vpack.c.bf16 %v13565_v39, %v13564_v42 }
 0x5fa   :  { %12398 = vmatprep.subr.bf16.mxu0 %v3130_v54 }
 0x5fb   :  { %12399 = vmatpush3.bf16.msra.mxu0 %v3122_v6  ;;  %13817 = vrot.lane.b32.xlu0 %v16486_v17, %s15307_s26 }
 0x5fc   :  { %13802 = vrot.lane.b32.xlu1 %v16457_v63, %s15301_s21 }
 0x5fd   :  { %v13568_v16 = vpop.permute.xlu0 %13567 }
 0x5fe   :  { %v13570_v13 = vunpack.i.h.bf16 %v13568_v16  ;;  %v13569_v60 = vunpack.i.l.bf16 %v13568_v16 }
 0x600   :  { %13812 = vrot.lane.b32.xlu1 %v16469_v24, %s15301_s21  ;;  %v3131_v36 = vpack.c.bf16 %v13570_v13, %v13569_v60 }
 0x602   :  { %12400 = vmatprep.subr.bf16.mxu0 %v3131_v36 }
 0x603   :  { %12401 = vmatpush3.bf16.msra.mxu0 %v3123_v14 }
 0x604   :  { %13822 = vrot.lane.b32.xlu1 %v16486_v17, %s15301_s21 }
 0x605   :  { %v13573_v5 = vpop.permute.xlu1 %13572 }
 0x606   :  { %v13575_v58 = vunpack.i.h.bf16 %v13573_v5  ;;  %v13574_v59 = vunpack.i.l.bf16 %v13573_v5 }
 0x608   :  { %v3132_v38 = vpack.c.bf16 %v13575_v58, %v13574_v59 }
 0x60a   :  { %12402 = vmatprep.subr.bf16.mxu0 %v3132_v38 }
 0x60b   :  { %12403 = vmatpush3.bf16.msra.mxu0 %v3124_v48 }
 0x60d   :  { %v13578_v25 = vpop.permute.xlu0 %13577 }
 0x60e   :  { %v13580_v6 = vunpack.i.h.bf16 %v13578_v25  ;;  %v13579_v22 = vunpack.i.l.bf16 %v13578_v25  ;;  %v14331_v25 = vld [vmem:[%s19520_s13 + $0x90] ss:$36 sps:$4 sm:$0xff]  }
 0x610   :  { %v3133_v20 = vpack.c.bf16 %v13580_v6, %v13579_v22  ;;  %v14332_v6 = vld [vmem:[%s19520_s13 + $0xdc] ss:$36 sps:$4 sm:$0xff]  }
 0x611   :  { %v13588_v33 = vpop.permute.xlu0 %13587 }
 0x612   :  { %12404 = vmatprep.subr.bf16.mxu0 %v3133_v20  ;;  %v13590_v11 = vunpack.i.h.bf16 %v13588_v33  ;;  %v13589_v14 = vunpack.i.l.bf16 %v13588_v33 }
 0x613   :  { %12405 = vmatpush3.bf16.msra.mxu0 %v3125_v45 }
 0x614   :  { %v3143_v24 = vpack.c.bf16 %v13590_v11, %v13589_v14 }
 0x615   :  { %v13598_v8 = vpop.permute.xlu0 %13597  ;;  %v13583_v40 = vpop.permute.xlu1 %13582 }
 0x616   :  { %v13585_v37 = vunpack.i.h.bf16 %v13583_v40  ;;  %v13584_v44 = vunpack.i.l.bf16 %v13583_v40  ;;  %v13600_v46 = vunpack.i.h.bf16 %v13598_v8  ;;  %v13599_v43 = vunpack.i.l.bf16 %v13598_v8 }
 0x618   :  { %v3134_v63 = vpack.c.bf16 %v13585_v37, %v13584_v44  ;;  %v3144_v9 = vpack.c.bf16 %v13600_v46, %v13599_v43 }
 0x619   :  { %v13608_v4 = vpop.permute.xlu0 %13607  ;;  %v13593_v48 = vpop.permute.xlu1 %13592 }
 0x61a   :  { %v13595_v18 = vunpack.i.h.bf16 %v13593_v48  ;;  %v13594_v21 = vunpack.i.l.bf16 %v13593_v48  ;;  %12406 = vmatprep.subr.bf16.mxu0 %v3134_v63  ;;  %v13610_v10 = vunpack.i.h.bf16 %v13608_v4  ;;  %v13609_v17 = vunpack.i.l.bf16 %v13608_v4 }
 0x61b   :  { %12407 = vmatpush3.bf16.msra.mxu0 %v3126_v28 }
 0x61c   :  { %v3135_v23 = vpack.c.bf16 %v13595_v18, %v13594_v21  ;;  %12456 = vmatprep.subr.bf16.mxu0 %v3143_v24  ;;  %v3145_v52 = vpack.c.bf16 %v13610_v10, %v13609_v17  ;;  %v14334_v21 = vld [vmem:[%s19520_s13 + $0xd8] ss:$36 sps:$4 sm:$0xff]  }
 0x61d   :  { %v13618_v45 = vpop.permute.xlu0 %13617  ;;  %v13603_v61 = vpop.permute.xlu1 %13602 }
 0x61e   :  { %v13605_v30 = vunpack.i.h.bf16 %v13603_v61  ;;  %v13604_v50 = vunpack.i.l.bf16 %v13603_v61  ;;  %3673 = vmatmul.mubr.bf16.vlgmr.msra.gmra.mrb[160].mxu0 %v14323_v56  ;;  %v13620_v62 = vunpack.i.h.bf16 %v13618_v45  ;;  %v13619_v12 = vunpack.i.l.bf16 %v13618_v45  ;;  %v14335_v56 = vld [vmem:[%s19520_s13 + $0x124] ss:$36 sps:$4 sm:$0xff]  }
 0x61f   :  { %12457 = vmatpush3.bf16.msra.mxu0 %v3135_v23  ;;  %3680 = vmatprep.mubr.bf16.mxu0 %v14326_v26 }
 0x620   :  { %v3136_v34 = vpack.c.bf16 %v13605_v30, %v13604_v50  ;;  %12458 = vmatprep.subr.bf16.mxu0 %v3144_v9  ;;  %v3146_v31 = vpack.c.bf16 %v13620_v62, %v13619_v12  ;;  %v14338_v62 = vld [vmem:[%s19520_s13 + $0x16c] ss:$36 sps:$4 sm:$0xff]  }
 0x621   :  { %v13628_v28 = vpop.permute.xlu0 %13627  ;;  %v13613_v41 = vpop.permute.xlu1 %13612  ;;  %v14340_v12 = vld [vmem:[%s19520_s13 + $0x168] ss:$36 sps:$4 sm:$0xff]  }
 0x622   :  { %v13615_v35 = vunpack.i.h.bf16 %v13613_v41  ;;  %v13614_v49 = vunpack.i.l.bf16 %v13613_v41  ;;  %v13630_v32 = vunpack.i.h.bf16 %v13628_v28  ;;  %v13629_v39 = vunpack.i.l.bf16 %v13628_v28  ;;  %v14341_v28 = vld [vmem:[%s19520_s13 + $0x1b4] ss:$36 sps:$4 sm:$0xff]  }
 0x623   :  { %12459 = vmatpush3.bf16.msra.mxu0 %v3136_v34  ;;  %v14337_v34 = vld [vmem:[%s19520_s13 + $0x120] ss:$36 sps:$4 sm:$0xff]  }
 0x624   :  { %v3137_v27 = vpack.c.bf16 %v13615_v35, %v13614_v49  ;;  %12460 = vmatprep.subr.bf16.mxu0 %v3145_v52  ;;  %v3147_v58 = vpack.c.bf16 %v13630_v32, %v13629_v39  ;;  %v14343_v49 = vld [vmem:[%s19520_s13 + $0x1b0] ss:$36 sps:$4 sm:$0xff]   ;;  %v14344_v52 = vld [vmem:[%s19520_s13 + $0x1fc] ss:$36 sps:$4 sm:$0xff]  }
 0x625   :  { %v13638_v29 = vpop.permute.xlu0 %13637  ;;  %v13623_v53 = vpop.permute.xlu1 %13622 }
 0x626   :  { %v13625_v42 = vunpack.i.h.bf16 %v13623_v53  ;;  %v13624_v54 = vunpack.i.l.bf16 %v13623_v53  ;;  %3681 = vmatmul.mubr.bf16.gmra.mrb[164].mxu0 %v14328_v57  ;;  %v13640_v13 = vunpack.i.h.bf16 %v13638_v29  ;;  %v13639_v60 = vunpack.i.l.bf16 %v13638_v29  ;;  %v14349_v29 = vld [vmem:[%s19520_s13 + $0xc] ss:$36 sps:$4 sm:$0xff]  }
 0x627   :  { %12461 = vmatpush3.bf16.msra.mxu0 %v3137_v27  ;;  %3688 = vmatprep.mubr.bf16.mxu0 %v14329_v55  ;;  %v14346_v27 = vld [vmem:[%s19520_s13 + $0x1f8] ss:$36 sps:$4 sm:$0xff]  }
 0x628   :  { %v3138_v16 = vpack.c.bf16 %v13625_v42, %v13624_v54  ;;  %12462 = vmatprep.subr.bf16.mxu0 %v3146_v31  ;;  %v3148_v20 = vpack.c.bf16 %v13640_v13, %v13639_v60  ;;  %v14347_v13 = vld [vmem:[%s19520_s13 + $0x8] ss:$36 sps:$4 sm:$0xff]  }
 0x629   :  { %v13648_v36 = vpop.permute.xlu0 %13647  ;;  %v13633_v5 = vpop.permute.xlu1 %13632 }
 0x62a   :  { %v13635_v59 = vunpack.i.h.bf16 %v13633_v5  ;;  %v13634_v38 = vunpack.i.l.bf16 %v13633_v5  ;;  %v13650_v40 = vunpack.i.h.bf16 %v13648_v36  ;;  %v13649_v11 = vunpack.i.l.bf16 %v13648_v36  ;;  %v14350_v36 = vld [vmem:[%s19520_s13 + $0x54] ss:$36 sps:$4 sm:$0xff]  }
 0x62b   :  { %12463 = vmatpush3.bf16.msra.mxu0 %v3138_v16 }
 0x62c   :  { %v3139_v22 = vpack.c.bf16 %v13635_v59, %v13634_v38  ;;  %12464 = vmatprep.subr.bf16.mxu0 %v3147_v58  ;;  %v3149_v4 = vpack.c.bf16 %v13650_v40, %v13649_v11 }
 0x62d   :  { %v13658_v33 = vpop.permute.xlu0 %13657  ;;  %v13643_v8 = vpop.permute.xlu1 %13642 }
 0x62e   :  { %v13645_v14 = vunpack.i.h.bf16 %v13643_v8  ;;  %v13644_v37 = vunpack.i.l.bf16 %v13643_v8  ;;  %3689 = vmatmul.mubr.bf16.gmra.mrb[168].mxu0 %v14331_v25  ;;  %v13660_v63 = vunpack.i.h.bf16 %v13658_v33  ;;  %v13659_v46 = vunpack.i.l.bf16 %v13658_v33 }
 0x62f   :  { %12465 = vmatpush3.bf16.msra.mxu0 %v3139_v22  ;;  %3696 = vmatprep.mubr.bf16.mxu0 %v14332_v6  ;;  %v14401_v22 = vld [vmem:[%s19520_s13 + $0x20] ss:$36 sps:$4 sm:$0xff]  }
 0x630   :  { %v3140_v44 = vpack.c.bf16 %v13645_v14, %v13644_v37  ;;  %12466 = vmatprep.subr.bf16.mxu0 %v3148_v20  ;;  %v3150_v23 = vpack.c.bf16 %v13660_v63, %v13659_v46  ;;  %v14402_v20 = vld [vmem:[%s19520_s13 + $0x68] ss:$36 sps:$4 sm:$0xff]   ;;  %v14352_v37 = vld [vmem:[%s19520_s13 + $0x50] ss:$36 sps:$4 sm:$0xff]   ;;  %13072 = vmatprep.mubr.bf16.mxu1 %v14401_v22 }
 0x631   :  { %v13653_v43 = vpop.permute.xlu1 %13652  ;;  %v13668_v24 = vpop.permute.xlu0 %13667  ;;  %13073 = vmatmul.mubr.bf16.vlgmr.msra.gmra.mrb[128].mxu1 %v14402_v20  ;;  %v14361_v20 = vld [vmem:[%s19520_s13 + $0x128] ss:$36 sps:$4 sm:$0xff]  }
 0x632   :  { %v13655_v48 = vunpack.i.h.bf16 %v13653_v43  ;;  %v13654_v18 = vunpack.i.l.bf16 %v13653_v43  ;;  %v13670_v61 = vunpack.i.h.bf16 %v13668_v24  ;;  %v13669_v9 = vunpack.i.l.bf16 %v13668_v24  ;;  %v14353_v43 = vld [vmem:[%s19520_s13 + $0x9c] ss:$36 sps:$4 sm:$0xff]  }
 0x633   :  { %12467 = vmatpush3.bf16.msra.mxu0 %v3140_v44 }
 0x634   :  { %v3141_v26 = vpack.c.bf16 %v13655_v48, %v13654_v18  ;;  %12468 = vmatprep.subr.bf16.mxu0 %v3149_v4  ;;  %v3159_v50 = vpack.c.bf16 %v13670_v61, %v13669_v9 }
 0x635   :  { %v13663_v45 = vpop.permute.xlu1 %13662  ;;  %v13678_v35 = vpop.permute.xlu0 %13677 }
 0x636   :  { %v13665_v10 = vunpack.i.h.bf16 %v13663_v45  ;;  %v13664_v17 = vunpack.i.l.bf16 %v13663_v45  ;;  %3697 = vmatmul.mubr.bf16.gmra.mrb[172].mxu0 %v14334_v21  ;;  %v13680_v42 = vunpack.i.h.bf16 %v13678_v35  ;;  %v13679_v54 = vunpack.i.l.bf16 %v13678_v35  ;;  %v14355_v45 = vld [vmem:[%s19520_s13 + $0x98] ss:$36 sps:$4 sm:$0xff]  }
 0x637   :  { %12469 = vmatpush3.bf16.msra.mxu0 %v3141_v26  ;;  %3704 = vmatprep.mubr.bf16.mxu0 %v14335_v56 }
 0x638   :  { %v3142_v30 = vpack.c.bf16 %v13665_v10, %v13664_v17  ;;  %12470 = vmatprep.subr.bf16.mxu0 %v3150_v23  ;;  %v3160_v38 = vpack.c.bf16 %v13680_v42, %v13679_v54  ;;  %v14358_v54 = vld [vmem:[%s19520_s13 + $0xe0] ss:$36 sps:$4 sm:$0xff]  }
 0x639   :  { %v13673_v41 = vpop.permute.xlu1 %13672  ;;  %v13688_v55 = vpop.permute.xlu0 %13687 }
 0x63a   :  { %v13675_v32 = vunpack.i.h.bf16 %v13673_v41  ;;  %v13674_v39 = vunpack.i.l.bf16 %v13673_v41  ;;  %v13690_v25 = vunpack.i.h.bf16 %v13688_v55  ;;  %v13689_v6 = vunpack.i.l.bf16 %v13688_v55 }
 0x63b   :  { %12471 = vmatpush3.bf16.msra.mxu0 %v3142_v30 }
 0x63c   :  { %12520 = vmatprep.subr.bf16.mxu0 %v3159_v50  ;;  %v3151_v5 = vpack.c.bf16 %v13675_v32, %v13674_v39  ;;  %v3161_v44 = vpack.c.bf16 %v13690_v25, %v13689_v6 }
 0x63d   :  { %v13683_v57 = vpop.permute.xlu1 %13682  ;;  %v13698_v31 = vpop.permute.xlu0 %13697 }
 0x63e   :  { %3705 = vmatmul.mubr.bf16.gmra.mrb[176].mxu0 %v14337_v34  ;;  %v13685_v58 = vunpack.i.h.bf16 %v13683_v57  ;;  %v13684_v59 = vunpack.i.l.bf16 %v13683_v57  ;;  %v13700_v63 = vunpack.i.h.bf16 %v13698_v31  ;;  %v13699_v46 = vunpack.i.l.bf16 %v13698_v31  ;;  %v14356_v34 = vld [vmem:[%s19520_s13 + $0xe4] ss:$36 sps:$4 sm:$0xff]  }
 0x63f   :  { %3712 = vmatprep.mubr.bf16.mxu0 %v14338_v62 }
 0x640   :  { %v3152_v8 = vpack.c.bf16 %v13685_v58, %v13684_v59  ;;  %v3162_v21 = vpack.c.bf16 %v13700_v63, %v13699_v46  ;;  %v14368_v46 = vld [vmem:[%s19520_s13 + $0x204] ss:$36 sps:$4 sm:$0xff]  }
 0x641   :  { %v13693_v53 = vpop.permute.xlu1 %13692  ;;  %v13708_v60 = vpop.permute.xlu0 %13707 }
 0x642   :  { %v13695_v40 = vunpack.i.h.bf16 %v13693_v53  ;;  %v13694_v11 = vunpack.i.l.bf16 %v13693_v53  ;;  %v13710_v24 = vunpack.i.h.bf16 %v13708_v60  ;;  %v13709_v56 = vunpack.i.l.bf16 %v13708_v60  ;;  %v14421_v53 = vld [vmem:[%s19520_s13 + $0xb0] ss:$36 sps:$4 sm:$0xff]  }
 0x643   :  { %v14359_v60 = vld [vmem:[%s19520_s13 + $0x12c] ss:$36 sps:$4 sm:$0xff]   ;;  %13076 = vmatprep.mubr.bf16.mxu1 %v14421_v53 }
 0x644   :  { %v3153_v4 = vpack.c.bf16 %v13695_v40, %v13694_v11  ;;  %v3163_v17 = vpack.c.bf16 %v13710_v24, %v13709_v56  ;;  %v14364_v40 = vld [vmem:[%s19520_s13 + $0x170] ss:$36 sps:$4 sm:$0xff]   ;;  %v14442_v11 = vld [vmem:[%s19520_s13 + $0x188] ss:$36 sps:$4 sm:$0xff]  }
 0x645   :  { %v13703_v16 = vpop.permute.xlu1 %13702  ;;  %v13718_v14 = vpop.permute.xlu0 %13717  ;;  %v14373_v24 = vld [vmem:[%s19520_s13 + $0x14] ss:$36 sps:$4 sm:$0xff]  }
 0x646   :  { %3713 = vmatmul.mubr.bf16.gmra.mrb[180].mxu0 %v14340_v12  ;;  %v13705_v48 = vunpack.i.h.bf16 %v13703_v16  ;;  %v13704_v18 = vunpack.i.l.bf16 %v13703_v16  ;;  %v13720_v30 = vunpack.i.h.bf16 %v13718_v14  ;;  %v13719_v50 = vunpack.i.l.bf16 %v13718_v14  ;;  %v14422_v16 = vld [vmem:[%s19520_s13 + $0xf8] ss:$36 sps:$4 sm:$0xff]  }
 0x647   :  { %3720 = vmatprep.mubr.bf16.mxu0 %v14341_v28  ;;  %13077 = vmatmul.mubr.bf16.gmra.mrb[132].mxu1 %v14422_v16  ;;  %v14365_v14 = vld [vmem:[%s19520_s13 + $0x1bc] ss:$36 sps:$4 sm:$0xff]  }
 0x648   :  { %v3154_v61 = vpack.c.bf16 %v13705_v48, %v13704_v18  ;;  %v14461_v48 = vld [vmem:[%s19520_s13 + $0x1d0] ss:$36 sps:$4 sm:$0xff]   ;;  %v14370_v18 = vld [vmem:[%s19520_s13 + $0x200] ss:$36 sps:$4 sm:$0xff]  }
 0x649   :  { %v13713_v33 = vpop.permute.xlu1 %13712  ;;  %v13728_v23 = vpop.permute.xlu0 %13727 }
 0x64a   :  { %v13715_v9 = vunpack.i.h.bf16 %v13713_v33  ;;  %v13714_v10 = vunpack.i.l.bf16 %v13713_v33  ;;  %v13729_v57 = vunpack.i.l.bf16 %v13728_v23  ;;  %v14362_v33 = vld [vmem:[%s19520_s13 + $0x174] ss:$36 sps:$4 sm:$0xff]  }
 0x64c   :  { %v3155_v12 = vpack.c.bf16 %v13715_v9, %v13714_v10 }
 0x64d   :  { %v13723_v26 = vpop.permute.xlu1 %13722  ;;  %v13738_v28 = vpop.permute.xlu0 %13737 }
 0x64e   :  { %3721 = vmatmul.mubr.bf16.gmra.mrb[184].mxu0 %v14343_v49  ;;  %v13725_v41 = vunpack.i.h.bf16 %v13723_v26  ;;  %v13724_v35 = vunpack.i.l.bf16 %v13723_v26  ;;  %v3164_v49 = vpack.c.bf16 %v13720_v30, %v13719_v50  ;;  %v13740_v32 = vunpack.i.h.bf16 %v13738_v28  ;;  %v14374_v30 = vld [vmem:[%s19520_s13 + $0x5c] ss:$36 sps:$4 sm:$0xff]  }
 0x64f   :  { %3728 = vmatprep.mubr.bf16.mxu0 %v14344_v52  ;;  %v13730_v52 = vunpack.i.h.bf16 %v13728_v23  ;;  %v13739_v39 = vunpack.i.l.bf16 %v13738_v28 }
 0x650   :  { %v3156_v55 = vpack.c.bf16 %v13725_v41, %v13724_v35 }
 0x651   :  { %v13733_v62 = vpop.permute.xlu1 %13732  ;;  %v3165_v31 = vpack.c.bf16 %v13730_v52, %v13729_v57  ;;  %v3166_v59 = vpack.c.bf16 %v13740_v32, %v13739_v39  ;;  %v14377_v39 = vld [vmem:[%s19520_s13 + $0xa4] ss:$36 sps:$4 sm:$0xff]  }
 0x656   :  { %3729 = vmatmul.mubr.bf16.gmra.mrb[188].mxu0 %v14346_v27  ;;  %v13735_v27 = vunpack.i.h.bf16 %v13733_v62  ;;  %v13743_v42 = vpop.permute.xlu1 %13742 }
 0x657   :  { %3769 = vmatprep.mubr.bf16.mxu0 %v14349_v29  ;;  %v13734_v29 = vunpack.i.l.bf16 %v13733_v62  ;;  %v13744_v58 = vunpack.i.l.bf16 %v13743_v42 }
 0x65e   :  { %3770 = vmatmul.mubr.bf16.vlgmr.msra.gmra.mrb[192].mxu0 %v14347_v13  ;;  %v13748_v13 = vpop.permute.xlu0 %13747 }
 0x65f   :  { %12521 = vmatpush3.bf16.msra.mxu0 %v3151_v5  ;;  %3777 = vmatprep.mubr.bf16.mxu0 %v14350_v36  ;;  %v3157_v36 = vpack.c.bf16 %v13735_v27, %v13734_v29  ;;  %v13745_v5 = vunpack.i.h.bf16 %v13743_v42  ;;  %v13749_v25 = vunpack.i.l.bf16 %v13748_v13 }
 0x660   :  { %12522 = vmatprep.subr.bf16.mxu0 %v3160_v38  ;;  %v13750_v38 = vunpack.i.h.bf16 %v13748_v13 }
 0x661   :  { %v3158_v6 = vpack.c.bf16 %v13745_v5, %v13744_v58 }
 0x662   :  { %v3175_v22 = vpack.c.bf16 %v13750_v38, %v13749_v25  ;;  %v13758_v63 = vpop.permute.xlu0 %13757 }
 0x663   :  { %12523 = vmatpush3.bf16.msra.mxu0 %v3152_v8  ;;  %v14441_v8 = vld [vmem:[%s19520_s13 + $0x140] ss:$36 sps:$4 sm:$0xff]   ;;  %v13759_v9 = vunpack.i.l.bf16 %v13758_v63 }
 0x664   :  { %12524 = vmatprep.subr.bf16.mxu0 %v3161_v44  ;;  %13080 = vmatprep.mubr.bf16.mxu1 %v14441_v8  ;;  %v14367_v44 = vld [vmem:[%s19520_s13 + $0x1b8] ss:$36 sps:$4 sm:$0xff]   ;;  %v14380_v8 = vld [vmem:[%s19520_s13 + $0xec] ss:$36 sps:$4 sm:$0xff]  }
 0x665   :  { %13081 = vmatmul.mubr.bf16.gmra.mrb[136].mxu1 %v14442_v11 }
 0x666   :  { %3778 = vmatmul.mubr.bf16.gmra.mrb[196].mxu0 %v14352_v37  ;;  %v13753_v37 = vpop.permute.xlu1 %13752  ;;  %13084 = vmatprep.mubr.bf16.mxu1 %v14461_v48 }
 0x667   :  { %12525 = vmatpush3.bf16.msra.mxu0 %v3153_v4  ;;  %3785 = vmatprep.mubr.bf16.mxu0 %v14353_v43  ;;  %v13768_v4 = vpop.permute.xlu0 %13767  ;;  %v13755_v23 = vunpack.i.h.bf16 %v13753_v37 }
 0x668   :  { %12526 = vmatprep.subr.bf16.mxu0 %v3162_v21  ;;  %v14462_v21 = vld [vmem:[%s19520_s13 + $0x218] ss:$36 sps:$4 sm:$0xff]   ;;  %v13770_v41 = vunpack.i.h.bf16 %v13768_v4  ;;  %v13769_v35 = vunpack.i.l.bf16 %v13768_v4 }
 0x66a   :  { %v13763_v43 = vpop.permute.xlu1 %13762  ;;  %v3177_v27 = vpack.c.bf16 %v13770_v41, %v13769_v35  ;;  %v14391_v41 = vld [vmem:[%s19520_s13 + $0x1c0] ss:$36 sps:$4 sm:$0xff]   ;;  %v14392_v35 = vld [vmem:[%s19520_s13 + $0x20c] ss:$36 sps:$4 sm:$0xff]  }
 0x66b   :  { %12527 = vmatpush3.bf16.msra.mxu0 %v3154_v61  ;;  %v13778_v26 = vpop.permute.xlu0 %13777  ;;  %v13760_v61 = vunpack.i.h.bf16 %v13758_v63  ;;  %v13764_v62 = vunpack.i.l.bf16 %v13763_v43 }
 0x66c   :  { %12528 = vmatprep.subr.bf16.mxu0 %v3163_v17  ;;  %v14371_v17 = vld [vmem:[%s19520_s13 + $0x10] ss:$36 sps:$4 sm:$0xff]   ;;  %v13780_v29 = vunpack.i.h.bf16 %v13778_v26  ;;  %v13779_v53 = vunpack.i.l.bf16 %v13778_v26 }
 0x66d   :  { %13085 = vmatmul.mubr.bf16.gmra.mrb[140].mxu1 %v14462_v21  ;;  %v3176_v28 = vpack.c.bf16 %v13760_v61, %v13759_v9 }
 0x66e   :  { %3786 = vmatmul.mubr.bf16.gmra.mrb[200].mxu0 %v14355_v45  ;;  %v13773_v56 = vpop.permute.xlu1 %13772  ;;  %v13754_v45 = vunpack.i.l.bf16 %v13753_v37  ;;  %v3178_v13 = vpack.c.bf16 %v13780_v29, %v13779_v53  ;;  %v14405_v29 = vld [vmem:[%s19521_s5 + $0x14] ss:$8 sps:$4 sm:$0xff]   ;;  %v14403_v53 = vld [vmem:[%s19521_s5 + $0x10] ss:$8 sps:$4 sm:$0xff]  }
 0x66f   :  { %12529 = vmatpush3.bf16.msra.mxu0 %v3155_v12  ;;  %3793 = vmatprep.mubr.bf16.mxu0 %v14356_v34  ;;  %v13765_v34 = vunpack.i.h.bf16 %v13763_v43  ;;  %v13788_v12 = vpop.permute.xlu0 %13787  ;;  %v13775_v57 = vunpack.i.h.bf16 %v13773_v56 }
 0x670   :  { %12530 = vmatprep.subr.bf16.mxu0 %v3164_v49  ;;  %v3167_v50 = vpack.c.bf16 %v13755_v23, %v13754_v45  ;;  %v14382_v23 = vld [vmem:[%s19520_s13 + $0xe8] ss:$36 sps:$4 sm:$0xff]   ;;  %v14383_v45 = vld [vmem:[%s19520_s13 + $0x134] ss:$36 sps:$4 sm:$0xff]  }
 0x671   :  { %v3168_v52 = vpack.c.bf16 %v13765_v34, %v13764_v62  ;;  %v14385_v34 = vld [vmem:[%s19520_s13 + $0x130] ss:$36 sps:$4 sm:$0xff]   ;;  %v14386_v62 = vld [vmem:[%s19520_s13 + $0x17c] ss:$36 sps:$4 sm:$0xff]  }
 0x672   :  { %v13783_v10 = vpop.permute.xlu1 %13782 }
 0x673   :  { %12531 = vmatpush3.bf16.msra.mxu0 %v3156_v55  ;;  %v13774_v55 = vunpack.i.l.bf16 %v13773_v56  ;;  %v13798_v32 = vpop.permute.xlu0 %13797  ;;  %v13784_v16 = vunpack.i.l.bf16 %v13783_v10 }
 0x674   :  { %12532 = vmatprep.subr.bf16.mxu0 %v3165_v31  ;;  %v14376_v31 = vld [vmem:[%s19520_s13 + $0x58] ss:$36 sps:$4 sm:$0xff]  }
 0x675   :  { %v3169_v42 = vpack.c.bf16 %v13775_v57, %v13774_v55  ;;  %v14395_v57 = vld [vmem:[%s19520_s13 + $0x18] ss:$36 sps:$4 sm:$0xff]   ;;  %v14398_v55 = vld [vmem:[%s19521_s5] ss:$8 sps:$4 sm:$0xff]  }
 0x676   :  { %3794 = vmatmul.mubr.bf16.gmra.mrb[204].mxu0 %v14358_v54  ;;  %v13793_v49 = vpop.permute.xlu1 %13792  ;;  %v13785_v54 = vunpack.i.h.bf16 %v13783_v10 }
 0x677   :  { %12533 = vmatpush3.bf16.msra.mxu0 %v3157_v36  ;;  %3801 = vmatprep.mubr.bf16.mxu0 %v14359_v60  ;;  %v13790_v60 = vunpack.i.h.bf16 %v13788_v12  ;;  %v13789_v36 = vunpack.i.l.bf16 %v13788_v12  ;;  %v13795_v38 = vunpack.i.h.bf16 %v13793_v49  ;;  %v13794_v25 = vunpack.i.l.bf16 %v13793_v49  ;;  %v14388_v12 = vld [vmem:[%s19520_s13 + $0x178] ss:$36 sps:$4 sm:$0xff]   ;;  %v14394_v49 = vld [vmem:[%s19520_s13 + $0x208] ss:$36 sps:$4 sm:$0xff]  }
 0x678   :  { %12534 = vmatprep.subr.bf16.mxu0 %v3166_v59  ;;  %v3170_v58 = vpack.c.bf16 %v13785_v54, %v13784_v16  ;;  %v13808_v59 = vpop.permute.xlu0 %13807  ;;  %v14414_v54 = vld [vmem:[%s19521_s5 + $0x34] ss:$8 sps:$4 sm:$0xff]   ;;  %v14412_v16 = vld [vmem:[%s19521_s5 + $0x30] ss:$8 sps:$4 sm:$0xff]  }
 0x679   :  { %v3171_v11 = vpack.c.bf16 %v13795_v38, %v13794_v25  ;;  %v13810_v63 = vunpack.i.h.bf16 %v13808_v59  ;;  %v14431_v38 = vld [vmem:[%s19521_s5 + $0x64] ss:$8 sps:$4 sm:$0xff]  }
 0x67a   :  { %v13803_v5 = vpop.permute.xlu1 %13802 }
 0x67b   :  { %12535 = vmatpush3.bf16.msra.mxu0 %v3158_v6  ;;  %v3179_v6 = vpack.c.bf16 %v13790_v60, %v13789_v36  ;;  %v13804_v37 = vunpack.i.l.bf16 %v13803_v5  ;;  %v14415_v60 = vld [vmem:[%s19520_s13 + $0xa8] ss:$36 sps:$4 sm:$0xff]  }
 0x67c   :  { %12584 = vmatprep.subr.bf16.mxu0 %v3175_v22  ;;  %v13800_v22 = vunpack.i.h.bf16 %v13798_v32  ;;  %v13818_v43 = vpop.permute.xlu0 %13817  ;;  %v14418_v36 = vld [vmem:[%s19521_s5 + $0x40] ss:$8 sps:$4 sm:$0xff]  }
 0x67d   :  { %v13819_v56 = vunpack.i.l.bf16 %v13818_v43 }
 0x67e   :  { %3802 = vmatmul.mubr.bf16.gmra.mrb[208].mxu0 %v14361_v20  ;;  %v13799_v20 = vunpack.i.l.bf16 %v13798_v32  ;;  %v14406_v32 = vld [vmem:[%s19520_s13 + $0x60] ss:$36 sps:$4 sm:$0xff]  }
 0x67f   :  { %3809 = vmatprep.mubr.bf16.mxu0 %v14362_v33  ;;  %v14379_v33 = vld [vmem:[%s19520_s13 + $0xa0] ss:$36 sps:$4 sm:$0xff]  }
 0x686   :  { %3810 = vmatmul.mubr.bf16.gmra.mrb[212].mxu0 %v14364_v40  ;;  %v13813_v40 = vpop.permute.xlu1 %13812 }
 0x687   :  { %3817 = vmatprep.mubr.bf16.mxu0 %v14365_v14  ;;  %v13805_v14 = vunpack.i.h.bf16 %v13803_v5  ;;  %v13815_v48 = vunpack.i.h.bf16 %v13813_v40  ;;  %v14428_v5 = vld [vmem:[%s19520_s13 + $0xf4] ss:$36 sps:$4 sm:$0xff]  }
 0x689   :  { %v3172_v4 = vpack.c.bf16 %v13805_v14, %v13804_v37  ;;  %v14434_v14 = vld [vmem:[%s19521_s5 + $0x74] ss:$8 sps:$4 sm:$0xff]  }
 0x68a   :  { %v13823_v26 = vpop.permute.xlu1 %13822 }
 0x68b   :  { %v13825_v9 = vunpack.i.h.bf16 %v13823_v26  ;;  %v13824_v10 = vunpack.i.l.bf16 %v13823_v26  ;;  %v14445_v26 = vld [vmem:[%s19521_s5 + $0x94] ss:$8 sps:$4 sm:$0xff]  }
 0x68e   :  { %3818 = vmatmul.mubr.bf16.gmra.mrb[216].mxu0 %v14367_v44  ;;  %v3180_v44 = vpack.c.bf16 %v13800_v22, %v13799_v20  ;;  %v14426_v22 = vld [vmem:[%s19520_s13 + $0xf0] ss:$36 sps:$4 sm:$0xff]  }
 0x68f   :  { %3825 = vmatprep.mubr.bf16.mxu0 %v14368_v46  ;;  %v13809_v46 = vunpack.i.l.bf16 %v13808_v59  ;;  %v14423_v59 = vld [vmem:[%s19521_s5 + $0x50] ss:$8 sps:$4 sm:$0xff]  }
 0x691   :  { %v3181_v21 = vpack.c.bf16 %v13810_v63, %v13809_v46  ;;  %v14440_v63 = vld [vmem:[%s19521_s5 + $0x84] ss:$8 sps:$4 sm:$0xff]  }
 0x696   :  { %3826 = vmatmul.mubr.bf16.gmra.mrb[220].mxu0 %v14370_v18  ;;  %v13814_v18 = vunpack.i.l.bf16 %v13813_v40  ;;  %v14437_v40 = vld [vmem:[%s19520_s13 + $0x13c] ss:$36 sps:$4 sm:$0xff]  }
 0x697   :  { %3866 = vmatprep.mubr.bf16.mxu0 %v14373_v24  ;;  %v13820_v24 = vunpack.i.h.bf16 %v13818_v43 }
 0x698   :  { %v3173_v61 = vpack.c.bf16 %v13815_v48, %v13814_v18 }
 0x69e   :  { %3867 = vmatmul.mubr.bf16.vlgmr.msra.gmra.mrb[224].mxu0 %v14371_v17  ;;  %v3182_v17 = vpack.c.bf16 %v13820_v24, %v13819_v56  ;;  %v14448_v24 = vld [vmem:[%s19520_s13 + $0x184] ss:$36 sps:$4 sm:$0xff]  }
 0x69f   :  { %12585 = vmatpush3.bf16.msra.mxu0 %v3167_v50  ;;  %3874 = vmatprep.mubr.bf16.mxu0 %v14374_v30  ;;  %v14400_v30 = vld [vmem:[%s19521_s5 + $0x4] ss:$8 sps:$4 sm:$0xff]   ;;  %v3174_v50 = vpack.c.bf16 %v13825_v9, %v13824_v10 }
 0x6a0   :  { %12586 = vmatprep.subr.bf16.mxu0 %v3176_v28  ;;  %v14389_v28 = vld [vmem:[%s19520_s13 + $0x1c4] ss:$36 sps:$4 sm:$0xff]  }
 0x6a3   :  { %12587 = vmatpush3.bf16.msra.mxu0 %v3168_v52  ;;  %v14397_v52 = vld [vmem:[%s19520_s13 + $0x1c] ss:$36 sps:$4 sm:$0xff]  }
 0x6a4   :  { %12588 = vmatprep.subr.bf16.mxu0 %v3177_v27  ;;  %v14408_v27 = vld [vmem:[%s19520_s13 + $0x64] ss:$36 sps:$4 sm:$0xff]  }
 0x6a6   :  { %3875 = vmatmul.mubr.bf16.gmra.mrb[228].mxu0 %v14376_v31  ;;  %v14411_v31 = vld [vmem:[%s19521_s5 + $0x24] ss:$8 sps:$4 sm:$0xff]  }
 0x6a7   :  { %12589 = vmatpush3.bf16.msra.mxu0 %v3169_v42  ;;  %3882 = vmatprep.mubr.bf16.mxu0 %v14377_v39  ;;  %v14409_v39 = vld [vmem:[%s19521_s5 + $0x20] ss:$8 sps:$4 sm:$0xff]   ;;  %v14417_v42 = vld [vmem:[%s19520_s13 + $0xac] ss:$36 sps:$4 sm:$0xff]  }
 0x6a8   :  { %12590 = vmatprep.subr.bf16.mxu0 %v3178_v13  ;;  %v14420_v13 = vld [vmem:[%s19521_s5 + $0x44] ss:$8 sps:$4 sm:$0xff]  }
 0x6ab   :  { %12591 = vmatpush3.bf16.msra.mxu0 %v3170_v58  ;;  %v14425_v58 = vld [vmem:[%s19521_s5 + $0x54] ss:$8 sps:$4 sm:$0xff]  }
 0x6ac   :  { %12592 = vmatprep.subr.bf16.mxu0 %v3179_v6 }
 0x6ae   :  { %3883 = vmatmul.mubr.bf16.gmra.mrb[232].mxu0 %v14379_v33 }
 0x6af   :  { %12593 = vmatpush3.bf16.msra.mxu0 %v3171_v11  ;;  %3890 = vmatprep.mubr.bf16.mxu0 %v14380_v8  ;;  %v14429_v8 = vld [vmem:[%s19521_s5 + $0x60] ss:$8 sps:$4 sm:$0xff]  }
 0x6b0   :  { %12594 = vmatprep.subr.bf16.mxu0 %v3180_v44  ;;  %v14432_v44 = vld [vmem:[%s19521_s5 + $0x70] ss:$8 sps:$4 sm:$0xff]  }
 0x6b3   :  { %12595 = vmatpush3.bf16.msra.mxu0 %v3172_v4  ;;  %v14435_v4 = vld [vmem:[%s19520_s13 + $0x138] ss:$36 sps:$4 sm:$0xff]  }
 0x6b4   :  { %12596 = vmatprep.subr.bf16.mxu0 %v3181_v21  ;;  %v14438_v21 = vld [vmem:[%s19521_s5 + $0x80] ss:$8 sps:$4 sm:$0xff]  }
 0x6b6   :  { %3891 = vmatmul.mubr.bf16.gmra.mrb[236].mxu0 %v14382_v23 }
 0x6b7   :  { %12597 = vmatpush3.bf16.msra.mxu0 %v3173_v61  ;;  %3898 = vmatprep.mubr.bf16.mxu0 %v14383_v45  ;;  %v14443_v45 = vld [vmem:[%s19521_s5 + $0x90] ss:$8 sps:$4 sm:$0xff]   ;;  %v14451_v61 = vld [vmem:[%s19521_s5 + $0xa4] ss:$8 sps:$4 sm:$0xff]  }
 0x6b8   :  { %12598 = vmatprep.subr.bf16.mxu0 %v3182_v17  ;;  %v14446_v17 = vld [vmem:[%s19520_s13 + $0x180] ss:$36 sps:$4 sm:$0xff]  }
 0x6bb   :  { %12599 = vmatpush3.bf16.msra.mxu0 %v3174_v50 }
 0x6bc   :  { %4589 = vmatprep.subr.bf16.mxu0 %v14400_v30 }
 0x6be   :  { %3899 = vmatmul.mubr.bf16.gmra.mrb[240].mxu0 %v14385_v34  ;;  %v14449_v34 = vld [vmem:[%s19521_s5 + $0xa0] ss:$8 sps:$4 sm:$0xff]  }
 0x6bf   :  { %3906 = vmatprep.mubr.bf16.mxu0 %v14386_v62  ;;  %v14457_v62 = vld [vmem:[%s19520_s13 + $0x1cc] ss:$36 sps:$4 sm:$0xff]  }
 0x6c6   :  { %3907 = vmatmul.mubr.bf16.gmra.mrb[244].mxu0 %v14388_v12 }
 0x6c7   :  { %3914 = vmatprep.mubr.bf16.mxu0 %v14389_v28  ;;  %v14454_v28 = vld [vmem:[%s19521_s5 + $0xb4] ss:$8 sps:$4 sm:$0xff]  }
 0x6ce   :  { %3915 = vmatmul.mubr.bf16.gmra.mrb[248].mxu0 %v14391_v41 }
 0x6cf   :  { %3922 = vmatprep.mubr.bf16.mxu0 %v14392_v35  ;;  %v14452_v35 = vld [vmem:[%s19521_s5 + $0xb0] ss:$8 sps:$4 sm:$0xff]  }
 0x6d6   :  { %3923 = vmatmul.mubr.bf16.gmra.mrb[252].mxu0 %v14394_v49  ;;  %v14460_v49 = vld [vmem:[%s19521_s5 + $0xc4] ss:$8 sps:$4 sm:$0xff]  }
 0x6d7   :  { %3963 = vmatprep.mubr.bf16.mxu0 %v14397_v52 }
 0x6de   :  { %3964 = vmatmul.mubr.bf16.vlgmr.msra.gmra.mrb[0].mxu0 %v14395_v57 }
 0x6df   :  { %4590 = vmatpush1.bf16.msra.mxu0 %v14398_v55  ;;  %3971 = vmatprep.mubr.bf16.mxu0 %v14408_v27  ;;  %v14455_v55 = vld [vmem:[%s19520_s13 + $0x1c8] ss:$36 sps:$4 sm:$0xff]  }
 0x6e0   :  { %4591 = vmatprep.subr.bf16.mxu0 %v14405_v29 }
 0x6e3   :  { %4592 = vmatpush1.bf16.msra.mxu0 %v14403_v53  ;;  %v14458_v53 = vld [vmem:[%s19521_s5 + $0xc0] ss:$8 sps:$4 sm:$0xff]  }
 0x6e4   :  { %4593 = vmatprep.subr.bf16.mxu0 %v14411_v31  ;;  %v14468_v31 = vld [vmem:[%s19520_s13 + $0x214] ss:$36 sps:$4 sm:$0xff]  }
 0x6e6   :  { %3972 = vmatmul.mubr.bf16.gmra.mrb[4].mxu0 %v14406_v32 }
 0x6e7   :  { %4594 = vmatpush1.bf16.msra.mxu0 %v14409_v39  ;;  %3979 = vmatprep.mubr.bf16.mxu0 %v14417_v42  ;;  %v14465_v39 = vld [vmem:[%s19521_s5 + $0xd4] ss:$8 sps:$4 sm:$0xff]  }
 0x6e8   :  { %4595 = vmatprep.subr.bf16.mxu0 %v14414_v54  ;;  %v14463_v54 = vld [vmem:[%s19521_s5 + $0xd0] ss:$8 sps:$4 sm:$0xff]  }
 0x6eb   :  { %4596 = vmatpush1.bf16.msra.mxu0 %v14412_v16  ;;  %v14471_v16 = vld [vmem:[%s19521_s5 + $0xe4] ss:$8 sps:$4 sm:$0xff]  }
 0x6ec   :  { %4597 = vmatprep.subr.bf16.mxu0 %v14420_v13 }
 0x6ee   :  { %3980 = vmatmul.mubr.bf16.gmra.mrb[8].mxu0 %v14415_v60 }
 0x6ef   :  { %4598 = vmatpush1.bf16.msra.mxu0 %v14418_v36  ;;  %3987 = vmatprep.mubr.bf16.mxu0 %v14428_v5  ;;  %v14466_v36 = vld [vmem:[%s19520_s13 + $0x210] ss:$36 sps:$4 sm:$0xff]  }
 0x6f0   :  { %4599 = vmatprep.subr.bf16.mxu0 %v14425_v58 }
 0x6f1   :  { %v12408_v25 = vpop.f32.mrb[160].mxu0 }
 0x6f2   :  { %v12409_v6 = vpop.f32.mrb[161].mxu0 }
 0x6f3   :  { %v16838_v20 = vadd.f32 %v12409_v6, %v12408_v25  ;;  %v12411_v33 = vpop.f32.mrb[162].mxu0  ;;  %4600 = vmatpush1.bf16.msra.mxu0 %v14423_v59  ;;  %v14469_v59 = vld [vmem:[%s19521_s5 + $0xe0] ss:$8 sps:$4 sm:$0xff]   ;;  %v14474_v6 = vld [vmem:[%s19521_s5 + $0xf4] ss:$8 sps:$4 sm:$0xff]  }
 0x6f4   :  { %v12412_v11 = vpop.f32.mrb[163].mxu0  ;;  %4601 = vmatprep.subr.bf16.mxu0 %v14431_v38  ;;  %v14477_v38 = vld [vmem:[%s19522_s1 + $0x4] ss:$8 sps:$4 sm:$0xff]  }
 0x6f5   :  { %v16849_v37 = vadd.f32 %v12412_v11, %v12411_v33  ;;  %v14472_v33 = vld [vmem:[%s19521_s5 + $0xf0] ss:$8 sps:$4 sm:$0xff]   ;;  %v14475_v11 = vld [vmem:[%s19522_s1] ss:$8 sps:$4 sm:$0xff]  }
 0x6f6   :  { %3988 = vmatmul.mubr.bf16.gmra.mrb[12].mxu0 %v14426_v22 }
 0x6f7   :  { %4602 = vmatpush1.bf16.msra.mxu0 %v14429_v8  ;;  %3995 = vmatprep.mubr.bf16.mxu0 %v14437_v40 }
 0x6f8   :  { %4603 = vmatprep.subr.bf16.mxu0 %v14434_v14 }
 0x6f9   :  { %v12414_v46 = vpop.f32.mrb[164].mxu0 }
 0x6fa   :  { %v12415_v43 = vpop.f32.mrb[165].mxu0 }
 0x6fb   :  { %v16860_v48 = vadd.f32 %v12415_v43, %v12414_v46  ;;  %v12417_v18 = vpop.f32.mrb[166].mxu0  ;;  %4604 = vmatpush1.bf16.msra.mxu0 %v14432_v44 }
 0x6fc   :  { %v12418_v56 = vpop.f32.mrb[167].mxu0  ;;  %4605 = vmatprep.subr.bf16.mxu0 %v14440_v63  ;;  %v14480_v63 = vld [vmem:[%s19522_s1 + $0x14] ss:$8 sps:$4 sm:$0xff]  }
 0x6fd   :  { %v16871_v23 = vadd.f32 %v12418_v56, %v12417_v18 }
 0x6fe   :  { %3996 = vmatmul.mubr.bf16.gmra.mrb[16].mxu0 %v14435_v4 }
 0x6ff   :  { %4606 = vmatpush1.bf16.msra.mxu0 %v14438_v21  ;;  %4003 = vmatprep.mubr.bf16.mxu0 %v14448_v24  ;;  %v14478_v21 = vld [vmem:[%s19522_s1 + $0x10] ss:$8 sps:$4 sm:$0xff]  }
 0x700   :  { %4607 = vmatprep.subr.bf16.mxu0 %v14445_v26 }
 0x701   :  { %v12420_v9 = vpop.f32.mrb[168].mxu0 }
 0x702   :  { %v12421_v10 = vpop.f32.mrb[169].mxu0 }
 0x703   :  { %v16882_v30 = vadd.f32 %v12421_v10, %v12420_v9  ;;  %v12423_v50 = vpop.f32.mrb[170].mxu0  ;;  %4608 = vmatpush1.bf16.msra.mxu0 %v14443_v45 }
 0x704   :  { %v12424_v12 = vpop.f32.mrb[171].mxu0  ;;  %4609 = vmatprep.subr.bf16.mxu0 %v14451_v61 }
 0x705   :  { %v16893_v41 = vadd.f32 %v12424_v12, %v12423_v50 }
 0x706   :  { %4004 = vmatmul.mubr.bf16.gmra.mrb[20].mxu0 %v14446_v17 }
 0x707   :  { %4610 = vmatpush1.bf16.msra.mxu0 %v14449_v34  ;;  %4011 = vmatprep.mubr.bf16.mxu0 %v14457_v62  ;;  %v16966_v62 = vld [vmem:[%s19517_s3 + $0x1] ss:$0 sm:$0xff] }
 0x708   :  { %4611 = vmatprep.subr.bf16.mxu0 %v14454_v28 }
 0x709   :  { %v12426_v52 = vpop.f32.mrb[172].mxu0 }
 0x70a   :  { %v12427_v57 = vpop.f32.mrb[173].mxu0 }
 0x70b   :  { %v16904_v27 = vadd.f32 %v12427_v57, %v12426_v52  ;;  %v12429_v29 = vpop.f32.mrb[174].mxu0  ;;  %4612 = vmatpush1.bf16.msra.mxu0 %v14452_v35  ;;  %v3675_v35 = vadd.f32 %v16838_v20, %v16966_v62 }
 0x70c   :  { %v12430_v32 = vpop.f32.mrb[175].mxu0  ;;  %4613 = vmatprep.subr.bf16.mxu0 %v14460_v49 }
 0x70d   :  { %v16915_v42 = vadd.f32 %v12430_v32, %v12429_v29 }
 0x70e   :  { %4012 = vmatmul.mubr.bf16.gmra.mrb[24].mxu0 %v14455_v55  ;;  %v3678_v55 = vadd.f32 %v16849_v37, %v16966_v62 }
 0x70f   :  { %4614 = vmatpush1.bf16.msra.mxu0 %v14458_v53  ;;  %4019 = vmatprep.mubr.bf16.mxu0 %v14468_v31  ;;  %v16974_v31 = vpop.f32.mrb[128].mxu1 }
 0x710   :  { %4615 = vmatprep.subr.bf16.mxu0 %v14465_v39  ;;  %v16976_v32 = vpop.f32.mrb[129].mxu1 }
 0x711   :  { %v12432_v13 = vpop.f32.mrb[176].mxu0 }
 0x712   :  { %v12433_v60 = vpop.f32.mrb[177].mxu0 }
 0x713   :  { %v16926_v5 = vadd.f32 %v12433_v60, %v12432_v13  ;;  %v12435_v58 = vpop.f32.mrb[178].mxu0  ;;  %4616 = vmatpush1.bf16.msra.mxu0 %v14463_v54  ;;  %v3683_v60 = vadd.f32 %v16860_v48, %v16966_v62  ;;  %v3694_v48 = vadd.f32 %v16893_v41, %v16966_v62 }
 0x714   :  { %v12436_v25 = vpop.f32.mrb[179].mxu0  ;;  %4617 = vmatprep.subr.bf16.mxu0 %v14471_v16  ;;  %v16980_v16 = vpop.f32.mrb[130].mxu1 }
 0x715   :  { %v16937_v22 = vadd.f32 %v12436_v25, %v12435_v58  ;;  %v16982_v20 = vpop.f32.mrb[131].mxu1 }
 0x716   :  { %4020 = vmatmul.mubr.bf16.gmra.mrb[28].mxu0 %v14466_v36 }
 0x717   :  { %4618 = vmatpush1.bf16.msra.mxu0 %v14469_v59  ;;  %4621 = vmatprep.mubr.bf16.mxu0 %v14477_v38  ;;  %v3686_v59 = vadd.f32 %v16871_v23, %v16966_v62 }
 0x718   :  { %4619 = vmatprep.subr.bf16.mxu0 %v14474_v6 }
 0x719   :  { %v12438_v8 = vpop.f32.mrb[180].mxu0 }
 0x71a   :  { %v12439_v40 = vpop.f32.mrb[181].mxu0 }
 0x71b   :  { %v16945_v14 = vadd.f32 %v12439_v40, %v12438_v8  ;;  %v12441_v44 = vpop.f32.mrb[182].mxu0  ;;  %4620 = vmatpush1.bf16.msra.mxu0 %v14472_v33  ;;  %v3691_v40 = vadd.f32 %v16882_v30, %v16966_v62 }
 0x71c   :  { %v12442_v46 = vpop.f32.mrb[183].mxu0 }
 0x71d   :  { %v16950_v43 = vadd.f32 %v12442_v46, %v12441_v44 }
 0x71e   :  { %4622 = vmatmul.mubr.bf16.vlgmr.msra.gmra.mrb[32].mxu0 %v14475_v11 }
 0x71f   :  { %4631 = vmatprep.mubr.bf16.mxu0 %v14480_v63 }
 0x721   :  { %v12444_v4 = vpop.f32.mrb[184].mxu0 }
 0x722   :  { %v12445_v18 = vpop.f32.mrb[185].mxu0 }
 0x723   :  { %v16955_v24 = vadd.f32 %v12445_v18, %v12444_v4  ;;  %v12447_v56 = vpop.f32.mrb[186].mxu0  ;;  %v17000_v18 = vpop.f32.mrb[132].mxu1 }
 0x724   :  { %v12448_v26 = vpop.f32.mrb[187].mxu0 }
 0x725   :  { %v16957_v45 = vadd.f32 %v12448_v26, %v12447_v56 }
 0x726   :  { %4632 = vmatmul.mubr.bf16.gmra.mrb[36].mxu0 %v14478_v21  ;;  %v17002_v21 = vpop.f32.mrb[133].mxu1 }
 0x727   :  { %v17004_v26 = vpop.f32.mrb[134].mxu1 }
 0x728   :  { %v17006_v30 = vpop.f32.mrb[135].mxu1 }
 0x729   :  { %v12450_v61 = vpop.f32.mrb[188].mxu0 }
 0x72a   :  { %v12451_v9 = vpop.f32.mrb[189].mxu0 }
 0x72b   :  { %v16959_v10 = vadd.f32 %v12451_v9, %v12450_v61  ;;  %v12453_v17 = vpop.f32.mrb[190].mxu0  ;;  %v3699_v9 = vadd.f32 %v16904_v27, %v16966_v62  ;;  %v3710_v27 = vadd.f32 %v16937_v22, %v16966_v62 }
 0x72c   :  { %v12454_v50 = vpop.f32.mrb[191].mxu0 }
 0x72d   :  { %v16961_v34 = vadd.f32 %v12454_v50, %v12453_v17 }
 0x731   :  { %v12472_v12 = vpop.f32.mrb[192].mxu0 }
 0x732   :  { %v12473_v28 = vpop.f32.mrb[193].mxu0 }
 0x733   :  { %v12474_v49 = vadd.f32 %v12473_v28, %v12472_v12  ;;  %v12475_v52 = vpop.f32.mrb[194].mxu0  ;;  %v3702_v12 = vadd.f32 %v16915_v42, %v16966_v62 }
 0x734   :  { %v12476_v57 = vpop.f32.mrb[195].mxu0 }
 0x735   :  { %v16972_v29 = vadd.f32 %v12474_v49, %v3675_v35  ;;  %v12477_v53 = vadd.f32 %v12476_v57, %v12475_v52 }
 0x737   :  { %v16978_v39 = vadd.f32 %v12477_v53, %v3678_v55  ;;  %v3707_v55 = vadd.f32 %v16926_v5, %v16966_v62 }
 0x739   :  { %v12478_v54 = vpop.f32.mrb[196].mxu0 }
 0x73a   :  { %v12479_v13 = vpop.f32.mrb[197].mxu0 }
 0x73b   :  { %v12480_v36 = vadd.f32 %v12479_v13, %v12478_v54  ;;  %v12481_v37 = vpop.f32.mrb[198].mxu0 }
 0x73c   :  { %v12482_v58 = vpop.f32.mrb[199].mxu0 }
 0x73d   :  { %v16988_v38 = vadd.f32 %v12480_v36, %v3683_v60  ;;  %v12483_v25 = vadd.f32 %v12482_v58, %v12481_v37  ;;  %v17024_v37 = vpop.f32.mrb[136].mxu1 }
 0x73e   :  { %v17026_v58 = vpop.f32.mrb[137].mxu1 }
 0x73f   :  { %v16990_v6 = vadd.f32 %v12483_v25, %v3686_v59  ;;  %v17028_v25 = vpop.f32.mrb[138].mxu1 }
 0x740   :  { %v17030_v5 = vpop.f32.mrb[139].mxu1 }
 0x741   :  { %v12484_v33 = vpop.f32.mrb[200].mxu0 }
 0x742   :  { %v12485_v8 = vpop.f32.mrb[201].mxu0 }
 0x743   :  { %v12486_v11 = vadd.f32 %v12485_v8, %v12484_v33  ;;  %v12487_v44 = vpop.f32.mrb[202].mxu0  ;;  %v3715_v8 = vadd.f32 %v16945_v14, %v16966_v62  ;;  %v3726_v14 = vadd.f32 %v16957_v45, %v16966_v62 }
 0x744   :  { %v12488_v63 = vpop.f32.mrb[203].mxu0 }
 0x745   :  { %v16996_v46 = vadd.f32 %v12486_v11, %v3691_v40  ;;  %v12489_v4 = vadd.f32 %v12488_v63, %v12487_v44  ;;  %v3718_v44 = vadd.f32 %v16950_v43, %v16966_v62 }
 0x747   :  { %v16998_v23 = vadd.f32 %v12489_v4, %v3694_v48 }
 0x749   :  { %v12490_v56 = vpop.f32.mrb[204].mxu0 }
 0x74a   :  { %v12491_v61 = vpop.f32.mrb[205].mxu0 }
 0x74b   :  { %v12492_v17 = vadd.f32 %v12491_v61, %v12490_v56  ;;  %v12493_v41 = vpop.f32.mrb[206].mxu0 }
 0x74c   :  { %v12494_v50 = vpop.f32.mrb[207].mxu0 }
 0x74d   :  { %v17012_v28 = vadd.f32 %v12492_v17, %v3699_v9  ;;  %v12495_v35 = vadd.f32 %v12494_v50, %v12493_v41  ;;  %v3723_v9 = vadd.f32 %v16955_v24, %v16966_v62 }
 0x74f   :  { %v17014_v49 = vadd.f32 %v12495_v35, %v3702_v12 }
 0x751   :  { %v12496_v52 = vpop.f32.mrb[208].mxu0 }
 0x752   :  { %v12497_v57 = vpop.f32.mrb[209].mxu0 }
 0x753   :  { %v12498_v53 = vadd.f32 %v12497_v57, %v12496_v52  ;;  %v12499_v54 = vpop.f32.mrb[210].mxu0  ;;  %v17048_v52 = vpop.f32.mrb[140].mxu1 }
 0x754   :  { %v12500_v13 = vpop.f32.mrb[211].mxu0  ;;  %v17050_v57 = vpop.f32.mrb[141].mxu1 }
 0x755   :  { %v17020_v60 = vadd.f32 %v12498_v53, %v3707_v55  ;;  %v12501_v36 = vadd.f32 %v12500_v13, %v12499_v54  ;;  %v17052_v53 = vpop.f32.mrb[142].mxu1  ;;  %v3731_v13 = vadd.f32 %v16959_v10, %v16966_v62 }
 0x756   :  { %v17054_v24 = vpop.f32.mrb[143].mxu1 }
 0x757   :  { %v17022_v42 = vadd.f32 %v12501_v36, %v3710_v27 }
 0x759   :  { %v12502_v59 = vpop.f32.mrb[212].mxu0 }
 0x75a   :  { %v12503_v33 = vpop.f32.mrb[213].mxu0 }
 0x75b   :  { %v12504_v40 = vadd.f32 %v12503_v33, %v12502_v59  ;;  %v12505_v22 = vpop.f32.mrb[214].mxu0  ;;  %v3734_v59 = vadd.f32 %v16961_v34, %v16966_v62  ;;  %v14481_v34 = vld [vmem:[%s19523_s10] sm:$0xff]  }
 0x75c   :  { %v12506_v11 = vpop.f32.mrb[215].mxu0  ;;  %13104 = vmatprep.mubr.bf16.mxu1 %v14481_v34 }
 0x75d   :  { %v17036_v63 = vadd.f32 %v12504_v40, %v3715_v8  ;;  %v12507_v48 = vadd.f32 %v12506_v11, %v12505_v22 }
 0x75f   :  { %v17038_v4 = vadd.f32 %v12507_v48, %v3718_v44 }
 0x761   :  { %v12508_v56 = vpop.f32.mrb[216].mxu0 }
 0x762   :  { %v12509_v61 = vpop.f32.mrb[217].mxu0 }
 0x763   :  { %v12510_v17 = vadd.f32 %v12509_v61, %v12508_v56  ;;  %v12511_v41 = vpop.f32.mrb[218].mxu0 }
 0x764   :  { %v12512_v50 = vpop.f32.mrb[219].mxu0 }
 0x765   :  { %v17044_v12 = vadd.f32 %v12510_v17, %v3723_v9  ;;  %v12513_v35 = vadd.f32 %v12512_v50, %v12511_v41 }
 0x767   :  { %v17046_v43 = vadd.f32 %v12513_v35, %v3726_v14 }
 0x769   :  { %v12514_v55 = vpop.f32.mrb[220].mxu0 }
 0x76a   :  { %v12515_v54 = vpop.f32.mrb[221].mxu0 }
 0x76b   :  { %v12516_v27 = vadd.f32 %v12515_v54, %v12514_v55  ;;  %v12517_v45 = vpop.f32.mrb[222].mxu0 }
 0x76c   :  { %v12518_v36 = vpop.f32.mrb[223].mxu0 }
 0x76d   :  { %v17060_v33 = vadd.f32 %v12516_v27, %v3731_v13  ;;  %v12519_v8 = vadd.f32 %v12518_v36, %v12517_v45 }
 0x76f   :  { %v17062_v40 = vadd.f32 %v12519_v8, %v3734_v59 }
 0x771   :  { %v12536_v22 = vpop.f32.mrb[224].mxu0 }
 0x772   :  { %v12537_v11 = vpop.f32.mrb[225].mxu0 }
 0x773   :  { %v12538_v44 = vadd.f32 %v12537_v11, %v12536_v22  ;;  %v12539_v48 = vpop.f32.mrb[226].mxu0 }
 0x774   :  { %v12540_v56 = vpop.f32.mrb[227].mxu0 }
 0x775   :  { %v17065_v61 = vadd.f32 %v12538_v44, %v16972_v29  ;;  %v12541_v10 = vadd.f32 %v12540_v56, %v12539_v48 }
 0x777   :  { %v17068_v9 = vadd.f32 %v12541_v10, %v16978_v39 }
 0x779   :  { %v12542_v17 = vpop.f32.mrb[228].mxu0 }
 0x77a   :  { %v12543_v41 = vpop.f32.mrb[229].mxu0 }
 0x77b   :  { %v12544_v62 = vadd.f32 %v12543_v41, %v12542_v17  ;;  %v12545_v50 = vpop.f32.mrb[230].mxu0 }
 0x77c   :  { %v12546_v14 = vpop.f32.mrb[231].mxu0 }
 0x77d   :  { %v17074_v35 = vadd.f32 %v12544_v62, %v16988_v38  ;;  %v12547_v55 = vadd.f32 %v12546_v14, %v12545_v50 }
 0x77f   :  { %v17077_v29 = vadd.f32 %v12547_v55, %v16990_v6 }
 0x781   :  { %v12548_v54 = vpop.f32.mrb[232].mxu0 }
 0x782   :  { %v12549_v39 = vpop.f32.mrb[233].mxu0 }
 0x783   :  { %v12550_v13 = vadd.f32 %v12549_v39, %v12548_v54  ;;  %v12551_v27 = vpop.f32.mrb[234].mxu0 }
 0x784   :  { %v12552_v45 = vpop.f32.mrb[235].mxu0 }
 0x785   :  { %v17080_v36 = vadd.f32 %v12550_v13, %v16996_v46  ;;  %v12553_v59 = vadd.f32 %v12552_v45, %v12551_v27 }
 0x787   :  { %v17083_v8 = vadd.f32 %v12553_v59, %v16998_v23 }
 0x789   :  { %v12554_v22 = vpop.f32.mrb[236].mxu0 }
 0x78a   :  { %v12555_v11 = vpop.f32.mrb[237].mxu0 }
 0x78b   :  { %v12556_v38 = vadd.f32 %v12555_v11, %v12554_v22  ;;  %v12557_v44 = vpop.f32.mrb[238].mxu0 }
 0x78c   :  { %v12558_v48 = vpop.f32.mrb[239].mxu0 }
 0x78d   :  { %v17086_v6 = vadd.f32 %v12556_v38, %v17012_v28  ;;  %v12559_v56 = vadd.f32 %v12558_v48, %v12557_v44 }
 0x78f   :  { %v17089_v10 = vadd.f32 %v12559_v56, %v17014_v49 }
 0x791   :  { %v12560_v17 = vpop.f32.mrb[240].mxu0 }
 0x792   :  { %v12561_v41 = vpop.f32.mrb[241].mxu0 }
 0x793   :  { %v12562_v46 = vadd.f32 %v12561_v41, %v12560_v17  ;;  %v12563_v34 = vpop.f32.mrb[242].mxu0 }
 0x794   :  { %v12564_v62 = vpop.f32.mrb[243].mxu0 }
 0x795   :  { %v17092_v23 = vadd.f32 %v12562_v46, %v17020_v60  ;;  %v12565_v50 = vadd.f32 %v12564_v62, %v12563_v34 }
 0x797   :  { %v17095_v14 = vadd.f32 %v12565_v50, %v17022_v42 }
 0x799   :  { %v12566_v55 = vpop.f32.mrb[244].mxu0 }
 0x79a   :  { %v12567_v54 = vpop.f32.mrb[245].mxu0 }
 0x79b   :  { %v12568_v28 = vadd.f32 %v12567_v54, %v12566_v55  ;;  %v12569_v39 = vpop.f32.mrb[246].mxu0 }
 0x79c   :  { %v12570_v13 = vpop.f32.mrb[247].mxu0 }
 0x79d   :  { %v17098_v49 = vadd.f32 %v12568_v28, %v17036_v63  ;;  %v12571_v27 = vadd.f32 %v12570_v13, %v12569_v39 }
 0x79f   :  { %v17101_v45 = vadd.f32 %v12571_v27, %v17038_v4 }
 0x7a1   :  { %v12572_v59 = vpop.f32.mrb[248].mxu0 }
 0x7a2   :  { %v12573_v22 = vpop.f32.mrb[249].mxu0 }
 0x7a3   :  { %v12574_v60 = vadd.f32 %v12573_v22, %v12572_v59  ;;  %v12575_v11 = vpop.f32.mrb[250].mxu0 }
 0x7a4   :  { %v12576_v38 = vpop.f32.mrb[251].mxu0 }
 0x7a5   :  { %v17104_v42 = vadd.f32 %v12574_v60, %v17044_v12  ;;  %v12577_v44 = vadd.f32 %v12576_v38, %v12575_v11 }
 0x7a7   :  { %v17107_v48 = vadd.f32 %v12577_v44, %v17046_v43 }
 0x7a9   :  { %v12578_v56 = vpop.f32.mrb[252].mxu0 }
 0x7aa   :  { %v12579_v17 = vpop.f32.mrb[253].mxu0 }
 0x7ab   :  { %v12580_v63 = vadd.f32 %v12579_v17, %v12578_v56  ;;  %v12581_v41 = vpop.f32.mrb[254].mxu0 }
 0x7ac   :  { %v12582_v46 = vpop.f32.mrb[255].mxu0 }
 0x7ad   :  { %v17110_v4 = vadd.f32 %v12580_v63, %v17060_v33  ;;  %v12583_v34 = vadd.f32 %v12582_v46, %v12581_v41 }
 0x7af   :  { %v17113_v62 = vadd.f32 %v12583_v34, %v17062_v40 }
 0x7b1   :  { %v12600_v50 = vpop.f32.mrb[0].mxu0 }
 0x7b2   :  { %v12601_v55 = vpop.f32.mrb[1].mxu0 }
 0x7b3   :  { %v12602_v12 = vadd.f32 %v12601_v55, %v12600_v50  ;;  %v12603_v54 = vpop.f32.mrb[2].mxu0 }
 0x7b4   :  { %v12604_v28 = vpop.f32.mrb[3].mxu0 }
 0x7b5   :  { %v12605_v39 = vadd.f32 %v12604_v28, %v12603_v54  ;;  %v3966_v43 = vadd.f32 %v12602_v12, %v17065_v61 }
 0x7b7   :  { %v4063_v13 = vadd.f32 %v16976_v32, %v3966_v43  ;;  %v3969_v27 = vadd.f32 %v12605_v39, %v17068_v9 }
 0x7b9   :  { %v4066_v59 = vadd.f32 %v16982_v20, %v3969_v27  ;;  %v12606_v33 = vpop.f32.mrb[4].mxu0  ;;  %v4125_v60 = vmax.f32 %v4063_v13, 0.0 }
 0x7ba   :  { %v12607_v22 = vpop.f32.mrb[5].mxu0 }
 0x7bb   :  { %v4126_v11 = vmax.f32 %v4066_v59, 0.0  ;;  %v12608_v40 = vadd.f32 %v12607_v22, %v12606_v33  ;;  %v12609_v38 = vpop.f32.mrb[6].mxu0 }
 0x7bc   :  { %v12610_v44 = vpop.f32.mrb[7].mxu0 }
 0x7bd   :  { %v4141_v56 = vpack.c.bf16 %v4126_v11, %v4125_v60  ;;  %v3974_v17 = vadd.f32 %v12608_v40, %v17074_v35  ;;  %v12611_v63 = vadd.f32 %v12610_v44, %v12609_v38 }
 0x7bf   :  { %v4071_v41 = vadd.f32 %v16974_v31, %v3974_v17  ;;  %v3977_v61 = vadd.f32 %v12611_v63, %v17077_v29  ;;  %13088 = vmatprep.subr.bf16.mxu1 %v4141_v56 }
 0x7c0   :  { %13089 = vmatpush3.bf16.msra.mxu1 %v4141_v56 }
 0x7c1   :  { %v4074_v32 = vadd.f32 %v16980_v16, %v3977_v61  ;;  %v12612_v20 = vpop.f32.mrb[8].mxu0  ;;  %v4127_v46 = vmax.f32 %v4071_v41, 0.0 }
 0x7c2   :  { %v12613_v9 = vpop.f32.mrb[9].mxu0 }
 0x7c3   :  { %v4128_v34 = vmax.f32 %v4074_v32, 0.0  ;;  %v12614_v50 = vadd.f32 %v12613_v9, %v12612_v20  ;;  %v12615_v55 = vpop.f32.mrb[10].mxu0 }
 0x7c4   :  { %v12616_v12 = vpop.f32.mrb[11].mxu0 }
 0x7c5   :  { %v12617_v54 = vadd.f32 %v12616_v12, %v12615_v55  ;;  %v3982_v28 = vadd.f32 %v12614_v50, %v17080_v36  ;;  %v4142_v35 = vpack.c.bf16 %v4128_v34, %v4127_v46 }
 0x7c7   :  { %v4079_v39 = vadd.f32 %v17002_v21, %v3982_v28  ;;  %13090 = vmatprep.subr.bf16.mxu1 %v4142_v35  ;;  %v3985_v31 = vadd.f32 %v12617_v54, %v17083_v8 }
 0x7c8   :  { %13091 = vmatpush3.bf16.msra.mxu1 %v4142_v35 }
 0x7c9   :  { %v4082_v29 = vadd.f32 %v17006_v30, %v3985_v31  ;;  %v12618_v16 = vpop.f32.mrb[12].mxu0  ;;  %v4129_v13 = vmax.f32 %v4079_v39, 0.0 }
 0x7ca   :  { %v12619_v43 = vpop.f32.mrb[13].mxu0 }
 0x7cb   :  { %v4130_v27 = vmax.f32 %v4082_v29, 0.0  ;;  %v12620_v59 = vadd.f32 %v12619_v43, %v12618_v16  ;;  %v12621_v33 = vpop.f32.mrb[14].mxu0 }
 0x7cc   :  { %v12622_v22 = vpop.f32.mrb[15].mxu0 }
 0x7cd   :  { %v4143_v60 = vpack.c.bf16 %v4130_v27, %v4129_v13  ;;  %v3990_v11 = vadd.f32 %v12620_v59, %v17086_v6  ;;  %v12623_v36 = vadd.f32 %v12622_v22, %v12621_v33 }
 0x7cf   :  { %v4087_v40 = vadd.f32 %v17000_v18, %v3990_v11  ;;  %v3993_v21 = vadd.f32 %v12623_v36, %v17089_v10  ;;  %13092 = vmatprep.subr.bf16.mxu1 %v4143_v60 }
 0x7d0   :  { %13093 = vmatpush3.bf16.msra.mxu1 %v4143_v60 }
 0x7d1   :  { %v4090_v8 = vadd.f32 %v17004_v26, %v3993_v21  ;;  %v12624_v30 = vpop.f32.mrb[16].mxu0  ;;  %v4131_v44 = vmax.f32 %v4087_v40, 0.0 }
 0x7d2   :  { %v12625_v38 = vpop.f32.mrb[17].mxu0 }
 0x7d3   :  { %v4132_v56 = vmax.f32 %v4090_v8, 0.0  ;;  %v12626_v17 = vadd.f32 %v12625_v38, %v12624_v30  ;;  %v12627_v63 = vpop.f32.mrb[18].mxu0 }
 0x7d4   :  { %v12628_v41 = vpop.f32.mrb[19].mxu0 }
 0x7d5   :  { %v12629_v61 = vadd.f32 %v12628_v41, %v12627_v63  ;;  %v3998_v32 = vadd.f32 %v12626_v17, %v17092_v23  ;;  %v4144_v6 = vpack.c.bf16 %v4132_v56, %v4131_v44 }
 0x7d7   :  { %v4095_v20 = vadd.f32 %v17026_v58, %v3998_v32  ;;  %13094 = vmatprep.subr.bf16.mxu1 %v4144_v6  ;;  %v4001_v18 = vadd.f32 %v12629_v61, %v17095_v14 }
 0x7d8   :  { %13095 = vmatpush3.bf16.msra.mxu1 %v4144_v6 }
 0x7d9   :  { %v4098_v10 = vadd.f32 %v17030_v5, %v4001_v18  ;;  %v12630_v26 = vpop.f32.mrb[20].mxu0  ;;  %v4133_v46 = vmax.f32 %v4095_v20, 0.0 }
 0x7da   :  { %v12631_v9 = vpop.f32.mrb[21].mxu0 }
 0x7db   :  { %v4134_v34 = vmax.f32 %v4098_v10, 0.0  ;;  %v12632_v50 = vadd.f32 %v12631_v9, %v12630_v26  ;;  %v12633_v55 = vpop.f32.mrb[22].mxu0 }
 0x7dc   :  { %v12634_v12 = vpop.f32.mrb[23].mxu0 }
 0x7dd   :  { %v4145_v54 = vpack.c.bf16 %v4134_v34, %v4133_v46  ;;  %v4006_v28 = vadd.f32 %v12632_v50, %v17098_v49  ;;  %v12635_v23 = vadd.f32 %v12634_v12, %v12633_v55  ;;  %v17174_v34 = vld [vmem:[%s19523_s10 + $0x18] sm:$0xff]   ;;  %v17179_v50 = vld [vmem:[%s19523_s10 + $0x20] sm:$0xff]   ;;  %v17190_v55 = vld [vmem:[%s19523_s10 + $0x28] sm:$0xff]  }
 0x7de   :  { %v17195_v12 = vld [vmem:[%s19523_s10 + $0x30] sm:$0xff]  }
 0x7df   :  { %v4103_v35 = vadd.f32 %v17024_v37, %v4006_v28  ;;  %v4009_v58 = vadd.f32 %v12635_v23, %v17101_v45  ;;  %13096 = vmatprep.subr.bf16.mxu1 %v4145_v54  ;;  %v17211_v28 = vld [vmem:[%s19524_s14 + $0x4] ss:$12 sps:$4 sm:$0xff]   ;;  %v17216_v23 = vld [vmem:[%s19524_s14 + $0x20] ss:$12 sps:$4 sm:$0xff]  }
 0x7e0   :  { %13097 = vmatpush3.bf16.msra.mxu1 %v4145_v54  ;;  %v17206_v54 = vld [vmem:[%s19523_s10 + $0x38] sm:$0xff]  }
 0x7e1   :  { %v4106_v14 = vadd.f32 %v17028_v25, %v4009_v58  ;;  %v12636_v5 = vpop.f32.mrb[24].mxu0  ;;  %v4135_v31 = vmax.f32 %v4103_v35, 0.0  ;;  %v17222_v35 = vld [vmem:[%s19524_s14 + $0x8] ss:$12 sps:$4 sm:$0xff]  }
 0x7e2   :  { %v12637_v39 = vpop.f32.mrb[25].mxu0  ;;  %13124 = vmatprep.mubr.msk.bf16.mxu0 %vm2499_vm1, %v17222_v35 }
 0x7e3   :  { %v4136_v29 = vmax.f32 %v4106_v14, 0.0  ;;  %v12638_v16 = vadd.f32 %v12637_v39, %v12636_v5  ;;  %v12639_v43 = vpop.f32.mrb[26].mxu0 }
 0x7e4   :  { %v12640_v13 = vpop.f32.mrb[27].mxu0 }
 0x7e5   :  { %v12641_v27 = vadd.f32 %v12640_v13, %v12639_v43  ;;  %v4014_v59 = vadd.f32 %v12638_v16, %v17104_v42  ;;  %v4146_v49 = vpack.c.bf16 %v4136_v29, %v4135_v31 }
 0x7e7   :  { %v4111_v33 = vadd.f32 %v17050_v57, %v4014_v59  ;;  %13098 = vmatprep.subr.bf16.mxu1 %v4146_v49  ;;  %v4017_v37 = vadd.f32 %v12641_v27, %v17107_v48 }
 0x7e8   :  { %13099 = vmatpush3.bf16.msra.mxu1 %v4146_v49 }
 0x7e9   :  { %v4114_v45 = vadd.f32 %v17054_v24, %v4017_v37  ;;  %v12642_v25 = vpop.f32.mrb[28].mxu0  ;;  %v4137_v60 = vmax.f32 %v4111_v33, 0.0 }
 0x7ea   :  { %v12643_v22 = vpop.f32.mrb[29].mxu0 }
 0x7eb   :  { %v4138_v11 = vmax.f32 %v4114_v45, 0.0  ;;  %v12644_v36 = vadd.f32 %v12643_v22, %v12642_v25  ;;  %v12645_v40 = vpop.f32.mrb[30].mxu0 }
 0x7ec   :  { %v12646_v21 = vpop.f32.mrb[31].mxu0 }
 0x7ed   :  { %v4147_v8 = vpack.c.bf16 %v4138_v11, %v4137_v60  ;;  %v4022_v30 = vadd.f32 %v12644_v36, %v17110_v4  ;;  %v12647_v42 = vadd.f32 %v12646_v21, %v12645_v40 }
 0x7ef   :  { %v4119_v38 = vadd.f32 %v17048_v52, %v4022_v30  ;;  %v4025_v57 = vadd.f32 %v12647_v42, %v17113_v62  ;;  %13100 = vmatprep.subr.bf16.mxu1 %v4147_v8  ;;  %v17160_v62 = vld [vmem:[%s19523_s10 + $0x10] sm:$0xff]  }
 0x7f0   :  { %13101 = vmatpush3.bf16.msra.mxu1 %v4147_v8 }
 0x7f1   :  { %v4122_v48 = vadd.f32 %v17052_v53, %v4025_v57  ;;  %v17147_v24 = vpop.f32.mrb[32].mxu0  ;;  %v4139_v56 = vmax.f32 %v4119_v38, 0.0  ;;  %v17155_v53 = vld [vmem:[%s19523_s10 + $0x8] sm:$0xff]  }
 0x7f2   :  { %v4625_v44 = vpop.f32.mrb[33].mxu0 }
 0x7f3   :  { %v4140_v17 = vmax.f32 %v4122_v48, 0.0  ;;  %v4627_v63 = vpop.f32.mrb[34].mxu0 }
 0x7f4   :  { %v4629_v41 = vpop.f32.mrb[35].mxu0  ;;  %v13826_v61 = vpack.i.bf16 %v4627_v63, %v17147_v24  ;;  %v4730_v52 = vpack.c.bf16 %v4627_v63, %v17147_v24 }
 0x7f5   :  { %v4746_v32 = vpack.c.bf16 %v4629_v41, %v4625_v44  ;;  %v4148_v4 = vpack.c.bf16 %v4140_v17, %v4139_v56 }
 0x7f6   :  { %13827 = vrot.lane.b32.xlu0 %v13826_v61, %s15302_s27 }
 0x7f7   :  { %13102 = vmatprep.subr.bf16.mxu1 %v4148_v4  ;;  %13120 = vmatprep.subr.bf16.mxu0 %v4746_v32 }
 0x7f8   :  { %13103 = vmatpush3.bf16.msra.mxu1 %v4148_v4  ;;  %13121 = vmatpush3.bf16.msra.mxu0 %v4746_v32 }
 0x7f9   :  { %v17162_v6 = vpop.f32.mrb[36].mxu0 }
 0x7fa   :  { %13837 = vrot.lane.b32.xlu0 %v13826_v61, %s15306_s25  ;;  %v4635_v20 = vpop.f32.mrb[37].mxu0 }
 0x7fb   :  { %13105 = vmatmul.mubr.bf16.vlgmr.msra.gmra.mrb[144].mxu1 %v17155_v53  ;;  %v4637_v18 = vpop.f32.mrb[38].mxu0 }
 0x7fc   :  { %v4639_v10 = vpop.f32.mrb[39].mxu0  ;;  %v13846_v26 = vpack.i.bf16 %v4637_v18, %v17162_v6  ;;  %13108 = vmatprep.mubr.bf16.mxu1 %v17160_v62  ;;  %v4731_v46 = vpack.c.bf16 %v4637_v18, %v17162_v6 }
 0x7fd   :  { %v4747_v9 = vpack.c.bf16 %v4639_v10, %v4635_v20 }
 0x7fe   :  { %13847 = vrot.lane.b32.xlu0 %v13846_v26, %s15306_s25  ;;  %13832 = vrot.lane.b32.xlu1 %v13846_v26, %s15302_s27 }
 0x7ff   :  { %13122 = vmatprep.subr.bf16.mxu0 %v4747_v9 }
 0x800   :  { %13123 = vmatpush3.bf16.msra.mxu0 %v4747_v9 }
 0x802   :  { %13852 = vrot.lane.b32.xlu0 %v13826_v61, %s15301_s21  ;;  %13842 = vrot.lane.b32.xlu1 %v13826_v61, %s15304_s19 }
 0x803   :  { %13109 = vmatmul.mubr.bf16.gmra.mrb[148].mxu1 %v17174_v34  ;;  %13125 = vmatmul.mubr.msk.bf16.vlgmr.msra.gmra.mrb[40].mxu0 %vm2499_vm1, %v17216_v23 }
 0x804   :  { %13112 = vmatprep.mubr.bf16.mxu1 %v17179_v50  ;;  %4955 = vmatprep.mubr.bf16.mxu0 %v15300_v0 }
 0x806   :  { %13867 = vrot.lane.b32.xlu0 %v13846_v26, %s15301_s21  ;;  %13857 = vrot.lane.b32.xlu1 %v13846_v26, %s15304_s19 }
 0x80a   :  { %13872 = vrot.lane.b32.xlu0 %v13826_v61, %s15307_s26  ;;  %13862 = vrot.lane.b32.xlu1 %v13826_v61, %s15303_s4 }
 0x80b   :  { %13113 = vmatmul.mubr.bf16.gmra.mrb[152].mxu1 %v17190_v55 }
 0x80c   :  { %13116 = vmatprep.mubr.bf16.mxu1 %v17195_v12 }
 0x80e   :  { %13887 = vrot.lane.b32.xlu0 %v13846_v26, %s15307_s26  ;;  %13877 = vrot.lane.b32.xlu1 %v13846_v26, %s15303_s4 }
 0x812   :  { %13882 = vrot.lane.b32.xlu1 %v13826_v61, %s15305_s24 }
 0x813   :  { %13117 = vmatmul.mubr.bf16.gmra.mrb[156].mxu1 %v17206_v54 }
 0x814   :  { %4825 = vmatprep.mubr.bf16.mxu1 %v17211_v28 }
 0x816   :  { %13892 = vrot.lane.b32.xlu1 %v13846_v26, %s15305_s24 }
 0x868   :  { %v13828_v58 = vpop.permute.xlu0 %13827 }
 0x869   :  { %v13830_v14 = vunpack.i.h.bf16 %v13828_v58  ;;  %v13829_v5 = vunpack.i.l.bf16 %v13828_v58 }
 0x86b   :  { %v4738_v39 = vpack.c.bf16 %v13830_v14, %v13829_v5 }
 0x86c   :  { %v13838_v31 = vpop.permute.xlu0 %13837 }
 0x86d   :  { %12680 = vmatprep.subr.bf16.mxu1 %v4738_v39  ;;  %v13840_v29 = vunpack.i.h.bf16 %v13838_v31  ;;  %v13839_v16 = vunpack.i.l.bf16 %v13838_v31 }
 0x86e   :  { %12681 = vmatpush3.bf16.msra.mxu1 %v4730_v52 }
 0x86f   :  { %v4740_v33 = vpack.c.bf16 %v13840_v29, %v13839_v16 }
 0x870   :  { %v13848_v43 = vpop.permute.xlu0 %13847  ;;  %v13833_v13 = vpop.permute.xlu1 %13832 }
 0x871   :  { %v13835_v27 = vunpack.i.h.bf16 %v13833_v13  ;;  %v13834_v59 = vunpack.i.l.bf16 %v13833_v13  ;;  %v13850_v25 = vunpack.i.h.bf16 %v13848_v43  ;;  %v13849_v22 = vunpack.i.l.bf16 %v13848_v43 }
 0x873   :  { %v4739_v49 = vpack.c.bf16 %v13835_v27, %v13834_v59  ;;  %v4741_v42 = vpack.c.bf16 %v13850_v25, %v13849_v22 }
 0x874   :  { %v13853_v37 = vpop.permute.xlu0 %13852  ;;  %v13843_v45 = vpop.permute.xlu1 %13842 }
 0x875   :  { %v13845_v60 = vunpack.i.h.bf16 %v13843_v45  ;;  %v13844_v11 = vunpack.i.l.bf16 %v13843_v45  ;;  %12682 = vmatprep.subr.bf16.mxu1 %v4739_v49  ;;  %v13855_v40 = vunpack.i.h.bf16 %v13853_v37  ;;  %v13854_v21 = vunpack.i.l.bf16 %v13853_v37  ;;  %v17235_v49 = vld [vmem:[%s19524_s14] ss:$12 sps:$4 sm:$0xff]   ;;  %v17247_v37 = vld [vmem:[%s19524_s14 + $0x18] ss:$12 sps:$4 sm:$0xff]  }
 0x876   :  { %12683 = vmatpush3.bf16.msra.mxu1 %v4731_v46 }
 0x877   :  { %v4732_v36 = vpack.c.bf16 %v13845_v60, %v13844_v11  ;;  %12684 = vmatprep.subr.bf16.mxu1 %v4740_v33  ;;  %v4742_v24 = vpack.c.bf16 %v13855_v40, %v13854_v21  ;;  %v17240_v33 = vld [vmem:[%s19524_s14 + $0x1c] ss:$12 sps:$4 sm:$0xff]  }
 0x878   :  { %v13868_v8 = vpop.permute.xlu0 %13867  ;;  %v13858_v30 = vpop.permute.xlu1 %13857 }
 0x879   :  { %v13860_v38 = vunpack.i.h.bf16 %v13858_v30  ;;  %v13859_v57 = vunpack.i.l.bf16 %v13858_v30  ;;  %v13870_v17 = vunpack.i.h.bf16 %v13868_v8  ;;  %v13869_v63 = vunpack.i.l.bf16 %v13868_v8 }
 0x87a   :  { %12685 = vmatpush3.bf16.msra.mxu1 %v4732_v36 }
 0x87b   :  { %v4733_v48 = vpack.c.bf16 %v13860_v38, %v13859_v57  ;;  %12686 = vmatprep.subr.bf16.mxu1 %v4741_v42  ;;  %v4743_v20 = vpack.c.bf16 %v13870_v17, %v13869_v63 }
 0x87c   :  { %v13873_v44 = vpop.permute.xlu0 %13872  ;;  %v13863_v56 = vpop.permute.xlu1 %13862 }
 0x87d   :  { %v13865_v41 = vunpack.i.h.bf16 %v13863_v56  ;;  %v13864_v61 = vunpack.i.l.bf16 %v13863_v56  ;;  %v13875_v4 = vunpack.i.h.bf16 %v13873_v44  ;;  %v13874_v52 = vunpack.i.l.bf16 %v13873_v44 }
 0x87e   :  { %12687 = vmatpush3.bf16.msra.mxu1 %v4733_v48 }
 0x87f   :  { %v4734_v32 = vpack.c.bf16 %v13865_v41, %v13864_v61  ;;  %12688 = vmatprep.subr.bf16.mxu1 %v4742_v24  ;;  %v4744_v46 = vpack.c.bf16 %v13875_v4, %v13874_v52 }
 0x880   :  { %v13878_v6 = vpop.permute.xlu1 %13877  ;;  %v13888_v26 = vpop.permute.xlu0 %13887 }
 0x881   :  { %v13880_v18 = vunpack.i.h.bf16 %v13878_v6  ;;  %v13879_v10 = vunpack.i.l.bf16 %v13878_v6  ;;  %v13890_v14 = vunpack.i.h.bf16 %v13888_v26  ;;  %v13889_v5 = vunpack.i.l.bf16 %v13888_v26 }
 0x882   :  { %12689 = vmatpush3.bf16.msra.mxu1 %v4734_v32 }
 0x883   :  { %v4735_v9 = vpack.c.bf16 %v13880_v18, %v13879_v10  ;;  %12690 = vmatprep.subr.bf16.mxu1 %v4743_v20  ;;  %v4745_v43 = vpack.c.bf16 %v13890_v14, %v13889_v5  ;;  %v14499_v20 = vld [vmem:[%s19525_s6 + $0x44] ss:$8 sps:$4 sm:$0xff]   ;;  %v14497_v18 = vld [vmem:[%s19525_s6 + $0x40] ss:$8 sps:$4 sm:$0xff]  }
 0x884   :  { %v13883_v58 = vpop.permute.xlu1 %13882  ;;  %4923 = vmatprep.subr.bf16.mxu0 %v14499_v20  ;;  %v14502_v10 = vld [vmem:[%s19525_s6 + $0x4] ss:$8 sps:$4 sm:$0xff]  }
 0x885   :  { %v13885_v39 = vunpack.i.h.bf16 %v13883_v58  ;;  %v13884_v31 = vunpack.i.l.bf16 %v13883_v58  ;;  %4924 = vmatpush1.bf16.msra.mxu0 %v14497_v18 }
 0x886   :  { %12691 = vmatpush3.bf16.msra.mxu1 %v4735_v9  ;;  %5022 = vmatprep.subr.bf16.mxu0 %v14502_v10 }
 0x887   :  { %v4736_v29 = vpack.c.bf16 %v13885_v39, %v13884_v31  ;;  %12692 = vmatprep.subr.bf16.mxu1 %v4744_v46 }
 0x888   :  { %v13893_v16 = vpop.permute.xlu1 %13892 }
 0x889   :  { %v13895_v13 = vunpack.i.h.bf16 %v13893_v16  ;;  %v13894_v27 = vunpack.i.l.bf16 %v13893_v16 }
 0x88a   :  { %12693 = vmatpush3.bf16.msra.mxu1 %v4736_v29 }
 0x88b   :  { %v4737_v59 = vpack.c.bf16 %v13895_v13, %v13894_v27  ;;  %12694 = vmatprep.subr.bf16.mxu1 %v4745_v43 }
 0x88e   :  { %12695 = vmatpush3.bf16.msra.mxu1 %v4737_v59 }
 0x891   :  { %4826 = vmatmul.mubr.bf16.vlgmr.msra.gmra.mrb[160].mxu1 %v17235_v49 }
 0x892   :  { %4833 = vmatprep.mubr.bf16.mxu1 %v17240_v33 }
 0x899   :  { %4834 = vmatmul.mubr.bf16.gmra.mrb[164].mxu1 %v17247_v37 }
 0x89a   :  { %5214 = vmatprep.mubr.bf16.mxu1 %v17211_v28 }
 0x8ce   :  { %v17251_v45 = vpop.f32.mrb[144].mxu1 }
 0x8cf   :  { %v4247_v25 = vpop.f32.mrb[145].mxu1 }
 0x8d0   :  { %v17253_v22 = vpop.f32.mrb[146].mxu1 }
 0x8d1   :  { %v4250_v60 = vpop.f32.mrb[147].mxu1 }
 0x8d6   :  { %v13110_v11 = vpop.f32.mrb[148].mxu1  ;;  %v17258_v63 = vpop.f32.mrb[40].mxu0 }
 0x8d7   :  { %v4263_v36 = vpop.f32.mrb[149].mxu1  ;;  %v4876_v32 = vpop.f32.mrb[41].mxu0 }
 0x8d8   :  { %v13111_v40 = vpop.f32.mrb[150].mxu1  ;;  %v17260_v52 = vpop.f32.mrb[42].mxu0 }
 0x8d9   :  { %v13911_v21 = vpack.i.bf16 %v13111_v40, %v13110_v11  ;;  %v4266_v8 = vpop.f32.mrb[151].mxu1  ;;  %v4879_v6 = vpop.f32.mrb[43].mxu0 }
 0x8da   :  { %v13896_v30 = vpack.i.bf16 %v4266_v8, %v4263_v36 }
 0x8dc   :  { %13897 = vrot.lane.b32.xlu0 %v13896_v30, %s15307_s26 }
 0x8de   :  { %v13114_v42 = vpop.f32.mrb[152].mxu1 }
 0x8df   :  { %v4279_v38 = vpop.f32.mrb[153].mxu1 }
 0x8e0   :  { %v13115_v57 = vpop.f32.mrb[154].mxu1 }
 0x8e1   :  { %v13916_v48 = vpack.i.bf16 %v13115_v57, %v13114_v42  ;;  %v4282_v24 = vpop.f32.mrb[155].mxu1 }
 0x8e2   :  { %v13901_v28 = vpack.i.bf16 %v4282_v24, %v4279_v38 }
 0x8e4   :  { %13902 = vrot.lane.b32.xlu1 %v13901_v28, %s15301_s21 }
 0x8e6   :  { %v13118_v44 = vpop.f32.mrb[156].mxu1 }
 0x8e7   :  { %v4295_v56 = vpop.f32.mrb[157].mxu1 }
 0x8e8   :  { %13912 = vrot.lane.b32.xlu1 %v13911_v21, %s15307_s26  ;;  %v13119_v17 = vpop.f32.mrb[158].mxu1 }
 0x8e9   :  { %v13921_v41 = vpack.i.bf16 %v13119_v17, %v13118_v44  ;;  %v4298_v61 = vpop.f32.mrb[159].mxu1 }
 0x8ea   :  { %v13906_v4 = vpack.i.bf16 %v4298_v61, %v4295_v56 }
 0x8ec   :  { %13907 = vrot.lane.b32.xlu0 %v13906_v4, %s15306_s25  ;;  %13922 = vrot.lane.b32.xlu1 %v13921_v41, %s15306_s25  ;;  %v4756_v41 = vld [vmem:[%s19517_s3 + $0x2] ss:$0 sm:$0xff] }
 0x8f0   :  { %13917 = vrot.lane.b32.xlu0 %v13916_v48, %s15301_s21 }
 0x94e   :  { %v13898_v9 = vpop.permute.xlu0 %13897 }
 0x94f   :  { %v13900_v46 = vunpack.i.h.bf16 %v13898_v9  ;;  %v13899_v58 = vunpack.i.l.bf16 %v13898_v9 }
 0x951   :  { %v4359_v29 = vsel %vm479_vm0, %v4250_v60, %v13900_v46  ;;  %v4358_v16 = vsel %vm479_vm0, %v4247_v25, %v13899_v58 }
 0x956   :  { %v13903_v26 = vpop.permute.xlu1 %13902 }
 0x957   :  { %v13905_v5 = vunpack.i.h.bf16 %v13903_v26  ;;  %v13904_v39 = vunpack.i.l.bf16 %v13903_v26 }
 0x959   :  { %v4363_v59 = vsel %vm2499_vm1, %v4359_v29, %v13905_v5  ;;  %v4362_v11 = vsel %vm2499_vm1, %v4358_v16, %v13904_v39 }
 0x95a   :  { %v13913_v14 = vpop.permute.xlu1 %13912 }
 0x95b   :  { %v13915_v36 = vunpack.i.h.bf16 %v13913_v14  ;;  %v13914_v40 = vunpack.i.l.bf16 %v13913_v14 }
 0x95d   :  { %v4361_v48 = vsel %vm479_vm0, %v17253_v22, %v13915_v36  ;;  %v4360_v24 = vsel %vm479_vm0, %v17251_v45, %v13914_v40  ;;  %v14503_v40 = vld [vmem:[%s19525_s6 + $0x10] ss:$8 sps:$4 sm:$0xff]  }
 0x95e   :  { %v13908_v31 = vpop.permute.xlu0 %13907  ;;  %v13923_v27 = vpop.permute.xlu1 %13922 }
 0x95f   :  { %v13910_v43 = vunpack.i.h.bf16 %v13908_v31  ;;  %v13909_v13 = vunpack.i.l.bf16 %v13908_v31  ;;  %v13925_v38 = vunpack.i.h.bf16 %v13923_v27  ;;  %v13924_v60 = vunpack.i.l.bf16 %v13923_v27 }
 0x961   :  { %v4368_v21 = vsel %vm4366_vm4, %v4363_v59, %v13910_v43  ;;  %v4367_v8 = vsel %vm4366_vm4, %v4362_v11, %v13909_v13  ;;  %v14500_v13 = vld [vmem:[%s19525_s6] ss:$8 sps:$4 sm:$0xff]  }
 0x962   :  { %v17280_v30 = vpack.c.bf16 %v4368_v21, %v4367_v8  ;;  %v13918_v42 = vpop.permute.xlu0 %13917  ;;  %v14508_v8 = vld [vmem:[%s19525_s6 + $0x24] ss:$8 sps:$4 sm:$0xff]  }
 0x963   :  { %v13920_v57 = vunpack.i.h.bf16 %v13918_v42  ;;  %v13919_v25 = vunpack.i.l.bf16 %v13918_v42 }
 0x964   :  { %v12696_v28 = vpop.f32.mrb[160].mxu1 }
 0x965   :  { %v4365_v44 = vsel %vm2499_vm1, %v4361_v48, %v13920_v57  ;;  %v4364_v56 = vsel %vm2499_vm1, %v4360_v24, %v13919_v25  ;;  %v12697_v17 = vpop.f32.mrb[161].mxu1  ;;  %v14511_v57 = vld [vmem:[%s19525_s6 + $0x34] ss:$8 sps:$4 sm:$0xff]  }
 0x966   :  { %v4369_v61 = vsel %vm4366_vm4, %v4364_v56, %v13924_v60  ;;  %v4370_v4 = vsel %vm4366_vm4, %v4365_v44, %v13925_v38  ;;  %v12698_v20 = vadd.f32 %v12697_v17, %v12696_v28  ;;  %v12699_v18 = vpop.f32.mrb[162].mxu1 }
 0x967   :  { %v17293_v22 = vpack.c.bf16 %v4370_v4, %v4369_v61  ;;  %v12700_v10 = vpop.f32.mrb[163].mxu1 }
 0x968   :  { %v4828_v45 = vadd.f32 %v12698_v20, %v4756_v41  ;;  %v12701_v26 = vadd.f32 %v12700_v10, %v12699_v18 }
 0x96a   :  { %v4877_v9 = vadd.f32 %v4876_v32, %v4828_v45  ;;  %v4831_v46 = vadd.f32 %v12701_v26, %v4756_v41  ;;  %v14505_v32 = vld [vmem:[%s19525_s6 + $0x14] ss:$8 sps:$4 sm:$0xff]   ;;  %v15297_v45 = vld [vmem:[%s19523_s10] sm:$0xff]  }
 0x96c   :  { %v4880_v58 = vadd.f32 %v4879_v6, %v4831_v46  ;;  %v12702_v14 = vpop.f32.mrb[164].mxu1  ;;  %v4891_v39 = vmax.f32 %v4877_v9, 0.0 }
 0x96d   :  { %v12703_v5 = vpop.f32.mrb[165].mxu1 }
 0x96e   :  { %v4892_v31 = vmax.f32 %v4880_v58, 0.0  ;;  %v12704_v29 = vadd.f32 %v12703_v5, %v12702_v14  ;;  %v12705_v16 = vpop.f32.mrb[166].mxu1 }
 0x96f   :  { %v12706_v43 = vpop.f32.mrb[167].mxu1 }
 0x970   :  { %v4895_v27 = vpack.c.bf16 %v4892_v31, %v4891_v39  ;;  %v4836_v59 = vadd.f32 %v12704_v29, %v4756_v41  ;;  %v12707_v11 = vadd.f32 %v12706_v43, %v12705_v16 }
 0x972   :  { %v4885_v6 = vadd.f32 %v17258_v63, %v4836_v59  ;;  %v4839_v36 = vadd.f32 %v12707_v11, %v4756_v41  ;;  %11758 = vmatmul.mubr.msk.bf16.vlgmr.msra.gmra.mrb[44].mxu0 %vm479_vm0, %v4895_v27  ;;  %v14506_v63 = vld [vmem:[%s19525_s6 + $0x20] ss:$8 sps:$4 sm:$0xff]  }
 0x973   :  { %5023 = vmatpush1.bf16.msra.mxu0 %v14500_v13  ;;  %4965 = vmatprep.mubr.bf16.mxu0 %v15300_v0 }
 0x974   :  { %v4888_v21 = vadd.f32 %v17260_v52, %v4839_v36  ;;  %5024 = vmatprep.subr.bf16.mxu0 %v14505_v32  ;;  %v4893_v42 = vmax.f32 %v4885_v6, 0.0  ;;  %v14509_v52 = vld [vmem:[%s19525_s6 + $0x30] ss:$8 sps:$4 sm:$0xff]  }
 0x976   :  { %v4894_v38 = vmax.f32 %v4888_v21, 0.0 }
 0x977   :  { %5025 = vmatpush1.bf16.msra.mxu0 %v14503_v40 }
 0x978   :  { %v4896_v60 = vpack.c.bf16 %v4894_v38, %v4893_v42  ;;  %5026 = vmatprep.subr.bf16.mxu0 %v14508_v8 }
 0x97a   :  { %11759 = vmatmul.mubr.msk.bf16.gmra.mrb[48].mxu0 %vm479_vm0, %v4896_v60 }
 0x97b   :  { %5027 = vmatpush1.bf16.msra.mxu0 %v14506_v63  ;;  %5054 = vmatprep.mubr.bf16.mxu0 %v15300_v0 }
 0x97c   :  { %5028 = vmatprep.subr.bf16.mxu0 %v14511_v57 }
 0x97f   :  { %5029 = vmatpush1.bf16.msra.mxu0 %v14509_v52 }
 0x982   :  { %11768 = vmatmul.mubr.msk.bf16.vlgmr.msra.gmra.mrb[44].mxu0 %vm2516_vm2, %v17280_v30 }
 0x983   :  { %5064 = vmatprep.mubr.bf16.mxu0 %v15300_v0 }
 0x98a   :  { %11769 = vmatmul.mubr.msk.bf16.gmra.mrb[48].mxu0 %vm2516_vm2, %v17293_v22 }
 0x98b   :  { %13132 = vmatprep.mubr.msk.bf16.mxu0 %vm2499_vm1, %v17222_v35 }
 0xa55   :  { %v17329_v25 = vpop.f32.mrb[44].mxu0 }
 0xa56   :  { %v5058_v48 = vpop.f32.mrb[45].mxu0 }
 0xa57   :  { %v5060_v24 = vpop.f32.mrb[46].mxu0 }
 0xa58   :  { %v5062_v28 = vpop.f32.mrb[47].mxu0  ;;  %v13926_v44 = vpack.i.bf16 %v5060_v24, %v17329_v25  ;;  %v5163_v17 = vpack.c.bf16 %v5060_v24, %v17329_v25 }
 0xa59   :  { %v5179_v56 = vpack.c.bf16 %v5062_v28, %v5058_v48 }
 0xa5a   :  { %13927 = vrot.lane.b32.xlu0 %v13926_v44, %s15302_s27 }
 0xa5b   :  { %13128 = vmatprep.subr.bf16.mxu0 %v5179_v56 }
 0xa5c   :  { %13129 = vmatpush3.bf16.msra.mxu0 %v5179_v56 }
 0xa5d   :  { %v17334_v41 = vpop.f32.mrb[48].mxu0 }
 0xa5e   :  { %13937 = vrot.lane.b32.xlu0 %v13926_v44, %s15306_s25  ;;  %v5068_v61 = vpop.f32.mrb[49].mxu0 }
 0xa5f   :  { %v17337_v35 = vpop.f32.mrb[50].mxu0 }
 0xa60   :  { %v5072_v4 = vpop.f32.mrb[51].mxu0  ;;  %v13946_v20 = vpack.i.bf16 %v17337_v35, %v17334_v41  ;;  %v5164_v10 = vpack.c.bf16 %v17337_v35, %v17334_v41 }
 0xa61   :  { %v5180_v18 = vpack.c.bf16 %v5072_v4, %v5068_v61 }
 0xa62   :  { %13947 = vrot.lane.b32.xlu0 %v13946_v20, %s15306_s25  ;;  %13932 = vrot.lane.b32.xlu1 %v13946_v20, %s15302_s27 }
 0xa63   :  { %13130 = vmatprep.subr.bf16.mxu0 %v5180_v18 }
 0xa64   :  { %13131 = vmatpush3.bf16.msra.mxu0 %v5180_v18 }
 0xa65   :  { %13136 = vmatprep.subr.bf16.mxu0 %v16304_v19 }
 0xa66   :  { %13952 = vrot.lane.b32.xlu0 %v13926_v44, %s15301_s21  ;;  %13942 = vrot.lane.b32.xlu1 %v13926_v44, %s15304_s19 }
 0xa67   :  { %13133 = vmatmul.mubr.msk.bf16.vlgmr.msra.gmra.mrb[52].mxu0 %vm2499_vm1, %v17216_v23 }
 0xa68   :  { %13137 = vmatpush3.bf16.msra.mxu0 %v16304_v19  ;;  %13152 = vmatprep.mubr.bf16.mxu0 %v15297_v45 }
 0xa69   :  { %13138 = vmatprep.subr.bf16.mxu0 %v16316_v2 }
 0xa6a   :  { %13967 = vrot.lane.b32.xlu0 %v13946_v20, %s15301_s21  ;;  %13957 = vrot.lane.b32.xlu1 %v13946_v20, %s15304_s19 }
 0xa6c   :  { %13139 = vmatpush3.bf16.msra.mxu0 %v16316_v2 }
 0xa6d   :  { %13140 = vmatprep.subr.bf16.mxu0 %v16328_v15 }
 0xa6e   :  { %13972 = vrot.lane.b32.xlu0 %v13926_v44, %s15307_s26  ;;  %13962 = vrot.lane.b32.xlu1 %v13926_v44, %s15303_s4 }
 0xa70   :  { %13141 = vmatpush3.bf16.msra.mxu0 %v16328_v15 }
 0xa71   :  { %13142 = vmatprep.subr.bf16.mxu0 %v16340_v1 }
 0xa72   :  { %13987 = vrot.lane.b32.xlu0 %v13946_v20, %s15307_s26  ;;  %13977 = vrot.lane.b32.xlu1 %v13946_v20, %s15303_s4 }
 0xa74   :  { %13143 = vmatpush3.bf16.msra.mxu0 %v16340_v1 }
 0xa75   :  { %13144 = vmatprep.subr.bf16.mxu0 %v16352_v47 }
 0xa76   :  { %13982 = vrot.lane.b32.xlu1 %v13926_v44, %s15305_s24 }
 0xa78   :  { %13145 = vmatpush3.bf16.msra.mxu0 %v16352_v47 }
 0xa79   :  { %13146 = vmatprep.subr.bf16.mxu0 %v16364_v3 }
 0xa7a   :  { %13992 = vrot.lane.b32.xlu1 %v13946_v20, %s15305_s24 }
 0xa7c   :  { %13147 = vmatpush3.bf16.msra.mxu0 %v16364_v3 }
 0xa7d   :  { %13148 = vmatprep.subr.bf16.mxu0 %v16376_v51 }
 0xa80   :  { %13149 = vmatpush3.bf16.msra.mxu0 %v16376_v51 }
 0xa81   :  { %13150 = vmatprep.subr.bf16.mxu0 %v16388_v7 }
 0xa84   :  { %13151 = vmatpush3.bf16.msra.mxu0 %v16388_v7 }
 0xa87   :  { %13153 = vmatmul.mubr.bf16.vlgmr.msra.gmra.mrb[56].mxu0 %v17155_v53 }
 0xa88   :  { %13156 = vmatprep.mubr.bf16.mxu0 %v17160_v62 }
 0xa8f   :  { %13157 = vmatmul.mubr.bf16.gmra.mrb[60].mxu0 %v17174_v34 }
 0xa90   :  { %13160 = vmatprep.mubr.bf16.mxu0 %v17179_v50 }
 0xa97   :  { %13161 = vmatmul.mubr.bf16.gmra.mrb[64].mxu0 %v17190_v55 }
 0xa98   :  { %13164 = vmatprep.mubr.bf16.mxu0 %v17195_v12 }
 0xa9f   :  { %13165 = vmatmul.mubr.bf16.gmra.mrb[68].mxu0 %v17206_v54 }
 0xacc   :  { %v13928_v19 = vpop.permute.xlu0 %13927 }
 0xacd   :  { %v13930_v2 = vunpack.i.h.bf16 %v13928_v19  ;;  %v13929_v15 = vunpack.i.l.bf16 %v13928_v19 }
 0xacf   :  { %v5171_v1 = vpack.c.bf16 %v13930_v2, %v13929_v15 }
 0xad0   :  { %v13938_v47 = vpop.permute.xlu0 %13937 }
 0xad1   :  { %12712 = vmatprep.subr.bf16.mxu1 %v5171_v1  ;;  %v13940_v3 = vunpack.i.h.bf16 %v13938_v47  ;;  %v13939_v51 = vunpack.i.l.bf16 %v13938_v47 }
 0xad2   :  { %12713 = vmatpush3.bf16.msra.mxu1 %v5163_v17 }
 0xad3   :  { %v5173_v23 = vpack.c.bf16 %v13940_v3, %v13939_v51  ;;  %v14519_v51 = vld [vmem:[%s19527_s7 + $0x1c] ss:$12 sps:$4 sm:$0xff]  }
 0xad4   :  { %v13948_v7 = vpop.permute.xlu0 %13947  ;;  %v13933_v53 = vpop.permute.xlu1 %13932 }
 0xad5   :  { %v13935_v62 = vunpack.i.h.bf16 %v13933_v53  ;;  %v13934_v34 = vunpack.i.l.bf16 %v13933_v53  ;;  %v13950_v12 = vunpack.i.h.bf16 %v13948_v7  ;;  %v13949_v9 = vunpack.i.l.bf16 %v13948_v7  ;;  %v14517_v53 = vld [vmem:[%s19527_s7 + $0x18] ss:$12 sps:$4 sm:$0xff]  }
 0xad7   :  { %v5172_v50 = vpack.c.bf16 %v13935_v62, %v13934_v34  ;;  %v5174_v29 = vpack.c.bf16 %v13950_v12, %v13949_v9  ;;  %v14522_v62 = vld [vmem:[%s19527_s7 + $0x34] ss:$12 sps:$4 sm:$0xff]  }
 0xad8   :  { %v13953_v55 = vpop.permute.xlu0 %13952  ;;  %v13943_v26 = vpop.permute.xlu1 %13942 }
 0xad9   :  { %v13945_v54 = vunpack.i.h.bf16 %v13943_v26  ;;  %v13944_v46 = vunpack.i.l.bf16 %v13943_v26  ;;  %12714 = vmatprep.subr.bf16.mxu1 %v5172_v50  ;;  %v13955_v14 = vunpack.i.h.bf16 %v13953_v55  ;;  %v13954_v5 = vunpack.i.l.bf16 %v13953_v55  ;;  %v14525_v26 = vld [vmem:[%s19527_s7 + $0x4c] ss:$12 sps:$4 sm:$0xff]  }
 0xada   :  { %12715 = vmatpush3.bf16.msra.mxu1 %v5164_v10 }
 0xadb   :  { %v5165_v58 = vpack.c.bf16 %v13945_v54, %v13944_v46  ;;  %12716 = vmatprep.subr.bf16.mxu1 %v5173_v23  ;;  %v5175_v27 = vpack.c.bf16 %v13955_v14, %v13954_v5  ;;  %v14520_v23 = vld [vmem:[%s19527_s7 + $0x30] ss:$12 sps:$4 sm:$0xff]   ;;  %v14523_v46 = vld [vmem:[%s19527_s7 + $0x48] ss:$12 sps:$4 sm:$0xff]   ;;  %v14512_v14 = vld [vmem:[%s19526_s11] sm:$0xff]  }
 0xadc   :  { %v13968_v39 = vpop.permute.xlu0 %13967  ;;  %v13958_v31 = vpop.permute.xlu1 %13957 }
 0xadd   :  { %v13960_v16 = vunpack.i.h.bf16 %v13958_v31  ;;  %v13959_v43 = vunpack.i.l.bf16 %v13958_v31  ;;  %v13970_v32 = vunpack.i.h.bf16 %v13968_v39  ;;  %v13969_v6 = vunpack.i.l.bf16 %v13968_v39  ;;  %v14526_v39 = vld [vmem:[%s19527_s7 + $0x60] ss:$12 sps:$4 sm:$0xff]  }
 0xade   :  { %12717 = vmatpush3.bf16.msra.mxu1 %v5165_v58  ;;  %v14528_v58 = vld [vmem:[%s19527_s7 + $0x64] ss:$12 sps:$4 sm:$0xff]  }
 0xadf   :  { %v5166_v13 = vpack.c.bf16 %v13960_v16, %v13959_v43  ;;  %12718 = vmatprep.subr.bf16.mxu1 %v5174_v29  ;;  %v5176_v63 = vpack.c.bf16 %v13970_v32, %v13969_v6  ;;  %v14531_v29 = vld [vmem:[%s19527_s7 + $0x7c] ss:$12 sps:$4 sm:$0xff]  }
 0xae0   :  { %v13973_v59 = vpop.permute.xlu0 %13972  ;;  %v13963_v11 = vpop.permute.xlu1 %13962 }
 0xae1   :  { %v13965_v36 = vunpack.i.h.bf16 %v13963_v11  ;;  %v13964_v40 = vunpack.i.l.bf16 %v13963_v11  ;;  %v13975_v8 = vunpack.i.h.bf16 %v13973_v59  ;;  %v13974_v42 = vunpack.i.l.bf16 %v13973_v59  ;;  %v14529_v59 = vld [vmem:[%s19527_s7 + $0x78] ss:$12 sps:$4 sm:$0xff]   ;;  %v14534_v11 = vld [vmem:[%s19527_s7 + $0x94] ss:$12 sps:$4 sm:$0xff]  }
 0xae2   :  { %12719 = vmatpush3.bf16.msra.mxu1 %v5166_v13 }
 0xae3   :  { %v5167_v21 = vpack.c.bf16 %v13965_v36, %v13964_v40  ;;  %12720 = vmatprep.subr.bf16.mxu1 %v5175_v27  ;;  %v5177_v48 = vpack.c.bf16 %v13975_v8, %v13974_v42  ;;  %v14532_v36 = vld [vmem:[%s19527_s7 + $0x90] ss:$12 sps:$4 sm:$0xff]  }
 0xae4   :  { %v13978_v38 = vpop.permute.xlu1 %13977  ;;  %v13988_v52 = vpop.permute.xlu0 %13987 }
 0xae5   :  { %v13980_v60 = vunpack.i.h.bf16 %v13978_v38  ;;  %v13979_v57 = vunpack.i.l.bf16 %v13978_v38  ;;  %v13990_v28 = vunpack.i.h.bf16 %v13988_v52  ;;  %v13989_v44 = vunpack.i.l.bf16 %v13988_v52  ;;  %v14538_v52 = vld [vmem:[%s19527_s7 + $0xc0] ss:$12 sps:$4 sm:$0xff]  }
 0xae6   :  { %12721 = vmatpush3.bf16.msra.mxu1 %v5167_v21  ;;  %v14513_v21 = vld [vmem:[%s19526_s11 + $0x8] sm:$0xff]  }
 0xae7   :  { %v5168_v25 = vpack.c.bf16 %v13980_v60, %v13979_v57  ;;  %12722 = vmatprep.subr.bf16.mxu1 %v5176_v63  ;;  %v5178_v35 = vpack.c.bf16 %v13990_v28, %v13989_v44  ;;  %v14537_v63 = vld [vmem:[%s19527_s7 + $0xac] ss:$12 sps:$4 sm:$0xff]   ;;  %v14535_v60 = vld [vmem:[%s19527_s7 + $0xa8] ss:$12 sps:$4 sm:$0xff]   ;;  %v14540_v57 = vld [vmem:[%s19527_s7 + $0xc4] ss:$12 sps:$4 sm:$0xff]  }
 0xae8   :  { %v13983_v24 = vpop.permute.xlu1 %13982  ;;  %v14546_v28 = vld [vmem:[%s19527_s7 + $0xe0] ss:$12 sps:$4 sm:$0xff]   ;;  %v14543_v44 = vld [vmem:[%s19527_s7 + $0xd8] ss:$12 sps:$4 sm:$0xff]  }
 0xae9   :  { %v13985_v56 = vunpack.i.h.bf16 %v13983_v24  ;;  %v13984_v17 = vunpack.i.l.bf16 %v13983_v24  ;;  %v14545_v24 = vld [vmem:[%s19527_s7 + $0xdc] ss:$12 sps:$4 sm:$0xff]  }
 0xaea   :  { %12723 = vmatpush3.bf16.msra.mxu1 %v5168_v25  ;;  %v14541_v25 = vld [vmem:[%s19527_s7 + $0xc8] ss:$12 sps:$4 sm:$0xff]  }
 0xaeb   :  { %v5169_v41 = vpack.c.bf16 %v13985_v56, %v13984_v17  ;;  %12724 = vmatprep.subr.bf16.mxu1 %v5177_v48  ;;  %v14542_v48 = vld [vmem:[%s19527_s7 + $0x8] ss:$12 sps:$4 sm:$0xff]   ;;  %v14547_v17 = vld [vmem:[%s19527_s7 + $0x20] ss:$12 sps:$4 sm:$0xff]  }
 0xaec   :  { %v13993_v61 = vpop.permute.xlu1 %13992  ;;  %v14550_v56 = vld [vmem:[%s19527_s7 + $0xf4] ss:$12 sps:$4 sm:$0xff]  }
 0xaed   :  { %v13995_v4 = vunpack.i.h.bf16 %v13993_v61  ;;  %v13994_v20 = vunpack.i.l.bf16 %v13993_v61  ;;  %v14548_v61 = vld [vmem:[%s19527_s7 + $0xf0] ss:$12 sps:$4 sm:$0xff]  }
 0xaee   :  { %12725 = vmatpush3.bf16.msra.mxu1 %v5169_v41  ;;  %v14551_v41 = vld [vmem:[%s19527_s7 + $0xf8] ss:$12 sps:$4 sm:$0xff]  }
 0xaef   :  { %v5170_v18 = vpack.c.bf16 %v13995_v4, %v13994_v20  ;;  %12726 = vmatprep.subr.bf16.mxu1 %v5178_v35  ;;  %v14555_v35 = vld [vmem:[%s19527_s7 + $0x10c] ss:$12 sps:$4 sm:$0xff]   ;;  %v14556_v20 = vld [vmem:[%s19527_s7 + $0x110] ss:$12 sps:$4 sm:$0xff]  }
 0xaf0   :  { %v14552_v4 = vld [vmem:[%s19527_s7 + $0x38] ss:$12 sps:$4 sm:$0xff]  }
 0xaf2   :  { %12727 = vmatpush3.bf16.msra.mxu1 %v5170_v18  ;;  %v14553_v18 = vld [vmem:[%s19527_s7 + $0x108] ss:$12 sps:$4 sm:$0xff]  }
 0xaf5   :  { %5215 = vmatmul.mubr.bf16.vlgmr.msra.gmra.mrb[168].mxu1 %v17235_v49  ;;  %v14514_v49 = vld [vmem:[%s19527_s7] ss:$12 sps:$4 sm:$0xff]  }
 0xaf6   :  { %5222 = vmatprep.mubr.bf16.mxu1 %v17240_v33  ;;  %v14516_v33 = vld [vmem:[%s19527_s7 + $0x4] ss:$12 sps:$4 sm:$0xff]  }
 0xaf7   :  { %8093 = vmatprep.subr.bf16.mxu0 %v14516_v33  ;;  %v14565_v33 = vld [vmem:[%s19527_s7 + $0x13c] ss:$12 sps:$4 sm:$0xff]  }
 0xaf8   :  { %8094 = vmatpush1.bf16.msra.mxu0 %v14514_v49  ;;  %v14561_v49 = vld [vmem:[%s19527_s7 + $0x128] ss:$12 sps:$4 sm:$0xff]  }
 0xaf9   :  { %8095 = vmatprep.subr.bf16.mxu0 %v14519_v51  ;;  %v14563_v51 = vld [vmem:[%s19527_s7 + $0x138] ss:$12 sps:$4 sm:$0xff]  }
 0xafc   :  { %8096 = vmatpush1.bf16.msra.mxu0 %v14517_v53  ;;  %v14567_v53 = vld [vmem:[%s19527_s7 + $0x80] ss:$12 sps:$4 sm:$0xff]  }
 0xafd   :  { %5223 = vmatmul.mubr.bf16.gmra.mrb[172].mxu1 %v17247_v37  ;;  %8097 = vmatprep.subr.bf16.mxu0 %v14522_v62  ;;  %v14571_v62 = vld [vmem:[%s19527_s7 + $0x158] ss:$12 sps:$4 sm:$0xff]  }
 0xafe   :  { %5443 = vmatprep.mubr.bf16.mxu1 %v15300_v0 }
 0xb00   :  { %8098 = vmatpush1.bf16.msra.mxu0 %v14520_v23  ;;  %v14575_v23 = vld [vmem:[%s19527_s7 + $0x16c] ss:$12 sps:$4 sm:$0xff]  }
 0xb01   :  { %8099 = vmatprep.subr.bf16.mxu0 %v14525_v26  ;;  %v14573_v26 = vld [vmem:[%s19527_s7 + $0x168] ss:$12 sps:$4 sm:$0xff]  }
 0xb04   :  { %8100 = vmatpush1.bf16.msra.mxu0 %v14523_v46 }
 0xb05   :  { %8101 = vmatprep.subr.bf16.mxu0 %v14528_v58  ;;  %v5181_v58 = vld [vmem:[%s19517_s3 + $0x3] ss:$0 sm:$0xff] }
 0xb08   :  { %8102 = vmatpush1.bf16.msra.mxu0 %v14526_v39 }
 0xb09   :  { %8103 = vmatprep.subr.bf16.mxu0 %v14531_v29 }
 0xb0c   :  { %8104 = vmatpush1.bf16.msra.mxu0 %v14529_v59 }
 0xb0d   :  { %8105 = vmatprep.subr.bf16.mxu0 %v14534_v11 }
 0xb10   :  { %8106 = vmatpush1.bf16.msra.mxu0 %v14532_v36 }
 0xb11   :  { %8107 = vmatprep.subr.bf16.mxu0 %v14537_v63 }
 0xb14   :  { %8108 = vmatpush1.bf16.msra.mxu0 %v14535_v60 }
 0xb15   :  { %8109 = vmatprep.subr.bf16.mxu0 %v14540_v57 }
 0xb18   :  { %8110 = vmatpush1.bf16.msra.mxu0 %v14538_v52 }
 0xb19   :  { %8111 = vmatprep.subr.bf16.mxu0 %v14545_v24 }
 0xb1c   :  { %8112 = vmatpush1.bf16.msra.mxu0 %v14543_v44  ;;  %v14578_v44 = vld [vmem:[%s19527_s7 + $0x180] ss:$12 sps:$4 sm:$0xff]  }
 0xb1d   :  { %8113 = vmatprep.subr.bf16.mxu0 %v14550_v56 }
 0xb20   :  { %8114 = vmatpush1.bf16.msra.mxu0 %v14548_v61  ;;  %v14583_v61 = vld [vmem:[%s19527_s7 + $0x198] ss:$12 sps:$4 sm:$0xff]  }
 0xb21   :  { %8115 = vmatprep.subr.bf16.mxu0 %v14555_v35  ;;  %v14587_v35 = vld [vmem:[%s19527_s7 + $0x1a0] ss:$12 sps:$4 sm:$0xff]  }
 0xb24   :  { %8116 = vmatpush1.bf16.msra.mxu0 %v14553_v18 }
 0xb3a   :  { %v17387_v10 = vpop.f32.mrb[52].mxu0 }
 0xb3b   :  { %v17389_v45 = vpop.f32.mrb[53].mxu0 }
 0xb3c   :  { %v17391_v19 = vpop.f32.mrb[54].mxu0 }
 0xb3d   :  { %v17393_v2 = vpop.f32.mrb[55].mxu0 }
 0xb5a   :  { %v13154_v15 = vpop.f32.mrb[56].mxu0 }
 0xb5b   :  { %v5320_v1 = vpop.f32.mrb[57].mxu0 }
 0xb5c   :  { %v13155_v47 = vpop.f32.mrb[58].mxu0 }
 0xb5d   :  { %v5387_v37 = vpack.c.bf16 %v13155_v47, %v13154_v15  ;;  %v5323_v3 = vpop.f32.mrb[59].mxu0  ;;  %v14560_v15 = vld [vmem:[%s19527_s7 + $0x124] ss:$12 sps:$4 sm:$0xff]   ;;  %v14558_v47 = vld [vmem:[%s19527_s7 + $0x120] ss:$12 sps:$4 sm:$0xff]  }
 0xb5e   :  { %v5383_v7 = vpack.c.bf16 %v5323_v3, %v5320_v1  ;;  %v14557_v1 = vld [vmem:[%s19527_s7 + $0x50] ss:$12 sps:$4 sm:$0xff]   ;;  %8117 = vmatprep.subr.bf16.mxu0 %v14560_v15  ;;  %v14566_v3 = vld [vmem:[%s19527_s7 + $0x140] ss:$12 sps:$4 sm:$0xff]  }
 0xb5f   :  { %8118 = vmatpush1.bf16.msra.mxu0 %v14558_v47 }
 0xb60   :  { %8119 = vmatprep.subr.bf16.mxu0 %v14565_v33  ;;  %v14595_v33 = vld [vmem:[%s19527_s7 + $0x1cc] ss:$12 sps:$4 sm:$0xff]  }
 0xb62   :  { %v13158_v34 = vpop.f32.mrb[60].mxu0 }
 0xb63   :  { %v5336_v50 = vpop.f32.mrb[61].mxu0  ;;  %8120 = vmatpush1.bf16.msra.mxu0 %v14563_v51  ;;  %v14593_v51 = vld [vmem:[%s19527_s7 + $0x1c8] ss:$12 sps:$4 sm:$0xff]  }
 0xb64   :  { %v13159_v55 = vpop.f32.mrb[62].mxu0 }
 0xb65   :  { %v5388_v12 = vpack.c.bf16 %v13159_v55, %v13158_v34  ;;  %v5339_v9 = vpop.f32.mrb[63].mxu0  ;;  %v14568_v34 = vld [vmem:[%s19527_s7 + $0x150] ss:$12 sps:$4 sm:$0xff]  }
 0xb66   :  { %v5384_v54 = vpack.c.bf16 %v5339_v9, %v5336_v50  ;;  %v14572_v50 = vld [vmem:[%s19527_s7 + $0x98] ss:$12 sps:$4 sm:$0xff]   ;;  %v14576_v55 = vld [vmem:[%s19527_s7 + $0x170] ss:$12 sps:$4 sm:$0xff]  }
 0xb67   :  { %v14580_v9 = vld [vmem:[%s19527_s7 + $0x184] ss:$12 sps:$4 sm:$0xff]  }
 0xb68   :  { %5411 = vmatprep.subr.bf16.mxu1 %v5384_v54  ;;  %v14581_v54 = vld [vmem:[%s19527_s7 + $0x248] ss:$12 sps:$4 sm:$0xff]  }
 0xb69   :  { %5412 = vmatpush1.bf16.msra.mxu1 %v5383_v7  ;;  %v14570_v7 = vld [vmem:[%s19527_s7 + $0x154] ss:$12 sps:$4 sm:$0xff]  }
 0xb6a   :  { %5413 = vmatprep.subr.bf16.mxu1 %v5388_v12  ;;  %v13162_v5 = vpop.f32.mrb[64].mxu0  ;;  %8121 = vmatprep.subr.bf16.mxu0 %v14570_v7  ;;  %v14577_v12 = vld [vmem:[%s19527_s7 + $0xb0] ss:$12 sps:$4 sm:$0xff]  }
 0xb6b   :  { %v5352_v31 = vpop.f32.mrb[65].mxu0  ;;  %8122 = vmatpush1.bf16.msra.mxu0 %v14568_v34  ;;  %v14597_v7 = vld [vmem:[%s19527_s7 + $0x1d0] ss:$12 sps:$4 sm:$0xff]  }
 0xb6c   :  { %v13163_v16 = vpop.f32.mrb[66].mxu0  ;;  %8123 = vmatprep.subr.bf16.mxu0 %v14575_v23  ;;  %v14598_v23 = vld [vmem:[%s19527_s7 + $0x1e0] ss:$12 sps:$4 sm:$0xff]  }
 0xb6d   :  { %5414 = vmatpush1.bf16.msra.mxu1 %v5387_v37  ;;  %v5389_v43 = vpack.c.bf16 %v13163_v16, %v13162_v5  ;;  %v5355_v13 = vpop.f32.mrb[67].mxu0  ;;  %v14562_v37 = vld [vmem:[%s19527_s7 + $0x68] ss:$12 sps:$4 sm:$0xff]  }
 0xb6e   :  { %v5385_v27 = vpack.c.bf16 %v5355_v13, %v5352_v31 }
 0xb6f   :  { %8124 = vmatpush1.bf16.msra.mxu0 %v14573_v26 }
 0xb70   :  { %11774 = vmatmul.mubr.msk.bf16.vlgmr.msra.gmra.mrb[176].mxu1 %vm2499_vm1, %v14512_v14  ;;  %8134 = vmatprep.subr.bf16.mxu0 %v14580_v9  ;;  %v14605_v9 = vld [vmem:[%s19527_s7 + $0x1fc] ss:$12 sps:$4 sm:$0xff]  }
 0xb71   :  { %5453 = vmatprep.mubr.bf16.mxu1 %v15300_v0 }
 0xb72   :  { %v13166_v32 = vpop.f32.mrb[68].mxu0 }
 0xb73   :  { %v5368_v6 = vpop.f32.mrb[69].mxu0 }
 0xb74   :  { %v13167_v40 = vpop.f32.mrb[70].mxu0 }
 0xb75   :  { %v5390_v8 = vpack.c.bf16 %v13167_v40, %v13166_v32  ;;  %v5371_v42 = vpop.f32.mrb[71].mxu0 }
 0xb76   :  { %v5386_v38 = vpack.c.bf16 %v5371_v42, %v5368_v6 }
 0xb78   :  { %11775 = vmatmul.mubr.msk.bf16.gmra.mrb[180].mxu1 %vm2499_vm1, %v14513_v21  ;;  %5464 = vmatprep.subr.bf16.mxu1 %v5386_v38 }
 0xb79   :  { %5465 = vmatpush1.bf16.msra.mxu1 %v5385_v27  ;;  %5496 = vmatprep.mubr.bf16.mxu1 %v15300_v0 }
 0xb7a   :  { %5466 = vmatprep.subr.bf16.mxu1 %v5390_v8 }
 0xb7d   :  { %5467 = vmatpush1.bf16.msra.mxu1 %v5389_v43 }
 0xb7e   :  { %12760 = vmatprep.subr.bf16.mxu1 %v14541_v25 }
 0xb80   :  { %11776 = vmatmul.mubr.msk.bf16.vlgmr.msra.gmra.mrb[184].mxu1 %vm2499_vm1, %v14512_v14 }
 0xb81   :  { %5506 = vmatprep.mubr.bf16.mxu1 %v15300_v0  ;;  %12761 = vmatpush3.bf16.msra.mxu1 %v14542_v48 }
 0xb82   :  { %12762 = vmatprep.subr.bf16.mxu1 %v14546_v28 }
 0xb85   :  { %12763 = vmatpush3.bf16.msra.mxu1 %v14547_v17 }
 0xb86   :  { %12764 = vmatprep.subr.bf16.mxu1 %v14551_v41  ;;  %v14586_v41 = vld [vmem:[%s19527_s7 + $0x260] ss:$12 sps:$4 sm:$0xff]  }
 0xb88   :  { %11777 = vmatmul.mubr.msk.bf16.gmra.mrb[188].mxu1 %vm2499_vm1, %v14513_v21 }
 0xb89   :  { %12765 = vmatpush3.bf16.msra.mxu1 %v14552_v4  ;;  %v14590_v4 = vld [vmem:[%s19527_s7 + $0x1b4] ss:$12 sps:$4 sm:$0xff]  }
 0xb8a   :  { %12766 = vmatprep.subr.bf16.mxu1 %v14556_v20  ;;  %v14591_v20 = vld [vmem:[%s19527_s7 + $0x278] ss:$12 sps:$4 sm:$0xff]  }
 0xb8d   :  { %12767 = vmatpush3.bf16.msra.mxu1 %v14557_v1  ;;  %v14588_v1 = vld [vmem:[%s19527_s7 + $0x1b0] ss:$12 sps:$4 sm:$0xff]  }
 0xb8e   :  { %12768 = vmatprep.subr.bf16.mxu1 %v14561_v49  ;;  %v14592_v49 = vld [vmem:[%s19527_s7 + $0x1b8] ss:$12 sps:$4 sm:$0xff]  }
 0xb91   :  { %12769 = vmatpush3.bf16.msra.mxu1 %v14562_v37  ;;  %v14596_v37 = vld [vmem:[%s19527_s7 + $0x290] ss:$12 sps:$4 sm:$0xff]  }
 0xb92   :  { %12770 = vmatprep.subr.bf16.mxu1 %v14566_v3 }
 0xb95   :  { %12771 = vmatpush3.bf16.msra.mxu1 %v14567_v53  ;;  %v14600_v53 = vld [vmem:[%s19527_s7 + $0x1e4] ss:$12 sps:$4 sm:$0xff]  }
 0xb96   :  { %12772 = vmatprep.subr.bf16.mxu1 %v14571_v62  ;;  %v14601_v62 = vld [vmem:[%s19527_s7 + $0x2a8] ss:$12 sps:$4 sm:$0xff]  }
 0xb99   :  { %12773 = vmatpush3.bf16.msra.mxu1 %v14572_v50 }
 0xb9a   :  { %12774 = vmatprep.subr.bf16.mxu1 %v14576_v55  ;;  %v14602_v55 = vld [vmem:[%s19527_s7 + $0x1e8] ss:$12 sps:$4 sm:$0xff]  }
 0xb9d   :  { %12775 = vmatpush3.bf16.msra.mxu1 %v14577_v12 }
 0xb9e   :  { %12782 = vmatprep.subr.bf16.mxu1 %v14581_v54  ;;  %v14606_v54 = vld [vmem:[%s19527_s7 + $0x2c0] ss:$12 sps:$4 sm:$0xff]  }
 0xbc8   :  { %v12728_v46 = vpop.f32.mrb[168].mxu1 }
 0xbc9   :  { %v12729_v14 = vpop.f32.mrb[169].mxu1 }
 0xbca   :  { %v12730_v5 = vadd.f32 %v12729_v14, %v12728_v46  ;;  %v12731_v39 = vpop.f32.mrb[170].mxu1  ;;  %v14607_v14 = vld [vmem:[%s19527_s7 + $0x200] ss:$12 sps:$4 sm:$0xff]  }
 0xbcb   :  { %v12732_v31 = vpop.f32.mrb[171].mxu1 }
 0xbcc   :  { %v5217_v29 = vadd.f32 %v12730_v5, %v5181_v58  ;;  %v12733_v16 = vadd.f32 %v12732_v31, %v12731_v39  ;;  %v14610_v5 = vld [vmem:[%s19527_s7 + $0x214] ss:$12 sps:$4 sm:$0xff]   ;;  %v14611_v39 = vld [vmem:[%s19527_s7 + $0x2d8] ss:$12 sps:$4 sm:$0xff]   ;;  %v14608_v31 = vld [vmem:[%s19527_s7 + $0x210] ss:$12 sps:$4 sm:$0xff]  }
 0xbce   :  { %v5266_v43 = vadd.f32 %v17389_v45, %v5217_v29  ;;  %v5220_v13 = vadd.f32 %v12733_v16, %v5181_v58  ;;  %v14612_v29 = vld [vmem:[%s19527_s7 + $0x218] ss:$12 sps:$4 sm:$0xff]  }
 0xbcf   :  { %v14615_v16 = vld [vmem:[%s19527_s7 + $0x22c] ss:$12 sps:$4 sm:$0xff]  }
 0xbd0   :  { %v5269_v27 = vadd.f32 %v17393_v2, %v5220_v13  ;;  %v12734_v59 = vpop.f32.mrb[172].mxu1  ;;  %v5280_v32 = vmax.f32 %v5266_v43, 0.0  ;;  %v14616_v43 = vld [vmem:[%s19527_s7 + $0x2f0] ss:$12 sps:$4 sm:$0xff]   ;;  %v14613_v13 = vld [vmem:[%s19527_s7 + $0x228] ss:$12 sps:$4 sm:$0xff]  }
 0xbd1   :  { %v12735_v11 = vpop.f32.mrb[173].mxu1 }
 0xbd2   :  { %v5281_v6 = vmax.f32 %v5269_v27, 0.0  ;;  %v12736_v36 = vadd.f32 %v12735_v11, %v12734_v59  ;;  %v12737_v40 = vpop.f32.mrb[174].mxu1  ;;  %v14617_v27 = vld [vmem:[%s19527_s7 + $0x230] ss:$12 sps:$4 sm:$0xff]   ;;  %v14621_v11 = vld [vmem:[%s19527_s7 + $0x3c8] ss:$12 sps:$4 sm:$0xff]  }
 0xbd3   :  { %v12738_v21 = vpop.f32.mrb[175].mxu1  ;;  %v14620_v59 = vld [vmem:[%s19527_s7 + $0x244] ss:$12 sps:$4 sm:$0xff]  }
 0xbd4   :  { %v5225_v8 = vadd.f32 %v12736_v36, %v5181_v58  ;;  %v12739_v42 = vadd.f32 %v12738_v21, %v12737_v40  ;;  %v17563_v38 = vpack.c.bf16 %v5281_v6, %v5280_v32  ;;  %v14618_v40 = vld [vmem:[%s19527_s7 + $0x240] ss:$12 sps:$4 sm:$0xff]   ;;  %v14622_v21 = vld [vmem:[%s19527_s7 + $0x308] ss:$12 sps:$4 sm:$0xff]  }
 0xbd6   :  { %v5274_v63 = vadd.f32 %v17387_v10, %v5225_v8  ;;  %v5228_v60 = vadd.f32 %v12739_v42, %v5181_v58  ;;  %v14582_v10 = vld [vmem:[%s19527_s7 + $0x188] ss:$12 sps:$4 sm:$0xff]   ;;  %v14603_v58 = vld [vmem:[%s19527_s7 + $0x1f8] ss:$12 sps:$4 sm:$0xff]   ;;  %v14626_v42 = vld [vmem:[%s19527_s7 + $0x3e0] ss:$12 sps:$4 sm:$0xff]  }
 0xbd7   :  { %v14625_v8 = vld [vmem:[%s19527_s7 + $0x25c] ss:$12 sps:$4 sm:$0xff]  }
 0xbd8   :  { %v5277_v57 = vadd.f32 %v17391_v19, %v5228_v60  ;;  %v5282_v45 = vmax.f32 %v5274_v63, 0.0  ;;  %v14585_v19 = vld [vmem:[%s19527_s7 + $0x19c] ss:$12 sps:$4 sm:$0xff]   ;;  %v14623_v60 = vld [vmem:[%s19527_s7 + $0x258] ss:$12 sps:$4 sm:$0xff]  }
 0xbda   :  { %v5283_v52 = vmax.f32 %v5277_v57, 0.0  ;;  %v14627_v57 = vld [vmem:[%s19527_s7 + $0x320] ss:$12 sps:$4 sm:$0xff]  }
 0xbdc   :  { %v17567_v25 = vpack.c.bf16 %v5283_v52, %v5282_v45  ;;  %v14630_v45 = vld [vmem:[%s19527_s7 + $0x274] ss:$12 sps:$4 sm:$0xff]   ;;  %v14631_v52 = vld [vmem:[%s19527_s7 + $0x3f8] ss:$12 sps:$4 sm:$0xff]  }
 0xc43   :  { %v5445_v2 = vpop.f32.mrb[176].mxu1 }
 0xc44   :  { %v5447_v48 = vpop.f32.mrb[177].mxu1  ;;  %v5517_v56 = vpack.c.bf16 %v5445_v2, %v5445_v2  ;;  %v14628_v2 = vld [vmem:[%s19527_s7 + $0x270] ss:$12 sps:$4 sm:$0xff]  }
 0xc45   :  { %v5518_v24 = vpack.c.bf16 %v5447_v48, %v5447_v48  ;;  %v17569_v28 = vpop.f32.mrb[178].mxu1  ;;  %v14632_v48 = vld [vmem:[%s19527_s7 + $0x338] ss:$12 sps:$4 sm:$0xff]  }
 0xc46   :  { %v17577_v17 = vpop.f32.mrb[179].mxu1 }
 0xc47   :  { %8125 = vmatprep.mubr.bf16.mxu0 %v5518_v24  ;;  %8453 = vmatprep.mubr.bf16.mxu1 %v5518_v24  ;;  %v17701_v63 = vpack.c.bf16 %v17577_v17, %v17577_v17  ;;  %v14635_v24 = vld [vmem:[%s19527_s7 + $0x28c] ss:$12 sps:$4 sm:$0xff]   ;;  %v14640_v17 = vld [vmem:[%s19527_s7 + $0x2a4] ss:$12 sps:$4 sm:$0xff]  }
 0xc48   :  { %8126 = vmatmul.mubr.bf16.vlgmr.msra.gmra.mrb[72].mxu0 %v5517_v56  ;;  %8454 = vmatmul.mubr.bf16.vlgmr.msra.gmra.mrb[192].mxu1 %v5517_v56  ;;  %v14637_v56 = vld [vmem:[%s19527_s7 + $0x350] ss:$12 sps:$4 sm:$0xff]  }
 0xc49   :  { %8135 = vmatpush1.bf16.msra.mxu0 %v14578_v44  ;;  %12783 = vmatpush3.bf16.msra.mxu1 %v14582_v10  ;;  %v14636_v44 = vld [vmem:[%s19527_s7 + $0x410] ss:$12 sps:$4 sm:$0xff]   ;;  %v14633_v10 = vld [vmem:[%s19527_s7 + $0x288] ss:$12 sps:$4 sm:$0xff]  }
 0xc4a   :  { %8136 = vmatprep.subr.bf16.mxu0 %v14585_v19  ;;  %12784 = vmatprep.subr.bf16.mxu1 %v14586_v41  ;;  %v14641_v19 = vld [vmem:[%s19527_s7 + $0x428] ss:$12 sps:$4 sm:$0xff]   ;;  %v14638_v41 = vld [vmem:[%s19527_s7 + $0x2a0] ss:$12 sps:$4 sm:$0xff]  }
 0xc4b   :  { %v17597_v18 = vpop.f32.mrb[180].mxu1 }
 0xc4c   :  { %v17599_v15 = vpop.f32.mrb[181].mxu1 }
 0xc4d   :  { %8137 = vmatpush1.bf16.msra.mxu0 %v14583_v61  ;;  %12785 = vmatpush3.bf16.msra.mxu1 %v14587_v35  ;;  %v17607_v47 = vpop.f32.mrb[182].mxu1  ;;  %v14642_v61 = vld [vmem:[%s19527_s7 + $0x368] ss:$12 sps:$4 sm:$0xff]  }
 0xc4e   :  { %8138 = vmatprep.subr.bf16.mxu0 %v14590_v4  ;;  %12786 = vmatprep.subr.bf16.mxu1 %v14591_v20  ;;  %v17615_v3 = vpop.f32.mrb[183].mxu1  ;;  %v14645_v35 = vld [vmem:[%s19527_s7 + $0x2bc] ss:$12 sps:$4 sm:$0xff]   ;;  %v14646_v4 = vld [vmem:[%s19527_s7 + $0x440] ss:$12 sps:$4 sm:$0xff]  }
 0xc4f   :  { %v14643_v20 = vld [vmem:[%s19527_s7 + $0x2b8] ss:$12 sps:$4 sm:$0xff]  }
 0xc51   :  { %8139 = vmatpush1.bf16.msra.mxu0 %v14588_v1  ;;  %12787 = vmatpush3.bf16.msra.mxu1 %v14592_v49  ;;  %v14647_v1 = vld [vmem:[%s19527_s7 + $0x380] ss:$12 sps:$4 sm:$0xff]  }
 0xc52   :  { %8140 = vmatprep.subr.bf16.mxu0 %v14595_v33  ;;  %12788 = vmatprep.subr.bf16.mxu1 %v14596_v37  ;;  %v14650_v49 = vld [vmem:[%s19527_s7 + $0x2d4] ss:$12 sps:$4 sm:$0xff]   ;;  %v14651_v33 = vld [vmem:[%s19527_s7 + $0x458] ss:$12 sps:$4 sm:$0xff]   ;;  %v14648_v37 = vld [vmem:[%s19527_s7 + $0x2d0] ss:$12 sps:$4 sm:$0xff]  }
 0xc53   :  { %v5498_v34 = vpop.f32.mrb[184].mxu1 }
 0xc54   :  { %v5500_v50 = vpop.f32.mrb[185].mxu1  ;;  %v17685_v36 = vpack.c.bf16 %v5498_v34, %v5498_v34  ;;  %v14657_v34 = vld [vmem:[%s19527_s7 + $0x3b0] ss:$12 sps:$4 sm:$0xff]  }
 0xc55   :  { %8141 = vmatpush1.bf16.msra.mxu0 %v14593_v51  ;;  %12789 = vmatpush3.bf16.msra.mxu1 %v14597_v7  ;;  %v5520_v26 = vpack.c.bf16 %v5500_v50, %v5500_v50  ;;  %v17635_v12 = vpop.f32.mrb[186].mxu1  ;;  %v14652_v51 = vld [vmem:[%s19527_s7 + $0x398] ss:$12 sps:$4 sm:$0xff]  }
 0xc56   :  { %8142 = vmatprep.subr.bf16.mxu0 %v14600_v53  ;;  %12790 = vmatprep.subr.bf16.mxu1 %v14601_v62  ;;  %v17643_v46 = vpop.f32.mrb[187].mxu1  ;;  %v14655_v7 = vld [vmem:[%s19527_s7 + $0x2ec] ss:$12 sps:$4 sm:$0xff]   ;;  %v14656_v53 = vld [vmem:[%s19527_s7 + $0x470] ss:$12 sps:$4 sm:$0xff]  }
 0xc57   :  { %8493 = vmatprep.mubr.bf16.mxu1 %v5520_v26  ;;  %8166 = vmatprep.mubr.bf16.mxu0 %v5520_v26  ;;  %v14653_v62 = vld [vmem:[%s19527_s7 + $0x2e8] ss:$12 sps:$4 sm:$0xff]   ;;  %v14660_v50 = vld [vmem:[%s19527_s7 + $0x304] ss:$12 sps:$4 sm:$0xff]   ;;  %v17794_v26 = vpack.c.bf16 %v17569_v28, %v17569_v28 }
 0xc58   :  { %v14663_v28 = vld [vmem:[%s19527_s7 + $0x318] ss:$12 sps:$4 sm:$0xff]  }
 0xc59   :  { %8143 = vmatpush1.bf16.msra.mxu0 %v14598_v23  ;;  %12791 = vmatpush3.bf16.msra.mxu1 %v14602_v55  ;;  %v14661_v23 = vld [vmem:[%s19527_s7 + $0x548] ss:$12 sps:$4 sm:$0xff]   ;;  %v14658_v55 = vld [vmem:[%s19527_s7 + $0x300] ss:$12 sps:$4 sm:$0xff]  }
 0xc5a   :  { %8144 = vmatprep.subr.bf16.mxu0 %v14605_v9  ;;  %12792 = vmatprep.subr.bf16.mxu1 %v14606_v54  ;;  %v14662_v9 = vld [vmem:[%s19527_s7 + $0x488] ss:$12 sps:$4 sm:$0xff]  }
 0xc5b   :  { %v17681_v32 = vpop.f32.mrb[188].mxu1  ;;  %v14665_v54 = vld [vmem:[%s19527_s7 + $0x31c] ss:$12 sps:$4 sm:$0xff]  }
 0xc5c   :  { %v17683_v6 = vpop.f32.mrb[189].mxu1 }
 0xc5d   :  { %8145 = vmatpush1.bf16.msra.mxu0 %v14603_v58  ;;  %12793 = vmatpush3.bf16.msra.mxu1 %v14607_v14  ;;  %v14666_v58 = vld [vmem:[%s19527_s7 + $0x560] ss:$12 sps:$4 sm:$0xff]   ;;  %v17807_v14 = vpack.c.bf16 %v17643_v46, %v17643_v46 }
 0xc5e   :  { %8146 = vmatprep.subr.bf16.mxu0 %v14610_v5  ;;  %12794 = vmatprep.subr.bf16.mxu1 %v14611_v39  ;;  %v14667_v5 = vld [vmem:[%s19527_s7 + $0x4a0] ss:$12 sps:$4 sm:$0xff]   ;;  %v14671_v39 = vld [vmem:[%s19527_s7 + $0x578] ss:$12 sps:$4 sm:$0xff]  }
 0xc5f   :  { %v14670_v46 = vld [vmem:[%s19527_s7 + $0x334] ss:$12 sps:$4 sm:$0xff]  }
 0xc61   :  { %8147 = vmatpush1.bf16.msra.mxu0 %v14608_v31  ;;  %12795 = vmatpush3.bf16.msra.mxu1 %v14612_v29  ;;  %v14668_v31 = vld [vmem:[%s19527_s7 + $0x330] ss:$12 sps:$4 sm:$0xff]   ;;  %v14672_v29 = vld [vmem:[%s19527_s7 + $0x4b8] ss:$12 sps:$4 sm:$0xff]  }
 0xc62   :  { %8148 = vmatprep.subr.bf16.mxu0 %v14615_v16  ;;  %12796 = vmatprep.subr.bf16.mxu1 %v14616_v43  ;;  %v14675_v16 = vld [vmem:[%s19527_s7 + $0x34c] ss:$12 sps:$4 sm:$0xff]   ;;  %v14676_v43 = vld [vmem:[%s19527_s7 + $0x590] ss:$12 sps:$4 sm:$0xff]  }
 0xc65   :  { %8149 = vmatpush1.bf16.msra.mxu0 %v14613_v13  ;;  %12797 = vmatpush3.bf16.msra.mxu1 %v14617_v27  ;;  %v14673_v13 = vld [vmem:[%s19527_s7 + $0x348] ss:$12 sps:$4 sm:$0xff]   ;;  %v14677_v27 = vld [vmem:[%s19527_s7 + $0x4d0] ss:$12 sps:$4 sm:$0xff]  }
 0xc66   :  { %8150 = vmatprep.subr.bf16.mxu0 %v14620_v59  ;;  %12804 = vmatprep.subr.bf16.mxu1 %v14621_v11  ;;  %v14680_v59 = vld [vmem:[%s19527_s7 + $0x364] ss:$12 sps:$4 sm:$0xff]   ;;  %v14681_v11 = vld [vmem:[%s19527_s7 + $0x5a8] ss:$12 sps:$4 sm:$0xff]  }
 0xc68   :  { %8494 = vmatmul.mubr.bf16.vlgmr.msra.gmra.mrb[196].mxu1 %v17685_v36 }
 0xc69   :  { %8151 = vmatpush1.bf16.msra.mxu0 %v14618_v40  ;;  %12805 = vmatpush3.bf16.msra.mxu1 %v14622_v21  ;;  %v14682_v40 = vld [vmem:[%s19527_s7 + $0x4e8] ss:$12 sps:$4 sm:$0xff]  }
 0xc6a   :  { %8533 = vmatprep.mubr.bf16.mxu1 %v17701_v63  ;;  %8152 = vmatprep.subr.bf16.mxu0 %v14625_v8  ;;  %v14685_v21 = vld [vmem:[%s19527_s7 + $0x37c] ss:$12 sps:$4 sm:$0xff]   ;;  %v14686_v8 = vld [vmem:[%s19527_s7 + $0x5c0] ss:$12 sps:$4 sm:$0xff]  }
 0xc6b   :  { %12806 = vmatprep.subr.bf16.mxu1 %v14626_v42  ;;  %v14683_v42 = vld [vmem:[%s19527_s7 + $0x378] ss:$12 sps:$4 sm:$0xff]  }
 0xc6d   :  { %8153 = vmatpush1.bf16.msra.mxu0 %v14623_v60  ;;  %12807 = vmatpush3.bf16.msra.mxu1 %v14627_v57  ;;  %v14690_v60 = vld [vmem:[%s19527_s7 + $0x394] ss:$12 sps:$4 sm:$0xff]   ;;  %v17870_v57 = vpop.f32.mrb[190].mxu1 }
 0xc6e   :  { %8154 = vmatprep.subr.bf16.mxu0 %v14630_v45  ;;  %12808 = vmatprep.subr.bf16.mxu1 %v14631_v52  ;;  %v14691_v45 = vld [vmem:[%s19527_s7 + $0x5d8] ss:$12 sps:$4 sm:$0xff]   ;;  %v17875_v52 = vpop.f32.mrb[191].mxu1 }
 0xc71   :  { %8155 = vmatpush1.bf16.msra.mxu0 %v14628_v2  ;;  %12809 = vmatpush3.bf16.msra.mxu1 %v14632_v48  ;;  %v14688_v2 = vld [vmem:[%s19527_s7 + $0x390] ss:$12 sps:$4 sm:$0xff]   ;;  %v14692_v48 = vld [vmem:[%s19527_s7 + $0x518] ss:$12 sps:$4 sm:$0xff]  }
 0xc72   :  { %8156 = vmatprep.subr.bf16.mxu0 %v14635_v24  ;;  %12810 = vmatprep.subr.bf16.mxu1 %v14636_v44  ;;  %v14695_v24 = vld [vmem:[%s19527_s7 + $0x3ac] ss:$12 sps:$4 sm:$0xff]   ;;  %v14696_v44 = vld [vmem:[%s19527_s7 + $0x5f0] ss:$12 sps:$4 sm:$0xff]  }
 0xc75   :  { %8157 = vmatpush1.bf16.msra.mxu0 %v14633_v10  ;;  %12811 = vmatpush3.bf16.msra.mxu1 %v14637_v56  ;;  %v14693_v10 = vld [vmem:[%s19527_s7 + $0x3a8] ss:$12 sps:$4 sm:$0xff]   ;;  %v14697_v56 = vld [vmem:[%s19527_s7 + $0x530] ss:$12 sps:$4 sm:$0xff]  }
 0xc76   :  { %8158 = vmatprep.subr.bf16.mxu0 %v14640_v17  ;;  %12812 = vmatprep.subr.bf16.mxu1 %v14641_v19  ;;  %v14700_v17 = vld [vmem:[%s19527_s7 + $0x3c4] ss:$12 sps:$4 sm:$0xff]   ;;  %v14701_v19 = vld [vmem:[%s19527_s7 + $0x6c8] ss:$12 sps:$4 sm:$0xff]  }
 0xc79   :  { %8159 = vmatpush1.bf16.msra.mxu0 %v14638_v41  ;;  %12813 = vmatpush3.bf16.msra.mxu1 %v14642_v61  ;;  %v14698_v41 = vld [vmem:[%s19527_s7 + $0x3c0] ss:$12 sps:$4 sm:$0xff]   ;;  %v14702_v61 = vld [vmem:[%s19527_s7 + $0x608] ss:$12 sps:$4 sm:$0xff]  }
 0xc7a   :  { %8160 = vmatprep.subr.bf16.mxu0 %v14645_v35  ;;  %12814 = vmatprep.subr.bf16.mxu1 %v14646_v4  ;;  %v17909_v35 = vpack.c.bf16 %v17635_v12, %v17635_v12  ;;  %v14705_v4 = vld [vmem:[%s19527_s7 + $0x3dc] ss:$12 sps:$4 sm:$0xff]   ;;  %v14703_v12 = vld [vmem:[%s19527_s7 + $0x3d8] ss:$12 sps:$4 sm:$0xff]  }
 0xc7d   :  { %8161 = vmatpush1.bf16.msra.mxu0 %v14643_v20  ;;  %12815 = vmatpush3.bf16.msra.mxu1 %v14647_v1  ;;  %v14706_v20 = vld [vmem:[%s19527_s7 + $0x6e0] ss:$12 sps:$4 sm:$0xff]   ;;  %v17919_v1 = vpack.c.bf16 %v17599_v15, %v17599_v15  ;;  %v14711_v15 = vld [vmem:[%s19527_s7 + $0x6f8] ss:$12 sps:$4 sm:$0xff]  }
 0xc7e   :  { %8162 = vmatprep.subr.bf16.mxu0 %v14650_v49  ;;  %12816 = vmatprep.subr.bf16.mxu1 %v14651_v33  ;;  %v14707_v49 = vld [vmem:[%s19527_s7 + $0x620] ss:$12 sps:$4 sm:$0xff]  }
 0xc7f   :  { %v14710_v33 = vld [vmem:[%s19527_s7 + $0x3f4] ss:$12 sps:$4 sm:$0xff]  }
 0xc81   :  { %8163 = vmatpush1.bf16.msra.mxu0 %v14648_v37  ;;  %12817 = vmatpush3.bf16.msra.mxu1 %v14652_v51  ;;  %v14708_v37 = vld [vmem:[%s19527_s7 + $0x3f0] ss:$12 sps:$4 sm:$0xff]   ;;  %v14712_v51 = vld [vmem:[%s19527_s7 + $0x638] ss:$12 sps:$4 sm:$0xff]  }
 0xc82   :  { %8164 = vmatprep.subr.bf16.mxu0 %v14655_v7  ;;  %12818 = vmatprep.subr.bf16.mxu1 %v14656_v53  ;;  %v14715_v7 = vld [vmem:[%s19527_s7 + $0x40c] ss:$12 sps:$4 sm:$0xff]   ;;  %v14716_v53 = vld [vmem:[%s19527_s7 + $0x710] ss:$12 sps:$4 sm:$0xff]  }
 0xc85   :  { %8165 = vmatpush1.bf16.msra.mxu0 %v14653_v62  ;;  %12819 = vmatpush3.bf16.msra.mxu1 %v14657_v34  ;;  %v14713_v62 = vld [vmem:[%s19527_s7 + $0x408] ss:$12 sps:$4 sm:$0xff]   ;;  %v14717_v34 = vld [vmem:[%s19527_s7 + $0x650] ss:$12 sps:$4 sm:$0xff]  }
 0xc86   :  { %8175 = vmatprep.subr.bf16.mxu0 %v14660_v50  ;;  %12826 = vmatprep.subr.bf16.mxu1 %v14661_v23  ;;  %v14720_v50 = vld [vmem:[%s19527_s7 + $0x424] ss:$12 sps:$4 sm:$0xff]   ;;  %v14721_v23 = vld [vmem:[%s19527_s7 + $0x728] ss:$12 sps:$4 sm:$0xff]  }
 0xc88   :  { %8167 = vmatmul.mubr.bf16.vlgmr.msra.gmra.mrb[72].mxu0 %v17685_v36  ;;  %8534 = vmatmul.mubr.bf16.vlgmr.msra.gmra.mrb[200].mxu1 %v17794_v26  ;;  %v14678_v36 = vld [vmem:[%s19527_s7 + $0x360] ss:$12 sps:$4 sm:$0xff]  }
 0xc89   :  { %8176 = vmatpush1.bf16.msra.mxu0 %v14658_v55  ;;  %8207 = vmatprep.mubr.bf16.mxu0 %v17701_v63  ;;  %v14687_v63 = vld [vmem:[%s19527_s7 + $0x500] ss:$12 sps:$4 sm:$0xff]  }
 0xc8a   :  { %12827 = vmatpush3.bf16.msra.mxu1 %v14662_v9  ;;  %8573 = vmatprep.mubr.bf16.mxu1 %v17807_v14  ;;  %v14718_v55 = vld [vmem:[%s19527_s7 + $0x420] ss:$12 sps:$4 sm:$0xff]   ;;  %v14722_v9 = vld [vmem:[%s19527_s7 + $0x668] ss:$12 sps:$4 sm:$0xff]  }
 0xc8b   :  { %8177 = vmatprep.subr.bf16.mxu0 %v14665_v54  ;;  %12828 = vmatprep.subr.bf16.mxu1 %v14666_v58  ;;  %v14725_v54 = vld [vmem:[%s19527_s7 + $0x43c] ss:$12 sps:$4 sm:$0xff]   ;;  %v14726_v58 = vld [vmem:[%s19527_s7 + $0x740] ss:$12 sps:$4 sm:$0xff]  }
 0xc8d   :  { %8178 = vmatpush1.bf16.msra.mxu0 %v14663_v28  ;;  %v14723_v28 = vld [vmem:[%s19527_s7 + $0x438] ss:$12 sps:$4 sm:$0xff]  }
 0xc8e   :  { %12829 = vmatpush3.bf16.msra.mxu1 %v14667_v5  ;;  %8179 = vmatprep.subr.bf16.mxu0 %v14670_v46  ;;  %v14727_v5 = vld [vmem:[%s19527_s7 + $0x680] ss:$12 sps:$4 sm:$0xff]  }
 0xc8f   :  { %12830 = vmatprep.subr.bf16.mxu1 %v14671_v39  ;;  %v14730_v46 = vld [vmem:[%s19527_s7 + $0x454] ss:$12 sps:$4 sm:$0xff]   ;;  %v14731_v39 = vld [vmem:[%s19527_s7 + $0x758] ss:$12 sps:$4 sm:$0xff]  }
 0xc91   :  { %8180 = vmatpush1.bf16.msra.mxu0 %v14668_v31  ;;  %v14728_v31 = vld [vmem:[%s19527_s7 + $0x450] ss:$12 sps:$4 sm:$0xff]  }
 0xc92   :  { %12831 = vmatpush3.bf16.msra.mxu1 %v14672_v29  ;;  %8181 = vmatprep.subr.bf16.mxu0 %v14675_v16  ;;  %v14732_v29 = vld [vmem:[%s19527_s7 + $0x698] ss:$12 sps:$4 sm:$0xff]  }
 0xc93   :  { %12832 = vmatprep.subr.bf16.mxu1 %v14676_v43  ;;  %v14735_v16 = vld [vmem:[%s19527_s7 + $0x46c] ss:$12 sps:$4 sm:$0xff]   ;;  %v14736_v43 = vld [vmem:[%s19527_s7 + $0x770] ss:$12 sps:$4 sm:$0xff]  }
 0xc95   :  { %8182 = vmatpush1.bf16.msra.mxu0 %v14673_v13  ;;  %v14733_v13 = vld [vmem:[%s19527_s7 + $0x468] ss:$12 sps:$4 sm:$0xff]  }
 0xc96   :  { %12833 = vmatpush3.bf16.msra.mxu1 %v14677_v27  ;;  %8183 = vmatprep.subr.bf16.mxu0 %v14680_v59  ;;  %v14737_v27 = vld [vmem:[%s19527_s7 + $0x6b0] ss:$12 sps:$4 sm:$0xff]  }
 0xc97   :  { %12834 = vmatprep.subr.bf16.mxu1 %v14681_v11  ;;  %v14740_v59 = vld [vmem:[%s19527_s7 + $0x484] ss:$12 sps:$4 sm:$0xff]   ;;  %v14741_v11 = vld [vmem:[%s19527_s7 + $0x848] ss:$12 sps:$4 sm:$0xff]  }
 0xc99   :  { %8184 = vmatpush1.bf16.msra.mxu0 %v14678_v36  ;;  %v14738_v36 = vld [vmem:[%s19527_s7 + $0x480] ss:$12 sps:$4 sm:$0xff]  }
 0xc9a   :  { %12835 = vmatpush3.bf16.msra.mxu1 %v14682_v40  ;;  %8185 = vmatprep.subr.bf16.mxu0 %v14685_v21  ;;  %v14742_v40 = vld [vmem:[%s19527_s7 + $0x788] ss:$12 sps:$4 sm:$0xff]   ;;  %v18015_v21 = vpack.c.bf16 %v17597_v18, %v17597_v18  ;;  %v14743_v18 = vld [vmem:[%s19527_s7 + $0x498] ss:$12 sps:$4 sm:$0xff]  }
 0xc9b   :  { %12836 = vmatprep.subr.bf16.mxu1 %v14686_v8  ;;  %v14745_v8 = vld [vmem:[%s19527_s7 + $0x49c] ss:$12 sps:$4 sm:$0xff]  }
 0xc9d   :  { %8186 = vmatpush1.bf16.msra.mxu0 %v14683_v42  ;;  %v14746_v42 = vld [vmem:[%s19527_s7 + $0x860] ss:$12 sps:$4 sm:$0xff]  }
 0xc9e   :  { %12837 = vmatpush3.bf16.msra.mxu1 %v14687_v63  ;;  %8187 = vmatprep.subr.bf16.mxu0 %v14690_v60  ;;  %v18026_v63 = vpack.c.bf16 %v17683_v6, %v17683_v6  ;;  %v14747_v60 = vld [vmem:[%s19527_s7 + $0x7a0] ss:$12 sps:$4 sm:$0xff]   ;;  %v14751_v6 = vld [vmem:[%s19527_s7 + $0x878] ss:$12 sps:$4 sm:$0xff]  }
 0xc9f   :  { %12838 = vmatprep.subr.bf16.mxu1 %v14691_v45  ;;  %v14752_v45 = vld [vmem:[%s19527_s7 + $0x7b8] ss:$12 sps:$4 sm:$0xff]  }
 0xca1   :  { %8188 = vmatpush1.bf16.msra.mxu0 %v14688_v2  ;;  %v14755_v2 = vld [vmem:[%s19527_s7 + $0x4cc] ss:$12 sps:$4 sm:$0xff]  }
 0xca2   :  { %12839 = vmatpush3.bf16.msra.mxu1 %v14692_v48  ;;  %8189 = vmatprep.subr.bf16.mxu0 %v14695_v24  ;;  %v14756_v48 = vld [vmem:[%s19527_s7 + $0x890] ss:$12 sps:$4 sm:$0xff]   ;;  %v14753_v24 = vld [vmem:[%s19527_s7 + $0x4c8] ss:$12 sps:$4 sm:$0xff]  }
 0xca3   :  { %12840 = vmatprep.subr.bf16.mxu1 %v14696_v44  ;;  %v14757_v44 = vld [vmem:[%s19527_s7 + $0x7d0] ss:$12 sps:$4 sm:$0xff]  }
 0xca5   :  { %8190 = vmatpush1.bf16.msra.mxu0 %v14693_v10  ;;  %v14760_v10 = vld [vmem:[%s19527_s7 + $0x4e4] ss:$12 sps:$4 sm:$0xff]  }
 0xca6   :  { %12841 = vmatpush3.bf16.msra.mxu1 %v14697_v56  ;;  %8191 = vmatprep.subr.bf16.mxu0 %v14700_v17  ;;  %v14761_v56 = vld [vmem:[%s19527_s7 + $0x8a8] ss:$12 sps:$4 sm:$0xff]   ;;  %v14758_v17 = vld [vmem:[%s19527_s7 + $0x4e0] ss:$12 sps:$4 sm:$0xff]  }
 0xca7   :  { %12848 = vmatprep.subr.bf16.mxu1 %v14701_v19  ;;  %v14762_v19 = vld [vmem:[%s19527_s7 + $0x7e8] ss:$12 sps:$4 sm:$0xff]  }
 0xca9   :  { %8574 = vmatmul.mubr.bf16.vlgmr.msra.gmra.mrb[204].mxu1 %v17909_v35  ;;  %8192 = vmatpush1.bf16.msra.mxu0 %v14698_v41  ;;  %v14765_v41 = vld [vmem:[%s19527_s7 + $0x4fc] ss:$12 sps:$4 sm:$0xff]  }
 0xcaa   :  { %12849 = vmatpush3.bf16.msra.mxu1 %v14702_v61  ;;  %8613 = vmatprep.mubr.bf16.mxu1 %v17919_v1  ;;  %v14766_v61 = vld [vmem:[%s19527_s7 + $0x8c0] ss:$12 sps:$4 sm:$0xff]  }
 0xcab   :  { %8193 = vmatprep.subr.bf16.mxu0 %v14705_v4  ;;  %12850 = vmatprep.subr.bf16.mxu1 %v14706_v20  ;;  %v14763_v4 = vld [vmem:[%s19527_s7 + $0x4f8] ss:$12 sps:$4 sm:$0xff]   ;;  %v14767_v20 = vld [vmem:[%s19527_s7 + $0x800] ss:$12 sps:$4 sm:$0xff]  }
 0xcad   :  { %8194 = vmatpush1.bf16.msra.mxu0 %v14703_v12  ;;  %v14770_v12 = vld [vmem:[%s19527_s7 + $0x514] ss:$12 sps:$4 sm:$0xff]  }
 0xcae   :  { %12851 = vmatpush3.bf16.msra.mxu1 %v14707_v49  ;;  %8195 = vmatprep.subr.bf16.mxu0 %v14710_v33  ;;  %v14771_v49 = vld [vmem:[%s19527_s7 + $0x8d8] ss:$12 sps:$4 sm:$0xff]   ;;  %v14768_v33 = vld [vmem:[%s19527_s7 + $0x510] ss:$12 sps:$4 sm:$0xff]  }
 0xcaf   :  { %12852 = vmatprep.subr.bf16.mxu1 %v14711_v15  ;;  %v14772_v15 = vld [vmem:[%s19527_s7 + $0x818] ss:$12 sps:$4 sm:$0xff]  }
 0xcb1   :  { %8196 = vmatpush1.bf16.msra.mxu0 %v14708_v37  ;;  %v14775_v37 = vld [vmem:[%s19527_s7 + $0x52c] ss:$12 sps:$4 sm:$0xff]  }
 0xcb2   :  { %12853 = vmatpush3.bf16.msra.mxu1 %v14712_v51  ;;  %8197 = vmatprep.subr.bf16.mxu0 %v14715_v7  ;;  %v14776_v51 = vld [vmem:[%s19527_s7 + $0x8f0] ss:$12 sps:$4 sm:$0xff]   ;;  %v14773_v7 = vld [vmem:[%s19527_s7 + $0x528] ss:$12 sps:$4 sm:$0xff]  }
 0xcb3   :  { %12854 = vmatprep.subr.bf16.mxu1 %v14716_v53  ;;  %v14777_v53 = vld [vmem:[%s19527_s7 + $0x830] ss:$12 sps:$4 sm:$0xff]  }
 0xcb5   :  { %8198 = vmatpush1.bf16.msra.mxu0 %v14713_v62  ;;  %v14780_v62 = vld [vmem:[%s19527_s7 + $0x544] ss:$12 sps:$4 sm:$0xff]  }
 0xcb6   :  { %12855 = vmatpush3.bf16.msra.mxu1 %v14717_v34  ;;  %8199 = vmatprep.subr.bf16.mxu0 %v14720_v50  ;;  %v14781_v34 = vld [vmem:[%s19527_s7 + $0x9c8] ss:$12 sps:$4 sm:$0xff]   ;;  %v18117_v50 = vpack.c.bf16 %v17681_v32, %v17681_v32  ;;  %v14786_v32 = vld [vmem:[%s19527_s7 + $0x9e0] ss:$12 sps:$4 sm:$0xff]  }
 0xcb7   :  { %12856 = vmatprep.subr.bf16.mxu1 %v14721_v23  ;;  %v14778_v23 = vld [vmem:[%s19527_s7 + $0x540] ss:$12 sps:$4 sm:$0xff]  }
 0xcb9   :  { %8200 = vmatpush1.bf16.msra.mxu0 %v14718_v55  ;;  %v14782_v55 = vld [vmem:[%s19527_s7 + $0x908] ss:$12 sps:$4 sm:$0xff]  }
 0xcba   :  { %12857 = vmatpush3.bf16.msra.mxu1 %v14722_v9  ;;  %8201 = vmatprep.subr.bf16.mxu0 %v14725_v54  ;;  %v14785_v9 = vld [vmem:[%s19527_s7 + $0x55c] ss:$12 sps:$4 sm:$0xff]   ;;  %v18133_v54 = vpack.c.bf16 %v17615_v3, %v17615_v3  ;;  %v14791_v3 = vld [vmem:[%s19527_s7 + $0x9f8] ss:$12 sps:$4 sm:$0xff]  }
 0xcbb   :  { %12858 = vmatprep.subr.bf16.mxu1 %v14726_v58  ;;  %v14783_v58 = vld [vmem:[%s19527_s7 + $0x558] ss:$12 sps:$4 sm:$0xff]  }
 0xcbd   :  { %8202 = vmatpush1.bf16.msra.mxu0 %v14723_v28  ;;  %v14787_v28 = vld [vmem:[%s19527_s7 + $0x920] ss:$12 sps:$4 sm:$0xff]  }
 0xcbe   :  { %12859 = vmatpush3.bf16.msra.mxu1 %v14727_v5  ;;  %8203 = vmatprep.subr.bf16.mxu0 %v14730_v46  ;;  %v14790_v5 = vld [vmem:[%s19527_s7 + $0x574] ss:$12 sps:$4 sm:$0xff]   ;;  %v14788_v46 = vld [vmem:[%s19527_s7 + $0x570] ss:$12 sps:$4 sm:$0xff]  }
 0xcbf   :  { %12860 = vmatprep.subr.bf16.mxu1 %v14731_v39  ;;  %v14792_v39 = vld [vmem:[%s19527_s7 + $0x938] ss:$12 sps:$4 sm:$0xff]  }
 0xcc1   :  { %8204 = vmatpush1.bf16.msra.mxu0 %v14728_v31  ;;  %v14795_v31 = vld [vmem:[%s19527_s7 + $0x58c] ss:$12 sps:$4 sm:$0xff]  }
 0xcc2   :  { %12861 = vmatpush3.bf16.msra.mxu1 %v14732_v29  ;;  %8205 = vmatprep.subr.bf16.mxu0 %v14735_v16  ;;  %v14796_v29 = vld [vmem:[%s19527_s7 + $0xa10] ss:$12 sps:$4 sm:$0xff]   ;;  %v14793_v16 = vld [vmem:[%s19527_s7 + $0x588] ss:$12 sps:$4 sm:$0xff]  }
 0xcc3   :  { %12862 = vmatprep.subr.bf16.mxu1 %v14736_v43  ;;  %v14797_v43 = vld [vmem:[%s19527_s7 + $0x950] ss:$12 sps:$4 sm:$0xff]  }
 0xcc5   :  { %8206 = vmatpush1.bf16.msra.mxu0 %v14733_v13  ;;  %v14800_v13 = vld [vmem:[%s19527_s7 + $0x5a4] ss:$12 sps:$4 sm:$0xff]  }
 0xcc6   :  { %12863 = vmatpush3.bf16.msra.mxu1 %v14737_v27  ;;  %8216 = vmatprep.subr.bf16.mxu0 %v14740_v59  ;;  %v14801_v27 = vld [vmem:[%s19527_s7 + $0xa28] ss:$12 sps:$4 sm:$0xff]   ;;  %v14798_v59 = vld [vmem:[%s19527_s7 + $0x5a0] ss:$12 sps:$4 sm:$0xff]  }
 0xcc7   :  { %12870 = vmatprep.subr.bf16.mxu1 %v14741_v11  ;;  %v14802_v11 = vld [vmem:[%s19527_s7 + $0x968] ss:$12 sps:$4 sm:$0xff]  }
 0xcc8   :  { %8208 = vmatmul.mubr.bf16.vlgmr.msra.gmra.mrb[72].mxu0 %v17794_v26  ;;  %v14750_v26 = vld [vmem:[%s19527_s7 + $0x4b4] ss:$12 sps:$4 sm:$0xff]  }
 0xcc9   :  { %8614 = vmatmul.mubr.bf16.vlgmr.msra.gmra.mrb[208].mxu1 %v18015_v21  ;;  %8217 = vmatpush1.bf16.msra.mxu0 %v14738_v36  ;;  %v14805_v36 = vld [vmem:[%s19527_s7 + $0x5bc] ss:$12 sps:$4 sm:$0xff]  }
 0xcca   :  { %8248 = vmatprep.mubr.bf16.mxu0 %v17807_v14  ;;  %12871 = vmatpush3.bf16.msra.mxu1 %v14742_v40  ;;  %v14748_v14 = vld [vmem:[%s19527_s7 + $0x4b0] ss:$12 sps:$4 sm:$0xff]   ;;  %v14806_v40 = vld [vmem:[%s19527_s7 + $0xa40] ss:$12 sps:$4 sm:$0xff]  }
 0xccb   :  { %8218 = vmatprep.subr.bf16.mxu0 %v14745_v8  ;;  %12872 = vmatprep.subr.bf16.mxu1 %v14746_v42  ;;  %v14803_v8 = vld [vmem:[%s19527_s7 + $0x5b8] ss:$12 sps:$4 sm:$0xff]   ;;  %v14807_v42 = vld [vmem:[%s19527_s7 + $0x980] ss:$12 sps:$4 sm:$0xff]  }
 0xccc   :  { %8653 = vmatprep.mubr.bf16.mxu1 %v18026_v63 }
 0xccd   :  { %8219 = vmatpush1.bf16.msra.mxu0 %v14743_v18  ;;  %v14810_v18 = vld [vmem:[%s19527_s7 + $0x5d4] ss:$12 sps:$4 sm:$0xff]  }
 0xcce   :  { %12873 = vmatpush3.bf16.msra.mxu1 %v14747_v60  ;;  %8220 = vmatprep.subr.bf16.mxu0 %v14750_v26  ;;  %v14811_v60 = vld [vmem:[%s19527_s7 + $0xa58] ss:$12 sps:$4 sm:$0xff]   ;;  %v14808_v26 = vld [vmem:[%s19527_s7 + $0x5d0] ss:$12 sps:$4 sm:$0xff]  }
 0xccf   :  { %12874 = vmatprep.subr.bf16.mxu1 %v14751_v6  ;;  %v14812_v6 = vld [vmem:[%s19527_s7 + $0x998] ss:$12 sps:$4 sm:$0xff]  }
 0xcd1   :  { %8221 = vmatpush1.bf16.msra.mxu0 %v14748_v14  ;;  %v14815_v14 = vld [vmem:[%s19527_s7 + $0x5ec] ss:$12 sps:$4 sm:$0xff]  }
 0xcd2   :  { %12875 = vmatpush3.bf16.msra.mxu1 %v14752_v45  ;;  %8222 = vmatprep.subr.bf16.mxu0 %v14755_v2  ;;  %v14816_v45 = vld [vmem:[%s19527_s7 + $0xa70] ss:$12 sps:$4 sm:$0xff]   ;;  %v14813_v2 = vld [vmem:[%s19527_s7 + $0x5e8] ss:$12 sps:$4 sm:$0xff]  }
 0xcd3   :  { %12876 = vmatprep.subr.bf16.mxu1 %v14756_v48  ;;  %v14817_v48 = vld [vmem:[%s19527_s7 + $0x9b0] ss:$12 sps:$4 sm:$0xff]  }
 0xcd5   :  { %8223 = vmatpush1.bf16.msra.mxu0 %v14753_v24  ;;  %v14820_v24 = vld [vmem:[%s19527_s7 + $0x604] ss:$12 sps:$4 sm:$0xff]  }
 0xcd6   :  { %12877 = vmatpush3.bf16.msra.mxu1 %v14757_v44  ;;  %8224 = vmatprep.subr.bf16.mxu0 %v14760_v10  ;;  %v14821_v44 = vld [vmem:[%s19527_s7 + $0xb48] ss:$12 sps:$4 sm:$0xff]   ;;  %v14818_v10 = vld [vmem:[%s19527_s7 + $0x600] ss:$12 sps:$4 sm:$0xff]  }
 0xcd7   :  { %12878 = vmatprep.subr.bf16.mxu1 %v14761_v56  ;;  %v14822_v56 = vld [vmem:[%s19527_s7 + $0xa88] ss:$12 sps:$4 sm:$0xff]  }
 0xcd9   :  { %8225 = vmatpush1.bf16.msra.mxu0 %v14758_v17  ;;  %v18229_v17 = vpack.c.bf16 %v17607_v47, %v17607_v47  ;;  %v14823_v47 = vld [vmem:[%s19527_s7 + $0x618] ss:$12 sps:$4 sm:$0xff]  }
 0xcda   :  { %12879 = vmatpush3.bf16.msra.mxu1 %v14762_v19  ;;  %8226 = vmatprep.subr.bf16.mxu0 %v14765_v41  ;;  %v14825_v19 = vld [vmem:[%s19527_s7 + $0x61c] ss:$12 sps:$4 sm:$0xff]   ;;  %v14826_v41 = vld [vmem:[%s19527_s7 + $0xb60] ss:$12 sps:$4 sm:$0xff]  }
 0xcdb   :  { %12880 = vmatprep.subr.bf16.mxu1 %v14766_v61  ;;  %v18240_v61 = vpack.c.bf16 %v17875_v52, %v17875_v52  ;;  %v14831_v52 = vld [vmem:[%s19527_s7 + $0xb78] ss:$12 sps:$4 sm:$0xff]  }
 0xcdd   :  { %8227 = vmatpush1.bf16.msra.mxu0 %v14763_v4  ;;  %v14827_v4 = vld [vmem:[%s19527_s7 + $0xaa0] ss:$12 sps:$4 sm:$0xff]  }
 0xcde   :  { %12881 = vmatpush3.bf16.msra.mxu1 %v14767_v20  ;;  %8228 = vmatprep.subr.bf16.mxu0 %v14770_v12  ;;  %v14832_v20 = vld [vmem:[%s19527_s7 + $0xab8] ss:$12 sps:$4 sm:$0xff]  }
 0xcdf   :  { %12882 = vmatprep.subr.bf16.mxu1 %v14771_v49  ;;  %v14835_v12 = vld [vmem:[%s19527_s7 + $0x64c] ss:$12 sps:$4 sm:$0xff]   ;;  %v14836_v49 = vld [vmem:[%s19527_s7 + $0xb90] ss:$12 sps:$4 sm:$0xff]  }
 0xce1   :  { %8229 = vmatpush1.bf16.msra.mxu0 %v14768_v33  ;;  %v14833_v33 = vld [vmem:[%s19527_s7 + $0x648] ss:$12 sps:$4 sm:$0xff]  }
 0xce2   :  { %12883 = vmatpush3.bf16.msra.mxu1 %v14772_v15  ;;  %8230 = vmatprep.subr.bf16.mxu0 %v14775_v37  ;;  %v14837_v15 = vld [vmem:[%s19527_s7 + $0xad0] ss:$12 sps:$4 sm:$0xff]  }
 0xce3   :  { %12884 = vmatprep.subr.bf16.mxu1 %v14776_v51  ;;  %v14840_v37 = vld [vmem:[%s19527_s7 + $0x664] ss:$12 sps:$4 sm:$0xff]   ;;  %v14841_v51 = vld [vmem:[%s19527_s7 + $0xba8] ss:$12 sps:$4 sm:$0xff]  }
 0xce5   :  { %8231 = vmatpush1.bf16.msra.mxu0 %v14773_v7  ;;  %v14838_v7 = vld [vmem:[%s19527_s7 + $0x660] ss:$12 sps:$4 sm:$0xff]  }
 0xce6   :  { %12885 = vmatpush3.bf16.msra.mxu1 %v14777_v53  ;;  %8232 = vmatprep.subr.bf16.mxu0 %v14780_v62  ;;  %v14842_v53 = vld [vmem:[%s19527_s7 + $0xae8] ss:$12 sps:$4 sm:$0xff]  }
 0xce7   :  { %12892 = vmatprep.subr.bf16.mxu1 %v14781_v34  ;;  %v14845_v62 = vld [vmem:[%s19527_s7 + $0x67c] ss:$12 sps:$4 sm:$0xff]   ;;  %v14846_v34 = vld [vmem:[%s19527_s7 + $0xbc0] ss:$12 sps:$4 sm:$0xff]  }
 0xce9   :  { %8654 = vmatmul.mubr.bf16.vlgmr.msra.gmra.mrb[212].mxu1 %v18117_v50  ;;  %8233 = vmatpush1.bf16.msra.mxu0 %v14778_v23  ;;  %v14843_v23 = vld [vmem:[%s19527_s7 + $0x678] ss:$12 sps:$4 sm:$0xff]  }
 0xcea   :  { %12893 = vmatpush3.bf16.msra.mxu1 %v14782_v55  ;;  %8693 = vmatprep.mubr.bf16.mxu1 %v18133_v54  ;;  %v14847_v55 = vld [vmem:[%s19527_s7 + $0xb00] ss:$12 sps:$4 sm:$0xff]  }
 0xceb   :  { %8234 = vmatprep.subr.bf16.mxu0 %v14785_v9  ;;  %12894 = vmatprep.subr.bf16.mxu1 %v14786_v32  ;;  %v14850_v9 = vld [vmem:[%s19527_s7 + $0x694] ss:$12 sps:$4 sm:$0xff]  }
 0xced   :  { %8235 = vmatpush1.bf16.msra.mxu0 %v14783_v58  ;;  %v14851_v58 = vld [vmem:[%s19527_s7 + $0xbd8] ss:$12 sps:$4 sm:$0xff]  }
 0xcee   :  { %12895 = vmatpush3.bf16.msra.mxu1 %v14787_v28  ;;  %8236 = vmatprep.subr.bf16.mxu0 %v14790_v5 }
 0xcef   :  { %12896 = vmatprep.subr.bf16.mxu1 %v14791_v3 }
 0xcf1   :  { %8237 = vmatpush1.bf16.msra.mxu0 %v14788_v46  ;;  %v14848_v46 = vld [vmem:[%s19527_s7 + $0x690] ss:$12 sps:$4 sm:$0xff]  }
 0xcf2   :  { %12897 = vmatpush3.bf16.msra.mxu1 %v14792_v39  ;;  %8238 = vmatprep.subr.bf16.mxu0 %v14795_v31  ;;  %v14852_v31 = vld [vmem:[%s19527_s7 + $0xb18] ss:$12 sps:$4 sm:$0xff]  }
 0xcf3   :  { %12898 = vmatprep.subr.bf16.mxu1 %v14796_v29  ;;  %v14855_v29 = vld [vmem:[%s19527_s7 + $0x6ac] ss:$12 sps:$4 sm:$0xff]  }
 0xcf5   :  { %8239 = vmatpush1.bf16.msra.mxu0 %v14793_v16  ;;  %v14856_v16 = vld [vmem:[%s19527_s7 + $0xbf0] ss:$12 sps:$4 sm:$0xff]  }
 0xcf6   :  { %12899 = vmatpush3.bf16.msra.mxu1 %v14797_v43  ;;  %8240 = vmatprep.subr.bf16.mxu0 %v14800_v13  ;;  %v14853_v43 = vld [vmem:[%s19527_s7 + $0x6a8] ss:$12 sps:$4 sm:$0xff]   ;;  %v14857_v13 = vld [vmem:[%s19527_s7 + $0xb30] ss:$12 sps:$4 sm:$0xff]  }
 0xcf7   :  { %12900 = vmatprep.subr.bf16.mxu1 %v14801_v27  ;;  %v14860_v27 = vld [vmem:[%s19527_s7 + $0x6c4] ss:$12 sps:$4 sm:$0xff]  }
 0xcf9   :  { %8241 = vmatpush1.bf16.msra.mxu0 %v14798_v59  ;;  %v18328_v59 = vpack.c.bf16 %v17870_v57, %v17870_v57  ;;  %v14866_v57 = vld [vmem:[%s19527_s7 + $0x6f4] ss:$12 sps:$4 sm:$0xff]  }
 0xcfa   :  { %12901 = vmatpush3.bf16.msra.mxu1 %v14802_v11  ;;  %8242 = vmatprep.subr.bf16.mxu0 %v14805_v36  ;;  %v14858_v11 = vld [vmem:[%s19527_s7 + $0x6c0] ss:$12 sps:$4 sm:$0xff]   ;;  %v14863_v36 = vld [vmem:[%s19527_s7 + $0x6dc] ss:$12 sps:$4 sm:$0xff]  }
 0xcfb   :  { %12902 = vmatprep.subr.bf16.mxu1 %v14806_v40  ;;  %v14861_v40 = vld [vmem:[%s19527_s7 + $0x6d8] ss:$12 sps:$4 sm:$0xff]  }
 0xcfd   :  { %8243 = vmatpush1.bf16.msra.mxu0 %v14803_v8  ;;  %v14864_v8 = vld [vmem:[%s19527_s7 + $0x6f0] ss:$12 sps:$4 sm:$0xff]  }
 0xcfe   :  { %12903 = vmatpush3.bf16.msra.mxu1 %v14807_v42  ;;  %8244 = vmatprep.subr.bf16.mxu0 %v14810_v18  ;;  %v14869_v42 = vld [vmem:[%s19527_s7 + $0x70c] ss:$12 sps:$4 sm:$0xff]   ;;  %v14867_v18 = vld [vmem:[%s19527_s7 + $0x708] ss:$12 sps:$4 sm:$0xff]  }
 0xcff   :  { %12904 = vmatprep.subr.bf16.mxu1 %v14811_v60  ;;  %v14872_v60 = vld [vmem:[%s19527_s7 + $0x724] ss:$12 sps:$4 sm:$0xff]  }
 0xd01   :  { %8245 = vmatpush1.bf16.msra.mxu0 %v14808_v26  ;;  %v14870_v26 = vld [vmem:[%s19527_s7 + $0x720] ss:$12 sps:$4 sm:$0xff]  }
 0xd02   :  { %12905 = vmatpush3.bf16.msra.mxu1 %v14812_v6  ;;  %8246 = vmatprep.subr.bf16.mxu0 %v14815_v14  ;;  %v14875_v6 = vld [vmem:[%s19527_s7 + $0x73c] ss:$12 sps:$4 sm:$0xff]   ;;  %v14873_v14 = vld [vmem:[%s19527_s7 + $0x738] ss:$12 sps:$4 sm:$0xff]  }
 0xd03   :  { %12906 = vmatprep.subr.bf16.mxu1 %v14816_v45  ;;  %v14878_v45 = vld [vmem:[%s19527_s7 + $0x754] ss:$12 sps:$4 sm:$0xff]  }
 0xd05   :  { %8247 = vmatpush1.bf16.msra.mxu0 %v14813_v2 }
 0xd06   :  { %12907 = vmatpush3.bf16.msra.mxu1 %v14817_v48  ;;  %8257 = vmatprep.subr.bf16.mxu0 %v14820_v24 }
 0xd07   :  { %12914 = vmatprep.subr.bf16.mxu1 %v14821_v44  ;;  %v14876_v44 = vld [vmem:[%s19527_s7 + $0x750] ss:$12 sps:$4 sm:$0xff]  }
 0xd08   :  { %8249 = vmatmul.mubr.bf16.vlgmr.msra.gmra.mrb[72].mxu0 %v17909_v35  ;;  %v14830_v35 = vld [vmem:[%s19527_s7 + $0x634] ss:$12 sps:$4 sm:$0xff]  }
 0xd09   :  { %8694 = vmatmul.mubr.bf16.vlgmr.msra.gmra.mrb[216].mxu1 %v18229_v17  ;;  %8258 = vmatpush1.bf16.msra.mxu0 %v14818_v10 }
 0xd0a   :  { %8289 = vmatprep.mubr.bf16.mxu0 %v17919_v1  ;;  %12915 = vmatpush3.bf16.msra.mxu1 %v14822_v56  ;;  %v14828_v1 = vld [vmem:[%s19527_s7 + $0x630] ss:$12 sps:$4 sm:$0xff]   ;;  %v14881_v56 = vld [vmem:[%s19527_s7 + $0x76c] ss:$12 sps:$4 sm:$0xff]  }
 0xd0b   :  { %8259 = vmatprep.subr.bf16.mxu0 %v14825_v19  ;;  %12916 = vmatprep.subr.bf16.mxu1 %v14826_v41 }
 0xd0c   :  { %8733 = vmatprep.mubr.bf16.mxu1 %v18240_v61 }
 0xd0d   :  { %8260 = vmatpush1.bf16.msra.mxu0 %v14823_v47  ;;  %v14879_v47 = vld [vmem:[%s19527_s7 + $0x768] ss:$12 sps:$4 sm:$0xff]  }
 0xd0e   :  { %12917 = vmatpush3.bf16.msra.mxu1 %v14827_v4  ;;  %8261 = vmatprep.subr.bf16.mxu0 %v14830_v35  ;;  %v14884_v4 = vld [vmem:[%s19527_s7 + $0x784] ss:$12 sps:$4 sm:$0xff]   ;;  %v14882_v35 = vld [vmem:[%s19527_s7 + $0x780] ss:$12 sps:$4 sm:$0xff]  }
 0xd0f   :  { %12918 = vmatprep.subr.bf16.mxu1 %v14831_v52  ;;  %v14887_v52 = vld [vmem:[%s19527_s7 + $0x79c] ss:$12 sps:$4 sm:$0xff]  }
 0xd11   :  { %8262 = vmatpush1.bf16.msra.mxu0 %v14828_v1  ;;  %v14885_v1 = vld [vmem:[%s19527_s7 + $0x798] ss:$12 sps:$4 sm:$0xff]  }
 0xd12   :  { %12919 = vmatpush3.bf16.msra.mxu1 %v14832_v20  ;;  %8263 = vmatprep.subr.bf16.mxu0 %v14835_v12  ;;  %v14890_v20 = vld [vmem:[%s19527_s7 + $0x7b4] ss:$12 sps:$4 sm:$0xff]   ;;  %v14888_v12 = vld [vmem:[%s19527_s7 + $0x7b0] ss:$12 sps:$4 sm:$0xff]  }
 0xd13   :  { %12920 = vmatprep.subr.bf16.mxu1 %v14836_v49  ;;  %v14896_v49 = vld [vmem:[%s19527_s7 + $0x7e4] ss:$12 sps:$4 sm:$0xff]  }
 0xd15   :  { %8264 = vmatpush1.bf16.msra.mxu0 %v14833_v33  ;;  %v14894_v33 = vld [vmem:[%s19527_s7 + $0x7e0] ss:$12 sps:$4 sm:$0xff]  }
 0xd16   :  { %12921 = vmatpush3.bf16.msra.mxu1 %v14837_v15  ;;  %8265 = vmatprep.subr.bf16.mxu0 %v14840_v37  ;;  %v14899_v15 = vld [vmem:[%s19527_s7 + $0x7fc] ss:$12 sps:$4 sm:$0xff]   ;;  %v14897_v37 = vld [vmem:[%s19527_s7 + $0x7f8] ss:$12 sps:$4 sm:$0xff]  }
 0xd17   :  { %12922 = vmatprep.subr.bf16.mxu1 %v14841_v51  ;;  %v14902_v51 = vld [vmem:[%s19527_s7 + $0x814] ss:$12 sps:$4 sm:$0xff]  }
 0xd19   :  { %8266 = vmatpush1.bf16.msra.mxu0 %v14838_v7 }
 0xd1a   :  { %12923 = vmatpush3.bf16.msra.mxu1 %v14842_v53  ;;  %8267 = vmatprep.subr.bf16.mxu0 %v14845_v62 }
 0xd1b   :  { %v12776_v32 = vpop.f32.mrb[192].mxu1  ;;  %12924 = vmatprep.subr.bf16.mxu1 %v14846_v34 }
 0xd1c   :  { %v12777_v28 = vpop.f32.mrb[193].mxu1 }
 0xd1d   :  { %8268 = vmatpush1.bf16.msra.mxu0 %v14843_v23  ;;  %v12778_v5 = vadd.f32 %v12777_v28, %v12776_v32  ;;  %v12779_v3 = vpop.f32.mrb[194].mxu1  ;;  %v14900_v23 = vld [vmem:[%s19527_s7 + $0x810] ss:$12 sps:$4 sm:$0xff]  }
 0xd1e   :  { %12925 = vmatpush3.bf16.msra.mxu1 %v14847_v55  ;;  %v12780_v39 = vpop.f32.mrb[195].mxu1  ;;  %8269 = vmatprep.subr.bf16.mxu0 %v14850_v9  ;;  %v14905_v9 = vld [vmem:[%s19527_s7 + $0x82c] ss:$12 sps:$4 sm:$0xff]   ;;  %v14908_v28 = vld [vmem:[%s19527_s7 + $0x844] ss:$12 sps:$4 sm:$0xff]  }
 0xd1f   :  { %12926 = vmatprep.subr.bf16.mxu1 %v14851_v58  ;;  %v14903_v58 = vld [vmem:[%s19527_s7 + $0x828] ss:$12 sps:$4 sm:$0xff]  }
 0xd20   :  { %v14911_v3 = vld [vmem:[%s19527_s7 + $0x85c] ss:$12 sps:$4 sm:$0xff]   ;;  %v14914_v39 = vld [vmem:[%s19527_s7 + $0x874] ss:$12 sps:$4 sm:$0xff]  }
 0xd21   :  { %8270 = vmatpush1.bf16.msra.mxu0 %v14848_v46  ;;  %v14909_v46 = vld [vmem:[%s19527_s7 + $0x858] ss:$12 sps:$4 sm:$0xff]  }
 0xd22   :  { %12927 = vmatpush3.bf16.msra.mxu1 %v14852_v31  ;;  %8271 = vmatprep.subr.bf16.mxu0 %v14855_v29  ;;  %v14912_v31 = vld [vmem:[%s19527_s7 + $0x870] ss:$12 sps:$4 sm:$0xff]   ;;  %v14917_v29 = vld [vmem:[%s19527_s7 + $0x88c] ss:$12 sps:$4 sm:$0xff]  }
 0xd23   :  { %12928 = vmatprep.subr.bf16.mxu1 %v14856_v16  ;;  %v14915_v16 = vld [vmem:[%s19527_s7 + $0x888] ss:$12 sps:$4 sm:$0xff]  }
 0xd25   :  { %8272 = vmatpush1.bf16.msra.mxu0 %v14853_v43  ;;  %v14920_v43 = vld [vmem:[%s19527_s7 + $0x8a4] ss:$12 sps:$4 sm:$0xff]  }
 0xd26   :  { %12929 = vmatpush3.bf16.msra.mxu1 %v14857_v13  ;;  %8273 = vmatprep.subr.bf16.mxu0 %v14860_v27  ;;  %v14918_v13 = vld [vmem:[%s19527_s7 + $0x8a0] ss:$12 sps:$4 sm:$0xff]   ;;  %v14923_v27 = vld [vmem:[%s19527_s7 + $0x8bc] ss:$12 sps:$4 sm:$0xff]  }
 0xd29   :  { %8734 = vmatmul.mubr.bf16.vlgmr.msra.gmra.mrb[220].mxu1 %v18328_v59  ;;  %8274 = vmatpush1.bf16.msra.mxu0 %v14858_v11  ;;  %v14921_v11 = vld [vmem:[%s19527_s7 + $0x8b8] ss:$12 sps:$4 sm:$0xff]  }
 0xd2a   :  { %8275 = vmatprep.subr.bf16.mxu0 %v14863_v36  ;;  %v14926_v36 = vld [vmem:[%s19527_s7 + $0x8d4] ss:$12 sps:$4 sm:$0xff]  }
 0xd2d   :  { %8276 = vmatpush1.bf16.msra.mxu0 %v14861_v40 }
 0xd2e   :  { %8277 = vmatprep.subr.bf16.mxu0 %v14866_v57 }
 0xd31   :  { %8278 = vmatpush1.bf16.msra.mxu0 %v14864_v8  ;;  %v14924_v8 = vld [vmem:[%s19527_s7 + $0x8d0] ss:$12 sps:$4 sm:$0xff]  }
 0xd32   :  { %8279 = vmatprep.subr.bf16.mxu0 %v14869_v42 }
 0xd35   :  { %8280 = vmatpush1.bf16.msra.mxu0 %v14867_v18 }
 0xd36   :  { %8281 = vmatprep.subr.bf16.mxu0 %v14872_v60  ;;  %v14929_v60 = vld [vmem:[%s19527_s7 + $0x8ec] ss:$12 sps:$4 sm:$0xff]  }
 0xd39   :  { %8282 = vmatpush1.bf16.msra.mxu0 %v14870_v26 }
 0xd3a   :  { %8283 = vmatprep.subr.bf16.mxu0 %v14875_v6 }
 0xd3b   :  { %v12798_v2 = vpop.f32.mrb[196].mxu1 }
 0xd3c   :  { %v12799_v48 = vpop.f32.mrb[197].mxu1 }
 0xd3d   :  { %v12800_v24 = vadd.f32 %v12799_v48, %v12798_v2  ;;  %8284 = vmatpush1.bf16.msra.mxu0 %v14873_v14  ;;  %v12801_v10 = vpop.f32.mrb[198].mxu1  ;;  %v14927_v14 = vld [vmem:[%s19527_s7 + $0x8e8] ss:$12 sps:$4 sm:$0xff]   ;;  %v14930_v2 = vld [vmem:[%s19527_s7 + $0x900] ss:$12 sps:$4 sm:$0xff]  }
 0xd3e   :  { %8285 = vmatprep.subr.bf16.mxu0 %v14878_v45  ;;  %v12802_v19 = vpop.f32.mrb[199].mxu1  ;;  %v14932_v45 = vld [vmem:[%s19527_s7 + $0x904] ss:$12 sps:$4 sm:$0xff]   ;;  %v14935_v48 = vld [vmem:[%s19527_s7 + $0x91c] ss:$12 sps:$4 sm:$0xff]  }
 0xd3f   :  { %v8496_v41 = vadd.f32 %v12800_v24, %v12778_v5  ;;  %v14906_v5 = vld [vmem:[%s19527_s7 + $0x840] ss:$12 sps:$4 sm:$0xff]   ;;  %v14933_v24 = vld [vmem:[%s19527_s7 + $0x918] ss:$12 sps:$4 sm:$0xff]   ;;  %v14936_v10 = vld [vmem:[%s19527_s7 + $0x930] ss:$12 sps:$4 sm:$0xff]  }
 0xd40   :  { %v14942_v19 = vld [vmem:[%s19527_s7 + $0x960] ss:$12 sps:$4 sm:$0xff]  }
 0xd41   :  { %8286 = vmatpush1.bf16.msra.mxu0 %v14876_v44  ;;  %v14938_v44 = vld [vmem:[%s19527_s7 + $0x934] ss:$12 sps:$4 sm:$0xff]  }
 0xd42   :  { %8287 = vmatprep.subr.bf16.mxu0 %v14881_v56  ;;  %v14944_v56 = vld [vmem:[%s19527_s7 + $0x964] ss:$12 sps:$4 sm:$0xff]  }
 0xd45   :  { %8288 = vmatpush1.bf16.msra.mxu0 %v14879_v47  ;;  %v14945_v47 = vld [vmem:[%s19527_s7 + $0x978] ss:$12 sps:$4 sm:$0xff]  }
 0xd46   :  { %8298 = vmatprep.subr.bf16.mxu0 %v14884_v4  ;;  %v14950_v4 = vld [vmem:[%s19527_s7 + $0x994] ss:$12 sps:$4 sm:$0xff]  }
 0xd48   :  { %8290 = vmatmul.mubr.bf16.vlgmr.msra.gmra.mrb[72].mxu0 %v18015_v21  ;;  %v14893_v21 = vld [vmem:[%s19527_s7 + $0x7cc] ss:$12 sps:$4 sm:$0xff]  }
 0xd49   :  { %8299 = vmatpush1.bf16.msra.mxu0 %v14882_v35  ;;  %8330 = vmatprep.mubr.bf16.mxu0 %v18026_v63  ;;  %v14891_v63 = vld [vmem:[%s19527_s7 + $0x7c8] ss:$12 sps:$4 sm:$0xff]  }
 0xd4a   :  { %8300 = vmatprep.subr.bf16.mxu0 %v14887_v52 }
 0xd4d   :  { %8301 = vmatpush1.bf16.msra.mxu0 %v14885_v1  ;;  %v14948_v1 = vld [vmem:[%s19527_s7 + $0x990] ss:$12 sps:$4 sm:$0xff]  }
 0xd4e   :  { %8302 = vmatprep.subr.bf16.mxu0 %v14890_v20 }
 0xd51   :  { %8303 = vmatpush1.bf16.msra.mxu0 %v14888_v12 }
 0xd52   :  { %8304 = vmatprep.subr.bf16.mxu0 %v14893_v21  ;;  %v14953_v21 = vld [vmem:[%s19527_s7 + $0x9ac] ss:$12 sps:$4 sm:$0xff]  }
 0xd55   :  { %8305 = vmatpush1.bf16.msra.mxu0 %v14891_v63 }
 0xd56   :  { %8306 = vmatprep.subr.bf16.mxu0 %v14896_v49 }
 0xd59   :  { %8307 = vmatpush1.bf16.msra.mxu0 %v14894_v33  ;;  %v14951_v33 = vld [vmem:[%s19527_s7 + $0x9a8] ss:$12 sps:$4 sm:$0xff]  }
 0xd5a   :  { %8308 = vmatprep.subr.bf16.mxu0 %v14899_v15  ;;  %v14956_v15 = vld [vmem:[%s19527_s7 + $0x9c4] ss:$12 sps:$4 sm:$0xff]  }
 0xd5b   :  { %v12820_v7 = vpop.f32.mrb[200].mxu1 }
 0xd5c   :  { %v12821_v53 = vpop.f32.mrb[201].mxu1 }
 0xd5d   :  { %v12822_v62 = vadd.f32 %v12821_v53, %v12820_v7  ;;  %8309 = vmatpush1.bf16.msra.mxu0 %v14897_v37  ;;  %v12823_v34 = vpop.f32.mrb[202].mxu1  ;;  %v14954_v37 = vld [vmem:[%s19527_s7 + $0x9c0] ss:$12 sps:$4 sm:$0xff]   ;;  %v14957_v7 = vld [vmem:[%s19527_s7 + $0x9d8] ss:$12 sps:$4 sm:$0xff]  }
 0xd5e   :  { %v12824_v55 = vpop.f32.mrb[203].mxu1  ;;  %8310 = vmatprep.subr.bf16.mxu0 %v14902_v51  ;;  %v14959_v51 = vld [vmem:[%s19527_s7 + $0x9dc] ss:$12 sps:$4 sm:$0xff]   ;;  %v14962_v53 = vld [vmem:[%s19527_s7 + $0x9f4] ss:$12 sps:$4 sm:$0xff]  }
 0xd5f   :  { %v8536_v32 = vadd.f32 %v12822_v62, %v8496_v41  ;;  %v14947_v41 = vld [vmem:[%s19527_s7 + $0x97c] ss:$12 sps:$4 sm:$0xff]   ;;  %v14965_v34 = vld [vmem:[%s19527_s7 + $0xa0c] ss:$12 sps:$4 sm:$0xff]   ;;  %v14968_v55 = vld [vmem:[%s19527_s7 + $0xa24] ss:$12 sps:$4 sm:$0xff]  }
 0xd60   :  { %v14960_v62 = vld [vmem:[%s19527_s7 + $0x9f0] ss:$12 sps:$4 sm:$0xff]  }
 0xd61   :  { %8311 = vmatpush1.bf16.msra.mxu0 %v14900_v23  ;;  %v14963_v23 = vld [vmem:[%s19527_s7 + $0xa08] ss:$12 sps:$4 sm:$0xff]  }
 0xd62   :  { %8312 = vmatprep.subr.bf16.mxu0 %v14905_v9  ;;  %v14966_v9 = vld [vmem:[%s19527_s7 + $0xa20] ss:$12 sps:$4 sm:$0xff]  }
 0xd65   :  { %8313 = vmatpush1.bf16.msra.mxu0 %v14903_v58  ;;  %v14969_v58 = vld [vmem:[%s19527_s7 + $0xa38] ss:$12 sps:$4 sm:$0xff]  }
 0xd66   :  { %8314 = vmatprep.subr.bf16.mxu0 %v14908_v28  ;;  %v14974_v28 = vld [vmem:[%s19527_s7 + $0xa54] ss:$12 sps:$4 sm:$0xff]  }
 0xd69   :  { %8315 = vmatpush1.bf16.msra.mxu0 %v14906_v5 }
 0xd6a   :  { %8316 = vmatprep.subr.bf16.mxu0 %v14911_v3 }
 0xd6d   :  { %8317 = vmatpush1.bf16.msra.mxu0 %v14909_v46  ;;  %v14972_v46 = vld [vmem:[%s19527_s7 + $0xa50] ss:$12 sps:$4 sm:$0xff]  }
 0xd6e   :  { %8318 = vmatprep.subr.bf16.mxu0 %v14914_v39 }
 0xd71   :  { %8319 = vmatpush1.bf16.msra.mxu0 %v14912_v31  ;;  %v14977_v31 = vld [vmem:[%s19527_s7 + $0xa6c] ss:$12 sps:$4 sm:$0xff]  }
 0xd72   :  { %8320 = vmatprep.subr.bf16.mxu0 %v14917_v29 }
 0xd75   :  { %8321 = vmatpush1.bf16.msra.mxu0 %v14915_v16 }
 0xd76   :  { %8322 = vmatprep.subr.bf16.mxu0 %v14920_v43 }
 0xd79   :  { %8323 = vmatpush1.bf16.msra.mxu0 %v14918_v13  ;;  %v14975_v13 = vld [vmem:[%s19527_s7 + $0xa68] ss:$12 sps:$4 sm:$0xff]  }
 0xd7a   :  { %8324 = vmatprep.subr.bf16.mxu0 %v14923_v27  ;;  %v14980_v27 = vld [vmem:[%s19527_s7 + $0xa84] ss:$12 sps:$4 sm:$0xff]  }
 0xd7c   :  { %v12842_v40 = vpop.f32.mrb[204].mxu1 }
 0xd7d   :  { %v12843_v57 = vpop.f32.mrb[205].mxu1  ;;  %8325 = vmatpush1.bf16.msra.mxu0 %v14921_v11  ;;  %v14978_v11 = vld [vmem:[%s19527_s7 + $0xa80] ss:$12 sps:$4 sm:$0xff]  }
 0xd7e   :  { %v12844_v42 = vadd.f32 %v12843_v57, %v12842_v40  ;;  %v12845_v18 = vpop.f32.mrb[206].mxu1  ;;  %8326 = vmatprep.subr.bf16.mxu0 %v14926_v36  ;;  %v14983_v36 = vld [vmem:[%s19527_s7 + $0xa9c] ss:$12 sps:$4 sm:$0xff]   ;;  %v14981_v40 = vld [vmem:[%s19527_s7 + $0xa98] ss:$12 sps:$4 sm:$0xff]  }
 0xd7f   :  { %v12846_v26 = vpop.f32.mrb[207].mxu1  ;;  %v14986_v57 = vld [vmem:[%s19527_s7 + $0xab4] ss:$12 sps:$4 sm:$0xff]  }
 0xd80   :  { %v8576_v6 = vadd.f32 %v12844_v42, %v8536_v32  ;;  %v14971_v32 = vld [vmem:[%s19527_s7 + $0xa3c] ss:$12 sps:$4 sm:$0xff]   ;;  %v14992_v42 = vld [vmem:[%s19527_s7 + $0xae4] ss:$12 sps:$4 sm:$0xff]   ;;  %v14990_v18 = vld [vmem:[%s19527_s7 + $0xae0] ss:$12 sps:$4 sm:$0xff]  }
 0xd81   :  { %8327 = vmatpush1.bf16.msra.mxu0 %v14924_v8  ;;  %v14984_v8 = vld [vmem:[%s19527_s7 + $0xab0] ss:$12 sps:$4 sm:$0xff]   ;;  %v14993_v26 = vld [vmem:[%s19527_s7 + $0xaf8] ss:$12 sps:$4 sm:$0xff]  }
 0xd82   :  { %8328 = vmatprep.subr.bf16.mxu0 %v14929_v60  ;;  %v14995_v60 = vld [vmem:[%s19527_s7 + $0xafc] ss:$12 sps:$4 sm:$0xff]  }
 0xd85   :  { %8329 = vmatpush1.bf16.msra.mxu0 %v14927_v14 }
 0xd86   :  { %8339 = vmatprep.subr.bf16.mxu0 %v14932_v45 }
 0xd88   :  { %8331 = vmatmul.mubr.bf16.vlgmr.msra.gmra.mrb[72].mxu0 %v18117_v50  ;;  %v14941_v50 = vld [vmem:[%s19527_s7 + $0x94c] ss:$12 sps:$4 sm:$0xff]  }
 0xd89   :  { %8340 = vmatpush1.bf16.msra.mxu0 %v14930_v2  ;;  %8371 = vmatprep.mubr.bf16.mxu0 %v18133_v54  ;;  %v14939_v54 = vld [vmem:[%s19527_s7 + $0x948] ss:$12 sps:$4 sm:$0xff]   ;;  %v14996_v2 = vld [vmem:[%s19527_s7 + $0xb10] ss:$12 sps:$4 sm:$0xff]  }
 0xd8a   :  { %8341 = vmatprep.subr.bf16.mxu0 %v14935_v48 }
 0xd8d   :  { %8342 = vmatpush1.bf16.msra.mxu0 %v14933_v24 }
 0xd8e   :  { %8343 = vmatprep.subr.bf16.mxu0 %v14938_v44  ;;  %v15001_v44 = vld [vmem:[%s19527_s7 + $0xb2c] ss:$12 sps:$4 sm:$0xff]  }
 0xd91   :  { %8344 = vmatpush1.bf16.msra.mxu0 %v14936_v10 }
 0xd92   :  { %8345 = vmatprep.subr.bf16.mxu0 %v14941_v50 }
 0xd95   :  { %8346 = vmatpush1.bf16.msra.mxu0 %v14939_v54  ;;  %v14999_v54 = vld [vmem:[%s19527_s7 + $0xb28] ss:$12 sps:$4 sm:$0xff]  }
 0xd96   :  { %8347 = vmatprep.subr.bf16.mxu0 %v14944_v56  ;;  %v15004_v56 = vld [vmem:[%s19527_s7 + $0xb44] ss:$12 sps:$4 sm:$0xff]  }
 0xd99   :  { %8348 = vmatpush1.bf16.msra.mxu0 %v14942_v19  ;;  %v15002_v19 = vld [vmem:[%s19527_s7 + $0xb40] ss:$12 sps:$4 sm:$0xff]  }
 0xd9a   :  { %8349 = vmatprep.subr.bf16.mxu0 %v14947_v41  ;;  %v15007_v41 = vld [vmem:[%s19527_s7 + $0xb5c] ss:$12 sps:$4 sm:$0xff]  }
 0xd9c   :  { %v12864_v35 = vpop.f32.mrb[208].mxu1 }
 0xd9d   :  { %v12865_v52 = vpop.f32.mrb[209].mxu1  ;;  %8350 = vmatpush1.bf16.msra.mxu0 %v14945_v47  ;;  %v15005_v47 = vld [vmem:[%s19527_s7 + $0xb58] ss:$12 sps:$4 sm:$0xff]  }
 0xd9e   :  { %v12866_v20 = vadd.f32 %v12865_v52, %v12864_v35  ;;  %v12867_v12 = vpop.f32.mrb[210].mxu1  ;;  %8351 = vmatprep.subr.bf16.mxu0 %v14950_v4  ;;  %v15010_v4 = vld [vmem:[%s19527_s7 + $0xb74] ss:$12 sps:$4 sm:$0xff]   ;;  %v15008_v35 = vld [vmem:[%s19527_s7 + $0xb70] ss:$12 sps:$4 sm:$0xff]  }
 0xd9f   :  { %v12868_v63 = vpop.f32.mrb[211].mxu1  ;;  %v15013_v52 = vld [vmem:[%s19527_s7 + $0xb8c] ss:$12 sps:$4 sm:$0xff]  }
 0xda0   :  { %v8616_v49 = vadd.f32 %v12866_v20, %v8576_v6  ;;  %v14998_v6 = vld [vmem:[%s19527_s7 + $0xb14] ss:$12 sps:$4 sm:$0xff]   ;;  %v15016_v20 = vld [vmem:[%s19527_s7 + $0xba4] ss:$12 sps:$4 sm:$0xff]  }
 0xda1   :  { %8352 = vmatpush1.bf16.msra.mxu0 %v14948_v1  ;;  %v15011_v1 = vld [vmem:[%s19527_s7 + $0xb88] ss:$12 sps:$4 sm:$0xff]   ;;  %v15014_v12 = vld [vmem:[%s19527_s7 + $0xba0] ss:$12 sps:$4 sm:$0xff]   ;;  %v15017_v63 = vld [vmem:[%s19527_s7 + $0xbb8] ss:$12 sps:$4 sm:$0xff]  }
 0xda2   :  { %8353 = vmatprep.subr.bf16.mxu0 %v14953_v21  ;;  %v15019_v21 = vld [vmem:[%s19527_s7 + $0xbbc] ss:$12 sps:$4 sm:$0xff]  }
 0xda5   :  { %8354 = vmatpush1.bf16.msra.mxu0 %v14951_v33 }
 0xda6   :  { %8355 = vmatprep.subr.bf16.mxu0 %v14956_v15 }
 0xda9   :  { %8356 = vmatpush1.bf16.msra.mxu0 %v14954_v37  ;;  %v15020_v37 = vld [vmem:[%s19527_s7 + $0xbd0] ss:$12 sps:$4 sm:$0xff]  }
 0xdaa   :  { %8357 = vmatprep.subr.bf16.mxu0 %v14959_v51 }
 0xdad   :  { %8358 = vmatpush1.bf16.msra.mxu0 %v14957_v7  ;;  %v15025_v7 = vld [vmem:[%s19527_s7 + $0xbec] ss:$12 sps:$4 sm:$0xff]  }
 0xdae   :  { %8359 = vmatprep.subr.bf16.mxu0 %v14962_v53 }
 0xdb1   :  { %8360 = vmatpush1.bf16.msra.mxu0 %v14960_v62 }
 0xdb2   :  { %8361 = vmatprep.subr.bf16.mxu0 %v14965_v34 }
 0xdb5   :  { %8362 = vmatpush1.bf16.msra.mxu0 %v14963_v23  ;;  %v15023_v23 = vld [vmem:[%s19527_s7 + $0xbe8] ss:$12 sps:$4 sm:$0xff]  }
 0xdb6   :  { %8363 = vmatprep.subr.bf16.mxu0 %v14968_v55  ;;  %v18676_v55 = vld [vmem:[%s19526_s11] sm:$0xff]  }
 0xdb9   :  { %8364 = vmatpush1.bf16.msra.mxu0 %v14966_v9  ;;  %v18685_v9 = vld [vmem:[%s19526_s11 + $0x8] sm:$0xff]  }
 0xdba   :  { %8365 = vmatprep.subr.bf16.mxu0 %v14971_v32 }
 0xdbc   :  { %v12886_v5 = vpop.f32.mrb[212].mxu1 }
 0xdbd   :  { %v12887_v3 = vpop.f32.mrb[213].mxu1  ;;  %8366 = vmatpush1.bf16.msra.mxu0 %v14969_v58 }
 0xdbe   :  { %v12888_v39 = vadd.f32 %v12887_v3, %v12886_v5  ;;  %8367 = vmatprep.subr.bf16.mxu0 %v14974_v28  ;;  %v12889_v29 = vpop.f32.mrb[214].mxu1 }
 0xdbf   :  { %v12890_v16 = vpop.f32.mrb[215].mxu1 }
 0xdc0   :  { %v8656_v43 = vadd.f32 %v12888_v39, %v8616_v49  ;;  %v15022_v49 = vld [vmem:[%s19527_s7 + $0xbd4] ss:$12 sps:$4 sm:$0xff]  }
 0xdc1   :  { %8368 = vmatpush1.bf16.msra.mxu0 %v14972_v46 }
 0xdc2   :  { %8369 = vmatprep.subr.bf16.mxu0 %v14977_v31 }
 0xdc5   :  { %8370 = vmatpush1.bf16.msra.mxu0 %v14975_v13 }
 0xdc6   :  { %8380 = vmatprep.subr.bf16.mxu0 %v14980_v27 }
 0xdc8   :  { %8372 = vmatmul.mubr.bf16.vlgmr.msra.gmra.mrb[72].mxu0 %v18229_v17  ;;  %v14989_v17 = vld [vmem:[%s19527_s7 + $0xacc] ss:$12 sps:$4 sm:$0xff]  }
 0xdc9   :  { %8381 = vmatpush1.bf16.msra.mxu0 %v14978_v11  ;;  %8412 = vmatprep.mubr.bf16.mxu0 %v18240_v61  ;;  %v14987_v61 = vld [vmem:[%s19527_s7 + $0xac8] ss:$12 sps:$4 sm:$0xff]  }
 0xdca   :  { %8382 = vmatprep.subr.bf16.mxu0 %v14983_v36 }
 0xdcd   :  { %8383 = vmatpush1.bf16.msra.mxu0 %v14981_v40 }
 0xdce   :  { %8384 = vmatprep.subr.bf16.mxu0 %v14986_v57 }
 0xdd1   :  { %8385 = vmatpush1.bf16.msra.mxu0 %v14984_v8  ;;  %v15028_v8 = vld [vmem:[%s19528_s8 + $0x64] ss:$12 sps:$4 sm:$0xff]  }
 0xdd2   :  { %8386 = vmatprep.subr.bf16.mxu0 %v14989_v17 }
 0xdd5   :  { %8387 = vmatpush1.bf16.msra.mxu0 %v14987_v61  ;;  %v18714_v61 = vld [vmem:[%s19529_s15] sm:$0xf] }
 0xdd6   :  { %8388 = vmatprep.subr.bf16.mxu0 %v14992_v42  ;;  %v15026_v42 = vld [vmem:[%s19528_s8 + $0x60] ss:$12 sps:$4 sm:$0xff]  }
 0xdd9   :  { %8389 = vmatpush1.bf16.msra.mxu0 %v14990_v18  ;;  %v15031_v18 = vld [vmem:[%s19528_s8 + $0x7c] ss:$12 sps:$4 sm:$0xff]  }
 0xdda   :  { %8390 = vmatprep.subr.bf16.mxu0 %v14995_v60  ;;  %v15029_v60 = vld [vmem:[%s19528_s8 + $0x78] ss:$12 sps:$4 sm:$0xff]  }
 0xddc   :  { %v12908_v14 = vpop.f32.mrb[216].mxu1 }
 0xddd   :  { %v12909_v45 = vpop.f32.mrb[217].mxu1  ;;  %8391 = vmatpush1.bf16.msra.mxu0 %v14993_v26  ;;  %v8767_v26 = vld [vmem:[%s19517_s3 + $0x4] ss:$0 sm:$0xff] }
 0xdde   :  { %v12910_v48 = vadd.f32 %v12909_v45, %v12908_v14  ;;  %v12911_v24 = vpop.f32.mrb[218].mxu1  ;;  %8392 = vmatprep.subr.bf16.mxu0 %v14998_v6 }
 0xddf   :  { %v12912_v10 = vpop.f32.mrb[219].mxu1 }
 0xde0   :  { %v8696_v50 = vadd.f32 %v12910_v48, %v8656_v43 }
 0xde1   :  { %8393 = vmatpush1.bf16.msra.mxu0 %v14996_v2 }
 0xde2   :  { %8394 = vmatprep.subr.bf16.mxu0 %v15001_v44  ;;  %v15032_v44 = vld [vmem:[%s19528_s8 + $0x68] ss:$12 sps:$4 sm:$0xff]  }
 0xde5   :  { %8395 = vmatpush1.bf16.msra.mxu0 %v14999_v54  ;;  %v15036_v54 = vld [vmem:[%s19528_s8 + $0x4] ss:$12 sps:$4 sm:$0xff]  }
 0xde6   :  { %8396 = vmatprep.subr.bf16.mxu0 %v15004_v56  ;;  %v15034_v56 = vld [vmem:[%s19528_s8] ss:$12 sps:$4 sm:$0xff]  }
 0xde9   :  { %8397 = vmatpush1.bf16.msra.mxu0 %v15002_v19  ;;  %v15039_v19 = vld [vmem:[%s19528_s8 + $0x1c] ss:$12 sps:$4 sm:$0xff]  }
 0xdea   :  { %8398 = vmatprep.subr.bf16.mxu0 %v15007_v41  ;;  %v15037_v41 = vld [vmem:[%s19528_s8 + $0x18] ss:$12 sps:$4 sm:$0xff]  }
 0xded   :  { %8399 = vmatpush1.bf16.msra.mxu0 %v15005_v47 }
 0xdee   :  { %8400 = vmatprep.subr.bf16.mxu0 %v15010_v4  ;;  %v15042_v4 = vld [vmem:[%s19528_s8 + $0x34] ss:$12 sps:$4 sm:$0xff]  }
 0xdf1   :  { %8401 = vmatpush1.bf16.msra.mxu0 %v15008_v35 }
 0xdf2   :  { %8402 = vmatprep.subr.bf16.mxu0 %v15013_v52 }
 0xdf5   :  { %8403 = vmatpush1.bf16.msra.mxu0 %v15011_v1  ;;  %v15040_v1 = vld [vmem:[%s19528_s8 + $0x30] ss:$12 sps:$4 sm:$0xff]  }
 0xdf6   :  { %8404 = vmatprep.subr.bf16.mxu0 %v15016_v20  ;;  %v15045_v20 = vld [vmem:[%s19528_s8 + $0x4c] ss:$12 sps:$4 sm:$0xff]  }
 0xdf9   :  { %8405 = vmatpush1.bf16.msra.mxu0 %v15014_v12 }
 0xdfa   :  { %8406 = vmatprep.subr.bf16.mxu0 %v15019_v21 }
 0xdfc   :  { %v12930_v33 = vpop.f32.mrb[220].mxu1 }
 0xdfd   :  { %v12931_v15 = vpop.f32.mrb[221].mxu1  ;;  %8407 = vmatpush1.bf16.msra.mxu0 %v15017_v63  ;;  %v15043_v63 = vld [vmem:[%s19528_s8 + $0x48] ss:$12 sps:$4 sm:$0xff]  }
 0xdfe   :  { %v12932_v51 = vadd.f32 %v12931_v15, %v12930_v33  ;;  %8408 = vmatprep.subr.bf16.mxu0 %v15022_v49  ;;  %v12933_v53 = vpop.f32.mrb[222].mxu1  ;;  %v15046_v33 = vld [vmem:[%s19528_s8 + $0x8] ss:$12 sps:$4 sm:$0xff]  }
 0xdff   :  { %v12934_v62 = vpop.f32.mrb[223].mxu1 }
 0xe00   :  { %v8736_v34 = vadd.f32 %v12932_v51, %v8696_v50  ;;  %v15033_v50 = vld [vmem:[%s19528_s8 + $0x80] ss:$12 sps:$4 sm:$0xff]   ;;  %v15048_v51 = vld [vmem:[%s19528_s8 + $0x38] ss:$12 sps:$4 sm:$0xff]  }
 0xe01   :  { %8409 = vmatpush1.bf16.msra.mxu0 %v15020_v37  ;;  %v15047_v37 = vld [vmem:[%s19528_s8 + $0x20] ss:$12 sps:$4 sm:$0xff]  }
 0xe02   :  { %8410 = vmatprep.subr.bf16.mxu0 %v15025_v7  ;;  %v8765_v57 = vpack.c.bf16 %v8736_v34, %v8736_v34  ;;  %v15049_v7 = vld [vmem:[%s19528_s8 + $0x50] ss:$12 sps:$4 sm:$0xff]  }
 0xe04   :  { %v8774_v17 = vsel %vm8772_vm6, %v8765_v57, 0 }
 0xe05   :  { %8411 = vmatpush1.bf16.msra.mxu0 %v15023_v23 }
 0xe06   :  { %13182 = vmatprep.subr.bf16.mxu0 %v17563_v38 }
 0xe08   :  { %8413 = vmatmul.mubr.bf16.vlgmr.msra.gmra.mrb[72].mxu0 %v18328_v59 }
 0xe09   :  { %13183 = vmatpush3.bf16.msra.mxu0 %v17563_v38  ;;  %13186 = vmatprep.mubr.msk.bf16.mxu0 %vm2499_vm1, %v18676_v55  ;;  %v15308_v38 = vmov 0.0  }
 0xe0a   :  { %13184 = vmatprep.subr.bf16.mxu0 %v17567_v25  ;;  %13168 = vmatprep.subr.bf16.mxu1 %v15308_v38 }
 0xe0b   :  { %13178 = vmatprep.mubr.msk.bf16.mxu1 %vm15309_vm5, %v15308_v38 }
 0xe0d   :  { %13185 = vmatpush3.bf16.msra.mxu0 %v17567_v25 }
 0xe10   :  { %13187 = vmatmul.mubr.msk.bf16.vlgmr.msra.gmra.mrb[76].mxu0 %vm2499_vm1, %v18685_v9 }
 0xedb   :  { %v8414_v59 = vpop.f32.mrb[72].mxu0 }
 0xedc   :  { %8745 = vrot.lane.b32.xlu1 %v8414_v59, %s15302_s27  ;;  %8742 = vrot.lane.b32.xlu0 %v8414_v59, %s15303_s4  ;;  %v8416_v32 = vpop.f32.mrb[73].mxu0 }
 0xedd   :  { %v8418_v58 = vpop.f32.mrb[74].mxu0 }
 0xede   :  { %v8419_v28 = vpop.f32.mrb[75].mxu0 }
 0xee0   :  { %8748 = vrot.lane.b32.xlu0 %v8414_v59, %s15301_s21  ;;  %8752 = vrot.lane.b32.xlu1 %v8416_v32, %s15303_s4 }
 0xee3   :  { %v13188_v25 = vpop.f32.mrb[76].mxu0 }
 0xee4   :  { %8755 = vrot.lane.b32.xlu0 %v8416_v32, %s15302_s27  ;;  %8758 = vrot.lane.b32.xlu1 %v8416_v32, %s15301_s21  ;;  %v18698_v5 = vpop.f32.mrb[77].mxu0 }
 0xee5   :  { %v13189_v3 = vpop.f32.mrb[78].mxu0 }
 0xee6   :  { %v8855_v46 = vpop.f32.mrb[79].mxu0 }
 0xee8   :  { %8868 = vrot.lane.b32.xlu0 %v8855_v46, %s15307_s26  ;;  %8872 = vrot.lane.b32.xlu1 %v13188_v25, %s15301_s21 }
 0xeec   :  { %8876 = vrot.lane.b32.xlu0 %v13189_v3, %s15306_s25 }
 0xf4e   :  { %v8746_v39 = vpop.permute.xlu1 %8745  ;;  %v8743_v31 = vpop.permute.xlu0 %8742 }
 0xf4f   :  { %v8761_v29 = vpack.c.bf16 %v8743_v31, %v8414_v59 }
 0xf51   :  { %13169 = vmatpush3.bf16.msra.mxu1 %v8761_v29 }
 0xf52   :  { %v8749_v16 = vpop.permute.xlu0 %8748  ;;  %v8753_v43 = vpop.permute.xlu1 %8752  ;;  %13170 = vmatprep.subr.bf16.mxu1 %v15308_v38 }
 0xf53   :  { %v8762_v13 = vpack.c.bf16 %v8749_v16, %v8746_v39  ;;  %v8763_v27 = vpack.c.bf16 %v8753_v43, %v8416_v32 }
 0xf55   :  { %13171 = vmatpush3.bf16.msra.mxu1 %v8762_v13 }
 0xf56   :  { %13172 = vmatprep.subr.bf16.mxu1 %v15308_v38  ;;  %v8756_v11 = vpop.permute.xlu0 %8755  ;;  %v8759_v36 = vpop.permute.xlu1 %8758 }
 0xf57   :  { %v8764_v40 = vpack.c.bf16 %v8759_v36, %v8756_v11  ;;  %v9196_v36 = vld [vmem:[%s19517_s3 + $0x5] ss:$0 sm:$0xff] }
 0xf59   :  { %13173 = vmatpush3.bf16.msra.mxu1 %v8763_v27 }
 0xf5a   :  { %13174 = vmatprep.subr.bf16.mxu1 %v15308_v38  ;;  %v8869_v47 = vpop.permute.xlu0 %8868  ;;  %v8873_v52 = vpop.permute.xlu1 %8872 }
 0xf5b   :  { %v8879_v35 = vsel %vm479_vm0, %v18698_v5, %v8869_v47 }
 0xf5c   :  { %v8880_v12 = vsel %vm2499_vm1, %v8879_v35, %v8873_v52  ;;  %v15050_v35 = vld [vmem:[%s19534_s23 + $0x110] ss:$8 sps:$4 sm:$0xff]  }
 0xf5d   :  { %13175 = vmatpush3.bf16.msra.mxu1 %v8764_v40 }
 0xf5e   :  { %13176 = vmatprep.subr.bf16.mxu1 %v15308_v38  ;;  %v8877_v21 = vpop.permute.xlu0 %8876 }
 0xf5f   :  { %v8881_v49 = vsel %vm4366_vm4, %v8880_v12, %v8877_v21  ;;  %v15053_v12 = vld [vmem:[%s19534_s23 + $0xa0] ss:$8 sps:$4 sm:$0xff]   ;;  %v15054_v21 = vld [vmem:[%s19534_s23 + $0x130] ss:$8 sps:$4 sm:$0xff]   ;;  %vm11377_vm4 = vcmask 1024  }
 0xf60   :  { %v8882_v15 = vpack.c.bf16 %v8881_v49, %v8881_v49  ;;  %v15056_v49 = vld [vmem:[%s19534_s23 + $0x140] ss:$8 sps:$4 sm:$0xff]  }
 0xf61   :  { %13177 = vmatpush3.bf16.msra.mxu1 %v8774_v17 }
 0xf62   :  { %8942 = vmatprep.subr.bf16.mxu1 %v15028_v8 }
 0xf64   :  { %13179 = vmatmul.mubr.msk.bf16.vlgmr.msra.gmra.mrb[224].mxu1 %vm8768_vm7, %v18714_v61 }
 0xf65   :  { %8943 = vmatpush1.bf16.msra.mxu1 %v15026_v42  ;;  %8974 = vmatprep.mubr.bf16.mxu1 %v15300_v0 }
 0xf66   :  { %8944 = vmatprep.subr.bf16.mxu1 %v15031_v18 }
 0xf69   :  { %8945 = vmatpush1.bf16.msra.mxu1 %v15029_v60 }
 0xf6a   :  { %13190 = vmatprep.subr.bf16.mxu1 %v15308_v38 }
0x1037   :  { %v8810_v6 = vpop.f32.mrb[224].mxu1 }
0x1038   :  { %v8811_v14 = vadd.f32 %v8810_v6, %v8767_v26  ;;  %v13180_v45 = vpop.f32.mrb[225].mxu1 }
0x1039   :  { %v8813_v2 = vpop.f32.mrb[226].mxu1 }
0x103a   :  { %v8816_v48 = vmax.f32 %v8811_v14, 0.0  ;;  %v13181_v24 = vpop.f32.mrb[227].mxu1 }
0x103c   :  { %v8817_v10 = vpack.c.bf16 %v8816_v48, %v8816_v48 }
0x103e   :  { %12171 = vmatmul.mubr.msk.bf16.vlgmr.msra.gmra.mrb[228].mxu1 %vm2499_vm1, %v8817_v10 }
0x103f   :  { %13191 = vmatpush3.bf16.msra.mxu1 %v15032_v44  ;;  %13194 = vmatprep.mubr.msk.bf16.mxu1 %vm15309_vm5, %v15308_v38 }
0x1040   :  { %13192 = vmatprep.subr.bf16.mxu1 %v15308_v38 }
0x1043   :  { %13193 = vmatpush3.bf16.msra.mxu1 %v15033_v50 }
0x1044   :  { %9090 = vmatprep.subr.bf16.mxu1 %v15036_v54 }
0x1046   :  { %13195 = vmatmul.mubr.msk.bf16.vlgmr.msra.gmra.mrb[232].mxu1 %vm2499_vm1, %v8817_v10 }
0x1047   :  { %9091 = vmatpush1.bf16.msra.mxu1 %v15034_v56  ;;  %9122 = vmatprep.mubr.bf16.mxu1 %v15300_v0 }
0x1048   :  { %9092 = vmatprep.subr.bf16.mxu1 %v15039_v19 }
0x104b   :  { %9093 = vmatpush1.bf16.msra.mxu1 %v15037_v41 }
0x104c   :  { %9094 = vmatprep.subr.bf16.mxu1 %v15042_v4 }
0x104f   :  { %9095 = vmatpush1.bf16.msra.mxu1 %v15040_v1  ;;  %v15051_v1 = vld [vmem:[%s19534_s23 + $0x90] ss:$8 sps:$4 sm:$0xff]  }
0x1050   :  { %9096 = vmatprep.subr.bf16.mxu1 %v15045_v20  ;;  %v15052_v20 = vld [vmem:[%s19534_s23 + $0x120] ss:$8 sps:$4 sm:$0xff]  }
0x1053   :  { %9097 = vmatpush1.bf16.msra.mxu1 %v15043_v63  ;;  %v15055_v63 = vld [vmem:[%s19534_s23 + $0xb0] ss:$8 sps:$4 sm:$0xff]  }
0x1054   :  { %13198 = vmatprep.subr.bf16.mxu1 %v15308_v38 }
0x1056   :  { %12185 = vmatmul.mubr.msk.bf16.vlgmr.msra.gmra.mrb[228].mxu1 %vm2516_vm2, %v8882_v15 }
0x1057   :  { %13199 = vmatpush3.bf16.msra.mxu1 %v15046_v33  ;;  %13206 = vmatprep.mubr.msk.bf16.mxu1 %vm15309_vm5, %v15308_v38  ;;  %v15057_v33 = vld [vmem:[%s19534_s23 + $0xc0] ss:$8 sps:$4 sm:$0xff]  }
0x1058   :  { %13200 = vmatprep.subr.bf16.mxu1 %v15308_v38 }
0x105b   :  { %13201 = vmatpush3.bf16.msra.mxu1 %v15047_v37  ;;  %v15059_v37 = vld [vmem:[%s19534_s23 + $0xd0] ss:$8 sps:$4 sm:$0xff]  }
0x105c   :  { %13202 = vmatprep.subr.bf16.mxu1 %v15308_v38 }
0x105f   :  { %13203 = vmatpush3.bf16.msra.mxu1 %v15048_v51  ;;  %v15060_v51 = vld [vmem:[%s19534_s23 + $0x160] ss:$8 sps:$4 sm:$0xff]  }
0x1060   :  { %13204 = vmatprep.subr.bf16.mxu1 %v15308_v38 }
0x1063   :  { %13205 = vmatpush3.bf16.msra.mxu1 %v15049_v7  ;;  %v15061_v7 = vld [vmem:[%s19534_s23 + $0xe0] ss:$8 sps:$4 sm:$0xff]  }
0x1064   :  { %13210 = vmatprep.subr.bf16.mxu1 %v15308_v38 }
0x1066   :  { %13207 = vmatmul.mubr.msk.bf16.vlgmr.msra.gmra.mrb[232].mxu1 %vm2516_vm2, %v8882_v15  ;;  %v15058_v15 = vld [vmem:[%s19534_s23 + $0x150] ss:$8 sps:$4 sm:$0xff]  }
0x1067   :  { %13220 = vmatprep.mubr.msk.bf16.mxu1 %vm15309_vm5, %v15308_v38 }
0x1129   :  { %v9124_v53 = vpop.f32.mrb[228].mxu1 }
0x112a   :  { %9175 = vrot.lane.b32.xlu0 %v9124_v53, %s15302_s27  ;;  %9172 = vrot.lane.b32.xlu1 %v9124_v53, %s15303_s4  ;;  %v9126_v62 = vpop.f32.mrb[229].mxu1 }
0x112b   :  { %v9128_v34 = vpop.f32.mrb[230].mxu1 }
0x112c   :  { %v9129_v23 = vpop.f32.mrb[231].mxu1  ;;  %v15064_v34 = vld [vmem:[%s19534_s23 + $0x180] ss:$8 sps:$4 sm:$0xff]  }
0x112d   :  { %v15065_v23 = vld [vmem:[%s19534_s23 + $0x100] ss:$8 sps:$4 sm:$0xff]  }
0x112e   :  { %9178 = vrot.lane.b32.xlu1 %v9124_v53, %s15301_s21  ;;  %9182 = vrot.lane.b32.xlu0 %v9126_v62, %s15303_s4 }
0x1132   :  { %9185 = vrot.lane.b32.xlu1 %v9126_v62, %s15302_s27  ;;  %9188 = vrot.lane.b32.xlu0 %v9126_v62, %s15301_s21 }
0x1139   :  { %v9165_v59 = vpop.f32.mrb[232].mxu1 }
0x113a   :  { %v13208_v32 = vpop.f32.mrb[233].mxu1  ;;  %v9195_v27 = vpack.c.bf16 %v9165_v59, %v9165_v59  ;;  %v15066_v59 = vld [vmem:[%s19534_s23 + $0x210] ss:$8 sps:$4 sm:$0xff]  }
0x113b   :  { %v9168_v58 = vpop.f32.mrb[234].mxu1 }
0x113c   :  { %v13209_v28 = vpop.f32.mrb[235].mxu1  ;;  %v9198_v11 = vsel %vm8772_vm6, %v9195_v27, 0  ;;  %v15072_v27 = vld [vmem:[%s19534_s23 + $0x240] ss:$8 sps:$4 sm:$0xff]  }
0x119c   :  { %v9176_v25 = vpop.permute.xlu0 %9175  ;;  %v9173_v5 = vpop.permute.xlu1 %9172 }
0x119d   :  { %v9191_v3 = vpack.c.bf16 %v9173_v5, %v9124_v53  ;;  %v15062_v53 = vld [vmem:[%s19534_s23 + $0x170] ss:$8 sps:$4 sm:$0xff]  }
0x119f   :  { %13211 = vmatpush3.bf16.msra.mxu1 %v9191_v3 }
0x11a0   :  { %v9179_v46 = vpop.permute.xlu1 %9178  ;;  %v9183_v39 = vpop.permute.xlu0 %9182  ;;  %13212 = vmatprep.subr.bf16.mxu1 %v15308_v38 }
0x11a1   :  { %v9192_v31 = vpack.c.bf16 %v9179_v46, %v9176_v25  ;;  %v9193_v29 = vpack.c.bf16 %v9183_v39, %v9126_v62  ;;  %v15063_v62 = vld [vmem:[%s19534_s23 + $0xf0] ss:$8 sps:$4 sm:$0xff]   ;;  %v15068_v39 = vld [vmem:[%s19534_s23 + $0x220] ss:$8 sps:$4 sm:$0xff]  }
0x11a2   :  { %v15067_v25 = vld [vmem:[%s19534_s23 + $0x190] ss:$8 sps:$4 sm:$0xff]  }
0x11a3   :  { %13213 = vmatpush3.bf16.msra.mxu1 %v9192_v31 }
0x11a4   :  { %13214 = vmatprep.subr.bf16.mxu1 %v15308_v38  ;;  %v9186_v16 = vpop.permute.xlu1 %9185  ;;  %v9189_v43 = vpop.permute.xlu0 %9188 }
0x11a5   :  { %v9194_v13 = vpack.c.bf16 %v9189_v43, %v9186_v16  ;;  %v15069_v16 = vld [vmem:[%s19534_s23 + $0x1a0] ss:$8 sps:$4 sm:$0xff]   ;;  %v15070_v43 = vld [vmem:[%s19534_s23 + $0x230] ss:$8 sps:$4 sm:$0xff]  }
0x11a7   :  { %13215 = vmatpush3.bf16.msra.mxu1 %v9193_v29 }
0x11a8   :  { %13216 = vmatprep.subr.bf16.mxu1 %v15308_v38 }
0x11ab   :  { %13217 = vmatpush3.bf16.msra.mxu1 %v9194_v13  ;;  %v15071_v13 = vld [vmem:[%s19534_s23 + $0x1b0] ss:$8 sps:$4 sm:$0xff]  }
0x11ac   :  { %13218 = vmatprep.subr.bf16.mxu1 %v15308_v38 }
0x11af   :  { %13219 = vmatpush3.bf16.msra.mxu1 %v9198_v11  ;;  %v15073_v11 = vld [vmem:[%s19534_s23 + $0x1c0] ss:$8 sps:$4 sm:$0xff]  }
0x11b0   :  { %13224 = vmatprep.subr.bf16.mxu1 %v15308_v38 }
0x11b2   :  { %13221 = vmatmul.mubr.msk.bf16.vlgmr.msra.gmra.mrb[236].mxu1 %vm8768_vm7, %v18714_v61  ;;  %v9242_v61 = vld [vmem:[%s19530_s12] sm:$0xf] }
0x11b3   :  { %13226 = vmatprep.mubr.msk.bf16.mxu1 %vm15309_vm5, %v15308_v38 }
0x1285   :  { %v9234_v40 = vpop.f32.mrb[236].mxu1 }
0x1286   :  { %v9235_v57 = vadd.f32 %v9234_v40, %v9196_v36  ;;  %v13222_v8 = vpop.f32.mrb[237].mxu1  ;;  %v15074_v36 = vld [vmem:[%s19534_s23 + $0x250] ss:$8 sps:$4 sm:$0xff]  }
0x1287   :  { %v9237_v17 = vpop.f32.mrb[238].mxu1  ;;  %v15075_v40 = vld [vmem:[%s19534_s23 + $0x1d0] ss:$8 sps:$4 sm:$0xff]   ;;  %v15077_v8 = vld [vmem:[%s19534_s23 + $0x1e0] ss:$8 sps:$4 sm:$0xff]  }
0x1288   :  { %v9240_v42 = vmax.f32 %v9235_v57, 0.0  ;;  %v13223_v18 = vpop.f32.mrb[239].mxu1  ;;  %v15076_v57 = vld [vmem:[%s19534_s23 + $0x260] ss:$8 sps:$4 sm:$0xff]   ;;  %v15078_v17 = vld [vmem:[%s19534_s23 + $0x270] ss:$8 sps:$4 sm:$0xff]  }
0x1289   :  { %v15080_v18 = vld [vmem:[%s19534_s23 + $0x280] ss:$8 sps:$4 sm:$0xff]  }
0x128a   :  { %v9241_v60 = vpack.c.bf16 %v9240_v42, %v9240_v42  ;;  %v15079_v42 = vld [vmem:[%s19534_s23 + $0x1f0] ss:$8 sps:$4 sm:$0xff]  }
0x128c   :  { %v9248_v26 = vsel %vm8772_vm6, %v9241_v60, 0  ;;  %v15081_v60 = vld [vmem:[%s19534_s23 + $0x200] ss:$8 sps:$4 sm:$0xff]  }
0x128d   :  { %13225 = vmatpush3.bf16.msra.mxu1 %v9248_v26 }
0x128e   :  { %13230 = vmatprep.subr.bf16.mxu1 %v17280_v30 }
0x1290   :  { %13227 = vmatmul.mubr.msk.bf16.vlgmr.msra.gmra.mrb[240].mxu1 %vm9243_vm8, %v9242_v61 }
0x1291   :  { %13231 = vmatpush3.bf16.msra.mxu1 %v17280_v30  ;;  %13234 = vmatprep.mubr.msk.bf16.mxu1 %vm2499_vm1, %v18676_v55 }
0x1292   :  { %13232 = vmatprep.subr.bf16.mxu1 %v17293_v22 }
0x1295   :  { %13233 = vmatpush3.bf16.msra.mxu1 %v17293_v22 }
0x1298   :  { %13235 = vmatmul.mubr.msk.bf16.vlgmr.msra.gmra.mrb[244].mxu1 %vm2499_vm1, %v18685_v9 }
0x1299   :  { %9406 = vmatprep.mubr.bf16.mxu1 %v15300_v0 }
0x1363   :  { %v18828_v6 = vpop.f32.mrb[240].mxu1 }
0x1364   :  { %v9291_v14 = vrot.slane %v18828_v6, 2  ;;  %v13228_v45 = vpop.f32.mrb[241].mxu1  ;;  %v9299_v55 = vrot.slane %v18828_v6, 6  ;;  %v9295_v10 = vrot.slane %v18828_v6, 4 }
0x1365   :  { %v9287_v2 = vpop.f32.mrb[242].mxu1  ;;  %v15083_v45 = vld [vmem:[%s19534_s23 + $0x290] ss:$8 sps:$4 sm:$0xff]  }
0x1366   :  { %9292 = vrot.lane.b32.xlu0 %v9291_v14, %s15301_s21  ;;  %v13229_v30 = vpop.f32.mrb[243].mxu1 }
0x1367   :  { %v15084_v30 = vld [vmem:[%s19534_s23 + $0x320] ss:$8 sps:$4 sm:$0xff]  }
0x136a   :  { %9300 = vrot.lane.b32.xlu0 %v9299_v55, %s15303_s4 }
0x136b   :  { %v13236_v48 = vpop.f32.mrb[244].mxu1 }
0x136c   :  { %v9341_v22 = vpop.f32.mrb[245].mxu1 }
0x136d   :  { %v13237_v24 = vpop.f32.mrb[246].mxu1 }
0x136e   :  { %v9344_v44 = vpop.f32.mrb[247].mxu1 }
0x136f   :  { %v13996_v9 = vpack.i.bf16 %v13237_v24, %v9344_v44  ;;  %v15087_v24 = vld [vmem:[%s19534_s23 + $0x2b0] ss:$8 sps:$4 sm:$0xff]   ;;  %v15088_v44 = vld [vmem:[%s19534_s23 + $0x340] ss:$8 sps:$4 sm:$0xff]  }
0x1371   :  { %13997 = vrot.lane.b32.xlu1 %v13996_v9, %s15302_s27  ;;  %v15089_v9 = vld [vmem:[%s19534_s23 + $0x2c0] ss:$8 sps:$4 sm:$0xff]  }
0x1375   :  { %9296 = vrot.lane.b32.xlu1 %v9295_v10, %s15302_s27  ;;  %v15090_v10 = vld [vmem:[%s19534_s23 + $0x350] ss:$8 sps:$4 sm:$0xff]  }
0x13e3   :  { %v13998_v50 = vpop.permute.xlu1 %13997 }
0x13e4   :  { %v14000_v54 = vunpack.i.h.bf16 %v13998_v50  ;;  %v13999_v56 = vunpack.i.l.bf16 %v13998_v50  ;;  %v15091_v50 = vld [vmem:[%s19534_s23 + $0x2d0] ss:$8 sps:$4 sm:$0xff]  }
0x13e6   :  { %v9365_v19 = vsel %vm2516_vm2, %v13236_v48, %v14000_v54  ;;  %v9364_v41 = vsel %vm2516_vm2, %v9341_v22, %v13999_v56  ;;  %v15085_v48 = vld [vmem:[%s19534_s23 + $0x2a0] ss:$8 sps:$4 sm:$0xff]   ;;  %v15086_v22 = vld [vmem:[%s19534_s23 + $0x330] ss:$8 sps:$4 sm:$0xff]  }
0x13e7   :  { %v9367_v47 = vpack.c.bf16 %v9365_v19, %v9365_v19  ;;  %v9366_v4 = vpack.c.bf16 %v9364_v41, %v9364_v41  ;;  %v15092_v54 = vld [vmem:[%s19534_s23 + $0x360] ss:$8 sps:$4 sm:$0xff]   ;;  %v15094_v19 = vld [vmem:[%s19534_s23 + $0x370] ss:$8 sps:$4 sm:$0xff]  }
0x13e8   :  { %v15093_v56 = vld [vmem:[%s19534_s23 + $0x2e0] ss:$8 sps:$4 sm:$0xff]   ;;  %v15095_v41 = vld [vmem:[%s19534_s23 + $0x2f0] ss:$8 sps:$4 sm:$0xff]  }
0x13e9   :  { %12191 = vmatprep.subr.msk.bf16.mxu1 %vm8772_vm6, %v9367_v47  ;;  %v9369_v52 = vsel %vm8772_vm6, %v9366_v4, 0  ;;  %v15096_v47 = vld [vmem:[%s19534_s23 + $0x380] ss:$8 sps:$4 sm:$0xff]  }
0x13ea   :  { %9375 = vmatpush1.bf16.msra.mxu1 %v9369_v52  ;;  %v15097_v4 = vld [vmem:[%s19534_s23 + $0x300] ss:$8 sps:$4 sm:$0xff]   ;;  %v15098_v52 = vld [vmem:[%s19534_s23 + $0x410] ss:$8 sps:$4 sm:$0xff]  }
0x13eb   :  { %12966 = vmatprep.subr.bf16.mxu1 %v15050_v35 }
0x13ed   :  { %12192 = vmatmul.mubr.msk.bf16.vlgmr.msra.gmra.mrb[248].mxu1 %vm9243_vm8, %v9242_v61  ;;  %v15082_v61 = vld [vmem:[%s19534_s23 + $0x310] ss:$8 sps:$4 sm:$0xff]  }
0x13ee   :  { %12967 = vmatpush3.bf16.msra.mxu1 %v15051_v1 }
0x13ef   :  { %12968 = vmatprep.subr.bf16.mxu1 %v15052_v20  ;;  %v15099_v20 = vld [vmem:[%s19534_s23 + $0x390] ss:$8 sps:$4 sm:$0xff]  }
0x13f2   :  { %12969 = vmatpush3.bf16.msra.mxu1 %v15053_v12 }
0x13f3   :  { %12970 = vmatprep.subr.bf16.mxu1 %v15054_v21  ;;  %v15100_v21 = vld [vmem:[%s19534_s23 + $0x420] ss:$8 sps:$4 sm:$0xff]  }
0x13f6   :  { %12971 = vmatpush3.bf16.msra.mxu1 %v15055_v63 }
0x13f7   :  { %12972 = vmatprep.subr.bf16.mxu1 %v15056_v49  ;;  %v15101_v49 = vld [vmem:[%s19534_s23 + $0x3a0] ss:$8 sps:$4 sm:$0xff]  }
0x13fa   :  { %12973 = vmatpush3.bf16.msra.mxu1 %v15057_v33  ;;  %v15102_v33 = vld [vmem:[%s19534_s23 + $0x430] ss:$8 sps:$4 sm:$0xff]  }
0x13fb   :  { %12974 = vmatprep.subr.bf16.mxu1 %v15058_v15  ;;  %v15103_v15 = vld [vmem:[%s19534_s23 + $0x3b0] ss:$8 sps:$4 sm:$0xff]  }
0x13fe   :  { %12975 = vmatpush3.bf16.msra.mxu1 %v15059_v37  ;;  %v15104_v37 = vld [vmem:[%s19534_s23 + $0x440] ss:$8 sps:$4 sm:$0xff]  }
0x13ff   :  { %12976 = vmatprep.subr.bf16.mxu1 %v15060_v51  ;;  %v15105_v51 = vld [vmem:[%s19534_s23 + $0x3c0] ss:$8 sps:$4 sm:$0xff]  }
0x1402   :  { %12977 = vmatpush3.bf16.msra.mxu1 %v15061_v7  ;;  %v15106_v7 = vld [vmem:[%s19534_s23 + $0x450] ss:$8 sps:$4 sm:$0xff]  }
0x1403   :  { %12978 = vmatprep.subr.bf16.mxu1 %v15062_v53  ;;  %v15107_v53 = vld [vmem:[%s19534_s23 + $0x3d0] ss:$8 sps:$4 sm:$0xff]  }
0x1406   :  { %12979 = vmatpush3.bf16.msra.mxu1 %v15063_v62  ;;  %v15108_v62 = vld [vmem:[%s19534_s23 + $0x460] ss:$8 sps:$4 sm:$0xff]  }
0x1407   :  { %12980 = vmatprep.subr.bf16.mxu1 %v15064_v34  ;;  %v15109_v34 = vld [vmem:[%s19534_s23 + $0x3e0] ss:$8 sps:$4 sm:$0xff]  }
0x140a   :  { %12981 = vmatpush3.bf16.msra.mxu1 %v15065_v23  ;;  %v15110_v23 = vld [vmem:[%s19534_s23 + $0x470] ss:$8 sps:$4 sm:$0xff]  }
0x140b   :  { %12988 = vmatprep.subr.bf16.mxu1 %v15066_v59  ;;  %v15111_v59 = vld [vmem:[%s19534_s23 + $0x3f0] ss:$8 sps:$4 sm:$0xff]  }
0x14c0   :  { %v18893_v32 = vpop.f32.mrb[248].mxu1 }
0x14c1   :  { %v18895_v58 = vpop.f32.mrb[249].mxu1  ;;  %v9429_v46 = vpack.c.bf16 %v18893_v32, %v18893_v32  ;;  %v9417_v26 = vrot.slane %v18893_v32, 2  ;;  %v9421_v35 = vrot.slane %v18893_v32, 4 }
0x14c2   :  { %v9430_v28 = vpack.c.bf16 %v18895_v58, %v18895_v58  ;;  %v9412_v5 = vpop.f32.mrb[250].mxu1  ;;  %v9418_v3 = vrot.slane %v18895_v58, 2  ;;  %v9422_v14 = vrot.slane %v18895_v58, 4  ;;  %v9426_v1 = vrot.slane %v18895_v58, 6  ;;  %v15112_v58 = vld [vmem:[%s19534_s23 + $0x480] ss:$8 sps:$4 sm:$0xff]  }
0x14c3   :  { %v9413_v31 = vpop.f32.mrb[251].mxu1  ;;  %v9431_v2 = vpack.c.bf16 %v9417_v26, %v9417_v26  ;;  %v9433_v12 = vpack.c.bf16 %v9421_v35, %v9421_v35  ;;  %v15141_v26 = vld [vmem:[%s19534_s23 + $0x520] ss:$8 sps:$4 sm:$0xff]  }
0x14c4   :  { %9982 = vmatprep.mubr.bf16.mxu1 %v9430_v28  ;;  %v9432_v29 = vpack.c.bf16 %v9418_v3, %v9418_v3  ;;  %v9434_v55 = vpack.c.bf16 %v9422_v14, %v9422_v14  ;;  %v9436_v63 = vpack.c.bf16 %v9426_v1, %v9426_v1  ;;  %v15113_v28 = vld [vmem:[%s19534_s23 + $0x400] ss:$8 sps:$4 sm:$0xff]   ;;  %v15114_v3 = vld [vmem:[%s19534_s23 + $0x490] ss:$8 sps:$4 sm:$0xff]   ;;  %v15122_v31 = vld [vmem:[%s19534_s23 + $0x4b4] ss:$8 sps:$4 sm:$0xff]  }
0x14c5   :  { %9983 = vmatmul.mubr.bf16.vlgmr.msra.gmra.mrb[252].mxu1 %v9429_v46  ;;  %v15116_v46 = vld [vmem:[%s19534_s23 + $0x494] ss:$8 sps:$4 sm:$0xff]   ;;  %v15144_v14 = vld [vmem:[%s19534_s23 + $0x530] ss:$8 sps:$4 sm:$0xff]  }
0x14c6   :  { %12989 = vmatpush3.bf16.msra.mxu1 %v15067_v25  ;;  %10022 = vmatprep.mubr.bf16.mxu1 %v9432_v29  ;;  %v9425_v25 = vrot.slane %v18893_v32, 6  ;;  %v15117_v32 = vld [vmem:[%s19534_s23 + $0x4a0] ss:$8 sps:$4 sm:$0xff]   ;;  %v15120_v29 = vld [vmem:[%s19534_s23 + $0x4b0] ss:$8 sps:$4 sm:$0xff]  }
0x14c7   :  { %12990 = vmatprep.subr.bf16.mxu1 %v15068_v39  ;;  %v15119_v39 = vld [vmem:[%s19534_s23 + $0x4a4] ss:$8 sps:$4 sm:$0xff]   ;;  %v15168_v1 = vld [vmem:[%s19534_s23 + $0x5b0] ss:$8 sps:$4 sm:$0xff]  }
0x14c8   :  { %v9435_v5 = vpack.c.bf16 %v9425_v25, %v9425_v25 }
0x14ca   :  { %12991 = vmatpush3.bf16.msra.mxu1 %v15069_v16  ;;  %v15123_v16 = vld [vmem:[%s19534_s23 + $0x4c0] ss:$8 sps:$4 sm:$0xff]  }
0x14cb   :  { %12992 = vmatprep.subr.bf16.mxu1 %v15070_v43  ;;  %v15125_v43 = vld [vmem:[%s19534_s23 + $0x4c4] ss:$8 sps:$4 sm:$0xff]  }
0x14ce   :  { %12993 = vmatpush3.bf16.msra.mxu1 %v15071_v13  ;;  %v15128_v13 = vld [vmem:[%s19534_s23 + $0x4d4] ss:$8 sps:$4 sm:$0xff]  }
0x14cf   :  { %12994 = vmatprep.subr.bf16.mxu1 %v15072_v27  ;;  %v15126_v27 = vld [vmem:[%s19534_s23 + $0x4d0] ss:$8 sps:$4 sm:$0xff]  }
0x14d2   :  { %12995 = vmatpush3.bf16.msra.mxu1 %v15073_v11  ;;  %v15131_v11 = vld [vmem:[%s19534_s23 + $0x4e4] ss:$8 sps:$4 sm:$0xff]  }
0x14d3   :  { %12996 = vmatprep.subr.bf16.mxu1 %v15074_v36  ;;  %v15129_v36 = vld [vmem:[%s19534_s23 + $0x4e0] ss:$8 sps:$4 sm:$0xff]  }
0x14d6   :  { %12997 = vmatpush3.bf16.msra.mxu1 %v15075_v40  ;;  %v15134_v40 = vld [vmem:[%s19534_s23 + $0x4f4] ss:$8 sps:$4 sm:$0xff]  }
0x14d7   :  { %12998 = vmatprep.subr.bf16.mxu1 %v15076_v57  ;;  %v15132_v57 = vld [vmem:[%s19534_s23 + $0x4f0] ss:$8 sps:$4 sm:$0xff]  }
0x14da   :  { %12999 = vmatpush3.bf16.msra.mxu1 %v15077_v8  ;;  %v15137_v8 = vld [vmem:[%s19534_s23 + $0x504] ss:$8 sps:$4 sm:$0xff]  }
0x14db   :  { %13000 = vmatprep.subr.bf16.mxu1 %v15078_v17  ;;  %v15135_v17 = vld [vmem:[%s19534_s23 + $0x500] ss:$8 sps:$4 sm:$0xff]  }
0x14de   :  { %13001 = vmatpush3.bf16.msra.mxu1 %v15079_v42  ;;  %v15140_v42 = vld [vmem:[%s19534_s23 + $0x514] ss:$8 sps:$4 sm:$0xff]  }
0x14df   :  { %13002 = vmatprep.subr.bf16.mxu1 %v15080_v18  ;;  %v15138_v18 = vld [vmem:[%s19534_s23 + $0x510] ss:$8 sps:$4 sm:$0xff]  }
0x14e2   :  { %13003 = vmatpush3.bf16.msra.mxu1 %v15081_v60  ;;  %v15143_v60 = vld [vmem:[%s19534_s23 + $0x524] ss:$8 sps:$4 sm:$0xff]  }
0x14e3   :  { %13010 = vmatprep.subr.bf16.mxu1 %v15082_v61  ;;  %v15146_v61 = vld [vmem:[%s19534_s23 + $0x534] ss:$8 sps:$4 sm:$0xff]  }
0x14e5   :  { %10023 = vmatmul.mubr.bf16.vlgmr.msra.gmra.mrb[0].mxu1 %v9431_v2  ;;  %v15147_v2 = vld [vmem:[%s19534_s23 + $0x540] ss:$8 sps:$4 sm:$0xff]  }
0x14e6   :  { %13011 = vmatpush3.bf16.msra.mxu1 %v15083_v45  ;;  %10062 = vmatprep.mubr.bf16.mxu1 %v9434_v55  ;;  %v15149_v45 = vld [vmem:[%s19534_s23 + $0x544] ss:$8 sps:$4 sm:$0xff]   ;;  %v15152_v55 = vld [vmem:[%s19534_s23 + $0x554] ss:$8 sps:$4 sm:$0xff]  }
0x14e7   :  { %13012 = vmatprep.subr.bf16.mxu1 %v15084_v30  ;;  %v15150_v30 = vld [vmem:[%s19534_s23 + $0x550] ss:$8 sps:$4 sm:$0xff]   ;;  %10479 = vmatprep.subr.bf16.mxu0 %v15152_v55 }
0x14e8   :  { %10480 = vmatpush1.bf16.msra.mxu0 %v15150_v30 }
0x14ea   :  { %13013 = vmatpush3.bf16.msra.mxu1 %v15085_v48  ;;  %v15155_v48 = vld [vmem:[%s19534_s23 + $0x564] ss:$8 sps:$4 sm:$0xff]  }
0x14eb   :  { %13014 = vmatprep.subr.bf16.mxu1 %v15086_v22  ;;  %v15153_v22 = vld [vmem:[%s19534_s23 + $0x560] ss:$8 sps:$4 sm:$0xff]   ;;  %10481 = vmatprep.subr.bf16.mxu0 %v15155_v48 }
0x14ec   :  { %10482 = vmatpush1.bf16.msra.mxu0 %v15153_v22 }
0x14ee   :  { %13015 = vmatpush3.bf16.msra.mxu1 %v15087_v24  ;;  %v15158_v24 = vld [vmem:[%s19534_s23 + $0x574] ss:$8 sps:$4 sm:$0xff]  }
0x14ef   :  { %13016 = vmatprep.subr.bf16.mxu1 %v15088_v44  ;;  %v15156_v44 = vld [vmem:[%s19534_s23 + $0x570] ss:$8 sps:$4 sm:$0xff]   ;;  %10483 = vmatprep.subr.bf16.mxu0 %v15158_v24 }
0x14f0   :  { %10484 = vmatpush1.bf16.msra.mxu0 %v15156_v44 }
0x14f2   :  { %13017 = vmatpush3.bf16.msra.mxu1 %v15089_v9  ;;  %v15161_v9 = vld [vmem:[%s19534_s23 + $0x584] ss:$8 sps:$4 sm:$0xff]  }
0x14f3   :  { %13018 = vmatprep.subr.bf16.mxu1 %v15090_v10  ;;  %v15159_v10 = vld [vmem:[%s19534_s23 + $0x580] ss:$8 sps:$4 sm:$0xff]   ;;  %10485 = vmatprep.subr.bf16.mxu0 %v15161_v9 }
0x14f4   :  { %10486 = vmatpush1.bf16.msra.mxu0 %v15159_v10 }
0x14f6   :  { %13019 = vmatpush3.bf16.msra.mxu1 %v15091_v50  ;;  %v15164_v50 = vld [vmem:[%s19534_s23 + $0x594] ss:$8 sps:$4 sm:$0xff]  }
0x14f7   :  { %13020 = vmatprep.subr.bf16.mxu1 %v15092_v54  ;;  %v15162_v54 = vld [vmem:[%s19534_s23 + $0x590] ss:$8 sps:$4 sm:$0xff]   ;;  %10487 = vmatprep.subr.bf16.mxu0 %v15164_v50 }
0x14f8   :  { %10488 = vmatpush1.bf16.msra.mxu0 %v15162_v54 }
0x14fa   :  { %13021 = vmatpush3.bf16.msra.mxu1 %v15093_v56  ;;  %v15167_v56 = vld [vmem:[%s19534_s23 + $0x5a4] ss:$8 sps:$4 sm:$0xff]  }
0x14fb   :  { %13022 = vmatprep.subr.bf16.mxu1 %v15094_v19  ;;  %v15165_v19 = vld [vmem:[%s19534_s23 + $0x5a0] ss:$8 sps:$4 sm:$0xff]   ;;  %10489 = vmatprep.subr.bf16.mxu0 %v15167_v56 }
0x14fc   :  { %10490 = vmatpush1.bf16.msra.mxu0 %v15165_v19  ;;  %v15186_v19 = vld [vmem:[%s19534_s23 + $0x610] ss:$8 sps:$4 sm:$0xff]  }
0x14fe   :  { %13023 = vmatpush3.bf16.msra.mxu1 %v15095_v41  ;;  %v15170_v41 = vld [vmem:[%s19534_s23 + $0x5b4] ss:$8 sps:$4 sm:$0xff]  }
0x14ff   :  { %13024 = vmatprep.subr.bf16.mxu1 %v15096_v47  ;;  %10491 = vmatprep.subr.bf16.mxu0 %v15170_v41 }
0x1500   :  { %10492 = vmatpush1.bf16.msra.mxu0 %v15168_v1  ;;  %v15191_v1 = vld [vmem:[%s19534_s23 + $0x660] ss:$8 sps:$4 sm:$0xff]  }
0x1502   :  { %13025 = vmatpush3.bf16.msra.mxu1 %v15097_v4 }
0x1503   :  { %13032 = vmatprep.subr.bf16.mxu1 %v15098_v52 }
0x1505   :  { %10063 = vmatmul.mubr.bf16.vlgmr.msra.gmra.mrb[4].mxu1 %v9433_v12  ;;  %v15173_v12 = vld [vmem:[%s19534_s23 + $0x5c4] ss:$8 sps:$4 sm:$0xff]  }
0x1506   :  { %13033 = vmatpush3.bf16.msra.mxu1 %v15099_v20  ;;  %10102 = vmatprep.mubr.bf16.mxu1 %v9436_v63  ;;  %v15176_v63 = vld [vmem:[%s19534_s23 + $0x5d4] ss:$8 sps:$4 sm:$0xff]  }
0x1507   :  { %13034 = vmatprep.subr.bf16.mxu1 %v15100_v21  ;;  %v15171_v21 = vld [vmem:[%s19534_s23 + $0x5c0] ss:$8 sps:$4 sm:$0xff]   ;;  %10493 = vmatprep.subr.bf16.mxu0 %v15173_v12 }
0x1508   :  { %10494 = vmatpush1.bf16.msra.mxu0 %v15171_v21  ;;  %v15193_v12 = vld [vmem:[%s19534_s23 + $0x680] ss:$8 sps:$4 sm:$0xff]   ;;  %v15194_v21 = vld [vmem:[%s19534_s23 + $0x690] ss:$8 sps:$4 sm:$0xff]  }
0x1509   :  { %10495 = vmatprep.subr.bf16.mxu0 %v15176_v63  ;;  %v15195_v63 = vld [vmem:[%s19534_s23 + $0x6a0] ss:$8 sps:$4 sm:$0xff]  }
0x150a   :  { %13035 = vmatpush3.bf16.msra.mxu1 %v15101_v49  ;;  %v15174_v49 = vld [vmem:[%s19534_s23 + $0x5d0] ss:$8 sps:$4 sm:$0xff]  }
0x150b   :  { %13036 = vmatprep.subr.bf16.mxu1 %v15102_v33  ;;  %v15179_v33 = vld [vmem:[%s19534_s23 + $0x5e4] ss:$8 sps:$4 sm:$0xff]  }
0x150c   :  { %10496 = vmatpush1.bf16.msra.mxu0 %v15174_v49  ;;  %v15196_v49 = vld [vmem:[%s19534_s23 + $0x6b0] ss:$8 sps:$4 sm:$0xff]  }
0x150d   :  { %10497 = vmatprep.subr.bf16.mxu0 %v15179_v33  ;;  %v15197_v33 = vld [vmem:[%s19534_s23 + $0x6c0] ss:$8 sps:$4 sm:$0xff]  }
0x150e   :  { %13037 = vmatpush3.bf16.msra.mxu1 %v15103_v15  ;;  %v15177_v15 = vld [vmem:[%s19534_s23 + $0x5e0] ss:$8 sps:$4 sm:$0xff]  }
0x150f   :  { %13038 = vmatprep.subr.bf16.mxu1 %v15104_v37  ;;  %v9565_v37 = vld [vmem:[%s19517_s3 + $0x6] ss:$0 sm:$0xff] }
0x1510   :  { %10498 = vmatpush1.bf16.msra.mxu0 %v15177_v15  ;;  %v12283_v15 = vld [vmem:[%s19517_s3 + $0x10] ss:$8 sm:$0x3] }
0x1512   :  { %13039 = vmatpush3.bf16.msra.mxu1 %v15105_v51 }
0x1513   :  { %13040 = vmatprep.subr.bf16.mxu1 %v15106_v7 }
0x1516   :  { %13041 = vmatpush3.bf16.msra.mxu1 %v15107_v53 }
0x1517   :  { %13042 = vmatprep.subr.bf16.mxu1 %v15108_v62 }
0x151a   :  { %13043 = vmatpush3.bf16.msra.mxu1 %v15109_v34 }
0x151b   :  { %13044 = vmatprep.subr.bf16.mxu1 %v15110_v23 }
0x151e   :  { %13045 = vmatpush3.bf16.msra.mxu1 %v15111_v59 }
0x151f   :  { %13046 = vmatprep.subr.bf16.mxu1 %v15112_v58 }
0x1522   :  { %13047 = vmatpush3.bf16.msra.mxu1 %v15113_v28 }
0x1523   :  { %10274 = vmatprep.subr.bf16.mxu1 %v15116_v46 }
0x1525   :  { %10103 = vmatmul.mubr.bf16.vlgmr.msra.gmra.mrb[8].mxu1 %v9435_v5 }
0x1526   :  { %10275 = vmatpush1.bf16.msra.mxu1 %v15114_v3 }
0x1527   :  { %10276 = vmatprep.subr.bf16.mxu1 %v15119_v39  ;;  %v9293_v39 = vpop.permute.xlu0 %9292 }
0x152a   :  { %10277 = vmatpush1.bf16.msra.mxu1 %v15117_v32  ;;  %v9297_v32 = vpop.permute.xlu1 %9296 }
0x152b   :  { %10278 = vmatprep.subr.bf16.mxu1 %v15122_v31 }
0x152e   :  { %10279 = vmatpush1.bf16.msra.mxu1 %v15120_v29 }
0x152f   :  { %10280 = vmatprep.subr.bf16.mxu1 %v15125_v43 }
0x1532   :  { %10281 = vmatpush1.bf16.msra.mxu1 %v15123_v16  ;;  %v9303_v16 = vsel %vm2499_vm1, %v18828_v6, %v9293_v39  ;;  %v15182_v6 = vld [vmem:[%s19534_s23 + $0x5f4] ss:$8 sps:$4 sm:$0xff]  }
0x1533   :  { %10282 = vmatprep.subr.bf16.mxu1 %v15128_v13  ;;  %10499 = vmatprep.subr.bf16.mxu0 %v15182_v6  ;;  %v10629_v6 = vld [vmem:[%s19517_s3 + $0x12] ss:$0 sm:$0xff] }
0x1536   :  { %10283 = vmatpush1.bf16.msra.mxu1 %v15126_v27  ;;  %v9304_v27 = vsel %vm2516_vm2, %v9303_v16, %v9297_v32  ;;  %v10747_v16 = vld [vmem:[%s19534_s23 + $0x6d0] sm:$0x77] }
0x1537   :  { %10284 = vmatprep.subr.bf16.mxu1 %v15131_v11 }
0x153a   :  { %10285 = vmatpush1.bf16.msra.mxu1 %v15129_v36 }
0x153b   :  { %10286 = vmatprep.subr.bf16.mxu1 %v15134_v40  ;;  %v9301_v40 = vpop.permute.xlu0 %9300 }
0x153e   :  { %10287 = vmatpush1.bf16.msra.mxu1 %v15132_v57  ;;  %v9305_v57 = vsel %vm2533_vm3, %v9304_v27, %v9301_v40  ;;  %v12324_v27 = vcombine.low %v10747_v16, %v10747_v16 }
0x153f   :  { %10288 = vmatprep.subr.bf16.mxu1 %v15137_v8 }
0x1542   :  { %10289 = vmatpush1.bf16.msra.mxu1 %v15135_v17 }
0x1543   :  { %10290 = vmatprep.subr.bf16.mxu1 %v15140_v42  ;;  %v19190_v42 = vpack.c.bf16 %v9305_v57, %v9305_v57 }
0x1546   :  { %10291 = vmatpush1.bf16.msra.mxu1 %v15138_v18  ;;  %v15180_v18 = vld [vmem:[%s19534_s23 + $0x5f0] ss:$8 sps:$4 sm:$0xff]  }
0x1547   :  { %10292 = vmatprep.subr.bf16.mxu1 %v15143_v60  ;;  %10500 = vmatpush1.bf16.msra.mxu0 %v15180_v18  ;;  %v15185_v60 = vld [vmem:[%s19534_s23 + $0x604] ss:$8 sps:$4 sm:$0xff]  }
0x1548   :  { %10501 = vmatprep.subr.bf16.mxu0 %v15185_v60 }
0x154a   :  { %10293 = vmatpush1.bf16.msra.mxu1 %v15141_v26  ;;  %v15183_v26 = vld [vmem:[%s19534_s23 + $0x600] ss:$8 sps:$4 sm:$0xff]  }
0x154b   :  { %10294 = vmatprep.subr.bf16.mxu1 %v15146_v61  ;;  %10502 = vmatpush1.bf16.msra.mxu0 %v15183_v26 }
0x154c   :  { %10705 = vmatprep.subr.bf16.mxu0 %v15300_v0 }
0x154e   :  { %10295 = vmatpush1.bf16.msra.mxu1 %v15144_v14 }
0x154f   :  { %10296 = vmatprep.subr.bf16.mxu1 %v15149_v45  ;;  %v12257_v45 = vld [vmem:[%s19517_s3 + $0x7] ss:$8 sm:$0x3] }
0x1552   :  { %10297 = vmatpush1.bf16.msra.mxu1 %v15147_v2 }
0x1553   :  { %13238 = vmatprep.subr.bf16.mxu1 %v15308_v38 }
0x1598   :  { %v12982_v47 = vpop.f32.mrb[252].mxu1 }
0x1599   :  { %v12983_v4 = vpop.f32.mrb[253].mxu1 }
0x159a   :  { %v12984_v35 = vadd.f32 %v12983_v4, %v12982_v47  ;;  %v12985_v52 = vpop.f32.mrb[254].mxu1  ;;  %v15187_v47 = vld [vmem:[%s19534_s23 + $0x620] ss:$8 sps:$4 sm:$0xff]   ;;  %v15188_v4 = vld [vmem:[%s19534_s23 + $0x630] ss:$8 sps:$4 sm:$0xff]  }
0x159b   :  { %v12986_v20 = vpop.f32.mrb[255].mxu1  ;;  %v15190_v52 = vld [vmem:[%s19534_s23 + $0x650] ss:$8 sps:$4 sm:$0xff]  }
0x159c   :  { %v9985_v53 = vadd.f32 %v12984_v35, %v9565_v37  ;;  %v15189_v35 = vld [vmem:[%s19534_s23 + $0x640] ss:$8 sps:$4 sm:$0xff]   ;;  %v15192_v20 = vld [vmem:[%s19534_s23 + $0x670] ss:$8 sps:$4 sm:$0xff]  }
0x15b8   :  { %v13004_v51 = vpop.f32.mrb[0].mxu1 }
0x15b9   :  { %v13005_v7 = vpop.f32.mrb[1].mxu1 }
0x15ba   :  { %v13006_v62 = vadd.f32 %v13005_v7, %v13004_v51  ;;  %v13007_v34 = vpop.f32.mrb[2].mxu1 }
0x15bb   :  { %v13008_v23 = vpop.f32.mrb[3].mxu1 }
0x15bc   :  { %v10025_v59 = vadd.f32 %v13006_v62, %v9985_v53 }
0x15d8   :  { %v13026_v58 = vpop.f32.mrb[4].mxu1 }
0x15d9   :  { %v13027_v28 = vpop.f32.mrb[5].mxu1 }
0x15da   :  { %v13028_v25 = vadd.f32 %v13027_v28, %v13026_v58  ;;  %v13029_v5 = vpop.f32.mrb[6].mxu1 }
0x15db   :  { %v13030_v3 = vpop.f32.mrb[7].mxu1 }
0x15dc   :  { %v10065_v46 = vadd.f32 %v13028_v25, %v10025_v59 }
0x15f8   :  { %v13048_v31 = vpop.f32.mrb[8].mxu1 }
0x15f9   :  { %v13049_v29 = vpop.f32.mrb[9].mxu1 }
0x15fa   :  { %v13050_v43 = vadd.f32 %v13049_v29, %v13048_v31  ;;  %v13051_v13 = vpop.f32.mrb[10].mxu1  ;;  %v10539_v31 = vld [vmem:[%s19534_s23 + $0x6d8] sm:$0x1] }
0x15fb   :  { %v13052_v11 = vpop.f32.mrb[11].mxu1  ;;  %v10547_v29 = vsel %vm10545_vm11, %v10539_v31, 0 }
0x15fc   :  { %v10105_v36 = vadd.f32 %v13050_v43, %v10065_v46  ;;  %v12325_v43 = vcombine.high %v10747_v16, %v10747_v16 }
0x15fe   :  { %v10110_v8 = vmax.f32 %v10105_v36, 0.0 }
0x1600   :  { %v19188_v17 = vpack.c.bf16 %v10110_v8, %v10110_v8  ;;  %v10772_v8 = vsel %vm10770_vm12, %v12324_v27, 0  ;;  %v15251_v27 = vld [vmem:[%s19534_s23 + $0x730] ss:$8 sps:$4 sm:$0xff]  }
0x1602   :  { %12282 = vmatprep.mubr.msk.bf16.mxu1 %vm2516_vm2, %v19188_v17 }
0x1603   :  { %10307 = vmatmul.mubr.bf16.vlgmr.msra.gmra.mrb[12].mxu1 %v19190_v42 }
0x1604   :  { %13240 = vmatprep.mubr.msk.bf16.mxu1 %vm15309_vm5, %v15308_v38  ;;  %v10141_v38 = vlaneseq  ;;  %13239 = vmatpush3.bf16.msra.mxu1 %v10547_v29  ;;  %v15253_v29 = vld [vmem:[%s19534_s23 + $0x734] ss:$8 sps:$4 sm:$0xff]  }
0x1605   :  { %12326 = vmatprep.subr.msk.bf16.mxu1 %vm10770_vm12, %v12325_v43 }
0x1606   :  { %v10142_v61 = vshrl.u32 %v10141_v38, 7 }
0x1608   :  { %v19210_v14 = vsub.s32 0, %v10142_v61  ;;  %v19215_v2 = vsub.s32 1, %v10142_v61 }
0x160a   :  { %v10144_v30 = vrot.slane %v12257_v45, %v19210_v14  ;;  %v10148_v55 = vrot.slane %v12257_v45, %v19215_v2  ;;  %v10349_v37 = vrot.slane %v12283_v15, %v19210_v14  ;;  %v10353_v51 = vrot.slane %v12283_v15, %v19215_v2  ;;  %v15233_v15 = vld [vmem:[%s19534_s23 + $0x850] ss:$8 sps:$4 sm:$0xff]  }
0x16d6   :  { %v10308_v48 = vpop.f32.mrb[12].mxu1 }
0x16d7   :  { %v10309_v22 = vadd.f32 %v10308_v48, %v10144_v30  ;;  %v10310_v24 = vpop.f32.mrb[13].mxu1  ;;  %v15202_v48 = vld [vmem:[%s19534_s23 + $0x7a4] ss:$8 sps:$4 sm:$0xff]  }
0x16d8   :  { %v10311_v44 = vadd.f32 %v10310_v24, %v10148_v55  ;;  %v10312_v9 = vpop.f32.mrb[14].mxu1  ;;  %v15200_v55 = vld [vmem:[%s19534_s23 + $0x7a0] ss:$8 sps:$4 sm:$0xff]   ;;  %v15203_v24 = vld [vmem:[%s19534_s23 + $0x7b0] ss:$8 sps:$4 sm:$0xff]  }
0x16d9   :  { %v10315_v10 = vmax.f32 %v10309_v22, 0.0  ;;  %v10313_v50 = vpop.f32.mrb[15].mxu1  ;;  %v15205_v22 = vld [vmem:[%s19534_s23 + $0x7b4] ss:$8 sps:$4 sm:$0xff]   ;;  %v15206_v9 = vld [vmem:[%s19534_s23 + $0x7c0] ss:$8 sps:$4 sm:$0xff]  }
0x16da   :  { %v10316_v54 = vmax.f32 %v10311_v44, 0.0  ;;  %v15208_v44 = vld [vmem:[%s19534_s23 + $0x7c4] ss:$8 sps:$4 sm:$0xff]   ;;  %v15209_v50 = vld [vmem:[%s19534_s23 + $0x7d0] ss:$8 sps:$4 sm:$0xff]  }
0x16db   :  { %v10317_v41 = vpack.c.bf16 %v10315_v10, %v10315_v10  ;;  %v15211_v10 = vld [vmem:[%s19534_s23 + $0x7d4] ss:$8 sps:$4 sm:$0xff]  }
0x16dc   :  { %v10318_v56 = vpack.c.bf16 %v10316_v54, %v10316_v54  ;;  %v15214_v54 = vld [vmem:[%s19534_s23 + $0x7e4] ss:$8 sps:$4 sm:$0xff]  }
0x16de   :  { %12308 = vmatprep.mubr.msk.bf16.mxu0 %vm2516_vm2, %v10318_v56  ;;  %v15212_v56 = vld [vmem:[%s19534_s23 + $0x7e0] ss:$8 sps:$4 sm:$0xff]  }
0x16df   :  { %10512 = vmatmul.mubr.bf16.vlgmr.msra.gmra.mrb[80].mxu0 %v10317_v41  ;;  %v15215_v41 = vld [vmem:[%s19534_s23 + $0x7f0] ss:$8 sps:$4 sm:$0xff]  }
0x16e0   :  { %10706 = vmatpush1.bf16.msra.mxu0 %v15186_v19  ;;  %v15217_v19 = vld [vmem:[%s19534_s23 + $0x7f4] ss:$8 sps:$4 sm:$0xff]  }
0x16e1   :  { %10707 = vmatprep.subr.bf16.mxu0 %v15300_v0 }
0x16e4   :  { %10708 = vmatpush1.bf16.msra.mxu0 %v15187_v47  ;;  %v15220_v47 = vld [vmem:[%s19534_s23 + $0x804] ss:$8 sps:$4 sm:$0xff]  }
0x16e5   :  { %10709 = vmatprep.subr.bf16.mxu0 %v15300_v0 }
0x16e8   :  { %10710 = vmatpush1.bf16.msra.mxu0 %v15188_v4  ;;  %v15218_v4 = vld [vmem:[%s19534_s23 + $0x800] ss:$8 sps:$4 sm:$0xff]  }
0x16e9   :  { %10711 = vmatprep.subr.bf16.mxu0 %v15300_v0 }
0x16ec   :  { %10712 = vmatpush1.bf16.msra.mxu0 %v15189_v35  ;;  %v15223_v35 = vld [vmem:[%s19534_s23 + $0x814] ss:$8 sps:$4 sm:$0xff]  }
0x16ed   :  { %10713 = vmatprep.subr.bf16.mxu0 %v15300_v0 }
0x16f0   :  { %10714 = vmatpush1.bf16.msra.mxu0 %v15190_v52  ;;  %v15221_v52 = vld [vmem:[%s19534_s23 + $0x810] ss:$8 sps:$4 sm:$0xff]  }
0x16f1   :  { %10715 = vmatprep.subr.bf16.mxu0 %v15300_v0 }
0x16f4   :  { %10716 = vmatpush1.bf16.msra.mxu0 %v15191_v1  ;;  %v15226_v1 = vld [vmem:[%s19534_s23 + $0x824] ss:$8 sps:$4 sm:$0xff]  }
0x16f5   :  { %10717 = vmatprep.subr.bf16.mxu0 %v15300_v0 }
0x16f8   :  { %10718 = vmatpush1.bf16.msra.mxu0 %v15192_v20  ;;  %v15224_v20 = vld [vmem:[%s19534_s23 + $0x820] ss:$8 sps:$4 sm:$0xff]  }
0x16f9   :  { %10719 = vmatprep.subr.bf16.mxu0 %v15300_v0 }
0x16fc   :  { %10720 = vmatpush1.bf16.msra.mxu0 %v15193_v12  ;;  %v15229_v12 = vld [vmem:[%s19534_s23 + $0x834] ss:$8 sps:$4 sm:$0xff]  }
0x16fd   :  { %10721 = vmatprep.subr.bf16.mxu0 %v15300_v0 }
0x1700   :  { %10722 = vmatpush1.bf16.msra.mxu0 %v15194_v21  ;;  %v15227_v21 = vld [vmem:[%s19534_s23 + $0x830] ss:$8 sps:$4 sm:$0xff]  }
0x1701   :  { %10723 = vmatprep.subr.bf16.mxu0 %v15300_v0 }
0x1704   :  { %10724 = vmatpush1.bf16.msra.mxu0 %v15195_v63  ;;  %v15232_v63 = vld [vmem:[%s19534_s23 + $0x844] ss:$8 sps:$4 sm:$0xff]  }
0x1705   :  { %10725 = vmatprep.subr.bf16.mxu0 %v15300_v0 }
0x1708   :  { %10726 = vmatpush1.bf16.msra.mxu0 %v15196_v49  ;;  %v15230_v49 = vld [vmem:[%s19534_s23 + $0x840] ss:$8 sps:$4 sm:$0xff]  }
0x1709   :  { %10727 = vmatprep.subr.bf16.mxu0 %v15300_v0 }
0x170c   :  { %10728 = vmatpush1.bf16.msra.mxu0 %v15197_v33  ;;  %v15235_v33 = vld [vmem:[%s19534_s23 + $0x854] ss:$8 sps:$4 sm:$0xff]  }
0x17b2   :  { %v10513_v7 = vpop.f32.mrb[80].mxu0 }
0x17b3   :  { %v19272_v53 = vadd.f32 %v10513_v7, %v10349_v37  ;;  %v10515_v62 = vpop.f32.mrb[81].mxu0  ;;  %v15236_v37 = vld [vmem:[%s19534_s23 + $0x6e0] ss:$8 sps:$4 sm:$0xff]   ;;  %v15241_v7 = vld [vmem:[%s19534_s23 + $0x6f4] ss:$8 sps:$4 sm:$0xff]  }
0x17b4   :  { %v19274_v34 = vadd.f32 %v10515_v62, %v10353_v51  ;;  %v10517_v23 = vpop.f32.mrb[82].mxu0  ;;  %v15238_v51 = vld [vmem:[%s19534_s23 + $0x6e4] ss:$8 sps:$4 sm:$0xff]   ;;  %v15239_v62 = vld [vmem:[%s19534_s23 + $0x6f0] ss:$8 sps:$4 sm:$0xff]  }
0x17b5   :  { %v10518_v59 = vpop.f32.mrb[83].mxu0  ;;  %v10529_v58 = vsel %vm10522_vm9, %v19272_v53, 0.0  ;;  %v10523_v28 = vsel %vm10522_vm9, %v19272_v53, -inf  ;;  %v10520_v32 = vpack.c.bf16 %v19272_v53, %v19272_v53  ;;  %11177 = vmatprep.subr.bf16.mxu0 %v15238_v51  ;;  %v15244_v23 = vld [vmem:[%s19534_s23 + $0x704] ss:$8 sps:$4 sm:$0xff]  }
0x17b6   :  { %v10521_v25 = vpack.c.bf16 %v19274_v34, %v19274_v34  ;;  %v10530_v5 = vsel %vm10524_vm10, %v19274_v34, 0.0  ;;  %v10525_v3 = vsel %vm10524_vm10, %v19274_v34, -inf  ;;  %v15242_v59 = vld [vmem:[%s19534_s23 + $0x700] ss:$8 sps:$4 sm:$0xff]  }
0x17b7   :  { %v10531_v46 = vadd.f32 %v10530_v5, %v10529_v58  ;;  %v10526_v39 = vmax.f32 %v10523_v28, %v10525_v3  ;;  %v15247_v58 = vld [vmem:[%s19534_s23 + $0x714] ss:$8 sps:$4 sm:$0xff]   ;;  %v15245_v28 = vld [vmem:[%s19534_s23 + $0x710] ss:$8 sps:$4 sm:$0xff]   ;;  %v15250_v5 = vld [vmem:[%s19534_s23 + $0x724] ss:$8 sps:$4 sm:$0xff]  }
0x17b8   :  { %12322 = vmatprep.mubr.msk.bf16.mxu0 %vm2516_vm2, %v10521_v25  ;;  %v10540_v25 = vld [vmem:[%s19517_s3 + $0x11] ss:$0 sm:$0xff] }
0x17b9   :  { %10532 = vadd.xlane.f32.xlu1 %v10531_v46  ;;  %10527 = vmax.xlane.f32.xlu0 %v10526_v39 }
0x17ba   :  { %10738 = vmatmul.mubr.bf16.vlgmr.msra.gmra.mrb[84].mxu0 %v10520_v32  ;;  %v15248_v32 = vld [vmem:[%s19534_s23 + $0x720] ss:$8 sps:$4 sm:$0xff]  }
0x17bb   :  { %11178 = vmatpush1.bf16.msra.mxu0 %v15236_v37 }
0x17bc   :  { %11179 = vmatprep.subr.bf16.mxu0 %v15241_v7 }
0x17bf   :  { %11180 = vmatpush1.bf16.msra.mxu0 %v15239_v62 }
0x17c0   :  { %11181 = vmatprep.subr.bf16.mxu0 %v15244_v23 }
0x17c3   :  { %11182 = vmatpush1.bf16.msra.mxu0 %v15242_v59 }
0x17c4   :  { %11183 = vmatprep.subr.bf16.mxu0 %v15247_v58 }
0x17c7   :  { %11184 = vmatpush1.bf16.msra.mxu0 %v15245_v28 }
0x17c8   :  { %11185 = vmatprep.subr.bf16.mxu0 %v15250_v5 }
0x17cb   :  { %11186 = vmatpush1.bf16.msra.mxu0 %v15248_v32 }
0x17cc   :  { %11187 = vmatprep.subr.bf16.mxu0 %v15253_v29  ;;  %v15272_v29 = vld [vmem:[%s19534_s23 + $0x860] ss:$8 sps:$4 sm:$0xff]  }
0x17cf   :  { %11188 = vmatpush1.bf16.msra.mxu0 %v15251_v27  ;;  %v15278_v27 = vld [vmem:[%s19534_s23 + $0x8c0] ss:$8 sps:$4 sm:$0xff]  }
0x1846   :  { %v10533_v13 = vpop.xlane.xlu1 %10532  ;;  %v10528_v36 = vpop.xlane.xlu0 %10527 }
0x1847   :  { %v10535_v11 = vmul.f32 0.0052083335, %v10533_v13 }
0x1849   :  { %v10537_v40 = vsel %vm10536_vm13, %v10528_v36, %v10535_v11  ;;  %v15256_v11 = vld [vmem:[%s19534_s23 + $0x744] ss:$8 sps:$4 sm:$0xff]  }
0x184a   :  { %v10538_v57 = vpack.c.bf16 %v10537_v40, %v10537_v40  ;;  %v15254_v40 = vld [vmem:[%s19534_s23 + $0x740] ss:$8 sps:$4 sm:$0xff]   ;;  %11189 = vmatprep.subr.bf16.mxu0 %v15256_v11  ;;  %v15279_v11 = vld [vmem:[%s19534_s23 + $0x8d0] ss:$8 sps:$4 sm:$0xff]  }
0x184b   :  { %11190 = vmatpush1.bf16.msra.mxu0 %v15254_v40  ;;  %v15281_v40 = vld [vmem:[%s19534_s23 + $0x8f0] ss:$8 sps:$4 sm:$0xff]  }
0x184c   :  { %13241 = vmatmul.mubr.msk.bf16.vlgmr.msra.gmra.mrb[16].mxu1 %vm10541_vm14, %v10538_v57  ;;  %v15259_v57 = vld [vmem:[%s19534_s23 + $0x754] ss:$8 sps:$4 sm:$0xff]  }
0x184d   :  { %10778 = vmatpush1.bf16.msra.mxu1 %v10772_v8  ;;  %10809 = vmatprep.mubr.bf16.mxu1 %v15300_v0  ;;  %v15257_v8 = vld [vmem:[%s19534_s23 + $0x750] ss:$8 sps:$4 sm:$0xff]  }
0x184e   :  { %11013 = vmatprep.subr.bf16.mxu1 %v15202_v48  ;;  %11191 = vmatprep.subr.bf16.mxu0 %v15259_v57  ;;  %v15282_v57 = vld [vmem:[%s19534_s23 + $0x900] ss:$8 sps:$4 sm:$0xff]  }
0x184f   :  { %11192 = vmatpush1.bf16.msra.mxu0 %v15257_v8  ;;  %v15283_v8 = vld [vmem:[%s19534_s23 + $0x910] ss:$8 sps:$4 sm:$0xff]  }
0x188d   :  { %v10739_v18 = vpop.f32.mrb[84].mxu0 }
0x188e   :  { %v10740_v60 = vadd.f32 %v10739_v18, %v10629_v6  ;;  %v10741_v26 = vpop.f32.mrb[85].mxu0  ;;  %v15262_v6 = vld [vmem:[%s19534_s23 + $0x764] ss:$8 sps:$4 sm:$0xff]   ;;  %v15260_v18 = vld [vmem:[%s19534_s23 + $0x760] ss:$8 sps:$4 sm:$0xff]  }
0x188f   :  { %v10742_v38 = vpop.f32.mrb[86].mxu0  ;;  %11193 = vmatprep.subr.bf16.mxu0 %v15262_v6 }
0x1890   :  { %v10745_v61 = vmax.f32 %v10740_v60, 0.0  ;;  %v10743_v45 = vpop.f32.mrb[87].mxu0  ;;  %v15265_v60 = vld [vmem:[%s19534_s23 + $0x774] ss:$8 sps:$4 sm:$0xff]   ;;  %11194 = vmatpush1.bf16.msra.mxu0 %v15260_v18 }
0x1891   :  { %11195 = vmatprep.subr.bf16.mxu0 %v15265_v60  ;;  %v15268_v45 = vld [vmem:[%s19534_s23 + $0x784] ss:$8 sps:$4 sm:$0xff]  }
0x1892   :  { %v10746_v30 = vpack.c.bf16 %v10745_v61, %v10745_v61  ;;  %v15263_v61 = vld [vmem:[%s19534_s23 + $0x770] ss:$8 sps:$4 sm:$0xff]  }
0x1894   :  { %12327 = vmatmul.mubr.msk.bf16.vlgmr.msra.gmra.mrb[20].mxu1 %vm10766_vm15, %v10746_v30  ;;  %11196 = vmatpush1.bf16.msra.mxu0 %v15263_v61  ;;  %v15266_v30 = vld [vmem:[%s19534_s23 + $0x780] ss:$8 sps:$4 sm:$0xff]  }
0x1895   :  { %11014 = vmatpush1.bf16.msra.mxu1 %v15200_v55  ;;  %11197 = vmatprep.subr.bf16.mxu0 %v15268_v45 }
0x1896   :  { %11015 = vmatprep.subr.bf16.mxu1 %v15205_v22 }
0x1898   :  { %11198 = vmatpush1.bf16.msra.mxu0 %v15266_v30 }
0x1899   :  { %11016 = vmatpush1.bf16.msra.mxu1 %v15203_v24  ;;  %v15271_v24 = vld [vmem:[%s19534_s23 + $0x794] ss:$8 sps:$4 sm:$0xff]  }
0x189a   :  { %11017 = vmatprep.subr.bf16.mxu1 %v15208_v44  ;;  %v15269_v44 = vld [vmem:[%s19534_s23 + $0x790] ss:$8 sps:$4 sm:$0xff]   ;;  %11199 = vmatprep.subr.bf16.mxu0 %v15271_v24  ;;  %v10112_v24 = vunpack.c.l.bf16 %v19190_v42 }
0x189c   :  { %11200 = vmatpush1.bf16.msra.mxu0 %v15269_v44 }
0x189d   :  { %11018 = vmatpush1.bf16.msra.mxu1 %v15206_v9  ;;  %v12323_v9 = vld [vmem:[%s19517_s3 + $0x13] ss:$8 sm:$0x3] }
0x189e   :  { %11019 = vmatprep.subr.bf16.mxu1 %v15211_v10  ;;  %v10754_v10 = vrot.slane %v12323_v9, %v19210_v14 }
0x18a1   :  { %11020 = vmatpush1.bf16.msra.mxu1 %v15209_v50  ;;  %v10758_v50 = vrot.slane %v12323_v9, %v19215_v2 }
0x18a2   :  { %11021 = vmatprep.subr.bf16.mxu1 %v15214_v54 }
0x18a5   :  { %11022 = vmatpush1.bf16.msra.mxu1 %v15212_v56 }
0x18a6   :  { %11023 = vmatprep.subr.bf16.mxu1 %v15217_v19 }
0x18a9   :  { %11024 = vmatpush1.bf16.msra.mxu1 %v15215_v41 }
0x18aa   :  { %11025 = vmatprep.subr.bf16.mxu1 %v15220_v47 }
0x18ad   :  { %11026 = vmatpush1.bf16.msra.mxu1 %v15218_v4 }
0x18ae   :  { %11027 = vmatprep.subr.bf16.mxu1 %v15223_v35 }
0x18b1   :  { %11028 = vmatpush1.bf16.msra.mxu1 %v15221_v52 }
0x18b2   :  { %11029 = vmatprep.subr.bf16.mxu1 %v15226_v1 }
0x18b5   :  { %11030 = vmatpush1.bf16.msra.mxu1 %v15224_v20 }
0x18b6   :  { %11031 = vmatprep.subr.bf16.mxu1 %v15229_v12 }
0x18b9   :  { %11032 = vmatpush1.bf16.msra.mxu1 %v15227_v21 }
0x18ba   :  { %11033 = vmatprep.subr.bf16.mxu1 %v15232_v63 }
0x18bd   :  { %11034 = vmatpush1.bf16.msra.mxu1 %v15230_v49 }
0x18be   :  { %11035 = vmatprep.subr.bf16.mxu1 %v15235_v33 }
0x18c1   :  { %11036 = vmatpush1.bf16.msra.mxu1 %v15233_v15 }
0x18c2   :  { %11337 = vmatprep.subr.bf16.mxu1 %v15300_v0 }
0x191f   :  { %v10583_v3 = vpop.f32.mrb[16].mxu1 }
0x1920   :  { %v10584_v46 = vadd.f32 %v10583_v3, %v10540_v25  ;;  %v13242_v39 = vpop.f32.mrb[17].mxu1 }
0x1921   :  { %v10586_v31 = vpop.f32.mrb[18].mxu1 }
0x1922   :  { %v10589_v16 = vand.u32 2147483647, %v10584_v46  ;;  %v13243_v43 = vpop.f32.mrb[19].mxu1  ;;  %vm10595_vm0 = vcmp.ge.f32.partialorder %v10584_v46, 0.0 }
0x1923   :  { %v15276_v43 = vld [vmem:[%s19534_s23 + $0x8a0] ss:$8 sps:$4 sm:$0xff]  }
0x1924   :  { %v10590_v13 = vsub.f32 0.0, %v10589_v16  ;;  %v15273_v16 = vld [vmem:[%s19534_s23 + $0x870] ss:$8 sps:$4 sm:$0xff]  }
0x1926   :  { %v10591_v36 = vmul.f32 1.442695, %v10590_v13  ;;  %v15277_v13 = vld [vmem:[%s19534_s23 + $0x8b0] ss:$8 sps:$4 sm:$0xff]  }
0x1928   :  { %15284 = vpow2.f32 %v10591_v36  ;;  %v15280_v36 = vld [vmem:[%s19534_s23 + $0x8e0] ss:$8 sps:$4 sm:$0xff]  }
0x1932   :  { %v15285_v26 = vpop.eup %15284 }
0x1933   :  { %v10593_v38 = vadd.f32 1.0, %v15285_v26 }
0x1935   :  { %15286 = vrcp.f32 %v10593_v38  ;;  %v12378_v38 = vld [vmem:[%s19517_s3 + $0x14] ss:$8 sm:$0x3] }
0x1936   :  { %v11224_v61 = vrot.slane %v12378_v38, %v19210_v14  ;;  %v11228_v30 = vrot.slane %v12378_v38, %v19215_v2  ;;  %v11261_v14 = vld [vmem:[%s19517_s3 + $0x15] ss:$0 sm:$0xff] }
0x193f   :  { %v15287_v55 = vpop.eup %15286 }
0x1940   :  { %v10596_v48 = vmul.f32 %v15287_v55, %v15285_v26 }
0x1942   :  { %v10597_v22 = vsel %vm10595_vm0, %v15287_v55, %v10596_v48 }
0x1943   :  { %10600 = vperm.xlu0 %14001, %v10597_v22  }
0x1967   :  { %v10811_v54 = vpop.f32.mrb[20].mxu1 }
0x1968   :  { %v10812_v56 = vadd.f32 %v10811_v54, %v10754_v10  ;;  %v10813_v19 = vpop.f32.mrb[21].mxu1  ;;  %v10113_v10 = vunpack.c.l.bf16 %v19188_v17 }
0x1969   :  { %v10814_v41 = vadd.f32 %v10813_v19, %v10758_v50  ;;  %v10815_v47 = vpop.f32.mrb[22].mxu1 }
0x196a   :  { %v10818_v4 = vand.u32 2147483647, %v10812_v56  ;;  %v10816_v35 = vpop.f32.mrb[23].mxu1  ;;  %vm10830_vm1 = vcmp.ge.f32.partialorder %v10812_v56, 0.0 }
0x196b   :  { %v10819_v52 = vand.u32 2147483647, %v10814_v41  ;;  %vm10831_vm3 = vcmp.ge.f32.partialorder %v10814_v41, 0.0 }
0x196c   :  { %v10820_v1 = vsub.f32 0.0, %v10818_v4 }
0x196d   :  { %v10821_v20 = vsub.f32 0.0, %v10819_v52 }
0x196e   :  { %v10822_v12 = vmul.f32 1.442695, %v10820_v1 }
0x196f   :  { %v10824_v21 = vmul.f32 1.442695, %v10821_v20 }
0x1970   :  { %15288 = vpow2.f32 %v10822_v12 }
0x1971   :  { %15290 = vpow2.f32 %v10824_v21 }
0x197a   :  { %v15289_v63 = vpop.eup %15288 }
0x197b   :  { %v15291_v49 = vpop.eup %15290  ;;  %v10826_v33 = vadd.f32 1.0, %v15289_v63 }
0x197c   :  { %v10827_v15 = vadd.f32 1.0, %v15291_v49 }
0x197d   :  { %15292 = vrcp.f32 %v10826_v33 }
0x197e   :  { %15294 = vrcp.f32 %v10827_v15 }
0x1987   :  { %v15293_v37 = vpop.eup %15292 }
0x1988   :  { %v15295_v51 = vpop.eup %15294  ;;  %v10832_v7 = vmul.f32 %v15293_v37, %v15289_v63 }
0x1989   :  { %v10833_v62 = vmul.f32 %v15295_v51, %v15291_v49 }
0x198a   :  { %v10834_v23 = vsel %vm10830_vm1, %v15293_v37, %v10832_v7 }
0x198b   :  { %v10836_v59 = vmul.f32 %v10834_v23, %v19272_v53  ;;  %v10835_v58 = vsel %vm10831_vm3, %v15295_v51, %v10833_v62 }
0x198c   :  { %v10837_v28 = vmul.f32 %v10835_v58, %v19274_v34 }
0x198d   :  { %v10888_v5 = vpack.c.bf16 %v10836_v59, %v10836_v59 }
0x198e   :  { %v10889_v25 = vpack.c.bf16 %v10837_v28, %v10837_v28 }
0x1990   :  { %12352 = vmatprep.mubr.msk.bf16.mxu1 %vm2516_vm2, %v10889_v25 }
0x1991   :  { %11046 = vmatmul.mubr.bf16.vlgmr.msra.gmra.mrb[24].mxu1 %v10888_v5 }
0x1992   :  { %11338 = vmatpush1.bf16.msra.mxu1 %v15272_v29 }
0x1993   :  { %11339 = vmatprep.subr.bf16.mxu1 %v15300_v0 }
0x1996   :  { %11340 = vmatpush1.bf16.msra.mxu1 %v15273_v16 }
0x1997   :  { %11341 = vmatprep.subr.bf16.mxu1 %v15300_v0 }
0x19c2   :  { %v10601_v3 = vpop.permute.xlu0 %10600 }
0x19c3   :  { %v10603_v46 = vmul.f32 %v10601_v3, %v19272_v53  ;;  %v10604_v39 = vmul.f32 %v10601_v3, %v19274_v34  ;;  %v15274_v53 = vld [vmem:[%s19534_s23 + $0x880] ss:$8 sps:$4 sm:$0xff]   ;;  %v15275_v34 = vld [vmem:[%s19534_s23 + $0x890] ss:$8 sps:$4 sm:$0xff]  }
0x19c4   :  { %11342 = vmatpush1.bf16.msra.mxu1 %v15274_v53 }
0x19c5   :  { %v10886_v32 = vpack.c.bf16 %v10603_v46, %v10603_v46  ;;  %v10887_v31 = vpack.c.bf16 %v10604_v39, %v10604_v39  ;;  %11343 = vmatprep.subr.bf16.mxu1 %v15300_v0 }
0x19c7   :  { %12377 = vmatprep.mubr.msk.bf16.mxu0 %vm2516_vm2, %v10887_v31 }
0x19c8   :  { %11210 = vmatmul.mubr.bf16.vlgmr.msra.gmra.mrb[88].mxu0 %v10886_v32  ;;  %11344 = vmatpush1.bf16.msra.mxu1 %v15275_v34 }
0x19c9   :  { %11345 = vmatprep.subr.bf16.mxu1 %v15300_v0 }
0x19cc   :  { %11346 = vmatpush1.bf16.msra.mxu1 %v15276_v43 }
0x19cd   :  { %11347 = vmatprep.subr.bf16.mxu1 %v15300_v0 }
0x19d0   :  { %11348 = vmatpush1.bf16.msra.mxu1 %v15277_v13 }
0x19d1   :  { %11349 = vmatprep.subr.bf16.mxu1 %v15300_v0 }
0x19d4   :  { %11350 = vmatpush1.bf16.msra.mxu1 %v15278_v27 }
0x19d5   :  { %11351 = vmatprep.subr.bf16.mxu1 %v15300_v0 }
0x19d8   :  { %11352 = vmatpush1.bf16.msra.mxu1 %v15279_v11 }
0x19d9   :  { %11353 = vmatprep.subr.bf16.mxu1 %v15300_v0 }
0x19dc   :  { %11354 = vmatpush1.bf16.msra.mxu1 %v15280_v36 }
0x19dd   :  { %11355 = vmatprep.subr.bf16.mxu1 %v15300_v0 }
0x19e0   :  { %11356 = vmatpush1.bf16.msra.mxu1 %v15281_v40 }
0x19e1   :  { %11357 = vmatprep.subr.bf16.mxu1 %v15300_v0 }
0x19e4   :  { %11358 = vmatpush1.bf16.msra.mxu1 %v15282_v57 }
0x19e5   :  { %11359 = vmatprep.subr.bf16.mxu1 %v15300_v0 }
0x19e8   :  { %11360 = vmatpush1.bf16.msra.mxu1 %v15283_v8 }
0x1a64   :  { %v11047_v6 = vpop.f32.mrb[24].mxu1 }
0x1a65   :  { %v11049_v18 = vpop.f32.mrb[25].mxu1 }
0x1a66   :  { %v11051_v60 = vpop.f32.mrb[26].mxu1 }
0x1a67   :  { %v11052_v26 = vpop.f32.mrb[27].mxu1 }
0x1a9b   :  { %v11211_v45 = vpop.f32.mrb[88].mxu0 }
0x1a9c   :  { %v11212_v55 = vadd.f32 %v11211_v45, %v11047_v6  ;;  %v11213_v0 = vpop.f32.mrb[89].mxu0 }
0x1a9d   :  { %v11214_v48 = vadd.f32 %v11213_v0, %v11049_v18  ;;  %v11215_v22 = vpop.f32.mrb[90].mxu0 }
0x1a9e   :  { %v11231_v44 = vadd.f32 %v11224_v61, %v11212_v55  ;;  %v11216_v9 = vpop.f32.mrb[91].mxu0 }
0x1a9f   :  { %v11232_v50 = vadd.f32 %v11228_v30, %v11214_v48 }
0x1aa0   :  { %v11233_v54 = vadd.f32 %v11231_v44, %v10112_v24 }
0x1aa1   :  { %v11234_v56 = vadd.f32 %v11232_v50, %v10113_v10 }
0x1aa2   :  { %v11235_v41 = vpack.c.bf16 %v11233_v54, %v11233_v54 }
0x1aa3   :  { %v11236_v19 = vpack.c.bf16 %v11234_v56, %v11234_v56 }
0x1aa5   :  { %12391 = vmatprep.mubr.msk.bf16.mxu1 %vm2516_vm2, %v11236_v19 }
0x1aa6   :  { %11370 = vmatmul.mubr.bf16.vlgmr.msra.gmra.mrb[28].mxu1 %v11235_v41 }
0x1b79   :  { %v11371_v2 = vpop.f32.mrb[28].mxu1 }
0x1b7a   :  { %v11372_v47 = vadd.f32 %v11371_v2, %v11261_v14  ;;  %v11373_v42 = vpop.f32.mrb[29].mxu1 }
0x1b7b   :  { %v11374_v4 = vpop.f32.mrb[30].mxu1 }
0x1b7c   :  { %11378 = vst.msk [vmem:[%s19531_s16] sm:$0x3] %vm11377_vm4, %v11372_v47  ;;  %v11375_v17 = vpop.f32.mrb[31].mxu1 }

</bundles_post_ra>
